<compile_context>
chip_gen: v7x
topology: tpu7x:2x2x1
jax: 0.10.0
libtpu: 0.0.40
codegen_flags: <defaults>
</compile_context>

<pallas_src>
import numpy as np
import jax
import jax.numpy as jnp
from jax.experimental import pallas as pl
from jax.experimental.pallas import tpu as pltpu

# ----------------------------- configuration ------------------------------- #
SR = 32000
B, C, T = 2, 2, 4224            # batch, channels, samples (small synthetic)
N_FFT, HOP = 256, 128
N_BINS_USED = 128               # Nyquist bin dropped (mel weight there is 0 anyway)
N_MELS = 64
N_FRAMES = 1 + (T - N_FFT) // HOP          # 32
STEM_STRIDE = 4                 # temporal patchify factor in the stem
T_OUT = N_FRAMES // STEM_STRIDE            # 8 output frames
R_ROWS = B * T_OUT              # batch folded into matmul M dimension (16)
PATCH_LEN = N_FFT + (STEM_STRIDE - 1) * HOP     # 640 samples per stem patch
PATCH_HOP = STEM_STRIDE * HOP                   # 512
N_SPEC = STEM_STRIDE * N_BINS_USED              # 512 (4 frames x 128 bins)
D_MODEL = 128                   # reduced ConvNeXt width
MLP_DIM = 4 * D_MODEL           # 512
N_BLOCKS = 2                    # reduced ConvNeXt depth
DW_KERNEL = 7                   # ConvNeXt depthwise kernel size
FEAT_SIZE = 768                 # CoNeTTEPreprocessor.feat_size
N_CLASSES = 527                 # AudioSet classes (clipwise_output)
N_CLASSES_PAD = 640             # padded to 5*128 lanes for unmasked stores
LN_EPS = 1e-6

# packed vector-slab row layout (all 128-wide vectors in one (32, 128) f32 array)
VEC_FIXED = 5                   # b_stem, stem LN g/b, final LN g/b
VEC_PER_BLK = 4 + DW_KERNEL     # bln_g, bln_b, b2, layer_scale, dw[0..6]
VEC_ROWS = VEC_FIXED + N_BLOCKS * VEC_PER_BLK   # 27
VEC_ROWS_PAD = 32


# ------------------------------ fused kernel -------------------------------- #
def fused_kernel(lens_ref, x_ref, wdft_ref, wmel_ref, wstem_ref,
                 wblk1_ref, wblk2_ref, wproj_ref, whead_ref,
                 vec_ref, vecw_ref, frame_ref, clip_ref):
    def layernorm(v, g, b):
        mu = jnp.mean(v, axis=-1, keepdims=True)
        var = jnp.mean((v - mu) ** 2, axis=-1, keepdims=True)
        return (v - mu) * jax.lax.rsqrt(var + LN_EPS) * g + b

    def bf16_dot(a, w):
        # bf16 MXU matmul with f32 accumulation; weights are stored in bf16.
        return jnp.dot(a.astype(jnp.bfloat16), w, preferred_element_type=jnp.float32)

    # ---- 1. channel mean + patch framing, fully in-kernel (no HBM bounce) ----
    # patch row (b, t) = mean over channels of x[b, :, t*512 : t*512+640]
    pieces = []
    for b in range(B):
        for t in range(T_OUT):
            s = t * PATCH_HOP
            xc = x_ref[b, :, s:s + PATCH_LEN]                      # (C, PATCH_LEN)
            pieces.append(jnp.mean(xc, axis=0, keepdims=True))     # (1, PATCH_LEN)
    patch = jnp.concatenate(pieces, axis=0)                        # (R_ROWS, PATCH_LEN)

    # ---- 2. windowed block-DFT + power + block-diag mel + log (batch folded) ----
    reim = bf16_dot(patch, wdft_ref[...])                          # (R, 2*N_SPEC)
    re = reim[:, :N_SPEC]
    im = reim[:, N_SPEC:]
    power = re * re + im * im                                      # (R, N_SPEC)
    mel = bf16_dot(power, wmel_ref[...])                           # (R, 4*N_MELS) = patches
    logmel = 10.0 * jnp.log10(jnp.maximum(mel, 1e-10))
    # TODO(synk): LogmelFilterBank top_db clipping / Slaney norm omitted.

    # ---- 3. stem linear + LN ----
    h = bf16_dot(logmel, wstem_ref[...]) + vec_ref[0:1, :]         # (R, D_MODEL)
    h = layernorm(h, vec_ref[1:2, :], vec_ref[2:3, :])

    # local time index within each batch block (for depthwise-conv edge masks)
    tl = jax.lax.broadcasted_iota(jnp.int32, (R_ROWS, 1), 0) % T_OUT

    # ---- 4. ConvNeXt blocks: depthwise conv via XLU rolls + LN + MLP + layer scale ----
    for blk in range(N_BLOCKS):
        base = VEC_FIXED + blk * VEC_PER_BLK
        xin = h
        y = jnp.zeros_like(h)
        for k in range(DW_KERNEL):
            o = k - DW_KERNEL // 2
            shifted = xin if o == 0 else pltpu.roll(xin, shift=(-o) % R_ROWS, axis=0)
            valid = ((tl + o >= 0) & (tl + o < T_OUT)).astype(jnp.float32)   # (R, 1)
            wk = vec_ref[base + 4 + k:base + 5 + k, :]                       # (1, D)
            y = y + shifted * valid * wk
        y = layernorm(y, vec_ref[base:base + 1, :], vec_ref[base + 1:base + 2, :])
        y = bf16_dot(y, wblk1_ref[blk]) + vecw_ref[2 + blk:3 + blk, :MLP_DIM]
        y = jax.nn.gelu(y, approximate=True)   # TODO(synk): exact erf GELU as in nn.GELU()
        y = bf16_dot(y, wblk2_ref[blk]) + vec_ref[base + 2:base + 3, :]
        h = xin + y * vec_ref[base + 3:base + 4, :]

    # ---- 5. final LN + projection to feat_size=768 (lane-dense output slab) ----
    h = layernorm(h, vec_ref[3:4, :], vec_ref[4:5, :])
    fe = bf16_dot(h, wproj_ref[...]) + vecw_ref[0:1, :]            # (R, FEAT_SIZE)
    frame_ref[...] = fe

    # ---- 6. clipwise head: per-item masked mean -> one (B,768)x(768,640) dot ----
    iota_t = jax.lax.broadcasted_iota(jnp.int32, (T_OUT, 1), 0)
    pooled_rows = []
    for b in range(B):
        mb = (iota_t < lens_ref[b]).astype(jnp.float32)            # (T_OUT, 1)
        feb = fe[b * T_OUT:(b + 1) * T_OUT, :]
        denom = jnp.maximum(jnp.sum(mb), 1.0)
        pooled_rows.append(jnp.sum(feb * mb, axis=0, keepdims=True) / denom)
    pooled = jnp.concatenate(pooled_rows, axis=0)                  # (B, FEAT_SIZE)
    logits = bf16_dot(pooled, whead_ref[...]) + vecw_ref[1:2, :N_CLASSES_PAD]
    clip_ref[...] = jax.nn.sigmoid(logits)                         # (B, N_CLASSES_PAD)


def fused_forward(frame_lens, x, params):
    vmem = pl.BlockSpec(memory_space=pltpu.MemorySpace.VMEM)
    smem = pl.BlockSpec(memory_space=pltpu.MemorySpace.SMEM)
    out_shape = (
        jax.ShapeDtypeStruct((R_ROWS, FEAT_SIZE), jnp.float32),
        jax.ShapeDtypeStruct((B, N_CLASSES_PAD), jnp.float32),
    )
    # Single invocation (no grid): everything (~4 MiB of weights + activations) is
    # resident in VMEM on all of v5e/v6e/v7x. On v7x one could instead split B over a
    # grid=(2,) "parallel" axis to use both TensorCores; at this size it is not worth it.
    return pl.pallas_call(
        fused_kernel,
        in_specs=[smem] + [vmem] * 10,
        out_specs=(vmem, vmem),
        out_shape=out_shape,
    )(frame_lens, x,
      params["wdft"], params["wmel"], params["w_stem"],
      params["w_blk1"], params["w_blk2"], params["w_proj"], params["w_head"],
      params["vec128"], params["vec_wide"])


# --------------------------- constants / parameters ------------------------- #
def make_mel_filterbank_np(sr, n_fft, n_mels, n_bins, fmin=50.0, fmax=14000.0):
    def hz2mel(f):
        return 2595.0 * np.log10(1.0 + f / 700.0)

    def mel2hz(m):
        return 700.0 * (10.0 ** (m / 2595.0) - 1.0)

    fft_freqs = np.arange(n_bins) * sr / n_fft
    mel_pts = np.linspace(hz2mel(fmin), hz2mel(fmax), n_mels + 2)
    hz_pts = mel2hz(mel_pts)
    fb = np.zeros((n_bins, n_mels), dtype=np.float64)
    for m in range(n_mels):
        lo, ce, hi = hz_pts[m], hz_pts[m + 1], hz_pts[m + 2]
        up = (fft_freqs - lo) / max(ce - lo, 1e-8)
        down = (hi - fft_freqs) / max(hi - ce, 1e-8)
        fb[:, m] = np.maximum(0.0, np.minimum(up, down))
    return fb.astype(np.float32)


def make_patch_dft_np():
    """(PATCH_LEN, 2*N_SPEC) windowed block-DFT: [cos blocks (4x128) | sin blocks]."""
    n = np.arange(N_FFT)
    win = 0.5 - 0.5 * np.cos(2.0 * np.pi * n / N_FFT)          # periodic Hann
    k = np.arange(N_BINS_USED)
    ang = 2.0 * np.pi * np.outer(n, k) / N_FFT                 # (N_FFT, 128)
    wcos = win[:, None] * np.cos(ang)
    wsin = win[:, None] * (-np.sin(ang))
    W = np.zeros((PATCH_LEN, 2 * N_SPEC), dtype=np.float32)
    for f in range(STEM_STRIDE):
        r0 = f * HOP
        W[r0:r0 + N_FFT, f * N_BINS_USED:(f + 1) * N_BINS_USED] = wcos
        W[r0:r0 + N_FFT, N_SPEC + f * N_BINS_USED:N_SPEC + (f + 1) * N_BINS_USED] = wsin
    return W


def make_block_mel_np():
    """(N_SPEC, 4*N_MELS) block-diagonal mel: frame-k bins -> patch position-k mels."""
    fb = make_mel_filterbank_np(SR, N_FFT, N_MELS, N_BINS_USED)
    M = np.zeros((N_SPEC, STEM_STRIDE * N_MELS), dtype=np.float32)
    for f in range(STEM_STRIDE):
        M[f * N_BINS_USED:(f + 1) * N_BINS_USED, f * N_MELS:(f + 1) * N_MELS] = fb
    return M


def init_params(key):
    ks = jax.random.split(key, 6)
    s = 0.02
    norm = lambda k, shp: jax.random.normal(k, shp, jnp.float32) * s
    w_stem = norm(ks[0], (STEM_STRIDE * N_MELS, D_MODEL))
    dw     = norm(ks[1], (N_BLOCKS, DW_KERNEL, D_MODEL))
    w1     = norm(ks[2], (N_BLOCKS, D_MODEL, MLP_DIM))
    w2     = norm(ks[3], (N_BLOCKS, MLP_DIM, D_MODEL))
    w_proj = norm(ks[4], (D_MODEL, FEAT_SIZE))
    w_head = norm(ks[5], (FEAT_SIZE, N_CLASSES))
    w_head_pad = jnp.zeros((FEAT_SIZE, N_CLASSES_PAD), jnp.float32)
    w_head_pad = w_head_pad.at[:, :N_CLASSES].set(w_head)

    # packed (32, 128) f32 slab: biases / LN params / layer-scales / depthwise taps
    rows = [jnp.zeros((1, D_MODEL)),                 # 0: b_stem
            jnp.ones((1, D_MODEL)),                  # 1: stem LN gamma
            jnp.zeros((1, D_MODEL)),                 # 2: stem LN beta
            jnp.ones((1, D_MODEL)),                  # 3: final LN gamma
            jnp.zeros((1, D_MODEL))]                 # 4: final LN beta
    for blk in range(N_BLOCKS):
        rows += [jnp.ones((1, D_MODEL)),             # block LN gamma
                 jnp.zeros((1, D_MODEL)),            # block LN beta
                 jnp.zeros((1, D_MODEL)),            # b2
                 jnp.full((1, D_MODEL), 1e-6),       # ConvNeXt layer-scale init
                 dw[blk]]                            # 7 depthwise taps
    vec128 = jnp.concatenate(rows, axis=0).astype(jnp.float32)
    vec128 = jnp.pad(vec128, ((0, VEC_ROWS_PAD - VEC_ROWS), (0, 0)))

    # packed (4, 768) f32 wide-bias slab: [b_proj; b_head(padded); b1[blk](padded)]
    vec_wide = jnp.zeros((2 + N_BLOCKS, FEAT_SIZE), jnp.float32)

    return {
        "wdft":   jnp.asarray(make_patch_dft_np(), jnp.bfloat16),
        "wmel":   jnp.asarray(make_block_mel_np(), jnp.bfloat16),
        "w_stem": w_stem.astype(jnp.bfloat16),
        "w_blk1": w1.astype(jnp.bfloat16),
        "w_blk2": w2.astype(jnp.bfloat16),
        "w_proj": w_proj.astype(jnp.bfloat16),
        "w_head": w_head_pad.astype(jnp.bfloat16),
        "vec128": vec128,
        "vec_wide": vec_wide,
    }


# ------------------------------- forward wrapper ----------------------------- #
def conette_preprocessor_forward(x, x_lens, params):
    """x: (B, C, T) float32 waveform @ 32 kHz; x_lens: (B,) int32 valid sample counts."""
    # frame-length bookkeeping (frame_embs_lens), passed to the kernel via SMEM
    spec_lens = 1 + (x_lens - N_FFT) // HOP
    frame_lens = jnp.maximum(spec_lens // STEM_STRIDE, 1).astype(jnp.int32)   # (B,)

    frame_flat, clip_pad = fused_forward(frame_lens, x, params)
    frame_embs = frame_flat.reshape(B, T_OUT, FEAT_SIZE)          # (B, T', 768)

    # glue, exactly as the torch module: transpose(1,2), audio_shape rows, 527 classes
    audio = jnp.transpose(frame_embs, (0, 2, 1))                  # (B, 768, T')
    audio_shape = jnp.stack(
        [jnp.full_like(frame_lens, FEAT_SIZE), frame_lens], axis=1)   # (B, 2) int32
    clip_probs = clip_pad[:, :N_CLASSES]                          # (B, 527)
    return {"audio": audio, "audio_shape": audio_shape, "clip_probs": clip_probs}


# ------------------------------------ main ----------------------------------- #
if __name__ == "__main__":
    key = jax.random.PRNGKey(0)
    k_x, k_p = jax.random.split(key)

    x = jax.random.normal(k_x, (B, C, T), dtype=jnp.float32) * 0.1
    x_lens = jnp.asarray([T, 3328], dtype=jnp.int32)              # per-item valid samples
    params = init_params(k_p)

    fwd = jax.jit(conette_preprocessor_forward)
    batch = fwd(x, x_lens, params)
    jax.block_until_ready(batch)

    assert batch["audio"].shape == (B, FEAT_SIZE, T_OUT)
    assert batch["audio_shape"].shape == (B, 2)
    assert batch["clip_probs"].shape == (B, N_CLASSES)
    assert bool(jnp.all(jnp.isfinite(batch["audio"])))
    assert bool(jnp.all(jnp.isfinite(batch["clip_probs"])))
    print("KERNEL_OK")
</pallas_src>

<mosaic_0001>
module attributes {stable_mosaic.version = 11 : i64} {
  func.func @fused_kernel(%arg0: memref<2xi32, #tpu.memory_space<smem>>, %arg1: memref<2x2x4224xf32, #tpu.memory_space<vmem>>, %arg2: memref<640x1024xbf16, #tpu.memory_space<vmem>>, %arg3: memref<512x256xbf16, #tpu.memory_space<vmem>>, %arg4: memref<256x128xbf16, #tpu.memory_space<vmem>>, %arg5: memref<2x128x512xbf16, #tpu.memory_space<vmem>>, %arg6: memref<2x512x128xbf16, #tpu.memory_space<vmem>>, %arg7: memref<128x768xbf16, #tpu.memory_space<vmem>>, %arg8: memref<768x640xbf16, #tpu.memory_space<vmem>>, %arg9: memref<32x128xf32, #tpu.memory_space<vmem>>, %arg10: memref<4x768xf32, #tpu.memory_space<vmem>>, %arg11: memref<16x768xf32, #tpu.memory_space<vmem>>, %arg12: memref<2x640xf32, #tpu.memory_space<vmem>>) attributes {dimension_semantics = [], scalar_prefetch = 0 : i64, scratch_operands = 0 : i64, tpu.core_type = #tpu.core_type<tc>} {
    %c0 = arith.constant 0 : index
    %c0_0 = arith.constant 0 : index
    %c0_1 = arith.constant 0 : index
    %0 = vector.load %arg1[%c0, %c0_0, %c0_1] : memref<2x2x4224xf32, #tpu.memory_space<vmem>>, vector<1x2x640xf32>
    %1 = vector.shape_cast %0 : vector<1x2x640xf32> to vector<2x640xf32>
    %cst = arith.constant dense<0.000000e+00> : vector<640xf32>
    %2 = vector.multi_reduction <add>, %1, %cst [0] : vector<2x640xf32> to vector<640xf32>
    %3 = vector.shape_cast %2 : vector<640xf32> to vector<1x640xf32>
    %cst_2 = arith.constant 2.000000e+00 : f32
    %4 = vector.broadcast %cst_2 : f32 to vector<1x640xf32>
    %5 = arith.divf %3, %4 : vector<1x640xf32>
    %c0_3 = arith.constant 0 : index
    %c0_4 = arith.constant 0 : index
    %c512 = arith.constant 512 : index
    %6 = vector.load %arg1[%c0_3, %c0_4, %c512] : memref<2x2x4224xf32, #tpu.memory_space<vmem>>, vector<1x2x640xf32>
    %7 = vector.shape_cast %6 : vector<1x2x640xf32> to vector<2x640xf32>
    %cst_5 = arith.constant dense<0.000000e+00> : vector<640xf32>
    %8 = vector.multi_reduction <add>, %7, %cst_5 [0] : vector<2x640xf32> to vector<640xf32>
    %9 = vector.shape_cast %8 : vector<640xf32> to vector<1x640xf32>
    %cst_6 = arith.constant 2.000000e+00 : f32
    %10 = vector.broadcast %cst_6 : f32 to vector<1x640xf32>
    %11 = arith.divf %9, %10 : vector<1x640xf32>
    %c0_7 = arith.constant 0 : index
    %c0_8 = arith.constant 0 : index
    %c1024 = arith.constant 1024 : index
    %12 = vector.load %arg1[%c0_7, %c0_8, %c1024] : memref<2x2x4224xf32, #tpu.memory_space<vmem>>, vector<1x2x640xf32>
    %13 = vector.shape_cast %12 : vector<1x2x640xf32> to vector<2x640xf32>
    %cst_9 = arith.constant dense<0.000000e+00> : vector<640xf32>
    %14 = vector.multi_reduction <add>, %13, %cst_9 [0] : vector<2x640xf32> to vector<640xf32>
    %15 = vector.shape_cast %14 : vector<640xf32> to vector<1x640xf32>
    %cst_10 = arith.constant 2.000000e+00 : f32
    %16 = vector.broadcast %cst_10 : f32 to vector<1x640xf32>
    %17 = arith.divf %15, %16 : vector<1x640xf32>
    %c0_11 = arith.constant 0 : index
    %c0_12 = arith.constant 0 : index
    %c1536 = arith.constant 1536 : index
    %18 = vector.load %arg1[%c0_11, %c0_12, %c1536] : memref<2x2x4224xf32, #tpu.memory_space<vmem>>, vector<1x2x640xf32>
    %19 = vector.shape_cast %18 : vector<1x2x640xf32> to vector<2x640xf32>
    %cst_13 = arith.constant dense<0.000000e+00> : vector<640xf32>
    %20 = vector.multi_reduction <add>, %19, %cst_13 [0] : vector<2x640xf32> to vector<640xf32>
    %21 = vector.shape_cast %20 : vector<640xf32> to vector<1x640xf32>
    %cst_14 = arith.constant 2.000000e+00 : f32
    %22 = vector.broadcast %cst_14 : f32 to vector<1x640xf32>
    %23 = arith.divf %21, %22 : vector<1x640xf32>
    %c0_15 = arith.constant 0 : index
    %c0_16 = arith.constant 0 : index
    %c2048 = arith.constant 2048 : index
    %24 = vector.load %arg1[%c0_15, %c0_16, %c2048] : memref<2x2x4224xf32, #tpu.memory_space<vmem>>, vector<1x2x640xf32>
    %25 = vector.shape_cast %24 : vector<1x2x640xf32> to vector<2x640xf32>
    %cst_17 = arith.constant dense<0.000000e+00> : vector<640xf32>
    %26 = vector.multi_reduction <add>, %25, %cst_17 [0] : vector<2x640xf32> to vector<640xf32>
    %27 = vector.shape_cast %26 : vector<640xf32> to vector<1x640xf32>
    %cst_18 = arith.constant 2.000000e+00 : f32
    %28 = vector.broadcast %cst_18 : f32 to vector<1x640xf32>
    %29 = arith.divf %27, %28 : vector<1x640xf32>
    %c0_19 = arith.constant 0 : index
    %c0_20 = arith.constant 0 : index
    %c2560 = arith.constant 2560 : index
    %30 = vector.load %arg1[%c0_19, %c0_20, %c2560] : memref<2x2x4224xf32, #tpu.memory_space<vmem>>, vector<1x2x640xf32>
    %31 = vector.shape_cast %30 : vector<1x2x640xf32> to vector<2x640xf32>
    %cst_21 = arith.constant dense<0.000000e+00> : vector<640xf32>
    %32 = vector.multi_reduction <add>, %31, %cst_21 [0] : vector<2x640xf32> to vector<640xf32>
    %33 = vector.shape_cast %32 : vector<640xf32> to vector<1x640xf32>
    %cst_22 = arith.constant 2.000000e+00 : f32
    %34 = vector.broadcast %cst_22 : f32 to vector<1x640xf32>
    %35 = arith.divf %33, %34 : vector<1x640xf32>
    %c0_23 = arith.constant 0 : index
    %c0_24 = arith.constant 0 : index
    %c3072 = arith.constant 3072 : index
    %36 = vector.load %arg1[%c0_23, %c0_24, %c3072] : memref<2x2x4224xf32, #tpu.memory_space<vmem>>, vector<1x2x640xf32>
    %37 = vector.shape_cast %36 : vector<1x2x640xf32> to vector<2x640xf32>
    %cst_25 = arith.constant dense<0.000000e+00> : vector<640xf32>
    %38 = vector.multi_reduction <add>, %37, %cst_25 [0] : vector<2x640xf32> to vector<640xf32>
    %39 = vector.shape_cast %38 : vector<640xf32> to vector<1x640xf32>
    %cst_26 = arith.constant 2.000000e+00 : f32
    %40 = vector.broadcast %cst_26 : f32 to vector<1x640xf32>
    %41 = arith.divf %39, %40 : vector<1x640xf32>
    %c0_27 = arith.constant 0 : index
    %c0_28 = arith.constant 0 : index
    %c3584 = arith.constant 3584 : index
    %42 = vector.load %arg1[%c0_27, %c0_28, %c3584] : memref<2x2x4224xf32, #tpu.memory_space<vmem>>, vector<1x2x640xf32>
    %43 = vector.shape_cast %42 : vector<1x2x640xf32> to vector<2x640xf32>
    %cst_29 = arith.constant dense<0.000000e+00> : vector<640xf32>
    %44 = vector.multi_reduction <add>, %43, %cst_29 [0] : vector<2x640xf32> to vector<640xf32>
    %45 = vector.shape_cast %44 : vector<640xf32> to vector<1x640xf32>
    %cst_30 = arith.constant 2.000000e+00 : f32
    %46 = vector.broadcast %cst_30 : f32 to vector<1x640xf32>
    %47 = arith.divf %45, %46 : vector<1x640xf32>
    %c1 = arith.constant 1 : index
    %c0_31 = arith.constant 0 : index
    %c0_32 = arith.constant 0 : index
    %48 = vector.load %arg1[%c1, %c0_31, %c0_32] : memref<2x2x4224xf32, #tpu.memory_space<vmem>>, vector<1x2x640xf32>
    %49 = vector.shape_cast %48 : vector<1x2x640xf32> to vector<2x640xf32>
    %cst_33 = arith.constant dense<0.000000e+00> : vector<640xf32>
    %50 = vector.multi_reduction <add>, %49, %cst_33 [0] : vector<2x640xf32> to vector<640xf32>
    %51 = vector.shape_cast %50 : vector<640xf32> to vector<1x640xf32>
    %cst_34 = arith.constant 2.000000e+00 : f32
    %52 = vector.broadcast %cst_34 : f32 to vector<1x640xf32>
    %53 = arith.divf %51, %52 : vector<1x640xf32>
    %c1_35 = arith.constant 1 : index
    %c0_36 = arith.constant 0 : index
    %c512_37 = arith.constant 512 : index
    %54 = vector.load %arg1[%c1_35, %c0_36, %c512_37] : memref<2x2x4224xf32, #tpu.memory_space<vmem>>, vector<1x2x640xf32>
    %55 = vector.shape_cast %54 : vector<1x2x640xf32> to vector<2x640xf32>
    %cst_38 = arith.constant dense<0.000000e+00> : vector<640xf32>
    %56 = vector.multi_reduction <add>, %55, %cst_38 [0] : vector<2x640xf32> to vector<640xf32>
    %57 = vector.shape_cast %56 : vector<640xf32> to vector<1x640xf32>
    %cst_39 = arith.constant 2.000000e+00 : f32
    %58 = vector.broadcast %cst_39 : f32 to vector<1x640xf32>
    %59 = arith.divf %57, %58 : vector<1x640xf32>
    %c1_40 = arith.constant 1 : index
    %c0_41 = arith.constant 0 : index
    %c1024_42 = arith.constant 1024 : index
    %60 = vector.load %arg1[%c1_40, %c0_41, %c1024_42] : memref<2x2x4224xf32, #tpu.memory_space<vmem>>, vector<1x2x640xf32>
    %61 = vector.shape_cast %60 : vector<1x2x640xf32> to vector<2x640xf32>
    %cst_43 = arith.constant dense<0.000000e+00> : vector<640xf32>
    %62 = vector.multi_reduction <add>, %61, %cst_43 [0] : vector<2x640xf32> to vector<640xf32>
    %63 = vector.shape_cast %62 : vector<640xf32> to vector<1x640xf32>
    %cst_44 = arith.constant 2.000000e+00 : f32
    %64 = vector.broadcast %cst_44 : f32 to vector<1x640xf32>
    %65 = arith.divf %63, %64 : vector<1x640xf32>
    %c1_45 = arith.constant 1 : index
    %c0_46 = arith.constant 0 : index
    %c1536_47 = arith.constant 1536 : index
    %66 = vector.load %arg1[%c1_45, %c0_46, %c1536_47] : memref<2x2x4224xf32, #tpu.memory_space<vmem>>, vector<1x2x640xf32>
    %67 = vector.shape_cast %66 : vector<1x2x640xf32> to vector<2x640xf32>
    %cst_48 = arith.constant dense<0.000000e+00> : vector<640xf32>
    %68 = vector.multi_reduction <add>, %67, %cst_48 [0] : vector<2x640xf32> to vector<640xf32>
    %69 = vector.shape_cast %68 : vector<640xf32> to vector<1x640xf32>
    %cst_49 = arith.constant 2.000000e+00 : f32
    %70 = vector.broadcast %cst_49 : f32 to vector<1x640xf32>
    %71 = arith.divf %69, %70 : vector<1x640xf32>
    %c1_50 = arith.constant 1 : index
    %c0_51 = arith.constant 0 : index
    %c2048_52 = arith.constant 2048 : index
    %72 = vector.load %arg1[%c1_50, %c0_51, %c2048_52] : memref<2x2x4224xf32, #tpu.memory_space<vmem>>, vector<1x2x640xf32>
    %73 = vector.shape_cast %72 : vector<1x2x640xf32> to vector<2x640xf32>
    %cst_53 = arith.constant dense<0.000000e+00> : vector<640xf32>
    %74 = vector.multi_reduction <add>, %73, %cst_53 [0] : vector<2x640xf32> to vector<640xf32>
    %75 = vector.shape_cast %74 : vector<640xf32> to vector<1x640xf32>
    %cst_54 = arith.constant 2.000000e+00 : f32
    %76 = vector.broadcast %cst_54 : f32 to vector<1x640xf32>
    %77 = arith.divf %75, %76 : vector<1x640xf32>
    %c1_55 = arith.constant 1 : index
    %c0_56 = arith.constant 0 : index
    %c2560_57 = arith.constant 2560 : index
    %78 = vector.load %arg1[%c1_55, %c0_56, %c2560_57] : memref<2x2x4224xf32, #tpu.memory_space<vmem>>, vector<1x2x640xf32>
    %79 = vector.shape_cast %78 : vector<1x2x640xf32> to vector<2x640xf32>
    %cst_58 = arith.constant dense<0.000000e+00> : vector<640xf32>
    %80 = vector.multi_reduction <add>, %79, %cst_58 [0] : vector<2x640xf32> to vector<640xf32>
    %81 = vector.shape_cast %80 : vector<640xf32> to vector<1x640xf32>
    %cst_59 = arith.constant 2.000000e+00 : f32
    %82 = vector.broadcast %cst_59 : f32 to vector<1x640xf32>
    %83 = arith.divf %81, %82 : vector<1x640xf32>
    %c1_60 = arith.constant 1 : index
    %c0_61 = arith.constant 0 : index
    %c3072_62 = arith.constant 3072 : index
    %84 = vector.load %arg1[%c1_60, %c0_61, %c3072_62] : memref<2x2x4224xf32, #tpu.memory_space<vmem>>, vector<1x2x640xf32>
    %85 = vector.shape_cast %84 : vector<1x2x640xf32> to vector<2x640xf32>
    %cst_63 = arith.constant dense<0.000000e+00> : vector<640xf32>
    %86 = vector.multi_reduction <add>, %85, %cst_63 [0] : vector<2x640xf32> to vector<640xf32>
    %87 = vector.shape_cast %86 : vector<640xf32> to vector<1x640xf32>
    %cst_64 = arith.constant 2.000000e+00 : f32
    %88 = vector.broadcast %cst_64 : f32 to vector<1x640xf32>
    %89 = arith.divf %87, %88 : vector<1x640xf32>
    %c1_65 = arith.constant 1 : index
    %c0_66 = arith.constant 0 : index
    %c3584_67 = arith.constant 3584 : index
    %90 = vector.load %arg1[%c1_65, %c0_66, %c3584_67] : memref<2x2x4224xf32, #tpu.memory_space<vmem>>, vector<1x2x640xf32>
    %91 = vector.shape_cast %90 : vector<1x2x640xf32> to vector<2x640xf32>
    %cst_68 = arith.constant dense<0.000000e+00> : vector<640xf32>
    %92 = vector.multi_reduction <add>, %91, %cst_68 [0] : vector<2x640xf32> to vector<640xf32>
    %93 = vector.shape_cast %92 : vector<640xf32> to vector<1x640xf32>
    %cst_69 = arith.constant 2.000000e+00 : f32
    %94 = vector.broadcast %cst_69 : f32 to vector<1x640xf32>
    %95 = arith.divf %93, %94 : vector<1x640xf32>
    %96 = tpu.concatenate %5, %11, %17, %23, %29, %35, %41, %47, %53, %59, %65, %71, %77, %83, %89, %95 in 0 : vector<1x640xf32>, vector<1x640xf32>, vector<1x640xf32>, vector<1x640xf32>, vector<1x640xf32>, vector<1x640xf32>, vector<1x640xf32>, vector<1x640xf32>, vector<1x640xf32>, vector<1x640xf32>, vector<1x640xf32>, vector<1x640xf32>, vector<1x640xf32>, vector<1x640xf32>, vector<1x640xf32>, vector<1x640xf32> -> vector<16x640xf32>
    %c0_70 = arith.constant 0 : index
    %c0_71 = arith.constant 0 : index
    %97 = vector.load %arg2[%c0_70, %c0_71] : memref<640x1024xbf16, #tpu.memory_space<vmem>>, vector<640x1024xbf16>
    %98 = arith.truncf %96 : vector<16x640xf32> to vector<16x640xbf16>
    %cst_72 = arith.constant dense<0.000000e+00> : vector<16x1024xf32>
    %99 = tpu.matmul %98, %97, %cst_72 {dimension_numbers = #tpu.dot_dimension_numbers<[1], [0], [0], [1], [0, 0, 1, 1], [], []>} : vector<16x640xbf16>, vector<640x1024xbf16>, vector<16x1024xf32> -> vector<16x1024xf32>
    %100 = vector.extract_strided_slice %99 {offsets = [0, 0], sizes = [16, 512], strides = [1, 1]} : vector<16x1024xf32> to vector<16x512xf32>
    %101 = vector.extract_strided_slice %99 {offsets = [0, 512], sizes = [16, 512], strides = [1, 1]} : vector<16x1024xf32> to vector<16x512xf32>
    %102 = arith.mulf %100, %100 : vector<16x512xf32>
    %103 = arith.mulf %101, %101 : vector<16x512xf32>
    %104 = arith.addf %102, %103 : vector<16x512xf32>
    %c0_73 = arith.constant 0 : index
    %c0_74 = arith.constant 0 : index
    %105 = vector.load %arg3[%c0_73, %c0_74] : memref<512x256xbf16, #tpu.memory_space<vmem>>, vector<512x256xbf16>
    %106 = arith.truncf %104 : vector<16x512xf32> to vector<16x512xbf16>
    %cst_75 = arith.constant dense<0.000000e+00> : vector<16x256xf32>
    %107 = tpu.matmul %106, %105, %cst_75 {dimension_numbers = #tpu.dot_dimension_numbers<[1], [0], [0], [1], [0, 0, 1, 1], [], []>} : vector<16x512xbf16>, vector<512x256xbf16>, vector<16x256xf32> -> vector<16x256xf32>
    %cst_76 = arith.constant 1.000000e-10 : f32
    %108 = vector.broadcast %cst_76 : f32 to vector<16x256xf32>
    %109 = arith.maximumf %107, %108 : vector<16x256xf32>
    %110 = math.log %109 : vector<16x256xf32>
    %cst_77 = arith.constant 0.434294492 : f32
    %111 = vector.broadcast %cst_77 : f32 to vector<16x256xf32>
    %112 = arith.mulf %110, %111 : vector<16x256xf32>
    %cst_78 = arith.constant 1.000000e+01 : f32
    %113 = vector.broadcast %cst_78 : f32 to vector<16x256xf32>
    %114 = arith.mulf %113, %112 : vector<16x256xf32>
    %c0_79 = arith.constant 0 : index
    %c0_80 = arith.constant 0 : index
    %115 = vector.load %arg4[%c0_79, %c0_80] : memref<256x128xbf16, #tpu.memory_space<vmem>>, vector<256x128xbf16>
    %116 = arith.truncf %114 : vector<16x256xf32> to vector<16x256xbf16>
    %cst_81 = arith.constant dense<0.000000e+00> : vector<16x128xf32>
    %117 = tpu.matmul %116, %115, %cst_81 {dimension_numbers = #tpu.dot_dimension_numbers<[1], [0], [0], [1], [0, 0, 1, 1], [], []>} : vector<16x256xbf16>, vector<256x128xbf16>, vector<16x128xf32> -> vector<16x128xf32>
    %c0_82 = arith.constant 0 : index
    %c0_83 = arith.constant 0 : index
    %118 = vector.load %arg9[%c0_82, %c0_83] : memref<32x128xf32, #tpu.memory_space<vmem>>, vector<1x128xf32>
    %119 = vector.broadcast %118 : vector<1x128xf32> to vector<16x128xf32>
    %120 = arith.addf %117, %119 : vector<16x128xf32>
    %c1_84 = arith.constant 1 : index
    %c0_85 = arith.constant 0 : index
    %121 = vector.load %arg9[%c1_84, %c0_85] : memref<32x128xf32, #tpu.memory_space<vmem>>, vector<1x128xf32>
    %c2 = arith.constant 2 : index
    %c0_86 = arith.constant 0 : index
    %122 = vector.load %arg9[%c2, %c0_86] : memref<32x128xf32, #tpu.memory_space<vmem>>, vector<1x128xf32>
    %cst_87 = arith.constant dense<0.000000e+00> : vector<16xf32>
    %123 = vector.multi_reduction <add>, %120, %cst_87 [1] : vector<16x128xf32> to vector<16xf32>
    %124 = vector.shape_cast %123 : vector<16xf32> to vector<16x1xf32>
    %cst_88 = arith.constant 1.280000e+02 : f32
    %125 = vector.broadcast %cst_88 : f32 to vector<16x1xf32>
    %126 = arith.divf %124, %125 : vector<16x1xf32>
    %127 = vector.broadcast %126 : vector<16x1xf32> to vector<16x128xf32>
    %128 = arith.subf %120, %127 : vector<16x128xf32>
    %129 = arith.mulf %128, %128 : vector<16x128xf32>
    %cst_89 = arith.constant dense<0.000000e+00> : vector<16xf32>
    %130 = vector.multi_reduction <add>, %129, %cst_89 [1] : vector<16x128xf32> to vector<16xf32>
    %131 = vector.shape_cast %130 : vector<16xf32> to vector<16x1xf32>
    %cst_90 = arith.constant 1.280000e+02 : f32
    %132 = vector.broadcast %cst_90 : f32 to vector<16x1xf32>
    %133 = arith.divf %131, %132 : vector<16x1xf32>
    %134 = vector.broadcast %126 : vector<16x1xf32> to vector<16x128xf32>
    %135 = arith.subf %120, %134 : vector<16x128xf32>
    %cst_91 = arith.constant 9.99999997E-7 : f32
    %136 = vector.broadcast %cst_91 : f32 to vector<16x1xf32>
    %137 = arith.addf %133, %136 : vector<16x1xf32>
    %138 = math.rsqrt %137 : vector<16x1xf32>
    %139 = vector.broadcast %138 : vector<16x1xf32> to vector<16x128xf32>
    %140 = arith.mulf %135, %139 : vector<16x128xf32>
    %141 = vector.broadcast %121 : vector<1x128xf32> to vector<16x128xf32>
    %142 = arith.mulf %140, %141 : vector<16x128xf32>
    %143 = vector.broadcast %122 : vector<1x128xf32> to vector<16x128xf32>
    %144 = arith.addf %142, %143 : vector<16x128xf32>
    %145 = tpu.iota {dimensions = array<i32: 0>} : vector<16x1xi32>
    %c8_i32 = arith.constant 8 : i32
    %c0_i32 = arith.constant 0 : i32
    %146 = arith.cmpi eq, %c8_i32, %c0_i32 : i32
    %c1_i32 = arith.constant 1 : i32
    %147 = arith.select %146, %c1_i32, %c8_i32 : i32
    %148 = vector.broadcast %147 : i32 to vector<16x1xi32>
    %149 = arith.remsi %145, %148 : vector<16x1xi32>
    %c0_i32_92 = arith.constant 0 : i32
    %150 = vector.broadcast %c0_i32_92 : i32 to vector<16x1xi32>
    %151 = arith.cmpi ne, %149, %150 : vector<16x1xi32>
    %c0_i32_93 = arith.constant 0 : i32
    %152 = vector.broadcast %c0_i32_93 : i32 to vector<16x1xi32>
    %153 = arith.cmpi slt, %149, %152 : vector<16x1xi32>
    %c0_i32_94 = arith.constant 0 : i32
    %154 = arith.cmpi slt, %147, %c0_i32_94 : i32
    %155 = vector.broadcast %154 : i1 to vector<16x1xi1>
    %156 = vector.broadcast %155 : vector<16x1xi1> to vector<16x1xi1>
    %157 = arith.xori %153, %156 : vector<16x1xi1>
    %158 = arith.andi %157, %151 : vector<16x1xi1>
    %159 = vector.broadcast %147 : i32 to vector<16x1xi32>
    %160 = arith.addi %149, %159 : vector<16x1xi32>
    %161 = arith.select %158, %160, %149 : vector<16x1xi1>, vector<16x1xi32>
    %cst_95 = arith.constant 0.000000e+00 : f32
    %162 = vector.broadcast %cst_95 : f32 to vector<16x128xf32>
    %c3_i32 = arith.constant 3 : i32
    %163 = tpu.dynamic_rotate %144 by %c3_i32 dim 0 : vector<16x128xf32>, i32 -> vector<16x128xf32>
    %c-3_i32 = arith.constant -3 : i32
    %164 = vector.broadcast %c-3_i32 : i32 to vector<16x1xi32>
    %165 = arith.addi %161, %164 : vector<16x1xi32>
    %c0_i32_96 = arith.constant 0 : i32
    %166 = vector.broadcast %c0_i32_96 : i32 to vector<16x1xi32>
    %167 = arith.cmpi sge, %165, %166 : vector<16x1xi32>
    %c-3_i32_97 = arith.constant -3 : i32
    %168 = vector.broadcast %c-3_i32_97 : i32 to vector<16x1xi32>
    %169 = arith.addi %161, %168 : vector<16x1xi32>
    %c8_i32_98 = arith.constant 8 : i32
    %170 = vector.broadcast %c8_i32_98 : i32 to vector<16x1xi32>
    %171 = arith.cmpi slt, %169, %170 : vector<16x1xi32>
    %172 = arith.andi %167, %171 : vector<16x1xi1>
    %173 = arith.extui %172 : vector<16x1xi1> to vector<16x1xi32>
    %174 = arith.sitofp %173 : vector<16x1xi32> to vector<16x1xf32>
    %c9 = arith.constant 9 : index
    %c0_99 = arith.constant 0 : index
    %175 = vector.load %arg9[%c9, %c0_99] : memref<32x128xf32, #tpu.memory_space<vmem>>, vector<1x128xf32>
    %176 = vector.broadcast %174 : vector<16x1xf32> to vector<16x128xf32>
    %177 = arith.mulf %163, %176 : vector<16x128xf32>
    %178 = vector.broadcast %175 : vector<1x128xf32> to vector<16x128xf32>
    %179 = arith.mulf %177, %178 : vector<16x128xf32>
    %180 = arith.addf %162, %179 : vector<16x128xf32>
    %c2_i32 = arith.constant 2 : i32
    %181 = tpu.dynamic_rotate %144 by %c2_i32 dim 0 : vector<16x128xf32>, i32 -> vector<16x128xf32>
    %c-2_i32 = arith.constant -2 : i32
    %182 = vector.broadcast %c-2_i32 : i32 to vector<16x1xi32>
    %183 = arith.addi %161, %182 : vector<16x1xi32>
    %c0_i32_100 = arith.constant 0 : i32
    %184 = vector.broadcast %c0_i32_100 : i32 to vector<16x1xi32>
    %185 = arith.cmpi sge, %183, %184 : vector<16x1xi32>
    %c-2_i32_101 = arith.constant -2 : i32
    %186 = vector.broadcast %c-2_i32_101 : i32 to vector<16x1xi32>
    %187 = arith.addi %161, %186 : vector<16x1xi32>
    %c8_i32_102 = arith.constant 8 : i32
    %188 = vector.broadcast %c8_i32_102 : i32 to vector<16x1xi32>
    %189 = arith.cmpi slt, %187, %188 : vector<16x1xi32>
    %190 = arith.andi %185, %189 : vector<16x1xi1>
    %191 = arith.extui %190 : vector<16x1xi1> to vector<16x1xi32>
    %192 = arith.sitofp %191 : vector<16x1xi32> to vector<16x1xf32>
    %c10 = arith.constant 10 : index
    %c0_103 = arith.constant 0 : index
    %193 = vector.load %arg9[%c10, %c0_103] : memref<32x128xf32, #tpu.memory_space<vmem>>, vector<1x128xf32>
    %194 = vector.broadcast %192 : vector<16x1xf32> to vector<16x128xf32>
    %195 = arith.mulf %181, %194 : vector<16x128xf32>
    %196 = vector.broadcast %193 : vector<1x128xf32> to vector<16x128xf32>
    %197 = arith.mulf %195, %196 : vector<16x128xf32>
    %198 = arith.addf %180, %197 : vector<16x128xf32>
    %c1_i32_104 = arith.constant 1 : i32
    %199 = tpu.dynamic_rotate %144 by %c1_i32_104 dim 0 : vector<16x128xf32>, i32 -> vector<16x128xf32>
    %c-1_i32 = arith.constant -1 : i32
    %200 = vector.broadcast %c-1_i32 : i32 to vector<16x1xi32>
    %201 = arith.addi %161, %200 : vector<16x1xi32>
    %c0_i32_105 = arith.constant 0 : i32
    %202 = vector.broadcast %c0_i32_105 : i32 to vector<16x1xi32>
    %203 = arith.cmpi sge, %201, %202 : vector<16x1xi32>
    %c-1_i32_106 = arith.constant -1 : i32
    %204 = vector.broadcast %c-1_i32_106 : i32 to vector<16x1xi32>
    %205 = arith.addi %161, %204 : vector<16x1xi32>
    %c8_i32_107 = arith.constant 8 : i32
    %206 = vector.broadcast %c8_i32_107 : i32 to vector<16x1xi32>
    %207 = arith.cmpi slt, %205, %206 : vector<16x1xi32>
    %208 = arith.andi %203, %207 : vector<16x1xi1>
    %209 = arith.extui %208 : vector<16x1xi1> to vector<16x1xi32>
    %210 = arith.sitofp %209 : vector<16x1xi32> to vector<16x1xf32>
    %c11 = arith.constant 11 : index
    %c0_108 = arith.constant 0 : index
    %211 = vector.load %arg9[%c11, %c0_108] : memref<32x128xf32, #tpu.memory_space<vmem>>, vector<1x128xf32>
    %212 = vector.broadcast %210 : vector<16x1xf32> to vector<16x128xf32>
    %213 = arith.mulf %199, %212 : vector<16x128xf32>
    %214 = vector.broadcast %211 : vector<1x128xf32> to vector<16x128xf32>
    %215 = arith.mulf %213, %214 : vector<16x128xf32>
    %216 = arith.addf %198, %215 : vector<16x128xf32>
    %c0_i32_109 = arith.constant 0 : i32
    %217 = vector.broadcast %c0_i32_109 : i32 to vector<16x1xi32>
    %218 = arith.addi %161, %217 : vector<16x1xi32>
    %c0_i32_110 = arith.constant 0 : i32
    %219 = vector.broadcast %c0_i32_110 : i32 to vector<16x1xi32>
    %220 = arith.cmpi sge, %218, %219 : vector<16x1xi32>
    %c0_i32_111 = arith.constant 0 : i32
    %221 = vector.broadcast %c0_i32_111 : i32 to vector<16x1xi32>
    %222 = arith.addi %161, %221 : vector<16x1xi32>
    %c8_i32_112 = arith.constant 8 : i32
    %223 = vector.broadcast %c8_i32_112 : i32 to vector<16x1xi32>
    %224 = arith.cmpi slt, %222, %223 : vector<16x1xi32>
    %225 = arith.andi %220, %224 : vector<16x1xi1>
    %226 = arith.extui %225 : vector<16x1xi1> to vector<16x1xi32>
    %227 = arith.sitofp %226 : vector<16x1xi32> to vector<16x1xf32>
    %c12 = arith.constant 12 : index
    %c0_113 = arith.constant 0 : index
    %228 = vector.load %arg9[%c12, %c0_113] : memref<32x128xf32, #tpu.memory_space<vmem>>, vector<1x128xf32>
    %229 = vector.broadcast %227 : vector<16x1xf32> to vector<16x128xf32>
    %230 = arith.mulf %144, %229 : vector<16x128xf32>
    %231 = vector.broadcast %228 : vector<1x128xf32> to vector<16x128xf32>
    %232 = arith.mulf %230, %231 : vector<16x128xf32>
    %233 = arith.addf %216, %232 : vector<16x128xf32>
    %c15_i32 = arith.constant 15 : i32
    %234 = tpu.dynamic_rotate %144 by %c15_i32 dim 0 : vector<16x128xf32>, i32 -> vector<16x128xf32>
    %c1_i32_114 = arith.constant 1 : i32
    %235 = vector.broadcast %c1_i32_114 : i32 to vector<16x1xi32>
    %236 = arith.addi %161, %235 : vector<16x1xi32>
    %c0_i32_115 = arith.constant 0 : i32
    %237 = vector.broadcast %c0_i32_115 : i32 to vector<16x1xi32>
    %238 = arith.cmpi sge, %236, %237 : vector<16x1xi32>
    %c1_i32_116 = arith.constant 1 : i32
    %239 = vector.broadcast %c1_i32_116 : i32 to vector<16x1xi32>
    %240 = arith.addi %161, %239 : vector<16x1xi32>
    %c8_i32_117 = arith.constant 8 : i32
    %241 = vector.broadcast %c8_i32_117 : i32 to vector<16x1xi32>
    %242 = arith.cmpi slt, %240, %241 : vector<16x1xi32>
    %243 = arith.andi %238, %242 : vector<16x1xi1>
    %244 = arith.extui %243 : vector<16x1xi1> to vector<16x1xi32>
    %245 = arith.sitofp %244 : vector<16x1xi32> to vector<16x1xf32>
    %c13 = arith.constant 13 : index
    %c0_118 = arith.constant 0 : index
    %246 = vector.load %arg9[%c13, %c0_118] : memref<32x128xf32, #tpu.memory_space<vmem>>, vector<1x128xf32>
    %247 = vector.broadcast %245 : vector<16x1xf32> to vector<16x128xf32>
    %248 = arith.mulf %234, %247 : vector<16x128xf32>
    %249 = vector.broadcast %246 : vector<1x128xf32> to vector<16x128xf32>
    %250 = arith.mulf %248, %249 : vector<16x128xf32>
    %251 = arith.addf %233, %250 : vector<16x128xf32>
    %c14_i32 = arith.constant 14 : i32
    %252 = tpu.dynamic_rotate %144 by %c14_i32 dim 0 : vector<16x128xf32>, i32 -> vector<16x128xf32>
    %c2_i32_119 = arith.constant 2 : i32
    %253 = vector.broadcast %c2_i32_119 : i32 to vector<16x1xi32>
    %254 = arith.addi %161, %253 : vector<16x1xi32>
    %c0_i32_120 = arith.constant 0 : i32
    %255 = vector.broadcast %c0_i32_120 : i32 to vector<16x1xi32>
    %256 = arith.cmpi sge, %254, %255 : vector<16x1xi32>
    %c2_i32_121 = arith.constant 2 : i32
    %257 = vector.broadcast %c2_i32_121 : i32 to vector<16x1xi32>
    %258 = arith.addi %161, %257 : vector<16x1xi32>
    %c8_i32_122 = arith.constant 8 : i32
    %259 = vector.broadcast %c8_i32_122 : i32 to vector<16x1xi32>
    %260 = arith.cmpi slt, %258, %259 : vector<16x1xi32>
    %261 = arith.andi %256, %260 : vector<16x1xi1>
    %262 = arith.extui %261 : vector<16x1xi1> to vector<16x1xi32>
    %263 = arith.sitofp %262 : vector<16x1xi32> to vector<16x1xf32>
    %c14 = arith.constant 14 : index
    %c0_123 = arith.constant 0 : index
    %264 = vector.load %arg9[%c14, %c0_123] : memref<32x128xf32, #tpu.memory_space<vmem>>, vector<1x128xf32>
    %265 = vector.broadcast %263 : vector<16x1xf32> to vector<16x128xf32>
    %266 = arith.mulf %252, %265 : vector<16x128xf32>
    %267 = vector.broadcast %264 : vector<1x128xf32> to vector<16x128xf32>
    %268 = arith.mulf %266, %267 : vector<16x128xf32>
    %269 = arith.addf %251, %268 : vector<16x128xf32>
    %c13_i32 = arith.constant 13 : i32
    %270 = tpu.dynamic_rotate %144 by %c13_i32 dim 0 : vector<16x128xf32>, i32 -> vector<16x128xf32>
    %c3_i32_124 = arith.constant 3 : i32
    %271 = vector.broadcast %c3_i32_124 : i32 to vector<16x1xi32>
    %272 = arith.addi %161, %271 : vector<16x1xi32>
    %c0_i32_125 = arith.constant 0 : i32
    %273 = vector.broadcast %c0_i32_125 : i32 to vector<16x1xi32>
    %274 = arith.cmpi sge, %272, %273 : vector<16x1xi32>
    %c3_i32_126 = arith.constant 3 : i32
    %275 = vector.broadcast %c3_i32_126 : i32 to vector<16x1xi32>
    %276 = arith.addi %161, %275 : vector<16x1xi32>
    %c8_i32_127 = arith.constant 8 : i32
    %277 = vector.broadcast %c8_i32_127 : i32 to vector<16x1xi32>
    %278 = arith.cmpi slt, %276, %277 : vector<16x1xi32>
    %279 = arith.andi %274, %278 : vector<16x1xi1>
    %280 = arith.extui %279 : vector<16x1xi1> to vector<16x1xi32>
    %281 = arith.sitofp %280 : vector<16x1xi32> to vector<16x1xf32>
    %c15 = arith.constant 15 : index
    %c0_128 = arith.constant 0 : index
    %282 = vector.load %arg9[%c15, %c0_128] : memref<32x128xf32, #tpu.memory_space<vmem>>, vector<1x128xf32>
    %283 = vector.broadcast %281 : vector<16x1xf32> to vector<16x128xf32>
    %284 = arith.mulf %270, %283 : vector<16x128xf32>
    %285 = vector.broadcast %282 : vector<1x128xf32> to vector<16x128xf32>
    %286 = arith.mulf %284, %285 : vector<16x128xf32>
    %287 = arith.addf %269, %286 : vector<16x128xf32>
    %c5 = arith.constant 5 : index
    %c0_129 = arith.constant 0 : index
    %288 = vector.load %arg9[%c5, %c0_129] : memref<32x128xf32, #tpu.memory_space<vmem>>, vector<1x128xf32>
    %c6 = arith.constant 6 : index
    %c0_130 = arith.constant 0 : index
    %289 = vector.load %arg9[%c6, %c0_130] : memref<32x128xf32, #tpu.memory_space<vmem>>, vector<1x128xf32>
    %cst_131 = arith.constant dense<0.000000e+00> : vector<16xf32>
    %290 = vector.multi_reduction <add>, %287, %cst_131 [1] : vector<16x128xf32> to vector<16xf32>
    %291 = vector.shape_cast %290 : vector<16xf32> to vector<16x1xf32>
    %cst_132 = arith.constant 1.280000e+02 : f32
    %292 = vector.broadcast %cst_132 : f32 to vector<16x1xf32>
    %293 = arith.divf %291, %292 : vector<16x1xf32>
    %294 = vector.broadcast %293 : vector<16x1xf32> to vector<16x128xf32>
    %295 = arith.subf %287, %294 : vector<16x128xf32>
    %296 = arith.mulf %295, %295 : vector<16x128xf32>
    %cst_133 = arith.constant dense<0.000000e+00> : vector<16xf32>
    %297 = vector.multi_reduction <add>, %296, %cst_133 [1] : vector<16x128xf32> to vector<16xf32>
    %298 = vector.shape_cast %297 : vector<16xf32> to vector<16x1xf32>
    %cst_134 = arith.constant 1.280000e+02 : f32
    %299 = vector.broadcast %cst_134 : f32 to vector<16x1xf32>
    %300 = arith.divf %298, %299 : vector<16x1xf32>
    %301 = vector.broadcast %293 : vector<16x1xf32> to vector<16x128xf32>
    %302 = arith.subf %287, %301 : vector<16x128xf32>
    %cst_135 = arith.constant 9.99999997E-7 : f32
    %303 = vector.broadcast %cst_135 : f32 to vector<16x1xf32>
    %304 = arith.addf %300, %303 : vector<16x1xf32>
    %305 = math.rsqrt %304 : vector<16x1xf32>
    %306 = vector.broadcast %305 : vector<16x1xf32> to vector<16x128xf32>
    %307 = arith.mulf %302, %306 : vector<16x128xf32>
    %308 = vector.broadcast %288 : vector<1x128xf32> to vector<16x128xf32>
    %309 = arith.mulf %307, %308 : vector<16x128xf32>
    %310 = vector.broadcast %289 : vector<1x128xf32> to vector<16x128xf32>
    %311 = arith.addf %309, %310 : vector<16x128xf32>
    %c0_136 = arith.constant 0 : index
    %c0_137 = arith.constant 0 : index
    %c0_138 = arith.constant 0 : index
    %312 = vector.load %arg5[%c0_136, %c0_137, %c0_138] : memref<2x128x512xbf16, #tpu.memory_space<vmem>>, vector<1x128x512xbf16>
    %313 = vector.shape_cast %312 : vector<1x128x512xbf16> to vector<128x512xbf16>
    %314 = arith.truncf %311 : vector<16x128xf32> to vector<16x128xbf16>
    %cst_139 = arith.constant dense<0.000000e+00> : vector<16x512xf32>
    %315 = tpu.matmul %314, %313, %cst_139 {dimension_numbers = #tpu.dot_dimension_numbers<[1], [0], [0], [1], [0, 0, 1, 1], [], []>} : vector<16x128xbf16>, vector<128x512xbf16>, vector<16x512xf32> -> vector<16x512xf32>
    %c2_140 = arith.constant 2 : index
    %c0_141 = arith.constant 0 : index
    %316 = vector.load %arg10[%c2_140, %c0_141] : memref<4x768xf32, #tpu.memory_space<vmem>>, vector<1x512xf32>
    %317 = vector.broadcast %316 : vector<1x512xf32> to vector<16x512xf32>
    %318 = arith.addf %315, %317 : vector<16x512xf32>
    %319 = arith.mulf %318, %318 : vector<16x512xf32>
    %320 = arith.mulf %318, %319 : vector<16x512xf32>
    %cst_142 = arith.constant 4.471500e-02 : f32
    %321 = vector.broadcast %cst_142 : f32 to vector<16x512xf32>
    %322 = arith.mulf %321, %320 : vector<16x512xf32>
    %323 = arith.addf %318, %322 : vector<16x512xf32>
    %cst_143 = arith.constant 0.797884583 : f32
    %324 = vector.broadcast %cst_143 : f32 to vector<16x512xf32>
    %325 = arith.mulf %324, %323 : vector<16x512xf32>
    %326 = math.tanh %325 : vector<16x512xf32>
    %cst_144 = arith.constant 1.000000e+00 : f32
    %327 = vector.broadcast %cst_144 : f32 to vector<16x512xf32>
    %328 = arith.addf %327, %326 : vector<16x512xf32>
    %cst_145 = arith.constant 5.000000e-01 : f32
    %329 = vector.broadcast %cst_145 : f32 to vector<16x512xf32>
    %330 = arith.mulf %329, %328 : vector<16x512xf32>
    %331 = arith.mulf %318, %330 : vector<16x512xf32>
    %c0_146 = arith.constant 0 : index
    %c0_147 = arith.constant 0 : index
    %c0_148 = arith.constant 0 : index
    %332 = vector.load %arg6[%c0_146, %c0_147, %c0_148] : memref<2x512x128xbf16, #tpu.memory_space<vmem>>, vector<1x512x128xbf16>
    %333 = vector.shape_cast %332 : vector<1x512x128xbf16> to vector<512x128xbf16>
    %334 = arith.truncf %331 : vector<16x512xf32> to vector<16x512xbf16>
    %cst_149 = arith.constant dense<0.000000e+00> : vector<16x128xf32>
    %335 = tpu.matmul %334, %333, %cst_149 {dimension_numbers = #tpu.dot_dimension_numbers<[1], [0], [0], [1], [0, 0, 1, 1], [], []>} : vector<16x512xbf16>, vector<512x128xbf16>, vector<16x128xf32> -> vector<16x128xf32>
    %c7 = arith.constant 7 : index
    %c0_150 = arith.constant 0 : index
    %336 = vector.load %arg9[%c7, %c0_150] : memref<32x128xf32, #tpu.memory_space<vmem>>, vector<1x128xf32>
    %337 = vector.broadcast %336 : vector<1x128xf32> to vector<16x128xf32>
    %338 = arith.addf %335, %337 : vector<16x128xf32>
    %c8 = arith.constant 8 : index
    %c0_151 = arith.constant 0 : index
    %339 = vector.load %arg9[%c8, %c0_151] : memref<32x128xf32, #tpu.memory_space<vmem>>, vector<1x128xf32>
    %340 = vector.broadcast %339 : vector<1x128xf32> to vector<16x128xf32>
    %341 = arith.mulf %338, %340 : vector<16x128xf32>
    %342 = arith.addf %144, %341 : vector<16x128xf32>
    %cst_152 = arith.constant 0.000000e+00 : f32
    %343 = vector.broadcast %cst_152 : f32 to vector<16x128xf32>
    %c3_i32_153 = arith.constant 3 : i32
    %344 = tpu.dynamic_rotate %342 by %c3_i32_153 dim 0 : vector<16x128xf32>, i32 -> vector<16x128xf32>
    %c-3_i32_154 = arith.constant -3 : i32
    %345 = vector.broadcast %c-3_i32_154 : i32 to vector<16x1xi32>
    %346 = arith.addi %161, %345 : vector<16x1xi32>
    %c0_i32_155 = arith.constant 0 : i32
    %347 = vector.broadcast %c0_i32_155 : i32 to vector<16x1xi32>
    %348 = arith.cmpi sge, %346, %347 : vector<16x1xi32>
    %c-3_i32_156 = arith.constant -3 : i32
    %349 = vector.broadcast %c-3_i32_156 : i32 to vector<16x1xi32>
    %350 = arith.addi %161, %349 : vector<16x1xi32>
    %c8_i32_157 = arith.constant 8 : i32
    %351 = vector.broadcast %c8_i32_157 : i32 to vector<16x1xi32>
    %352 = arith.cmpi slt, %350, %351 : vector<16x1xi32>
    %353 = arith.andi %348, %352 : vector<16x1xi1>
    %354 = arith.extui %353 : vector<16x1xi1> to vector<16x1xi32>
    %355 = arith.sitofp %354 : vector<16x1xi32> to vector<16x1xf32>
    %c20 = arith.constant 20 : index
    %c0_158 = arith.constant 0 : index
    %356 = vector.load %arg9[%c20, %c0_158] : memref<32x128xf32, #tpu.memory_space<vmem>>, vector<1x128xf32>
    %357 = vector.broadcast %355 : vector<16x1xf32> to vector<16x128xf32>
    %358 = arith.mulf %344, %357 : vector<16x128xf32>
    %359 = vector.broadcast %356 : vector<1x128xf32> to vector<16x128xf32>
    %360 = arith.mulf %358, %359 : vector<16x128xf32>
    %361 = arith.addf %343, %360 : vector<16x128xf32>
    %c2_i32_159 = arith.constant 2 : i32
    %362 = tpu.dynamic_rotate %342 by %c2_i32_159 dim 0 : vector<16x128xf32>, i32 -> vector<16x128xf32>
    %c-2_i32_160 = arith.constant -2 : i32
    %363 = vector.broadcast %c-2_i32_160 : i32 to vector<16x1xi32>
    %364 = arith.addi %161, %363 : vector<16x1xi32>
    %c0_i32_161 = arith.constant 0 : i32
    %365 = vector.broadcast %c0_i32_161 : i32 to vector<16x1xi32>
    %366 = arith.cmpi sge, %364, %365 : vector<16x1xi32>
    %c-2_i32_162 = arith.constant -2 : i32
    %367 = vector.broadcast %c-2_i32_162 : i32 to vector<16x1xi32>
    %368 = arith.addi %161, %367 : vector<16x1xi32>
    %c8_i32_163 = arith.constant 8 : i32
    %369 = vector.broadcast %c8_i32_163 : i32 to vector<16x1xi32>
    %370 = arith.cmpi slt, %368, %369 : vector<16x1xi32>
    %371 = arith.andi %366, %370 : vector<16x1xi1>
    %372 = arith.extui %371 : vector<16x1xi1> to vector<16x1xi32>
    %373 = arith.sitofp %372 : vector<16x1xi32> to vector<16x1xf32>
    %c21 = arith.constant 21 : index
    %c0_164 = arith.constant 0 : index
    %374 = vector.load %arg9[%c21, %c0_164] : memref<32x128xf32, #tpu.memory_space<vmem>>, vector<1x128xf32>
    %375 = vector.broadcast %373 : vector<16x1xf32> to vector<16x128xf32>
    %376 = arith.mulf %362, %375 : vector<16x128xf32>
    %377 = vector.broadcast %374 : vector<1x128xf32> to vector<16x128xf32>
    %378 = arith.mulf %376, %377 : vector<16x128xf32>
    %379 = arith.addf %361, %378 : vector<16x128xf32>
    %c1_i32_165 = arith.constant 1 : i32
    %380 = tpu.dynamic_rotate %342 by %c1_i32_165 dim 0 : vector<16x128xf32>, i32 -> vector<16x128xf32>
    %c-1_i32_166 = arith.constant -1 : i32
    %381 = vector.broadcast %c-1_i32_166 : i32 to vector<16x1xi32>
    %382 = arith.addi %161, %381 : vector<16x1xi32>
    %c0_i32_167 = arith.constant 0 : i32
    %383 = vector.broadcast %c0_i32_167 : i32 to vector<16x1xi32>
    %384 = arith.cmpi sge, %382, %383 : vector<16x1xi32>
    %c-1_i32_168 = arith.constant -1 : i32
    %385 = vector.broadcast %c-1_i32_168 : i32 to vector<16x1xi32>
    %386 = arith.addi %161, %385 : vector<16x1xi32>
    %c8_i32_169 = arith.constant 8 : i32
    %387 = vector.broadcast %c8_i32_169 : i32 to vector<16x1xi32>
    %388 = arith.cmpi slt, %386, %387 : vector<16x1xi32>
    %389 = arith.andi %384, %388 : vector<16x1xi1>
    %390 = arith.extui %389 : vector<16x1xi1> to vector<16x1xi32>
    %391 = arith.sitofp %390 : vector<16x1xi32> to vector<16x1xf32>
    %c22 = arith.constant 22 : index
    %c0_170 = arith.constant 0 : index
    %392 = vector.load %arg9[%c22, %c0_170] : memref<32x128xf32, #tpu.memory_space<vmem>>, vector<1x128xf32>
    %393 = vector.broadcast %391 : vector<16x1xf32> to vector<16x128xf32>
    %394 = arith.mulf %380, %393 : vector<16x128xf32>
    %395 = vector.broadcast %392 : vector<1x128xf32> to vector<16x128xf32>
    %396 = arith.mulf %394, %395 : vector<16x128xf32>
    %397 = arith.addf %379, %396 : vector<16x128xf32>
    %c0_i32_171 = arith.constant 0 : i32
    %398 = vector.broadcast %c0_i32_171 : i32 to vector<16x1xi32>
    %399 = arith.addi %161, %398 : vector<16x1xi32>
    %c0_i32_172 = arith.constant 0 : i32
    %400 = vector.broadcast %c0_i32_172 : i32 to vector<16x1xi32>
    %401 = arith.cmpi sge, %399, %400 : vector<16x1xi32>
    %c0_i32_173 = arith.constant 0 : i32
    %402 = vector.broadcast %c0_i32_173 : i32 to vector<16x1xi32>
    %403 = arith.addi %161, %402 : vector<16x1xi32>
    %c8_i32_174 = arith.constant 8 : i32
    %404 = vector.broadcast %c8_i32_174 : i32 to vector<16x1xi32>
    %405 = arith.cmpi slt, %403, %404 : vector<16x1xi32>
    %406 = arith.andi %401, %405 : vector<16x1xi1>
    %407 = arith.extui %406 : vector<16x1xi1> to vector<16x1xi32>
    %408 = arith.sitofp %407 : vector<16x1xi32> to vector<16x1xf32>
    %c23 = arith.constant 23 : index
    %c0_175 = arith.constant 0 : index
    %409 = vector.load %arg9[%c23, %c0_175] : memref<32x128xf32, #tpu.memory_space<vmem>>, vector<1x128xf32>
    %410 = vector.broadcast %408 : vector<16x1xf32> to vector<16x128xf32>
    %411 = arith.mulf %342, %410 : vector<16x128xf32>
    %412 = vector.broadcast %409 : vector<1x128xf32> to vector<16x128xf32>
    %413 = arith.mulf %411, %412 : vector<16x128xf32>
    %414 = arith.addf %397, %413 : vector<16x128xf32>
    %c15_i32_176 = arith.constant 15 : i32
    %415 = tpu.dynamic_rotate %342 by %c15_i32_176 dim 0 : vector<16x128xf32>, i32 -> vector<16x128xf32>
    %c1_i32_177 = arith.constant 1 : i32
    %416 = vector.broadcast %c1_i32_177 : i32 to vector<16x1xi32>
    %417 = arith.addi %161, %416 : vector<16x1xi32>
    %c0_i32_178 = arith.constant 0 : i32
    %418 = vector.broadcast %c0_i32_178 : i32 to vector<16x1xi32>
    %419 = arith.cmpi sge, %417, %418 : vector<16x1xi32>
    %c1_i32_179 = arith.constant 1 : i32
    %420 = vector.broadcast %c1_i32_179 : i32 to vector<16x1xi32>
    %421 = arith.addi %161, %420 : vector<16x1xi32>
    %c8_i32_180 = arith.constant 8 : i32
    %422 = vector.broadcast %c8_i32_180 : i32 to vector<16x1xi32>
    %423 = arith.cmpi slt, %421, %422 : vector<16x1xi32>
    %424 = arith.andi %419, %423 : vector<16x1xi1>
    %425 = arith.extui %424 : vector<16x1xi1> to vector<16x1xi32>
    %426 = arith.sitofp %425 : vector<16x1xi32> to vector<16x1xf32>
    %c24 = arith.constant 24 : index
    %c0_181 = arith.constant 0 : index
    %427 = vector.load %arg9[%c24, %c0_181] : memref<32x128xf32, #tpu.memory_space<vmem>>, vector<1x128xf32>
    %428 = vector.broadcast %426 : vector<16x1xf32> to vector<16x128xf32>
    %429 = arith.mulf %415, %428 : vector<16x128xf32>
    %430 = vector.broadcast %427 : vector<1x128xf32> to vector<16x128xf32>
    %431 = arith.mulf %429, %430 : vector<16x128xf32>
    %432 = arith.addf %414, %431 : vector<16x128xf32>
    %c14_i32_182 = arith.constant 14 : i32
    %433 = tpu.dynamic_rotate %342 by %c14_i32_182 dim 0 : vector<16x128xf32>, i32 -> vector<16x128xf32>
    %c2_i32_183 = arith.constant 2 : i32
    %434 = vector.broadcast %c2_i32_183 : i32 to vector<16x1xi32>
    %435 = arith.addi %161, %434 : vector<16x1xi32>
    %c0_i32_184 = arith.constant 0 : i32
    %436 = vector.broadcast %c0_i32_184 : i32 to vector<16x1xi32>
    %437 = arith.cmpi sge, %435, %436 : vector<16x1xi32>
    %c2_i32_185 = arith.constant 2 : i32
    %438 = vector.broadcast %c2_i32_185 : i32 to vector<16x1xi32>
    %439 = arith.addi %161, %438 : vector<16x1xi32>
    %c8_i32_186 = arith.constant 8 : i32
    %440 = vector.broadcast %c8_i32_186 : i32 to vector<16x1xi32>
    %441 = arith.cmpi slt, %439, %440 : vector<16x1xi32>
    %442 = arith.andi %437, %441 : vector<16x1xi1>
    %443 = arith.extui %442 : vector<16x1xi1> to vector<16x1xi32>
    %444 = arith.sitofp %443 : vector<16x1xi32> to vector<16x1xf32>
    %c25 = arith.constant 25 : index
    %c0_187 = arith.constant 0 : index
    %445 = vector.load %arg9[%c25, %c0_187] : memref<32x128xf32, #tpu.memory_space<vmem>>, vector<1x128xf32>
    %446 = vector.broadcast %444 : vector<16x1xf32> to vector<16x128xf32>
    %447 = arith.mulf %433, %446 : vector<16x128xf32>
    %448 = vector.broadcast %445 : vector<1x128xf32> to vector<16x128xf32>
    %449 = arith.mulf %447, %448 : vector<16x128xf32>
    %450 = arith.addf %432, %449 : vector<16x128xf32>
    %c13_i32_188 = arith.constant 13 : i32
    %451 = tpu.dynamic_rotate %342 by %c13_i32_188 dim 0 : vector<16x128xf32>, i32 -> vector<16x128xf32>
    %c3_i32_189 = arith.constant 3 : i32
    %452 = vector.broadcast %c3_i32_189 : i32 to vector<16x1xi32>
    %453 = arith.addi %161, %452 : vector<16x1xi32>
    %c0_i32_190 = arith.constant 0 : i32
    %454 = vector.broadcast %c0_i32_190 : i32 to vector<16x1xi32>
    %455 = arith.cmpi sge, %453, %454 : vector<16x1xi32>
    %c3_i32_191 = arith.constant 3 : i32
    %456 = vector.broadcast %c3_i32_191 : i32 to vector<16x1xi32>
    %457 = arith.addi %161, %456 : vector<16x1xi32>
    %c8_i32_192 = arith.constant 8 : i32
    %458 = vector.broadcast %c8_i32_192 : i32 to vector<16x1xi32>
    %459 = arith.cmpi slt, %457, %458 : vector<16x1xi32>
    %460 = arith.andi %455, %459 : vector<16x1xi1>
    %461 = arith.extui %460 : vector<16x1xi1> to vector<16x1xi32>
    %462 = arith.sitofp %461 : vector<16x1xi32> to vector<16x1xf32>
    %c26 = arith.constant 26 : index
    %c0_193 = arith.constant 0 : index
    %463 = vector.load %arg9[%c26, %c0_193] : memref<32x128xf32, #tpu.memory_space<vmem>>, vector<1x128xf32>
    %464 = vector.broadcast %462 : vector<16x1xf32> to vector<16x128xf32>
    %465 = arith.mulf %451, %464 : vector<16x128xf32>
    %466 = vector.broadcast %463 : vector<1x128xf32> to vector<16x128xf32>
    %467 = arith.mulf %465, %466 : vector<16x128xf32>
    %468 = arith.addf %450, %467 : vector<16x128xf32>
    %c16 = arith.constant 16 : index
    %c0_194 = arith.constant 0 : index
    %469 = vector.load %arg9[%c16, %c0_194] : memref<32x128xf32, #tpu.memory_space<vmem>>, vector<1x128xf32>
    %c17 = arith.constant 17 : index
    %c0_195 = arith.constant 0 : index
    %470 = vector.load %arg9[%c17, %c0_195] : memref<32x128xf32, #tpu.memory_space<vmem>>, vector<1x128xf32>
    %cst_196 = arith.constant dense<0.000000e+00> : vector<16xf32>
    %471 = vector.multi_reduction <add>, %468, %cst_196 [1] : vector<16x128xf32> to vector<16xf32>
    %472 = vector.shape_cast %471 : vector<16xf32> to vector<16x1xf32>
    %cst_197 = arith.constant 1.280000e+02 : f32
    %473 = vector.broadcast %cst_197 : f32 to vector<16x1xf32>
    %474 = arith.divf %472, %473 : vector<16x1xf32>
    %475 = vector.broadcast %474 : vector<16x1xf32> to vector<16x128xf32>
    %476 = arith.subf %468, %475 : vector<16x128xf32>
    %477 = arith.mulf %476, %476 : vector<16x128xf32>
    %cst_198 = arith.constant dense<0.000000e+00> : vector<16xf32>
    %478 = vector.multi_reduction <add>, %477, %cst_198 [1] : vector<16x128xf32> to vector<16xf32>
    %479 = vector.shape_cast %478 : vector<16xf32> to vector<16x1xf32>
    %cst_199 = arith.constant 1.280000e+02 : f32
    %480 = vector.broadcast %cst_199 : f32 to vector<16x1xf32>
    %481 = arith.divf %479, %480 : vector<16x1xf32>
    %482 = vector.broadcast %474 : vector<16x1xf32> to vector<16x128xf32>
    %483 = arith.subf %468, %482 : vector<16x128xf32>
    %cst_200 = arith.constant 9.99999997E-7 : f32
    %484 = vector.broadcast %cst_200 : f32 to vector<16x1xf32>
    %485 = arith.addf %481, %484 : vector<16x1xf32>
    %486 = math.rsqrt %485 : vector<16x1xf32>
    %487 = vector.broadcast %486 : vector<16x1xf32> to vector<16x128xf32>
    %488 = arith.mulf %483, %487 : vector<16x128xf32>
    %489 = vector.broadcast %469 : vector<1x128xf32> to vector<16x128xf32>
    %490 = arith.mulf %488, %489 : vector<16x128xf32>
    %491 = vector.broadcast %470 : vector<1x128xf32> to vector<16x128xf32>
    %492 = arith.addf %490, %491 : vector<16x128xf32>
    %c1_201 = arith.constant 1 : index
    %c0_202 = arith.constant 0 : index
    %c0_203 = arith.constant 0 : index
    %493 = vector.load %arg5[%c1_201, %c0_202, %c0_203] : memref<2x128x512xbf16, #tpu.memory_space<vmem>>, vector<1x128x512xbf16>
    %494 = vector.shape_cast %493 : vector<1x128x512xbf16> to vector<128x512xbf16>
    %495 = arith.truncf %492 : vector<16x128xf32> to vector<16x128xbf16>
    %cst_204 = arith.constant dense<0.000000e+00> : vector<16x512xf32>
    %496 = tpu.matmul %495, %494, %cst_204 {dimension_numbers = #tpu.dot_dimension_numbers<[1], [0], [0], [1], [0, 0, 1, 1], [], []>} : vector<16x128xbf16>, vector<128x512xbf16>, vector<16x512xf32> -> vector<16x512xf32>
    %c3 = arith.constant 3 : index
    %c0_205 = arith.constant 0 : index
    %497 = vector.load %arg10[%c3, %c0_205] : memref<4x768xf32, #tpu.memory_space<vmem>>, vector<1x512xf32>
    %498 = vector.broadcast %497 : vector<1x512xf32> to vector<16x512xf32>
    %499 = arith.addf %496, %498 : vector<16x512xf32>
    %500 = arith.mulf %499, %499 : vector<16x512xf32>
    %501 = arith.mulf %499, %500 : vector<16x512xf32>
    %cst_206 = arith.constant 4.471500e-02 : f32
    %502 = vector.broadcast %cst_206 : f32 to vector<16x512xf32>
    %503 = arith.mulf %502, %501 : vector<16x512xf32>
    %504 = arith.addf %499, %503 : vector<16x512xf32>
    %cst_207 = arith.constant 0.797884583 : f32
    %505 = vector.broadcast %cst_207 : f32 to vector<16x512xf32>
    %506 = arith.mulf %505, %504 : vector<16x512xf32>
    %507 = math.tanh %506 : vector<16x512xf32>
    %cst_208 = arith.constant 1.000000e+00 : f32
    %508 = vector.broadcast %cst_208 : f32 to vector<16x512xf32>
    %509 = arith.addf %508, %507 : vector<16x512xf32>
    %cst_209 = arith.constant 5.000000e-01 : f32
    %510 = vector.broadcast %cst_209 : f32 to vector<16x512xf32>
    %511 = arith.mulf %510, %509 : vector<16x512xf32>
    %512 = arith.mulf %499, %511 : vector<16x512xf32>
    %c1_210 = arith.constant 1 : index
    %c0_211 = arith.constant 0 : index
    %c0_212 = arith.constant 0 : index
    %513 = vector.load %arg6[%c1_210, %c0_211, %c0_212] : memref<2x512x128xbf16, #tpu.memory_space<vmem>>, vector<1x512x128xbf16>
    %514 = vector.shape_cast %513 : vector<1x512x128xbf16> to vector<512x128xbf16>
    %515 = arith.truncf %512 : vector<16x512xf32> to vector<16x512xbf16>
    %cst_213 = arith.constant dense<0.000000e+00> : vector<16x128xf32>
    %516 = tpu.matmul %515, %514, %cst_213 {dimension_numbers = #tpu.dot_dimension_numbers<[1], [0], [0], [1], [0, 0, 1, 1], [], []>} : vector<16x512xbf16>, vector<512x128xbf16>, vector<16x128xf32> -> vector<16x128xf32>
    %c18 = arith.constant 18 : index
    %c0_214 = arith.constant 0 : index
    %517 = vector.load %arg9[%c18, %c0_214] : memref<32x128xf32, #tpu.memory_space<vmem>>, vector<1x128xf32>
    %518 = vector.broadcast %517 : vector<1x128xf32> to vector<16x128xf32>
    %519 = arith.addf %516, %518 : vector<16x128xf32>
    %c19 = arith.constant 19 : index
    %c0_215 = arith.constant 0 : index
    %520 = vector.load %arg9[%c19, %c0_215] : memref<32x128xf32, #tpu.memory_space<vmem>>, vector<1x128xf32>
    %521 = vector.broadcast %520 : vector<1x128xf32> to vector<16x128xf32>
    %522 = arith.mulf %519, %521 : vector<16x128xf32>
    %523 = arith.addf %342, %522 : vector<16x128xf32>
    %c3_216 = arith.constant 3 : index
    %c0_217 = arith.constant 0 : index
    %524 = vector.load %arg9[%c3_216, %c0_217] : memref<32x128xf32, #tpu.memory_space<vmem>>, vector<1x128xf32>
    %c4 = arith.constant 4 : index
    %c0_218 = arith.constant 0 : index
    %525 = vector.load %arg9[%c4, %c0_218] : memref<32x128xf32, #tpu.memory_space<vmem>>, vector<1x128xf32>
    %cst_219 = arith.constant dense<0.000000e+00> : vector<16xf32>
    %526 = vector.multi_reduction <add>, %523, %cst_219 [1] : vector<16x128xf32> to vector<16xf32>
    %527 = vector.shape_cast %526 : vector<16xf32> to vector<16x1xf32>
    %cst_220 = arith.constant 1.280000e+02 : f32
    %528 = vector.broadcast %cst_220 : f32 to vector<16x1xf32>
    %529 = arith.divf %527, %528 : vector<16x1xf32>
    %530 = vector.broadcast %529 : vector<16x1xf32> to vector<16x128xf32>
    %531 = arith.subf %523, %530 : vector<16x128xf32>
    %532 = arith.mulf %531, %531 : vector<16x128xf32>
    %cst_221 = arith.constant dense<0.000000e+00> : vector<16xf32>
    %533 = vector.multi_reduction <add>, %532, %cst_221 [1] : vector<16x128xf32> to vector<16xf32>
    %534 = vector.shape_cast %533 : vector<16xf32> to vector<16x1xf32>
    %cst_222 = arith.constant 1.280000e+02 : f32
    %535 = vector.broadcast %cst_222 : f32 to vector<16x1xf32>
    %536 = arith.divf %534, %535 : vector<16x1xf32>
    %537 = vector.broadcast %529 : vector<16x1xf32> to vector<16x128xf32>
    %538 = arith.subf %523, %537 : vector<16x128xf32>
    %cst_223 = arith.constant 9.99999997E-7 : f32
    %539 = vector.broadcast %cst_223 : f32 to vector<16x1xf32>
    %540 = arith.addf %536, %539 : vector<16x1xf32>
    %541 = math.rsqrt %540 : vector<16x1xf32>
    %542 = vector.broadcast %541 : vector<16x1xf32> to vector<16x128xf32>
    %543 = arith.mulf %538, %542 : vector<16x128xf32>
    %544 = vector.broadcast %524 : vector<1x128xf32> to vector<16x128xf32>
    %545 = arith.mulf %543, %544 : vector<16x128xf32>
    %546 = vector.broadcast %525 : vector<1x128xf32> to vector<16x128xf32>
    %547 = arith.addf %545, %546 : vector<16x128xf32>
    %c0_224 = arith.constant 0 : index
    %c0_225 = arith.constant 0 : index
    %548 = vector.load %arg7[%c0_224, %c0_225] : memref<128x768xbf16, #tpu.memory_space<vmem>>, vector<128x768xbf16>
    %549 = arith.truncf %547 : vector<16x128xf32> to vector<16x128xbf16>
    %cst_226 = arith.constant dense<0.000000e+00> : vector<16x768xf32>
    %550 = tpu.matmul %549, %548, %cst_226 {dimension_numbers = #tpu.dot_dimension_numbers<[1], [0], [0], [1], [0, 0, 1, 1], [], []>} : vector<16x128xbf16>, vector<128x768xbf16>, vector<16x768xf32> -> vector<16x768xf32>
    %c0_227 = arith.constant 0 : index
    %c0_228 = arith.constant 0 : index
    %551 = vector.load %arg10[%c0_227, %c0_228] : memref<4x768xf32, #tpu.memory_space<vmem>>, vector<1x768xf32>
    %552 = vector.broadcast %551 : vector<1x768xf32> to vector<16x768xf32>
    %553 = arith.addf %550, %552 : vector<16x768xf32>
    %c0_229 = arith.constant 0 : index
    %c0_230 = arith.constant 0 : index
    %554 = vector.load %arg11[%c0_229, %c0_230] : memref<16x768xf32, #tpu.memory_space<vmem>>, vector<16x768xf32>
    tpu.vector_store %arg11[%c0_229, %c0_230], %553 {strides = array<i32>} : memref<16x768xf32, #tpu.memory_space<vmem>>, vector<16x768xf32>,
    %555 = tpu.iota {dimensions = array<i32: 0>} : vector<8x1xi32>
    %c0_231 = arith.constant 0 : index
    %556 = memref.load %arg0[%c0_231] : memref<2xi32, #tpu.memory_space<smem>>
    %557 = vector.broadcast %556 : i32 to vector<8x1xi32>
    %558 = arith.cmpi slt, %555, %557 : vector<8x1xi32>
    %559 = arith.extui %558 : vector<8x1xi1> to vector<8x1xi32>
    %560 = arith.sitofp %559 : vector<8x1xi32> to vector<8x1xf32>
    %561 = vector.extract_strided_slice %553 {offsets = [0, 0], sizes = [8, 768], strides = [1, 1]} : vector<16x768xf32> to vector<8x768xf32>
    %562 = vector.shape_cast %560 : vector<8x1xf32> to vector<1x8x1xf32>
    %cst_232 = arith.constant dense<0.000000e+00> : vector<1xf32>
    %563 = vector.multi_reduction <add>, %562, %cst_232 [1, 2] : vector<1x8x1xf32> to vector<1xf32>
    %564 = vector.shape_cast %563 : vector<1xf32> to vector<1x1x1xf32>
    %565 = vector.extract %564[0, 0, 0] : f32 from vector<1x1x1xf32>
    %cst_233 = arith.constant 1.000000e+00 : f32
    %566 = arith.maximumf %565, %cst_233 : f32
    %567 = vector.broadcast %560 : vector<8x1xf32> to vector<8x768xf32>
    %568 = arith.mulf %561, %567 : vector<8x768xf32>
    %cst_234 = arith.constant dense<0.000000e+00> : vector<768xf32>
    %569 = vector.multi_reduction <add>, %568, %cst_234 [0] : vector<8x768xf32> to vector<768xf32>
    %570 = vector.shape_cast %569 : vector<768xf32> to vector<1x768xf32>
    %571 = vector.broadcast %566 : f32 to vector<1x768xf32>
    %572 = arith.divf %570, %571 : vector<1x768xf32>
    %c1_235 = arith.constant 1 : index
    %573 = memref.load %arg0[%c1_235] : memref<2xi32, #tpu.memory_space<smem>>
    %574 = vector.broadcast %573 : i32 to vector<8x1xi32>
    %575 = arith.cmpi slt, %555, %574 : vector<8x1xi32>
    %576 = arith.extui %575 : vector<8x1xi1> to vector<8x1xi32>
    %577 = arith.sitofp %576 : vector<8x1xi32> to vector<8x1xf32>
    %578 = vector.extract_strided_slice %553 {offsets = [8, 0], sizes = [8, 768], strides = [1, 1]} : vector<16x768xf32> to vector<8x768xf32>
    %579 = vector.shape_cast %577 : vector<8x1xf32> to vector<1x8x1xf32>
    %cst_236 = arith.constant dense<0.000000e+00> : vector<1xf32>
    %580 = vector.multi_reduction <add>, %579, %cst_236 [1, 2] : vector<1x8x1xf32> to vector<1xf32>
    %581 = vector.shape_cast %580 : vector<1xf32> to vector<1x1x1xf32>
    %582 = vector.extract %581[0, 0, 0] : f32 from vector<1x1x1xf32>
    %cst_237 = arith.constant 1.000000e+00 : f32
    %583 = arith.maximumf %582, %cst_237 : f32
    %584 = vector.broadcast %577 : vector<8x1xf32> to vector<8x768xf32>
    %585 = arith.mulf %578, %584 : vector<8x768xf32>
    %cst_238 = arith.constant dense<0.000000e+00> : vector<768xf32>
    %586 = vector.multi_reduction <add>, %585, %cst_238 [0] : vector<8x768xf32> to vector<768xf32>
    %587 = vector.shape_cast %586 : vector<768xf32> to vector<1x768xf32>
    %588 = vector.broadcast %583 : f32 to vector<1x768xf32>
    %589 = arith.divf %587, %588 : vector<1x768xf32>
    %590 = tpu.concatenate %572, %589 in 0 : vector<1x768xf32>, vector<1x768xf32> -> vector<2x768xf32>
    %c0_239 = arith.constant 0 : index
    %c0_240 = arith.constant 0 : index
    %591 = vector.load %arg8[%c0_239, %c0_240] : memref<768x640xbf16, #tpu.memory_space<vmem>>, vector<768x640xbf16>
    %592 = arith.truncf %590 : vector<2x768xf32> to vector<2x768xbf16>
    %cst_241 = arith.constant dense<0.000000e+00> : vector<2x640xf32>
    %593 = tpu.matmul %592, %591, %cst_241 {dimension_numbers = #tpu.dot_dimension_numbers<[1], [0], [0], [1], [0, 0, 1, 1], [], []>} : vector<2x768xbf16>, vector<768x640xbf16>, vector<2x640xf32> -> vector<2x640xf32>
    %c1_242 = arith.constant 1 : index
    %c0_243 = arith.constant 0 : index
    %594 = vector.load %arg10[%c1_242, %c0_243] : memref<4x768xf32, #tpu.memory_space<vmem>>, vector<1x640xf32>
    %595 = vector.broadcast %594 : vector<1x640xf32> to vector<2x640xf32>
    %596 = arith.addf %593, %595 : vector<2x640xf32>
    %597 = arith.negf %596 : vector<2x640xf32>
    %598 = math.exp %597 : vector<2x640xf32>
    %cst_244 = arith.constant 1.000000e+00 : f32
    %599 = vector.broadcast %cst_244 : f32 to vector<2x640xf32>
    %600 = arith.addf %599, %598 : vector<2x640xf32>
    %601 = arith.divf %599, %600 : vector<2x640xf32>
    %c0_245 = arith.constant 0 : index
    %c0_246 = arith.constant 0 : index
    %602 = vector.load %arg12[%c0_245, %c0_246] : memref<2x640xf32, #tpu.memory_space<vmem>>, vector<2x640xf32>
    tpu.vector_store %arg12[%c0_245, %c0_246], %601 {strides = array<i32>} : memref<2x640xf32, #tpu.memory_space<vmem>>, vector<2x640xf32>,
    return
  }
}

</mosaic_0001>

<bundles_post_ra>
// kernel: conette_preprocessor_forward.1
= control target key start
LH: loop header
LB: loop body
LE: loop exit
PB: predicated region body
PF: predicated region fallthrough
CT: control target
= control target key end

     0   :  { %18 = vsyncpa [#allocation5], 0  ;;  %s13564_s0 = inlined_call_operand.vmem [shape: s32[2], index: 0, kind: input, shape index: {}]   ;;  %s13565_s1 = inlined_call_operand.hbm [shape: f32[2,2,4224], index: 1, kind: input, shape index: {}]   ;;  %s13566_s2 = inlined_call_operand.hbm [shape: bf16[640,1024], index: 2, kind: input, shape index: {}]   ;;  %s13567_s3 = inlined_call_operand.hbm [shape: bf16[512,256], index: 3, kind: input, shape index: {}]   ;;  %s13568_s4 = inlined_call_operand.hbm [shape: bf16[256,128], index: 4, kind: input, shape index: {}]   ;;  %s13569_s5 = inlined_call_operand.hbm [shape: bf16[2,128,512], index: 5, kind: input, shape index: {}]   ;;  %s13570_s6 = inlined_call_operand.hbm [shape: bf16[2,512,128], index: 6, kind: input, shape index: {}]   ;;  %s13571_s7 = inlined_call_operand.hbm [shape: bf16[128,768], index: 7, kind: input, shape index: {}]   ;;  %s13572_s8 = inlined_call_operand.hbm [shape: bf16[768,640], index: 8, kind: input, shape index: {}]   ;;  %s13573_s9 = inlined_call_operand.hbm [shape: f32[32,128], index: 9, kind: input, shape index: {}]   ;;  %s13574_s10 = inlined_call_operand.hbm [shape: f32[4,768], index: 10, kind: input, shape index: {}]   ;;  %s13575_s11 = inlined_call_operand.hbm [shape: f32[16,768], index: 11, kind: output, shape index: {0}]   ;;  %s13576_s12 = inlined_call_operand.hbm [shape: f32[2,640], index: 12, kind: output, shape index: {1}]  }
   0x1   :  { %19 = vsyncpa [#allocation3], 0 }
   0x2   :  { %20 = vsyncpa [#allocation8], 0 }
   0x3   :  { %21 = vsyncpa [#allocation11], 0 }
   0x4   :  { %22 = vsyncpa [#allocation14], 0 }
   0x5   :  { %23 = vsyncpa [#allocation17], 0 }
   0x6   :  { %24 = vsyncpa [#allocation20], 0 }
   0x7   :  { %25 = vsyncpa [#allocation4], 0 }
   0x8   :  { %26 = vsyncpa [#allocation23], 0  ;;  %s11382_s21 = smov [#allocation7]   ;;  %s11088_s25 = scalar_lea.hbm %s13566_s2, 40960 }
   0x9   :  { %s54_s22 = sshll.u32 %s11382_s21, 4  ;;  %p11089_p0 = scmp.ne.s32.totalorder %s13566_s2, %s11088_s25  ;;  %s55_s22 = int_to_ptr.vmem [resolvable:$true] %s54_s22 }
   0xa   :  { %p11092_p1 = scmp.lt.u32.totalorder %s11088_s25, %s13566_s2 }
   0xc   :  { %p11094_p2 = pnand %p11092_p1, %p11089_p0 }
   0xe   :  { %11097 = shalt.err (!%p11094_p2)
}
   0xf   :  { %s11098_s30 = scalar_lea.vmem %s55_s22, 40960  ;;  %p11103_p4 = scmp.lt.s32.totalorder %s55_s22, %s55_s22 }
  0x10   :  { %p11099_p3 = scmp.ne.s32.totalorder %s55_s22, %s11098_s30  ;;  %p11104_p5 = scmp.lt.s32.totalorder %s11098_s30, %s11098_s30 }
  0x12   :  { %p11105_p6 = por %p11104_p5, %p11103_p4 }
  0x14   :  { %p11106_p7 = pnand %p11105_p6, %p11099_p3 }
  0x16   :  { %11109 = shalt.err (!%p11106_p7)
}
  0x17   :  { %s11383_s13 = smov 512   ;;  %s11384_s14 = smov 32  }
  0x18   :  { %60 = dma.hbm_to_vmem [thread:$0]  %s13566_s2, 40960, %s55_s22, [#allocation8], %s11383_s13, %s11383_s13, %s11384_s14  }
  0x19   :  { %s11385_s17 = smov [#allocation10]   ;;  %s11110_s21 = scalar_lea.hbm %s13568_s4, 2048 }
  0x1a   :  { %s78_s18 = sshll.u32 %s11385_s17, 4  ;;  %p11111_p8 = scmp.ne.s32.totalorder %s13568_s4, %s11110_s21  ;;  %s79_s18 = int_to_ptr.vmem [resolvable:$true] %s78_s18 }
  0x1b   :  { %p11114_p9 = scmp.lt.u32.totalorder %s11110_s21, %s13568_s4 }
  0x1d   :  { %p11116_p10 = pnand %p11114_p9, %p11111_p8 }
  0x1f   :  { %11119 = shalt.err (!%p11116_p10)
}
  0x20   :  { %s11120_s27 = scalar_lea.vmem %s79_s18, 2048  ;;  %p11125_p12 = scmp.lt.s32.totalorder %s79_s18, %s79_s18 }
  0x21   :  { %p11121_p11 = scmp.ne.s32.totalorder %s79_s18, %s11120_s27  ;;  %p11126_p13 = scmp.lt.s32.totalorder %s11120_s27, %s11120_s27 }
  0x23   :  { %p11127_p0 = por %p11126_p13, %p11125_p12 }
  0x25   :  { %p11128_p1 = pnand %p11127_p0, %p11121_p11 }
  0x27   :  { %11131 = shalt.err (!%p11128_p1)
}
  0x28   :  { %s11386_s2 = smov 64   ;;  %s11387_s22 = smov 4  }
  0x29   :  { %84 = dma.hbm_to_vmem [thread:$0]  %s13568_s4, 2048, %s79_s18, [#allocation11], %s11386_s2, %s11386_s2, %s11387_s22  }
  0x2a   :  { %s11388_s30 = smov [#allocation13]   ;;  %s11389_s14 = smov [#allocation16]  }
  0x2b   :  { %s102_s13 = sshll.u32 %s11388_s30, 4  ;;  %s126_s15 = sshll.u32 %s11389_s14, 4  ;;  %s103_s13 = int_to_ptr.vmem [resolvable:$true] %s102_s13  ;;  %s11504_s15 = int_to_ptr.vmem [resolvable:$true] %s126_s15 }
  0x2c   :  { %s11132_s19 = scalar_lea.hbm %s13570_s6, 8192 }
  0x2d   :  { %p11133_p2 = scmp.ne.s32.totalorder %s13570_s6, %s11132_s19  ;;  %p11136_p3 = scmp.lt.u32.totalorder %s11132_s19, %s13570_s6 }
  0x2f   :  { %p11138_p4 = pnand %p11136_p3, %p11133_p2 }
  0x31   :  { %11141 = shalt.err (!%p11138_p4)
}
  0x32   :  { %s11142_s4 = scalar_lea.vmem %s103_s13, 8192  ;;  %p11147_p6 = scmp.lt.s32.totalorder %s103_s13, %s103_s13 }
  0x33   :  { %p11143_p5 = scmp.ne.s32.totalorder %s103_s13, %s11142_s4  ;;  %p11148_p7 = scmp.lt.s32.totalorder %s11142_s4, %s11142_s4 }
  0x35   :  { %p11149_p8 = por %p11148_p7, %p11147_p6 }
  0x37   :  { %p11150_p9 = pnand %p11149_p8, %p11143_p5 }
  0x39   :  { %11153 = shalt.err (!%p11150_p9)
}
  0x3a   :  { %108 = dma.hbm_to_vmem [thread:$0]  %s13570_s6, 8192, %s103_s13, [#allocation14], %s11386_s2, %s11386_s2, %s11387_s22  }
  0x3b   :  { %s11154_s28 = scalar_lea.hbm %s13572_s8, 30720 }
  0x3c   :  { %p11155_p10 = scmp.ne.s32.totalorder %s13572_s8, %s11154_s28  ;;  %p11158_p11 = scmp.lt.u32.totalorder %s11154_s28, %s13572_s8 }
  0x3e   :  { %p11160_p12 = pnand %p11158_p11, %p11155_p10 }
  0x40   :  { %11163 = shalt.err (!%p11160_p12)
}
  0x41   :  { %s11164_s17 = scalar_lea.vmem %s11504_s15, 30720  ;;  %p11169_p0 = scmp.lt.s32.totalorder %s11504_s15, %s11504_s15 }
  0x42   :  { %p11165_p13 = scmp.ne.s32.totalorder %s11504_s15, %s11164_s17  ;;  %p11170_p1 = scmp.lt.s32.totalorder %s11164_s17, %s11164_s17 }
  0x44   :  { %p11171_p2 = por %p11170_p1, %p11169_p0 }
  0x46   :  { %p11172_p3 = pnand %p11171_p2, %p11165_p13 }
  0x48   :  { %11175 = shalt.err (!%p11172_p3)
}
  0x49   :  { %s11390_s6 = smov 320   ;;  %s11391_s2 = smov 20  }
  0x4a   :  { %132 = dma.hbm_to_vmem [thread:$0]  %s13572_s8, 30720, %s11504_s15, [#allocation17], %s11390_s6, %s11390_s6, %s11391_s2  }
  0x4b   :  { %s33_s21 = sshll.u32 %s13564_s0, 4  ;;  %s34_s21 = int_to_ptr.vmem [resolvable:$true] %s33_s21 }
  0x4c   :  { %s11176_s23 = scalar_lea.vmem %s34_s21, 16  ;;  %p11181_p5 = scmp.lt.s32.totalorder %s34_s21, %s34_s21 }
  0x4d   :  { %p11177_p4 = scmp.ne.s32.totalorder %s34_s21, %s11176_s23  ;;  %p11182_p6 = scmp.lt.s32.totalorder %s11176_s23, %s11176_s23 }
  0x4f   :  { %p11183_p7 = por %p11182_p6, %p11181_p5 }
  0x51   :  { %p11184_p8 = pnand %p11183_p7, %p11177_p4 }
  0x53   :  { %11187 = shalt.err (!%p11184_p8)
}
  0x54   :  { %s11392_s24 = smov [#allocation2]   ;;  %s11393_s4 = smov [#allocation6]  }
  0x55   :  { %36 = dma.vmem_to_smem %s34_s21, 16, %s11392_s24, [#allocation5]  }
  0x56   :  { %s42_s18 = sshll.u32 %s11393_s4, 4  ;;  %s11188_s8 = scalar_lea.hbm %s13565_s1, 2112  ;;  %s43_s18 = int_to_ptr.vmem [resolvable:$true] %s42_s18 }
  0x57   :  { %p11189_p9 = scmp.ne.s32.totalorder %s13565_s1, %s11188_s8  ;;  %p11192_p10 = scmp.lt.u32.totalorder %s11188_s8, %s13565_s1 }
  0x59   :  { %p11194_p11 = pnand %p11192_p10, %p11189_p9 }
  0x5b   :  { %11197 = shalt.err (!%p11194_p11)
}
  0x5c   :  { %s11198_s29 = scalar_lea.vmem %s43_s18, 2112  ;;  %p11203_p13 = scmp.lt.s32.totalorder %s43_s18, %s43_s18 }
  0x5d   :  { %p11199_p12 = scmp.ne.s32.totalorder %s43_s18, %s11198_s29  ;;  %p11204_p0 = scmp.lt.s32.totalorder %s11198_s29, %s11198_s29 }
  0x5f   :  { %p11205_p1 = por %p11204_p0, %p11203_p13 }
  0x61   :  { %p11206_p2 = pnand %p11205_p1, %p11199_p12 }
  0x63   :  { %11209 = shalt.err (!%p11206_p2)
}
  0x64   :  { %s11394_s30 = smov 1056   ;;  %s11395_s14 = smov 66  }
  0x65   :  { %48 = dma.hbm_to_vmem [thread:$0]  %s13565_s1, 2112, %s43_s18, [#allocation3], %s11394_s30, %s11394_s30, %s11395_s14  }
  0x66   :  { %s11396_s6 = smov [#allocation9]   ;;  %s11210_s19 = scalar_lea.hbm %s13567_s3, 8192 }
  0x67   :  { %s66_s2 = sshll.u32 %s11396_s6, 4  ;;  %p11211_p3 = scmp.ne.s32.totalorder %s13567_s3, %s11210_s19  ;;  %s67_s2 = int_to_ptr.vmem [resolvable:$true] %s66_s2 }
  0x68   :  { %p11214_p4 = scmp.lt.u32.totalorder %s11210_s19, %s13567_s3 }
  0x6a   :  { %p11216_p5 = pnand %p11214_p4, %p11211_p3 }
  0x6c   :  { %11219 = shalt.err (!%p11216_p5)
}
  0x6d   :  { %s11220_s4 = scalar_lea.vmem %s67_s2, 8192  ;;  %p11225_p7 = scmp.lt.s32.totalorder %s67_s2, %s67_s2 }
  0x6e   :  { %p11221_p6 = scmp.ne.s32.totalorder %s67_s2, %s11220_s4  ;;  %p11226_p8 = scmp.lt.s32.totalorder %s11220_s4, %s11220_s4 }
  0x70   :  { %p11227_p9 = por %p11226_p8, %p11225_p7 }
  0x72   :  { %p11228_p10 = pnand %p11227_p9, %p11221_p6 }
  0x74   :  { %11231 = shalt.err (!%p11228_p10)
}
  0x75   :  { %s11397_s1 = smov 128   ;;  %s11398_s18 = smov 8  }
  0x76   :  { %72 = dma.hbm_to_vmem [thread:$0]  %s13567_s3, 8192, %s67_s2, [#allocation8], %s11397_s1, %s11397_s1, %s11398_s18  }
  0x77   :  { %s11399_s8 = smov [#allocation12]   ;;  %s11232_s28 = scalar_lea.hbm %s13569_s5, 8192 }
  0x78   :  { %s90_s15 = sshll.u32 %s11399_s8, 4  ;;  %p11233_p11 = scmp.ne.s32.totalorder %s13569_s5, %s11232_s28  ;;  %s91_s15 = int_to_ptr.vmem [resolvable:$true] %s90_s15 }
  0x79   :  { %p11236_p12 = scmp.lt.u32.totalorder %s11232_s28, %s13569_s5 }
  0x7b   :  { %p11238_p13 = pnand %p11236_p12, %p11233_p11 }
  0x7d   :  { %11241 = shalt.err (!%p11238_p13)
}
  0x7e   :  { %s11242_s17 = scalar_lea.vmem %s91_s15, 8192  ;;  %p11247_p1 = scmp.lt.s32.totalorder %s91_s15, %s91_s15 }
  0x7f   :  { %p11243_p0 = scmp.ne.s32.totalorder %s91_s15, %s11242_s17  ;;  %p11248_p2 = scmp.lt.s32.totalorder %s11242_s17, %s11242_s17 }
  0x81   :  { %p11249_p3 = por %p11248_p2, %p11247_p1 }
  0x83   :  { %p11250_p4 = pnand %p11249_p3, %p11243_p0 }
  0x85   :  { %11253 = shalt.err (!%p11250_p4)
}
  0x86   :  { %s11400_s3 = smov 256   ;;  %s11401_s6 = smov 16  }
  0x87   :  { %96 = dma.hbm_to_vmem [thread:$0]  %s13569_s5, 8192, %s91_s15, [#allocation11], %s11400_s3, %s11400_s3, %s11401_s6  }
  0x88   :  { %s11402_s13 = smov [#allocation15]   ;;  %s11254_s23 = scalar_lea.hbm %s13571_s7, 6144 }
  0x89   :  { %s114_s19 = sshll.u32 %s11402_s13, 4  ;;  %p11255_p5 = scmp.ne.s32.totalorder %s13571_s7, %s11254_s23  ;;  %s115_s19 = int_to_ptr.vmem [resolvable:$true] %s114_s19 }
  0x8a   :  { %p11258_p6 = scmp.lt.u32.totalorder %s11254_s23, %s13571_s7 }
  0x8c   :  { %p11260_p7 = pnand %p11258_p6, %p11255_p5 }
  0x8e   :  { %11263 = shalt.err (!%p11260_p7)
}
  0x8f   :  { %s11264_s8 = scalar_lea.vmem %s115_s19, 6144  ;;  %p11269_p9 = scmp.lt.s32.totalorder %s115_s19, %s115_s19 }
  0x90   :  { %p11265_p8 = scmp.ne.s32.totalorder %s115_s19, %s11264_s8  ;;  %p11270_p10 = scmp.lt.s32.totalorder %s11264_s8, %s11264_s8 }
  0x92   :  { %p11271_p11 = por %p11270_p10, %p11269_p9 }
  0x94   :  { %p11272_p12 = pnand %p11271_p11, %p11265_p8 }
  0x96   :  { %11275 = shalt.err (!%p11272_p12)
}
  0x97   :  { %s11403_s5 = smov 384   ;;  %s11404_s15 = smov 24  }
  0x98   :  { %120 = dma.hbm_to_vmem [thread:$0]  %s13571_s7, 6144, %s115_s19, [#allocation14], %s11403_s5, %s11403_s5, %s11404_s15  }
  0x99   :  { %s11405_s28 = smov [#allocation18]   ;;  %s11406_s30 = smov [#allocation19]  }
  0x9a   :  { %s138_s29 = sshll.u32 %s11405_s28, 4  ;;  %s151_s14 = sshll.u32 %s11406_s30, 4  ;;  %s139_s29 = int_to_ptr.vmem [resolvable:$true] %s138_s29  ;;  %s152_s14 = int_to_ptr.vmem [resolvable:$true] %s151_s14 }
  0x9b   :  { %s11276_s3 = scalar_lea.hbm %s13573_s9, 512 }
  0x9c   :  { %p11277_p13 = scmp.ne.s32.totalorder %s13573_s9, %s11276_s3  ;;  %p11280_p0 = scmp.lt.u32.totalorder %s11276_s3, %s13573_s9 }
  0x9e   :  { %p11282_p1 = pnand %p11280_p0, %p11277_p13 }
  0xa0   :  { %11285 = shalt.err (!%p11282_p1)
}
  0xa1   :  { %s11286_s7 = scalar_lea.vmem %s139_s29, 512  ;;  %p11291_p3 = scmp.lt.s32.totalorder %s139_s29, %s139_s29 }
  0xa2   :  { %p11287_p2 = scmp.ne.s32.totalorder %s139_s29, %s11286_s7  ;;  %p11292_p4 = scmp.lt.s32.totalorder %s11286_s7, %s11286_s7 }
  0xa4   :  { %p11293_p5 = por %p11292_p4, %p11291_p3 }
  0xa6   :  { %p11294_p6 = pnand %p11293_p5, %p11287_p2 }
  0xa8   :  { %11297 = shalt.err (!%p11294_p6)
}
  0xa9   :  { %144 = dma.hbm_to_vmem [thread:$0]  %s13573_s9, 512, %s139_s29, [#allocation17], %s11397_s1, %s11397_s1, %s11398_s18  }
  0xaa   :  { %s11298_s24 = scalar_lea.hbm %s13574_s10, 384 }
  0xab   :  { %p11299_p7 = scmp.ne.s32.totalorder %s13574_s10, %s11298_s24  ;;  %p11302_p8 = scmp.lt.u32.totalorder %s11298_s24, %s13574_s10 }
  0xad   :  { %p11304_p9 = pnand %p11302_p8, %p11299_p7 }
  0xaf   :  { %11307 = shalt.err (!%p11304_p9)
}
  0xb0   :  { %s11308_s5 = scalar_lea.vmem %s152_s14, 384  ;;  %p11313_p11 = scmp.lt.s32.totalorder %s152_s14, %s152_s14 }
  0xb1   :  { %p11309_p10 = scmp.ne.s32.totalorder %s152_s14, %s11308_s5  ;;  %p11314_p12 = scmp.lt.s32.totalorder %s11308_s5, %s11308_s5 }
  0xb3   :  { %p11315_p13 = por %p11314_p12, %p11313_p11 }
  0xb5   :  { %p11316_p0 = pnand %p11315_p13, %p11309_p10 }
  0xb7   :  { %11319 = shalt.err (!%p11316_p0)
}
  0xb8   :  { %154 = dma.hbm_to_vmem [thread:$0]  %s13574_s10, 384, %s152_s14, [#allocation20]  }
  0xb9   :  { %11364 = dma.done.wait [#allocation5], 16  }
  0xba   :  { %11365 = vsyncadd [#allocation5], 4294967280 }
  0xbb   :  { %11366 = dma.done.wait [#allocation3], 2112  }
  0xbc   :  { %11367 = vsyncadd [#allocation3], 4294965184 }
  0xbd   :  { %11368 = dma.done.wait [#allocation8], 49152  }
  0xbe   :  { %11369 = vsyncadd [#allocation8], 4294918144 }
  0xbf   :  { %11370 = dma.done.wait [#allocation11], 10240  }
  0xc0   :  { %11371 = vsyncadd [#allocation11], 4294957056 }
  0xc1   :  { %11372 = dma.done.wait [#allocation14], 14336  }
  0xc2   :  { %11373 = vsyncadd [#allocation14], 4294952960 }
  0xc3   :  { %11374 = dma.done.wait [#allocation17], 31232  }
  0xc4   :  { %11375 = vsyncadd [#allocation17], 4294936064 }
  0xc5   :  { %11376 = dma.done.wait [#allocation20], 384  }
  0xc6   :  { %11377 = vsyncadd [#allocation20], 4294966912 }
  0xc7   :  { %188 = sfence }
  0xc8   :  { %v1437_v0 = vld [vmem:[#allocation7] sm:$0xff]  ;;  %v1438_v2 = vld [vmem:[#allocation7 + $0x8] sm:$0xff]  ;;  %v198_v8 = vlaneseq  ;;  %v11407_v15 = vmov 1983009808   ;;  %vm223_vm0 = vcmask 1041408   ;;  %vm1361_vm1 = vcmask 1040384  }
  0xc9   :  { %v1441_v1 = vld [vmem:[#allocation7 + $0x20] sm:$0xff]  ;;  %v1442_v4 = vld [vmem:[#allocation7 + $0x28] sm:$0xff]  ;;  %v196_v16 = vunpack.c.l.s4 %v11407_v15  ;;  %vm1372_vm2 = vcmask 1042432   ;;  %vm1378_vm3 = vcmask 1043456   ;;  %vm1384_vm4 = vcmask 1044480   ;;  %s9765_s10 = sld [smem:[#allocation2 + $0x1]] }
  0xca   :  { %v9150_v3 = vcombine.high %v1437_v0, %v1441_v1  ;;  %v9149_v5 = vcombine.low %v1437_v0, %v1441_v1  ;;  %v1445_v6 = vld [vmem:[#allocation7 + $0x40] sm:$0xff]  ;;  %v9152_v9 = vcombine.high %v1438_v2, %v1442_v4  ;;  %v9151_v10 = vcombine.low %v1438_v2, %v1442_v4  ;;  %v1446_v12 = vld [vmem:[#allocation7 + $0x48] sm:$0xff]  ;;  %s6958_s18 = sld [smem:[#allocation2]]  ;;  %s11410_s0 = smov 1.0  }
  0xcb   :  { %v1449_v7 = vld [vmem:[#allocation7 + $0x60] sm:$0xff]  ;;  %v1450_v13 = vld [vmem:[#allocation7 + $0x68] sm:$0xff]  ;;  %v197_v34 = vunpack.c.0.s8 %v196_v16  ;;  %v11643_v35 = vshrl.u32 %v198_v8, 7  ;;  %vm1390_vm5 = vcmask 1045504   ;;  %vm1396_vm6 = vcmask 1046528   ;;  %s11411_s30 = smov [#allocation21]  }
  0xcc   :  { %v9158_v11 = vcombine.high %v1445_v6, %v1449_v7  ;;  %v11616_v14 = vld [vmem:[#allocation7 + $0x80] sm:$0xff]  ;;  %3362 = vmatprep.subr.bf16.mxu0 %v9150_v3  ;;  %v9160_v17 = vcombine.high %v1446_v12, %v1450_v13  ;;  %v11618_v19 = vld [vmem:[#allocation7 + $0x88] sm:$0xff]  ;;  %3491 = vmatprep.subr.bf16.mxu1 %v9152_v9  ;;  %v9157_v21 = vcombine.low %v1445_v6, %v1449_v7  ;;  %s9101_s14 = sshll.u32 %s11411_s30, 4  ;;  %s9102_s14 = int_to_ptr.vmem [resolvable:$true] %s9101_s14 }
  0xcd   :  { %v1457_v18 = vld [vmem:[#allocation7 + $0xa0] sm:$0xff]  ;;  %v11620_v20 = vld [vmem:[#allocation7 + $0xa8] sm:$0xff]  ;;  %3363 = vmatpush1.bf16.msra.mxu0 %v9149_v5  ;;  %3492 = vmatpush1.bf16.msra.mxu1 %v9151_v10  ;;  %v9159_v25 = vcombine.low %v1446_v12, %v1450_v13  ;;  %13615 = vst [vmem:[#allocation33_spill] sm:$0xff] %v11643_v35  ;;  %v11691_v59 = vsub.s32 %v197_v34, %v11643_v35  ;;  %v11902_v35 = vld.sshfl [vmem:[#allocation6 + $0x38] sm:$0xff pattern:$0x76325410]  ;;  %p11325_p2 = scmp.lt.s32.totalorder %s9102_s14, %s9102_s14 }
  0xce   :  { %v11622_v22 = vld [vmem:[#allocation7 + $0xc0] sm:$0xff]  ;;  %v11626_v24 = vld [vmem:[#allocation7 + $0xc8] sm:$0xff]  ;;  %3364 = vmatprep.subr.bf16.mxu0 %v9158_v11  ;;  %v9166_v26 = vcombine.high %v11616_v14, %v1457_v18  ;;  %3493 = vmatprep.subr.bf16.mxu1 %v9160_v17  ;;  %v9168_v30 = vcombine.high %v11618_v19, %v11620_v20  ;;  %v9165_v36 = vcombine.low %v11616_v14, %v1457_v18  ;;  %s11320_s16 = scalar_lea.vmem %s9102_s14, 1536 }
  0xcf   :  { %v11624_v23 = vld [vmem:[#allocation7 + $0xe0] sm:$0xff]  ;;  %v11629_v27 = vld [vmem:[#allocation7 + $0xe8] sm:$0xff]  ;;  %v9167_v40 = vcombine.low %v11618_v19, %v11620_v20  ;;  %13616 = vst [vmem:[#allocation34_spill] sm:$0xff] %v11691_v59  ;;  %p11321_p1 = scmp.ne.s32.totalorder %s9102_s14, %s11320_s16  ;;  %p11326_p3 = scmp.lt.s32.totalorder %s11320_s16, %s11320_s16 }
  0xd0   :  { %v11631_v28 = vld [vmem:[#allocation7 + $0x100] sm:$0xff]  ;;  %v11637_v31 = vld [vmem:[#allocation7 + $0x108] sm:$0xff]  ;;  %v9174_v41 = vcombine.high %v11622_v22, %v11624_v23  ;;  %v9176_v42 = vcombine.high %v11626_v24, %v11629_v27  ;;  %v9173_v43 = vcombine.low %v11622_v22, %v11624_v23  ;;  %v9175_v47 = vcombine.low %v11626_v24, %v11629_v27 }
  0xd1   :  { %v11633_v29 = vld [vmem:[#allocation7 + $0x120] sm:$0xff]  ;;  %v11639_v32 = vld [vmem:[#allocation7 + $0x128] sm:$0xff]  ;;  %3365 = vmatpush1.bf16.msra.mxu0 %v9157_v21  ;;  %3494 = vmatpush1.bf16.msra.mxu1 %v9159_v25  ;;  %p11327_p4 = por %p11326_p3, %p11325_p2 }
  0xd2   :  { %v11641_v33 = vld [vmem:[#allocation7 + $0x140] sm:$0xff]  ;;  %v11648_v38 = vld [vmem:[#allocation7 + $0x148] sm:$0xff]  ;;  %3366 = vmatprep.subr.bf16.mxu0 %v9166_v26  ;;  %v9182_v48 = vcombine.high %v11631_v28, %v11633_v29  ;;  %v9181_v49 = vcombine.low %v11631_v28, %v11633_v29  ;;  %3495 = vmatprep.subr.bf16.mxu1 %v9168_v30  ;;  %v9184_v53 = vcombine.high %v11637_v31, %v11639_v32 }
  0xd3   :  { %v11646_v37 = vld [vmem:[#allocation7 + $0x160] sm:$0xff]  ;;  %v11650_v39 = vld [vmem:[#allocation7 + $0x168] sm:$0xff]  ;;  %v9183_v54 = vcombine.low %v11637_v31, %v11639_v32  ;;  %p11328_p5 = pnand %p11327_p4, %p11321_p1 }
  0xd4   :  { %v11660_v44 = vld [vmem:[#allocation7 + $0x180] sm:$0xff]  ;;  %v11664_v46 = vld [vmem:[#allocation7 + $0x188] sm:$0xff]  ;;  %v9190_v55 = vcombine.high %v11641_v33, %v11646_v37  ;;  %v9192_v60 = vcombine.high %v11648_v38, %v11650_v39  ;;  %v9189_v61 = vcombine.low %v11641_v33, %v11646_v37  ;;  %v9191_v62 = vcombine.low %v11648_v38, %v11650_v39 }
  0xd5   :  { %v11662_v45 = vld [vmem:[#allocation7 + $0x1a0] sm:$0xff]  ;;  %v11672_v50 = vld [vmem:[#allocation7 + $0x1a8] sm:$0xff]  ;;  %3367 = vmatpush1.bf16.msra.mxu0 %v9165_v36  ;;  %3496 = vmatpush1.bf16.msra.mxu1 %v9167_v40 }
  0xd6   :  { %v11674_v51 = vld [vmem:[#allocation7 + $0x1c0] sm:$0xff]  ;;  %v11684_v56 = vld [vmem:[#allocation7 + $0x1c8] sm:$0xff]  ;;  %v9198_v63 = vcombine.high %v11660_v44, %v11662_v45  ;;  %v9200_v3 = vcombine.high %v11664_v46, %v11672_v50  ;;  %3368 = vmatprep.subr.bf16.mxu0 %v9174_v41  ;;  %3497 = vmatprep.subr.bf16.mxu1 %v9176_v42 }
  0xd7   :  { %v11676_v52 = vld [vmem:[#allocation7 + $0x1e0] sm:$0xff]  ;;  %v11686_v57 = vld [vmem:[#allocation7 + $0x1e8] sm:$0xff] }
  0xd8   :  { %v11688_v58 = vld [vmem:[#allocation7 + $0x200] sm:$0xff]  ;;  %v11703_v1 = vld [vmem:[#allocation7 + $0x208] sm:$0xff] }
  0xd9   :  { %v11701_v0 = vld [vmem:[#allocation7 + $0x220] sm:$0xff]  ;;  %v11705_v2 = vld [vmem:[#allocation7 + $0x228] sm:$0xff]  ;;  %3369 = vmatpush1.bf16.msra.mxu0 %v9173_v43  ;;  %3498 = vmatpush1.bf16.msra.mxu1 %v9175_v47  ;;  %v11861_v43 = vld.sshfl [vmem:[#allocation6 + $0x18] sm:$0xff pattern:$0x76325410] }
  0xda   :  { %v11715_v7 = vld [vmem:[#allocation7 + $0x240] sm:$0xff]  ;;  %v11719_v9 = vld [vmem:[#allocation7 + $0x248] sm:$0xff]  ;;  %3370 = vmatprep.subr.bf16.mxu0 %v9182_v48  ;;  %3499 = vmatprep.subr.bf16.mxu1 %v9184_v53  ;;  %13619 = vst [vmem:[#allocation37_spill] sm:$0xff] %v11861_v43 }
  0xdb   :  { %v11717_v8 = vld [vmem:[#allocation7 + $0x260] sm:$0xff]  ;;  %v11727_v13 = vld [vmem:[#allocation7 + $0x268] sm:$0xff] }
  0xdc   :  { %v11729_v14 = vld [vmem:[#allocation7 + $0x280] sm:$0xff]  ;;  %v11741_v20 = vld [vmem:[#allocation7 + $0x288] sm:$0xff] }
  0xdd   :  { %v11731_v15 = vld [vmem:[#allocation7 + $0x2a0] sm:$0xff]  ;;  %v11743_v21 = vld [vmem:[#allocation7 + $0x2a8] sm:$0xff]  ;;  %3371 = vmatpush1.bf16.msra.mxu0 %v9181_v49  ;;  %3500 = vmatpush1.bf16.msra.mxu1 %v9183_v54 }
  0xde   :  { %v11745_v22 = vld [vmem:[#allocation7 + $0x2c0] sm:$0xff]  ;;  %v11757_v30 = vld [vmem:[#allocation7 + $0x2c8] sm:$0xff]  ;;  %3372 = vmatprep.subr.bf16.mxu0 %v9190_v55  ;;  %3501 = vmatprep.subr.bf16.mxu1 %v9192_v60  ;;  %v430_v60 = vcombine.high %v11861_v43, %v11861_v43 }
  0xdf   :  { %v11755_v27 = vld [vmem:[#allocation7 + $0x2e0] sm:$0xff]  ;;  %v11759_v34 = vld [vmem:[#allocation7 + $0x2e8] sm:$0xff] }
  0xe0   :  { %v11769_v26 = vld [vmem:[#allocation7 + $0x300] sm:$0xff]  ;;  %v11773_v24 = vld [vmem:[#allocation7 + $0x308] sm:$0xff] }
  0xe1   :  { %v11771_v25 = vld [vmem:[#allocation7 + $0x320] sm:$0xff]  ;;  %v11781_v36 = vld [vmem:[#allocation7 + $0x328] sm:$0xff]  ;;  %3373 = vmatpush1.bf16.msra.mxu0 %v9189_v61  ;;  %3502 = vmatpush1.bf16.msra.mxu1 %v9191_v62 }
  0xe2   :  { %v11783_v42 = vld [vmem:[#allocation7 + $0x340] sm:$0xff]  ;;  %v11795_v41 = vld [vmem:[#allocation7 + $0x348] sm:$0xff]  ;;  %3374 = vmatprep.subr.bf16.mxu0 %v9198_v63  ;;  %3503 = vmatprep.subr.bf16.mxu1 %v9200_v3  ;;  %v13623_v3 = vcombine.low %v11660_v44, %v11662_v45  ;;  %v13626_v44 = vcombine.high %v11684_v56, %v11686_v57 }
  0xe3   :  { %v11785_v23 = vld [vmem:[#allocation7 + $0x360] sm:$0xff]  ;;  %v11797_v19 = vld [vmem:[#allocation7 + $0x368] sm:$0xff] }
  0xe4   :  { %v11799_v18 = vld [vmem:[#allocation7 + $0x380] sm:$0xff]  ;;  %v11811_v40 = vld [vmem:[#allocation7 + $0x388] sm:$0xff] }
  0xe5   :  { %v11809_v17 = vld [vmem:[#allocation7 + $0x3a0] sm:$0xff]  ;;  %v11813_v16 = vld [vmem:[#allocation7 + $0x3a8] sm:$0xff]  ;;  %3375 = vmatpush1.bf16.msra.mxu0 %v13623_v3 }
  0xe6   :  { %v11826_v12 = vld [vmem:[#allocation7 + $0x3c0] sm:$0xff]  ;;  %v11830_v10 = vld [vmem:[#allocation7 + $0x3c8] sm:$0xff] }
  0xe7   :  { %v11828_v11 = vld [vmem:[#allocation7 + $0x3e0] sm:$0xff]  ;;  %v11842_v49 = vld [vmem:[#allocation7 + $0x3e8] sm:$0xff] }
  0xe8   :  { %v11846_v48 = vld [vmem:[#allocation6] sm:$0xff]  ;;  %v11848_v31 = vld.sshfl [vmem:[#allocation6 + $0x8] sm:$0xff pattern:$0x76325410] }
  0xe9   :  { %13617 = vst [vmem:[#allocation35_spill] sm:$0xff] %v11846_v48  ;;  %v201_v55 = vrot.slane %v11846_v48, %v11691_v59  ;;  %v11859_v29 = vld.sshfl [vmem:[#allocation6 + $0x10] sm:$0xff pattern:$0x76325410]  ;;  %v284_v32 = vcombine.high %v11848_v31, %v11848_v31 }
  0xea   :  { %13618 = vst [vmem:[#allocation36_spill] sm:$0xff] %v11859_v29  ;;  %v11863_v28 = vld.sshfl [vmem:[#allocation6 + $0x20] sm:$0xff pattern:$0x76325410]  ;;  %v357_v6 = vcombine.high %v11859_v29, %v11859_v29 }
  0xeb   :  { %13620 = vst [vmem:[#allocation38_spill] sm:$0xff] %v11863_v28  ;;  %v11865_v47 = vld.sshfl [vmem:[#allocation6 + $0x28] sm:$0xff pattern:$0x76325410]  ;;  %v209_v54 = vcombine.high %v201_v55, %v201_v55  ;;  %v503_v33 = vcombine.high %v11863_v28, %v11863_v28  ;;  %v11889_v37 = vsel %vm223_vm0, %v201_v55, 0.0  ;;  %v305_v39 = vsel %vm223_vm0, %v284_v32, 0.0 }
  0xec   :  { %13621 = vst [vmem:[#allocation39_spill] sm:$0xff] %v11865_v47  ;;  %v11867_v53 = vld.sshfl [vmem:[#allocation6 + $0x30] sm:$0xff pattern:$0x76325410]  ;;  %v576_v61 = vcombine.high %v11865_v47, %v11865_v47  ;;  %v306_v5 = vrot.slane %v305_v39, 4  ;;  %v378_v4 = vsel %vm223_vm0, %v357_v6, 0.0  ;;  %v13625_v6 = vcombine.high %v11674_v51, %v11676_v52 }
  0xed   :  { %13622 = vst [vmem:[#allocation40_spill] sm:$0xff] %v11867_v53  ;;  %v231_v38 = vsel %vm223_vm0, %v209_v54, 0.0  ;;  %v649_v62 = vcombine.high %v11867_v53, %v11867_v53  ;;  %v451_v55 = vsel %vm223_vm0, %v430_v60, 0.0  ;;  %v379_v54 = vrot.slane %v378_v4, 4 }
  0xee   :  { %v232_v63 = vrot.slane %v231_v38, 4  ;;  %v452_v32 = vrot.slane %v451_v55, 4  ;;  %v524_v48 = vsel %vm223_vm0, %v503_v33, 0.0  ;;  %v597_v59 = vsel %vm223_vm0, %v576_v61, 0.0  ;;  %3376 = vmatprep.subr.bf16.mxu0 %v13625_v6 }
  0xef   :  { %v13624_v53 = vcombine.low %v11664_v46, %v11672_v50  ;;  %v307_v47 = vadd.f32 %v306_v5, %v305_v39  ;;  %v525_v28 = vrot.slane %v524_v48, 4  ;;  %v598_v43 = vrot.slane %v597_v59, 4 }
  0xf0   :  { %v233_v60 = vadd.f32 %v232_v63, %v231_v38  ;;  %v380_v45 = vadd.f32 %v379_v54, %v378_v4  ;;  %v453_v33 = vadd.f32 %v452_v32, %v451_v55  ;;  %v670_v61 = vsel %vm223_vm0, %v649_v62, 0.0 }
  0xf1   :  { %3504 = vmatpush1.bf16.msra.mxu1 %v13624_v53  ;;  %v308_v29 = vrot.slane %v307_v47, 2  ;;  %v526_v46 = vadd.f32 %v525_v28, %v524_v48  ;;  %v599_v50 = vadd.f32 %v598_v43, %v597_v59  ;;  %v13627_v53 = vcombine.low %v11674_v51, %v11676_v52 }
  0xf2   :  { %3505 = vmatprep.subr.bf16.mxu1 %v13626_v44  ;;  %v234_v3 = vrot.slane %v233_v60, 2  ;;  %v381_v38 = vrot.slane %v380_v45, 2  ;;  %v454_v5 = vrot.slane %v453_v33, 2  ;;  %v671_v39 = vrot.slane %v670_v61, 4 }
  0xf3   :  { %3377 = vmatpush1.bf16.msra.mxu0 %v13627_v53  ;;  %v722_v63 = vcombine.high %v11902_v35, %v11902_v35  ;;  %v13628_v4 = vcombine.low %v11684_v56, %v11686_v57  ;;  %v13629_v62 = vcombine.high %v11688_v58, %v11701_v0  ;;  %v309_v59 = vadd.f32 %v308_v29, %v307_v47 }
  0xf4   :  { %v235_v48 = vadd.f32 %v234_v3, %v233_v60  ;;  %v527_v43 = vrot.slane %v526_v46, 2  ;;  %v600_v28 = vrot.slane %v599_v50, 2  ;;  %v13630_v51 = vcombine.high %v11703_v1, %v11705_v2 }
  0xf5   :  { %3506 = vmatpush1.bf16.msra.mxu1 %v13628_v4  ;;  %3378 = vmatprep.subr.bf16.mxu0 %v13629_v62  ;;  %v382_v52 = vadd.f32 %v381_v38, %v380_v45  ;;  %v455_v55 = vadd.f32 %v454_v5, %v453_v33  ;;  %v672_v54 = vadd.f32 %v671_v39, %v670_v61  ;;  %v743_v32 = vsel %vm223_vm0, %v722_v63, 0.0  ;;  %v11946_v63 = vld.sshfl [vmem:[#allocation6 + $0x42] sm:$0xff pattern:$0x76325410] }
  0xf6   :  { %3507 = vmatprep.subr.bf16.mxu1 %v13630_v51  ;;  %v236_v6 = vrot.slane %v235_v48, 1  ;;  %v310_v56 = vrot.slane %v309_v59, 1  ;;  %v528_v57 = vadd.f32 %v527_v43, %v526_v46  ;;  %v601_v44 = vadd.f32 %v600_v28, %v599_v50  ;;  %v11954_v43 = vld.sshfl [vmem:[#allocation6 + $0x52] sm:$0xff pattern:$0x76325410] }
  0xf7   :  { %v13631_v53 = vcombine.low %v11688_v58, %v11701_v0  ;;  %v383_v47 = vrot.slane %v382_v52, 1  ;;  %v456_v29 = vrot.slane %v455_v55, 1  ;;  %v673_v60 = vrot.slane %v672_v54, 2  ;;  %v11956_v28 = vld.sshfl [vmem:[#allocation6 + $0x5a] sm:$0xff pattern:$0x76325410] }
  0xf8   :  { %v744_v3 = vrot.slane %v743_v32, 4  ;;  %v13632_v4 = vcombine.low %v11703_v1, %v11705_v2  ;;  %v13633_v45 = vcombine.high %v11715_v7, %v11717_v8  ;;  %v237_v33 = vadd.f32 %v236_v6, %v235_v48  ;;  %v11948_v1 = vld.sshfl [vmem:[#allocation6 + $0x4a] sm:$0xff pattern:$0x76325410] }
  0xf9   :  { %3379 = vmatpush1.bf16.msra.mxu0 %v13631_v53  ;;  %v311_v61 = vadd.f32 %v310_v56, %v309_v59  ;;  %v529_v46 = vrot.slane %v528_v57, 1  ;;  %v602_v50 = vrot.slane %v601_v44, 1  ;;  %v13634_v58 = vcombine.high %v11719_v9, %v11727_v13  ;;  %v11965_v6 = vld.sshfl [vmem:[#allocation6 + $0x62] sm:$0xff pattern:$0x76325410] }
  0xfa   :  { %3508 = vmatpush1.bf16.msra.mxu1 %v13632_v4  ;;  %3380 = vmatprep.subr.bf16.mxu0 %v13633_v45  ;;  %v384_v0 = vadd.f32 %v383_v47, %v382_v52  ;;  %v457_v38 = vadd.f32 %v456_v29, %v455_v55  ;;  %v674_v5 = vadd.f32 %v673_v60, %v672_v54  ;;  %v11950_v2 = vmul.f32 0.5, %v237_v33  ;;  %v11967_v56 = vld.sshfl [vmem:[#allocation6 + $0x6a] sm:$0xff pattern:$0x76325410] }
  0xfb   :  { %3509 = vmatprep.subr.bf16.mxu1 %v13634_v58  ;;  %v745_v39 = vadd.f32 %v744_v3, %v743_v32  ;;  %v11952_v62 = vmul.f32 0.5, %v311_v61  ;;  %v530_v48 = vadd.f32 %v529_v46, %v528_v57  ;;  %v603_v59 = vadd.f32 %v602_v50, %v601_v44 }
  0xfc   :  { %v13635_v51 = vcombine.low %v11715_v7, %v11717_v8  ;;  %v11961_v52 = vmul.f32 0.5, %v384_v0  ;;  %v11963_v55 = vmul.f32 0.5, %v457_v38  ;;  %v675_v54 = vrot.slane %v674_v5, 1 }
  0xfd   :  { %v746_v32 = vrot.slane %v745_v39, 2  ;;  %v13636_v57 = vcombine.low %v11719_v9, %v11727_v13  ;;  %v13637_v44 = vcombine.high %v11729_v14, %v11731_v15  ;;  %v11975_v7 = vmul.f32 0.5, %v530_v48 }
  0xfe   :  { %3381 = vmatpush1.bf16.msra.mxu0 %v13635_v51  ;;  %v11977_v8 = vmul.f32 0.5, %v603_v59  ;;  %v13638_v53 = vcombine.high %v11741_v20, %v11743_v21  ;;  %v676_v47 = vadd.f32 %v675_v54, %v674_v5  ;;  %v796_v60 = vcombine.high %v11946_v63, %v11946_v63 }
  0xff   :  { %3510 = vmatpush1.bf16.msra.mxu1 %v13636_v57  ;;  %3382 = vmatprep.subr.bf16.mxu0 %v13637_v44  ;;  %v747_v29 = vadd.f32 %v746_v32, %v745_v39  ;;  %v869_v9 = vcombine.high %v11948_v1, %v11948_v1  ;;  %v13639_v13 = vcombine.low %v11729_v14, %v11731_v15  ;;  %v12011_v39 = vld.sshfl [vmem:[#allocation6 + $0x72] sm:$0xff pattern:$0x76325410]  ;;  %v12016_v32 = vld.sshfl [vmem:[#allocation6 + $0x7a] sm:$0xff pattern:$0x76325410] }
 0x100   :  { %3511 = vmatprep.subr.bf16.mxu1 %v13638_v53  ;;  %v11989_v3 = vmul.f32 0.5, %v676_v47  ;;  %v942_v45 = vcombine.high %v11954_v43, %v11954_v43  ;;  %v1015_v33 = vcombine.high %v11956_v28, %v11956_v28  ;;  %v13640_v61 = vcombine.low %v11741_v20, %v11743_v21 }
 0x101   :  { %v748_v4 = vrot.slane %v747_v29, 1  ;;  %v13641_v46 = vcombine.high %v11745_v22, %v11755_v27  ;;  %v817_v14 = vsel %vm223_vm0, %v796_v60, 0.0  ;;  %v890_v15 = vsel %vm223_vm0, %v869_v9, 0.0 }
 0x102   :  { %3383 = vmatpush1.bf16.msra.mxu0 %v13639_v13  ;;  %v1088_v50 = vcombine.high %v11965_v6, %v11965_v6  ;;  %v1161_v58 = vcombine.high %v11967_v56, %v11967_v56  ;;  %v13642_v0 = vcombine.high %v11757_v30, %v11759_v34  ;;  %v818_v21 = vrot.slane %v817_v14, 4 }
 0x103   :  { %3512 = vmatpush1.bf16.msra.mxu1 %v13640_v61  ;;  %3384 = vmatprep.subr.bf16.mxu0 %v13641_v46  ;;  %v749_v20 = vadd.f32 %v748_v4, %v747_v29  ;;  %v891_v38 = vrot.slane %v890_v15, 4  ;;  %v963_v5 = vsel %vm223_vm0, %v942_v45, 0.0  ;;  %v1036_v59 = vsel %vm223_vm0, %v1015_v33, 0.0 }
 0x104   :  { %3513 = vmatprep.subr.bf16.mxu1 %v13642_v0  ;;  %v964_v48 = vrot.slane %v963_v5, 4  ;;  %v1109_v51 = vsel %vm223_vm0, %v1088_v50, 0.0  ;;  %v1182_v54 = vsel %vm223_vm0, %v1161_v58, 0.0  ;;  %v13643_v57 = vcombine.low %v11745_v22, %v11755_v27 }
 0x105   :  { %v12021_v44 = vmul.f32 0.5, %v749_v20  ;;  %v819_v53 = vadd.f32 %v818_v21, %v817_v14  ;;  %v892_v47 = vadd.f32 %v891_v38, %v890_v15  ;;  %v1037_v29 = vrot.slane %v1036_v59, 4 }
 0x106   :  { %3385 = vmatpush1.bf16.msra.mxu0 %v13643_v57  ;;  %v13644_v60 = vcombine.low %v11757_v30, %v11759_v34  ;;  %v13645_v9 = vcombine.high %v11769_v26, %v11771_v25  ;;  %v965_v13 = vadd.f32 %v964_v48, %v963_v5  ;;  %v1110_v4 = vrot.slane %v1109_v51, 4 }
 0x107   :  { %v1183_v45 = vrot.slane %v1182_v54, 4  ;;  %v13646_v22 = vcombine.high %v11773_v24, %v11781_v36  ;;  %v820_v27 = vrot.slane %v819_v53, 2  ;;  %v893_v33 = vrot.slane %v892_v47, 2 }
 0x108   :  { %3514 = vmatpush1.bf16.msra.mxu1 %v13644_v60  ;;  %3386 = vmatprep.subr.bf16.mxu0 %v13645_v9  ;;  %v1038_v61 = vadd.f32 %v1037_v29, %v1036_v59  ;;  %v966_v46 = vrot.slane %v965_v13, 2  ;;  %v1111_v14 = vadd.f32 %v1110_v4, %v1109_v51  ;;  %v1234_v30 = vcombine.high %v12011_v39, %v12011_v39 }
 0x109   :  { %3515 = vmatprep.subr.bf16.mxu1 %v13646_v22  ;;  %v1184_v15 = vadd.f32 %v1183_v45, %v1182_v54  ;;  %v13647_v34 = vcombine.low %v11769_v26, %v11771_v25  ;;  %v821_v50 = vadd.f32 %v820_v27, %v819_v53  ;;  %v894_v58 = vadd.f32 %v893_v33, %v892_v47 }
 0x10a   :  { %v1039_v0 = vrot.slane %v1038_v61, 2  ;;  %v1307_v20 = vcombine.high %v12016_v32, %v12016_v32  ;;  %v13648_v21 = vcombine.low %v11773_v24, %v11781_v36  ;;  %v13649_v38 = vcombine.high %v11783_v42, %v11785_v23 }
 0x10b   :  { %3387 = vmatpush1.bf16.msra.mxu0 %v13647_v34  ;;  %v967_v5 = vadd.f32 %v966_v46, %v965_v13  ;;  %v1112_v48 = vrot.slane %v1111_v14, 2  ;;  %v1185_v59 = vrot.slane %v1184_v15, 2  ;;  %v1255_v25 = vsel %vm223_vm0, %v1234_v30, 0.0 }
 0x10c   :  { %3516 = vmatpush1.bf16.msra.mxu1 %v13648_v21  ;;  %3388 = vmatprep.subr.bf16.mxu0 %v13649_v38  ;;  %v13650_v26 = vcombine.high %v11795_v41, %v11797_v19  ;;  %v822_v51 = vrot.slane %v821_v50, 1  ;;  %v895_v54 = vrot.slane %v894_v58, 1  ;;  %v1040_v57 = vadd.f32 %v1039_v0, %v1038_v61  ;;  %v12066_v21 = vld [vmem:[#allocation7 + $0x408] sm:$0xff] }
 0x10d   :  { %v1256_v53 = vrot.slane %v1255_v25, 4  ;;  %v968_v24 = vrot.slane %v967_v5, 1  ;;  %v1113_v36 = vadd.f32 %v1112_v48, %v1111_v14  ;;  %v1186_v47 = vadd.f32 %v1185_v59, %v1184_v15  ;;  %v12059_v15 = vld [vmem:[#allocation7 + $0x400] sm:$0xff]  ;;  %v12068_v38 = vld [vmem:[#allocation7 + $0x428] sm:$0xff] }
 0x10e   :  { %3517 = vmatprep.subr.bf16.mxu1 %v13650_v26  ;;  %v1328_v29 = vsel %vm223_vm0, %v1307_v20, 0.0  ;;  %v13651_v60 = vcombine.low %v11783_v42, %v11785_v23  ;;  %v823_v9 = vadd.f32 %v822_v51, %v821_v50  ;;  %v896_v13 = vadd.f32 %v895_v54, %v894_v58  ;;  %v12061_v23 = vld [vmem:[#allocation7 + $0x420] sm:$0xff] }
 0x10f   :  { %v1041_v4 = vrot.slane %v1040_v57, 1  ;;  %v1257_v45 = vadd.f32 %v1256_v53, %v1255_v25  ;;  %v13652_v22 = vcombine.low %v11795_v41, %v11797_v19  ;;  %v13653_v27 = vcombine.high %v11799_v18, %v11809_v17 }
 0x110   :  { %3389 = vmatpush1.bf16.msra.mxu0 %v13651_v60  ;;  %v969_v33 = vadd.f32 %v968_v24, %v967_v5  ;;  %v1114_v61 = vrot.slane %v1113_v36, 1  ;;  %v1187_v46 = vrot.slane %v1186_v47, 1  ;;  %v1329_v14 = vrot.slane %v1328_v29, 4 }
 0x111   :  { %3518 = vmatpush1.bf16.msra.mxu1 %v13652_v22  ;;  %3390 = vmatprep.subr.bf16.mxu0 %v13653_v27  ;;  %v13654_v42 = vcombine.high %v11811_v40, %v11813_v16  ;;  %v846_v30 = vmul.f32 0.5, %v823_v9  ;;  %v919_v34 = vmul.f32 0.5, %v896_v13  ;;  %v1042_v19 = vadd.f32 %v1041_v4, %v1040_v57 }
 0x112   :  { %v1258_v41 = vrot.slane %v1257_v45, 2  ;;  %v992_v50 = vmul.f32 0.5, %v969_v33  ;;  %v1115_v58 = vadd.f32 %v1114_v61, %v1113_v36  ;;  %v1188_v0 = vadd.f32 %v1187_v46, %v1186_v47  ;;  %v13661_v46 = vld [vmem:[#allocation36_spill] sm:$0xff] }
 0x113   :  { %3519 = vmatprep.subr.bf16.mxu1 %v13654_v42  ;;  %v1330_v20 = vadd.f32 %v1329_v14, %v1328_v29  ;;  %v13655_v5 = vcombine.low %v11799_v18, %v11809_v17  ;;  %v1065_v48 = vmul.f32 0.5, %v1042_v19  ;;  %v1363_v25 = vsel %vm1361_vm1, %v11950_v2, %v11952_v62  ;;  %v13662_v14 = vld [vmem:[#allocation37_spill] sm:$0xff] }
 0x114   :  { %v1259_v59 = vadd.f32 %v1258_v41, %v1257_v45  ;;  %v1403_v26 = vsel %vm1361_vm1, %v846_v30, %v919_v34  ;;  %v13656_v51 = vcombine.low %v11811_v40, %v11813_v16  ;;  %v13657_v54 = vcombine.high %v11826_v12, %v11828_v11 }
 0x115   :  { %3391 = vmatpush1.bf16.msra.mxu0 %v13655_v5  ;;  %v1138_v57 = vmul.f32 0.5, %v1115_v58  ;;  %v1211_v53 = vmul.f32 0.5, %v1188_v0  ;;  %v1331_v17 = vrot.slane %v1330_v20, 2  ;;  %v1368_v18 = vsel %vm223_vm0, %v1363_v25, %v11961_v52  ;;  %v13663_v58 = vld [vmem:[#allocation38_spill] sm:$0xff]  ;;  %v13664_v0 = vld [vmem:[#allocation39_spill] sm:$0xff] }
 0x116   :  { %3520 = vmatpush1.bf16.msra.mxu1 %v13656_v51  ;;  %3392 = vmatprep.subr.bf16.mxu0 %v13657_v54  ;;  %v13658_v24 = vcombine.high %v11830_v10, %v11842_v49  ;;  %v1260_v2 = vrot.slane %v1259_v59, 1  ;;  %v1374_v62 = vsel %vm1372_vm2, %v1368_v18, %v11963_v55  ;;  %v1408_v16 = vsel %vm223_vm0, %v1403_v26, %v992_v50 }
 0x117   :  { %v9277_v40 = vcombine.low %v12059_v15, %v12061_v23  ;;  %v1332_v36 = vadd.f32 %v1331_v17, %v1330_v20  ;;  %v1380_v47 = vsel %vm1378_vm3, %v1374_v62, %v11975_v7  ;;  %v1413_v29 = vsel %vm1372_vm2, %v1408_v16, %v1065_v48 }
 0x118   :  { %3521 = vmatprep.subr.bf16.mxu1 %v13658_v24  ;;  %v9278_v52 = vcombine.high %v12059_v15, %v12061_v23  ;;  %v13659_v60 = vcombine.low %v11826_v12, %v11828_v11  ;;  %v1261_v9 = vadd.f32 %v1260_v2, %v1259_v59  ;;  %v1386_v55 = vsel %vm1384_vm4, %v1380_v47, %v11977_v8 }
 0x119   :  { %v1418_v13 = vsel %vm1378_vm3, %v1413_v29, %v1138_v57  ;;  %v9279_v4 = vcombine.low %v12066_v21, %v12068_v38  ;;  %v13660_v7 = vcombine.low %v11830_v10, %v11842_v49  ;;  %v1333_v45 = vrot.slane %v1332_v36, 1  ;;  %v13665_v57 = vld [vmem:[#allocation40_spill] sm:$0xff] }
 0x11a   :  { %3393 = vmatpush1.bf16.msra.mxu0 %v13659_v60  ;;  %v1392_v22 = vsel %vm1390_vm5, %v1386_v55, %v11989_v3  ;;  %v1423_v11 = vsel %vm1384_vm4, %v1418_v13, %v1211_v53  ;;  %v9280_v12 = vcombine.high %v12066_v21, %v12068_v38  ;;  %v1284_v8 = vmul.f32 0.5, %v1261_v9  ;;  %v12364_v38 = vld [vmem:[#allocation7 + $0x708] sm:$0xff] }
 0x11b   :  { %3522 = vmatpush1.bf16.msra.mxu1 %v13660_v7  ;;  %3405 = vmatprep.subr.bf16.mxu0 %v9278_v52  ;;  %v1398_v27 = vsel %vm1396_vm6, %v1392_v22, %v12021_v44  ;;  %v225_v33 = vrot.slane %v11889_v37, 4  ;;  %v298_v10 = vsel %vm223_vm0, %v11848_v31, 0.0  ;;  %v1334_v49 = vadd.f32 %v1333_v45, %v1332_v36 }
 0x11c   :  { %3534 = vmatprep.subr.bf16.mxu1 %v9280_v12  ;;  %v299_v61 = vrot.slane %v298_v10, 4  ;;  %v371_v3 = vsel %vm223_vm0, %v13661_v46, 0.0  ;;  %v444_v42 = vsel %vm223_vm0, %v13662_v14, 0.0  ;;  %v1428_v30 = vsel %vm1390_vm5, %v1423_v11, %v1284_v8 }
 0x11d   :  { %v226_v34 = vadd.f32 %v225_v33, %v11889_v37  ;;  %v372_v19 = vrot.slane %v371_v3, 4  ;;  %v445_v44 = vrot.slane %v444_v42, 4  ;;  %v1357_v41 = vmul.f32 0.5, %v1334_v49 }
 0x11e   :  { %v300_v50 = vadd.f32 %v299_v61, %v298_v10  ;;  %v517_v31 = vsel %vm223_vm0, %v13663_v58, 0.0  ;;  %v590_v20 = vsel %vm223_vm0, %v13664_v0, 0.0  ;;  %v663_v37 = vsel %vm223_vm0, %v13665_v57, 0.0 }
 0x11f   :  { %v227_v5 = vrot.slane %v226_v34, 2  ;;  %v373_v48 = vadd.f32 %v372_v19, %v371_v3  ;;  %v446_v59 = vadd.f32 %v445_v44, %v444_v42  ;;  %v518_v25 = vrot.slane %v517_v31, 4 }
 0x120   :  { %v1433_v26 = vsel %vm1396_vm6, %v1428_v30, %v1357_v41  ;;  %v301_v51 = vrot.slane %v300_v50, 2  ;;  %v591_v54 = vrot.slane %v590_v20, 4  ;;  %v664_v36 = vrot.slane %v663_v37, 4 }
 0x121   :  { %v12132_v53 = vpack.c.bf16 %v1433_v26, %v1398_v27  ;;  %v228_v17 = vadd.f32 %v227_v5, %v226_v34  ;;  %v374_v18 = vrot.slane %v373_v48, 2  ;;  %v447_v24 = vrot.slane %v446_v59, 2 }
 0x122   :  { %v302_v2 = vadd.f32 %v301_v51, %v300_v50  ;;  %v519_v62 = vadd.f32 %v518_v25, %v517_v31  ;;  %v592_v16 = vadd.f32 %v591_v54, %v590_v20  ;;  %v736_v60 = vsel %vm223_vm0, %v11902_v35, 0.0 }
 0x123   :  { %13666 = vst [vmem:[#allocation36_spill] sm:$0xff] %v12132_v53  ;;  %3394 = vmatprep.mubr.bf16.mxu0 %v12132_v53  ;;  %3523 = vmatprep.mubr.bf16.mxu1 %v12132_v53  ;;  %v229_v47 = vrot.slane %v228_v17, 1  ;;  %v375_v29 = vadd.f32 %v374_v18, %v373_v48  ;;  %v448_v52 = vadd.f32 %v447_v24, %v446_v59  ;;  %v737_v12 = vrot.slane %v736_v60, 4  ;;  %v12405_v53 = vld [vmem:[#allocation7 + $0x7e0] sm:$0xff] }
 0x124   :  { %v303_v9 = vrot.slane %v302_v2, 1  ;;  %v520_v55 = vrot.slane %v519_v62, 2  ;;  %v593_v13 = vrot.slane %v592_v16, 2  ;;  %v665_v7 = vadd.f32 %v664_v36, %v663_v37  ;;  %13674 = vst [vmem:[#allocation44_spill] sm:$0xff] %v12405_v53 }
 0x125   :  { %v230_v45 = vadd.f32 %v229_v47, %v228_v17  ;;  %v376_v22 = vrot.slane %v375_v29, 1  ;;  %v449_v11 = vrot.slane %v448_v52, 1  ;;  %v738_v3 = vadd.f32 %v737_v12, %v736_v60 }
 0x126   :  { %v304_v8 = vadd.f32 %v303_v9, %v302_v2  ;;  %v521_v27 = vadd.f32 %v520_v55, %v519_v62  ;;  %v594_v33 = vadd.f32 %v593_v13, %v592_v16  ;;  %v666_v10 = vrot.slane %v665_v7, 2 }
 0x127   :  { %v12138_v49 = vmul.f32 0.5, %v230_v45  ;;  %v377_v61 = vadd.f32 %v376_v22, %v375_v29  ;;  %v450_v46 = vadd.f32 %v449_v11, %v448_v52  ;;  %v739_v44 = vrot.slane %v738_v3, 2 }
 0x128   :  { %v12140_v14 = vmul.f32 0.5, %v304_v8  ;;  %v522_v35 = vrot.slane %v521_v27, 1  ;;  %v595_v42 = vrot.slane %v594_v33, 1  ;;  %v667_v30 = vadd.f32 %v666_v10, %v665_v7 }
 0x129   :  { %v12142_v34 = vmul.f32 0.5, %v377_v61  ;;  %v12144_v19 = vmul.f32 0.5, %v450_v46  ;;  %v810_v41 = vsel %vm223_vm0, %v11946_v63, 0.0  ;;  %v740_v20 = vadd.f32 %v739_v44, %v738_v3 }
 0x12a   :  { %v523_v50 = vadd.f32 %v522_v35, %v521_v27  ;;  %v596_v58 = vadd.f32 %v595_v42, %v594_v33  ;;  %v668_v31 = vrot.slane %v667_v30, 1  ;;  %v811_v0 = vrot.slane %v810_v41, 4 }
 0x12b   :  { %v883_v5 = vsel %vm223_vm0, %v11948_v1, 0.0  ;;  %v956_v48 = vsel %vm223_vm0, %v11954_v43, 0.0  ;;  %v1029_v59 = vsel %vm223_vm0, %v11956_v28, 0.0  ;;  %v741_v54 = vrot.slane %v740_v20, 1 }
 0x12c   :  { %v12154_v25 = vmul.f32 0.5, %v523_v50  ;;  %v12156_v26 = vmul.f32 0.5, %v596_v58  ;;  %v669_v51 = vadd.f32 %v668_v31, %v667_v30  ;;  %v812_v63 = vadd.f32 %v811_v0, %v810_v41 }
 0x12d   :  { %v884_v57 = vrot.slane %v883_v5, 4  ;;  %v957_v37 = vrot.slane %v956_v48, 4  ;;  %v1030_v17 = vrot.slane %v1029_v59, 4  ;;  %v1102_v1 = vsel %vm223_vm0, %v11965_v6, 0.0 }
 0x12e   :  { %v12158_v18 = vmul.f32 0.5, %v669_v51  ;;  %v813_v24 = vrot.slane %v812_v63, 2  ;;  %v1175_v43 = vsel %vm223_vm0, %v11967_v56, 0.0  ;;  %v742_v28 = vadd.f32 %v741_v54, %v740_v20  ;;  %v12175_v51 = vld [vmem:[#allocation7 + $0x460] sm:$0xff] }
 0x12f   :  { %v885_v2 = vadd.f32 %v884_v57, %v883_v5  ;;  %v958_v62 = vadd.f32 %v957_v37, %v956_v48  ;;  %v1031_v16 = vadd.f32 %v1030_v17, %v1029_v59  ;;  %v1103_v47 = vrot.slane %v1102_v1, 4  ;;  %v12173_v59 = vld [vmem:[#allocation7 + $0x440] sm:$0xff] }
 0x130   :  { %v814_v36 = vadd.f32 %v813_v24, %v812_v63  ;;  %v1176_v29 = vrot.slane %v1175_v43, 4  ;;  %v1248_v52 = vsel %vm223_vm0, %v12011_v39, 0.0  ;;  %v12166_v60 = vmul.f32 0.5, %v742_v28  ;;  %v12179_v28 = vld [vmem:[#allocation7 + $0x448] sm:$0xff] }
 0x131   :  { %v886_v9 = vrot.slane %v885_v2, 2  ;;  %v959_v55 = vrot.slane %v958_v62, 2  ;;  %v1032_v13 = vrot.slane %v1031_v16, 2  ;;  %v1104_v6 = vadd.f32 %v1103_v47, %v1102_v1  ;;  %v12190_v47 = vld [vmem:[#allocation7 + $0x4a0] sm:$0xff] }
 0x132   :  { %v815_v7 = vrot.slane %v814_v36, 1  ;;  %v1177_v45 = vadd.f32 %v1176_v29, %v1175_v43  ;;  %v1249_v22 = vrot.slane %v1248_v52, 4  ;;  %v1321_v8 = vsel %vm223_vm0, %v12016_v32, 0.0  ;;  %v12192_v29 = vld [vmem:[#allocation7 + $0x488] sm:$0xff] }
 0x133   :  { %v887_v56 = vadd.f32 %v886_v9, %v885_v2  ;;  %v960_v11 = vadd.f32 %v959_v55, %v958_v62  ;;  %v1033_v12 = vadd.f32 %v1032_v13, %v1031_v16  ;;  %v1105_v33 = vrot.slane %v1104_v6, 2  ;;  %v12181_v2 = vld [vmem:[#allocation7 + $0x468] sm:$0xff] }
 0x134   :  { %v816_v27 = vadd.f32 %v815_v7, %v814_v36  ;;  %v1178_v10 = vrot.slane %v1177_v45, 2  ;;  %v1250_v61 = vadd.f32 %v1249_v22, %v1248_v52  ;;  %v1322_v35 = vrot.slane %v1321_v8, 4  ;;  %v12188_v36 = vld [vmem:[#allocation7 + $0x480] sm:$0xff]  ;;  %v12196_v13 = vld [vmem:[#allocation7 + $0x4a8] sm:$0xff] }
 0x135   :  { %v888_v39 = vrot.slane %v887_v56, 1  ;;  %v961_v46 = vrot.slane %v960_v11, 1  ;;  %v1034_v3 = vrot.slane %v1033_v12, 1  ;;  %v1106_v30 = vadd.f32 %v1105_v33, %v1104_v6  ;;  %v12200_v7 = vld [vmem:[#allocation7 + $0x4e0] sm:$0xff]  ;;  %v12401_v16 = vld [vmem:[#allocation7 + $0x7a8] sm:$0xff] }
 0x136   :  { %v845_v42 = vmul.f32 0.5, %v816_v27  ;;  %v1179_v44 = vadd.f32 %v1178_v10, %v1177_v45  ;;  %v1251_v41 = vrot.slane %v1250_v61, 2  ;;  %v1323_v0 = vadd.f32 %v1322_v35, %v1321_v8  ;;  %v12218_v10 = vld [vmem:[#allocation7 + $0x520] sm:$0xff]  ;;  %13672 = vst [vmem:[#allocation42_spill] sm:$0xff] %v12401_v16  ;;  %v11063_v16 = vld [vmem:[#allocation6 + $0x30] sm:$0xff] }
 0x137   :  { %v889_v50 = vadd.f32 %v888_v39, %v887_v56  ;;  %v962_v58 = vadd.f32 %v961_v46, %v960_v11  ;;  %v1035_v31 = vadd.f32 %v1034_v3, %v1033_v12  ;;  %v1107_v20 = vrot.slane %v1106_v30, 1  ;;  %v12207_v11 = vld [vmem:[#allocation7 + $0x4c8] sm:$0xff] }
 0x138   :  { %v1180_v5 = vrot.slane %v1179_v44, 1  ;;  %v1252_v48 = vadd.f32 %v1251_v41, %v1250_v61  ;;  %v1362_v32 = vsel %vm1361_vm1, %v12138_v49, %v12140_v14  ;;  %v1324_v37 = vrot.slane %v1323_v0, 2  ;;  %v12209_v12 = vld [vmem:[#allocation7 + $0x4e8] sm:$0xff] }
 0x139   :  { %v918_v63 = vmul.f32 0.5, %v889_v50  ;;  %v991_v54 = vmul.f32 0.5, %v962_v58  ;;  %v1064_v57 = vmul.f32 0.5, %v1035_v31  ;;  %v1108_v17 = vadd.f32 %v1107_v20, %v1106_v30  ;;  %v12220_v61 = vld [vmem:[#allocation7 + $0x508] sm:$0xff]  ;;  %v12231_v30 = vld [vmem:[#allocation7 + $0x560] sm:$0xff] }
 0x13a   :  { %v1181_v24 = vadd.f32 %v1180_v5, %v1179_v44  ;;  %v1253_v1 = vrot.slane %v1252_v48, 1  ;;  %v1367_v43 = vsel %vm223_vm0, %v1362_v32, %v12142_v34  ;;  %v1325_v62 = vadd.f32 %v1324_v37, %v1323_v0  ;;  %v12222_v39 = vld [vmem:[#allocation7 + $0x528] sm:$0xff]  ;;  %v12244_v0 = vld [vmem:[#allocation7 + $0x580] sm:$0xff] }
 0x13b   :  { %v1373_v49 = vsel %vm1372_vm2, %v1367_v43, %v12144_v19  ;;  %v1402_v14 = vsel %vm1361_vm1, %v845_v42, %v918_v63  ;;  %v1137_v34 = vmul.f32 0.5, %v1108_v17  ;;  %v12198_v19 = vld [vmem:[#allocation7 + $0x4c0] sm:$0xff]  ;;  %v9286_v56 = vcombine.high %v12173_v59, %v12175_v51  ;;  %v12233_v44 = vld [vmem:[#allocation7 + $0x548] sm:$0xff] }
 0x13c   :  { %v1210_v52 = vmul.f32 0.5, %v1181_v24  ;;  %v1254_v9 = vadd.f32 %v1253_v1, %v1252_v48  ;;  %v1379_v55 = vsel %vm1378_vm3, %v1373_v49, %v12154_v25  ;;  %v1326_v6 = vrot.slane %v1325_v62, 1  ;;  %v12211_v25 = vld [vmem:[#allocation7 + $0x500] sm:$0xff]  ;;  %v12235_v41 = vld [vmem:[#allocation7 + $0x568] sm:$0xff] }
 0x13d   :  { %v1385_v45 = vsel %vm1384_vm4, %v1379_v55, %v12156_v26  ;;  %v1407_v22 = vsel %vm223_vm0, %v1402_v14, %v991_v54  ;;  %v12229_v42 = vld [vmem:[#allocation7 + $0x540] sm:$0xff]  ;;  %v12248_v5 = vld [vmem:[#allocation7 + $0x588] sm:$0xff]  ;;  %v13676_v23 = vcombine.low %v12179_v28, %v12181_v2  ;;  %v13683_v21 = vcombine.high %v12198_v19, %v12200_v7 }
 0x13e   :  { %v1283_v8 = vmul.f32 0.5, %v1254_v9  ;;  %v1391_v27 = vsel %vm1390_vm5, %v1385_v45, %v12158_v18  ;;  %v1412_v33 = vsel %vm1372_vm2, %v1407_v22, %v1064_v57  ;;  %v1327_v46 = vadd.f32 %v1326_v6, %v1325_v62  ;;  %v12246_v20 = vld [vmem:[#allocation7 + $0x5a0] sm:$0xff]  ;;  %v12250_v48 = vld [vmem:[#allocation7 + $0x5a8] sm:$0xff] }
 0x13f   :  { %v1397_v3 = vsel %vm1396_vm6, %v1391_v27, %v12166_v60  ;;  %v1417_v35 = vsel %vm1378_vm3, %v1412_v33, %v1137_v34  ;;  %v9288_v18 = vcombine.high %v12179_v28, %v12181_v2  ;;  %v12257_v37 = vld [vmem:[#allocation7 + $0x5c0] sm:$0xff]  ;;  %v12269_v49 = vld [vmem:[#allocation7 + $0x5c8] sm:$0xff]  ;;  %v13678_v28 = vcombine.high %v12188_v36, %v12190_v47 }
 0x140   :  { %v1422_v50 = vsel %vm1384_vm4, %v1417_v35, %v1210_v52  ;;  %v1356_v32 = vmul.f32 0.5, %v1327_v46  ;;  %v12259_v17 = vld [vmem:[#allocation7 + $0x5e0] sm:$0xff]  ;;  %v12271_v14 = vld [vmem:[#allocation7 + $0x5e8] sm:$0xff]  ;;  %v13679_v2 = vcombine.high %v12192_v29, %v12196_v13 }
 0x141   :  { %v1427_v63 = vsel %vm1390_vm5, %v1422_v50, %v1283_v8  ;;  %v12273_v34 = vld [vmem:[#allocation7 + $0x600] sm:$0xff]  ;;  %v12284_v22 = vld [vmem:[#allocation7 + $0x608] sm:$0xff] }
 0x142   :  { %v12275_v52 = vld [vmem:[#allocation7 + $0x620] sm:$0xff]  ;;  %v1432_v9 = vsel %vm1396_vm6, %v1427_v63, %v1356_v32  ;;  %v12286_v8 = vld [vmem:[#allocation7 + $0x628] sm:$0xff] }
 0x143   :  { %v12288_v27 = vpack.c.bf16 %v1432_v9, %v1397_v3  ;;  %v12296_v50 = vld [vmem:[#allocation7 + $0x640] sm:$0xff]  ;;  %v12300_v63 = vld [vmem:[#allocation7 + $0x648] sm:$0xff] }
 0x144   :  { %v12298_v32 = vld [vmem:[#allocation7 + $0x660] sm:$0xff]  ;;  %v12302_v6 = vld [vmem:[#allocation7 + $0x668] sm:$0xff] }
 0x145   :  { %13667 = vst [vmem:[#allocation37_spill] sm:$0xff] %v12288_v27  ;;  %v12312_v46 = vld [vmem:[#allocation7 + $0x680] sm:$0xff]  ;;  %v12316_v45 = vld [vmem:[#allocation7 + $0x688] sm:$0xff]  ;;  %3395 = vmatmul.mubr.bf16.vlgmr.msra.gmra.mrb[0].mxu0 %v12288_v27  ;;  %3524 = vmatmul.mubr.bf16.vlgmr.msra.gmra.mrb[0].mxu1 %v12288_v27 }
 0x146   :  { %v12314_v62 = vld [vmem:[#allocation7 + $0x6a0] sm:$0xff]  ;;  %13669 = vst [vmem:[#allocation39_spill] sm:$0xff] %v12316_v45  ;;  %v12318_v55 = vld [vmem:[#allocation7 + $0x6a8] sm:$0xff]  ;;  %3406 = vmatpush1.bf16.msra.mxu0 %v9277_v40  ;;  %3535 = vmatpush1.bf16.msra.mxu1 %v9279_v4 }
 0x147   :  { %13668 = vst [vmem:[#allocation38_spill] sm:$0xff] %v12314_v62  ;;  %13670 = vst [vmem:[#allocation40_spill] sm:$0xff] %v12318_v55  ;;  %v9133_v1 = vld.sshfl [vmem:[#allocation6 + $0x8] sm:$0x3 pattern:$0x76325410]  ;;  %3407 = vmatprep.subr.bf16.mxu0 %v9286_v56  ;;  %3536 = vmatprep.subr.bf16.mxu1 %v9288_v18  ;;  %v13675_v18 = vcombine.low %v12173_v59, %v12175_v51 }
 0x148   :  { %v12328_v3 = vld [vmem:[#allocation7 + $0x6c0] sm:$0xff]  ;;  %v12332_v43 = vld [vmem:[#allocation7 + $0x6c8] sm:$0xff]  ;;  %v12373_v9 = vsel %vm223_vm0, %v9133_v1, 0.0 }
 0x149   :  { %v12330_v57 = vld [vmem:[#allocation7 + $0x6e0] sm:$0xff]  ;;  %v12346_v24 = vld [vmem:[#allocation7 + $0x6e8] sm:$0xff]  ;;  %13671 = vst [vmem:[#allocation41_spill] sm:$0xff] %v12373_v9  ;;  %v11060_v9 = vld [vmem:[#allocation6 + $0x18] sm:$0xff] }
 0x14a   :  { %v12348_v31 = vld [vmem:[#allocation7 + $0x700] sm:$0xff]  ;;  %v12366_v40 = vld [vmem:[#allocation7 + $0x728] sm:$0xff]  ;;  %3408 = vmatpush1.bf16.msra.mxu0 %v13675_v18  ;;  %3537 = vmatpush1.bf16.msra.mxu1 %v13676_v23  ;;  %v9135_v51 = vld.sshfl [vmem:[#allocation6 + $0x18] sm:$0x3 pattern:$0x76325410] }
 0x14b   :  { %v12350_v58 = vld [vmem:[#allocation7 + $0x720] sm:$0xff]  ;;  %v12383_v33 = vld [vmem:[#allocation7 + $0x748] sm:$0xff]  ;;  %3409 = vmatprep.subr.bf16.mxu0 %v13678_v28  ;;  %3538 = vmatprep.subr.bf16.mxu1 %v13679_v2  ;;  %v13681_v28 = vcombine.low %v12188_v36, %v12190_v47  ;;  %v13682_v2 = vcombine.low %v12192_v29, %v12196_v13  ;;  %v13684_v36 = vcombine.high %v12207_v11, %v12209_v12 }
 0x14c   :  { %v12368_v4 = vld [vmem:[#allocation7 + $0x740] sm:$0xff]  ;;  %v12385_v35 = vld [vmem:[#allocation7 + $0x768] sm:$0xff]  ;;  %v415_v47 = vcombine.high %v11060_v9, %v11060_v9  ;;  %v634_v13 = vcombine.high %v11063_v16, %v11063_v16  ;;  %v13692_v16 = vcombine.high %v12211_v25, %v12218_v10 }
 0x14d   :  { %v12370_v56 = vld [vmem:[#allocation7 + $0x760] sm:$0xff]  ;;  %v9134_v60 = vld.sshfl [vmem:[#allocation6 + $0x10] sm:$0x3 pattern:$0x76325410] }
 0x14e   :  { %v12387_v54 = vld [vmem:[#allocation7 + $0x780] sm:$0xff]  ;;  %v12399_v26 = vld [vmem:[#allocation7 + $0x788] sm:$0xff]  ;;  %v12437_v59 = vsel %vm223_vm0, %v9134_v60, 0.0  ;;  %3410 = vmatpush1.bf16.msra.mxu0 %v13681_v28  ;;  %3539 = vmatpush1.bf16.msra.mxu1 %v13682_v2  ;;  %v12480_v28 = vsel %vm223_vm0, %v9135_v51, 0.0  ;;  %v13687_v60 = vld [vmem:[#allocation35_spill] sm:$0xff] }
 0x14f   :  { %v12389_v1 = vld [vmem:[#allocation7 + $0x7a0] sm:$0xff]  ;;  %v12419_v45 = vld [vmem:[#allocation7 + $0x7c8] sm:$0xff]  ;;  %13680 = vst [vmem:[#allocation46_spill] sm:$0xff] %v12437_v59  ;;  %3411 = vmatprep.subr.bf16.mxu0 %v13683_v21  ;;  %3540 = vmatprep.subr.bf16.mxu1 %v13684_v36  ;;  %13685 = vst [vmem:[#allocation47_spill] sm:$0xff] %v12480_v28  ;;  %v13688_v21 = vcombine.high %v13687_v60, %v13687_v60  ;;  %v13689_v28 = vcombine.low %v12198_v19, %v12200_v7 }
 0x150   :  { %v12403_v27 = vld [vmem:[#allocation7 + $0x7c0] sm:$0xff]  ;;  %v12421_v62 = vld [vmem:[#allocation7 + $0x7e8] sm:$0xff]  ;;  %v13690_v60 = vcombine.low %v12207_v11, %v12209_v12  ;;  %v13693_v19 = vcombine.high %v12220_v61, %v12222_v39 }
 0x151   :  { %13673 = vst [vmem:[#allocation43_spill] sm:$0xff] %v12403_v27  ;;  %13677 = vst [vmem:[#allocation45_spill] sm:$0xff] %v12421_v62  ;;  %v13686_v2 = vld [vmem:[#allocation34_spill] sm:$0xff]  ;;  %v11061_v59 = vld [vmem:[#allocation6 + $0x20] sm:$0xff] }
 0x152   :  { %v208_v18 = vrot.slane %v13688_v21, %v13686_v2  ;;  %v11058_v55 = vld [vmem:[#allocation6 + $0x8] sm:$0xff]  ;;  %v11059_v36 = vld [vmem:[#allocation6 + $0x10] sm:$0xff]  ;;  %v488_v53 = vcombine.high %v11061_v59, %v11061_v59  ;;  %v11064_v62 = vld [vmem:[#allocation6 + $0x38] sm:$0xff]  ;;  %3412 = vmatpush1.bf16.msra.mxu0 %v13689_v28  ;;  %3541 = vmatpush1.bf16.msra.mxu1 %v13690_v60  ;;  %v12508_v7 = vrot.slane %v415_v47, %v13686_v2 }
 0x153   :  { %v269_v23 = vcombine.high %v11058_v55, %v11058_v55  ;;  %v342_v15 = vcombine.high %v11059_v36, %v11059_v36  ;;  %v11062_v29 = vld [vmem:[#allocation6 + $0x28] sm:$0xff]  ;;  %v707_v51 = vcombine.high %v11064_v62, %v11064_v62  ;;  %3413 = vmatprep.subr.bf16.mxu0 %v13692_v16  ;;  %3542 = vmatprep.subr.bf16.mxu1 %v13693_v19 }
 0x154   :  { %v561_v27 = vcombine.high %v11062_v29, %v11062_v29  ;;  %v210_v55 = vcombine.high %v208_v18, %v208_v18  ;;  %v12499_v59 = vsel %vm223_vm0, %v208_v18, 0.0  ;;  %v12511_v11 = vrot.slane %v488_v53, %v13686_v2 }
 0x155   :  { %v12493_v21 = vrot.slane %v269_v23, %v13686_v2  ;;  %v12496_v9 = vrot.slane %v342_v15, %v13686_v2  ;;  %13691 = vst [vmem:[#allocation34_spill] sm:$0xff] %v12499_v59  ;;  %v12523_v29 = vrot.slane %v634_v13, %v13686_v2  ;;  %v431_v53 = vcombine.high %v12508_v7, %v12508_v7 }
 0x156   :  { %13694 = vst [vmem:[#allocation35_spill] sm:$0xff] %v12511_v11  ;;  %v12514_v12 = vrot.slane %v561_v27, %v13686_v2  ;;  %v245_v15 = vsel %vm223_vm0, %v210_v55, 0.0  ;;  %v504_v27 = vcombine.high %v12511_v11, %v12511_v11  ;;  %v13697_v36 = vcombine.low %v12211_v25, %v12218_v10 }
 0x157   :  { %v285_v23 = vcombine.high %v12493_v21, %v12493_v21  ;;  %v358_v18 = vcombine.high %v12496_v9, %v12496_v9  ;;  %13696 = vst [vmem:[#allocation49_spill] sm:$0xff] %v12523_v29  ;;  %v246_v47 = vrot.slane %v245_v15, 4  ;;  %v13698_v60 = vcombine.low %v12220_v61, %v12222_v39 }
 0x158   :  { %13695 = vst [vmem:[#allocation48_spill] sm:$0xff] %v12514_v12  ;;  %v577_v28 = vcombine.high %v12514_v12, %v12514_v12  ;;  %3414 = vmatpush1.bf16.msra.mxu0 %v13697_v36  ;;  %v650_v16 = vcombine.high %v12523_v29, %v12523_v29  ;;  %v12542_v19 = vrot.slane %v707_v51, %v13686_v2  ;;  %v538_v36 = vsel %vm223_vm0, %v504_v27, 0.0 }
 0x159   :  { %3543 = vmatpush1.bf16.msra.mxu1 %v13698_v60  ;;  %v319_v13 = vsel %vm223_vm0, %v285_v23, 0.0  ;;  %v392_v55 = vsel %vm223_vm0, %v358_v18, 0.0  ;;  %v13699_v62 = vcombine.high %v12229_v42, %v12231_v30  ;;  %v13700_v25 = vcombine.high %v12233_v44, %v12235_v41 }
 0x15a   :  { %v247_v10 = vadd.f32 %v246_v47, %v245_v15  ;;  %v320_v61 = vrot.slane %v319_v13, 4  ;;  %v393_v39 = vrot.slane %v392_v55, 4  ;;  %v465_v23 = vsel %vm223_vm0, %v431_v53, 0.0 }
 0x15b   :  { %3415 = vmatprep.subr.bf16.mxu0 %v13699_v62  ;;  %3544 = vmatprep.subr.bf16.mxu1 %v13700_v25  ;;  %v466_v18 = vrot.slane %v465_v23, 4  ;;  %v611_v60 = vsel %vm223_vm0, %v577_v28, 0.0  ;;  %v684_v51 = vsel %vm223_vm0, %v650_v16, 0.0  ;;  %v539_v62 = vrot.slane %v538_v36, 4 }
 0x15c   :  { %v248_v29 = vrot.slane %v247_v10, 2  ;;  %v321_v12 = vadd.f32 %v320_v61, %v319_v13  ;;  %v394_v11 = vadd.f32 %v393_v39, %v392_v55  ;;  %v13701_v59 = vcombine.low %v12229_v42, %v12231_v30 }
 0x15d   :  { %v13702_v15 = vcombine.low %v12233_v44, %v12235_v41  ;;  %v467_v47 = vadd.f32 %v466_v18, %v465_v23  ;;  %v612_v53 = vrot.slane %v611_v60, 4  ;;  %v685_v25 = vrot.slane %v684_v51, 4 }
 0x15e   :  { %3416 = vmatpush1.bf16.msra.mxu0 %v13701_v59  ;;  %v723_v27 = vcombine.high %v12542_v19, %v12542_v19  ;;  %v13703_v28 = vcombine.high %v12244_v0, %v12246_v20  ;;  %v13704_v13 = vcombine.high %v12248_v5, %v12250_v48  ;;  %v249_v42 = vadd.f32 %v248_v29, %v247_v10 }
 0x15f   :  { %3545 = vmatpush1.bf16.msra.mxu1 %v13702_v15  ;;  %v322_v30 = vrot.slane %v321_v12, 2  ;;  %v395_v59 = vrot.slane %v394_v11, 2  ;;  %v540_v55 = vadd.f32 %v539_v62, %v538_v36  ;;  %v468_v44 = vrot.slane %v467_v47, 2 }
 0x160   :  { %3417 = vmatprep.subr.bf16.mxu0 %v13703_v28  ;;  %3546 = vmatprep.subr.bf16.mxu1 %v13704_v13  ;;  %v613_v41 = vadd.f32 %v612_v53, %v611_v60  ;;  %v686_v16 = vadd.f32 %v685_v25, %v684_v51  ;;  %v757_v61 = vsel %vm223_vm0, %v723_v27, 0.0  ;;  %v250_v39 = vrot.slane %v249_v42, 1 }
 0x161   :  { %v323_v23 = vadd.f32 %v322_v30, %v321_v12  ;;  %v396_v18 = vadd.f32 %v395_v59, %v394_v11  ;;  %v541_v15 = vrot.slane %v540_v55, 2  ;;  %v13705_v28 = vcombine.low %v12244_v0, %v12246_v20 }
 0x162   :  { %v13706_v13 = vcombine.low %v12248_v5, %v12250_v48  ;;  %v469_v29 = vadd.f32 %v468_v44, %v467_v47  ;;  %v614_v10 = vrot.slane %v613_v41, 2  ;;  %v687_v36 = vrot.slane %v686_v16, 2 }
 0x163   :  { %3418 = vmatpush1.bf16.msra.mxu0 %v13705_v28  ;;  %v758_v62 = vrot.slane %v757_v61, 4  ;;  %v13707_v60 = vcombine.high %v12257_v37, %v12259_v17  ;;  %v13708_v11 = vcombine.high %v12269_v49, %v12271_v14  ;;  %v251_v12 = vadd.f32 %v250_v39, %v249_v42 }
 0x164   :  { %3547 = vmatpush1.bf16.msra.mxu1 %v13706_v13  ;;  %v324_v51 = vrot.slane %v323_v23, 1  ;;  %v397_v0 = vrot.slane %v396_v18, 1  ;;  %v542_v20 = vadd.f32 %v541_v15, %v540_v55  ;;  %v470_v53 = vrot.slane %v469_v29, 1 }
 0x165   :  { %3419 = vmatprep.subr.bf16.mxu0 %v13707_v60  ;;  %3548 = vmatprep.subr.bf16.mxu1 %v13708_v11  ;;  %v615_v25 = vadd.f32 %v614_v10, %v613_v41  ;;  %v688_v5 = vadd.f32 %v687_v36, %v686_v16  ;;  %v759_v48 = vadd.f32 %v758_v62, %v757_v61  ;;  %v12581_v47 = vmul.f32 0.5, %v251_v12  ;;  %v11066_v62 = vld [vmem:[#allocation6 + $0x4a] sm:$0xff]  ;;  %v11067_v11 = vld [vmem:[#allocation6 + $0x52] sm:$0xff] }
 0x166   :  { %v325_v27 = vadd.f32 %v324_v51, %v323_v23  ;;  %v398_v30 = vadd.f32 %v397_v0, %v396_v18  ;;  %v543_v59 = vrot.slane %v542_v20, 1  ;;  %v13709_v44 = vcombine.low %v12257_v37, %v12259_v17  ;;  %v11065_v23 = vld [vmem:[#allocation6 + $0x42] sm:$0xff] }
 0x167   :  { %v13710_v28 = vcombine.low %v12269_v49, %v12271_v14  ;;  %v471_v42 = vadd.f32 %v470_v53, %v469_v29  ;;  %v616_v39 = vrot.slane %v615_v25, 1  ;;  %v689_v55 = vrot.slane %v688_v5, 1 }
 0x168   :  { %3420 = vmatpush1.bf16.msra.mxu0 %v13709_v44  ;;  %v760_v15 = vrot.slane %v759_v48, 2  ;;  %v13711_v41 = vcombine.high %v12273_v34, %v12275_v52  ;;  %v13712_v16 = vcombine.high %v12284_v22, %v12286_v8  ;;  %v12595_v61 = vmul.f32 0.5, %v325_v27 }
 0x169   :  { %3549 = vmatpush1.bf16.msra.mxu1 %v13710_v28  ;;  %v12597_v37 = vmul.f32 0.5, %v398_v30  ;;  %v544_v17 = vadd.f32 %v543_v59, %v542_v20  ;;  %v781_v49 = vcombine.high %v11065_v23, %v11065_v23  ;;  %v12599_v14 = vmul.f32 0.5, %v471_v42  ;;  %v11069_v28 = vld [vmem:[#allocation6 + $0x62] sm:$0xff] }
 0x16a   :  { %3421 = vmatprep.subr.bf16.mxu0 %v13711_v41  ;;  %3550 = vmatprep.subr.bf16.mxu1 %v13712_v16  ;;  %v617_v18 = vadd.f32 %v616_v39, %v615_v25  ;;  %v690_v13 = vadd.f32 %v689_v55, %v688_v5  ;;  %v761_v29 = vadd.f32 %v760_v15, %v759_v48  ;;  %v11068_v5 = vld [vmem:[#allocation6 + $0x5a] sm:$0xff]  ;;  %v11070_v39 = vld [vmem:[#allocation6 + $0x6a] sm:$0xff] }
 0x16b   :  { %v12601_v10 = vmul.f32 0.5, %v544_v17  ;;  %v12604_v36 = vrot.slane %v781_v49, %v13686_v2  ;;  %v854_v60 = vcombine.high %v11066_v62, %v11066_v62  ;;  %v927_v12 = vcombine.high %v11067_v11, %v11067_v11  ;;  %v11071_v17 = vld [vmem:[#allocation6 + $0x72] sm:$0xff] }
 0x16c   :  { %v13713_v51 = vcombine.low %v12273_v34, %v12275_v52  ;;  %v13714_v0 = vcombine.low %v12284_v22, %v12286_v8  ;;  %v12612_v20 = vmul.f32 0.5, %v617_v18  ;;  %v12614_v53 = vmul.f32 0.5, %v690_v13 }
 0x16d   :  { %v762_v25 = vrot.slane %v761_v29, 1  ;;  %v1000_v48 = vcombine.high %v11068_v5, %v11068_v5  ;;  %v13715_v27 = vcombine.high %v12296_v50, %v12298_v32  ;;  %v13716_v30 = vcombine.high %v12300_v63, %v12302_v6 }
 0x16e   :  { %3422 = vmatpush1.bf16.msra.mxu0 %v13713_v51  ;;  %3551 = vmatpush1.bf16.msra.mxu1 %v13714_v0  ;;  %v797_v34 = vcombine.high %v12604_v36, %v12604_v36  ;;  %v12625_v52 = vrot.slane %v854_v60, %v13686_v2  ;;  %v12628_v22 = vrot.slane %v927_v12, %v13686_v2  ;;  %v12632_v8 = vsel %vm223_vm0, %v12493_v21, 0.0  ;;  %v13719_v60 = vld [vmem:[#allocation38_spill] sm:$0xff]  ;;  %v13721_v12 = vld [vmem:[#allocation39_spill] sm:$0xff] }
 0x16f   :  { %3423 = vmatprep.subr.bf16.mxu0 %v13715_v27  ;;  %3552 = vmatprep.subr.bf16.mxu1 %v13716_v30  ;;  %v763_v59 = vadd.f32 %v762_v25, %v761_v29  ;;  %v12635_v44 = vrot.slane %v1000_v48, %v13686_v2  ;;  %v1073_v42 = vcombine.high %v11069_v28, %v11069_v28 }
 0x170   :  { %v1146_v55 = vcombine.high %v11070_v39, %v11070_v39  ;;  %v831_v15 = vsel %vm223_vm0, %v797_v34, 0.0  ;;  %v870_v41 = vcombine.high %v12625_v52, %v12625_v52  ;;  %v943_v16 = vcombine.high %v12628_v22, %v12628_v22 }
 0x171   :  { %v1219_v23 = vcombine.high %v11071_v17, %v11071_v17  ;;  %v13717_v21 = vcombine.low %v12296_v50, %v12298_v32  ;;  %v13718_v49 = vcombine.low %v12300_v63, %v12302_v6  ;;  %v12648_v18 = vmul.f32 0.5, %v763_v59  ;;  %v13722_v50 = vld [vmem:[#allocation40_spill] sm:$0xff] }
 0x172   :  { %v832_v13 = vrot.slane %v831_v15, 4  ;;  %v1016_v29 = vcombine.high %v12635_v44, %v12635_v44  ;;  %v12653_v62 = vrot.slane %v1073_v42, %v13686_v2  ;;  %v13720_v11 = vcombine.high %v12312_v46, %v13719_v60 }
 0x173   :  { %3424 = vmatpush1.bf16.msra.mxu0 %v13717_v21  ;;  %3553 = vmatpush1.bf16.msra.mxu1 %v13718_v49  ;;  %v13723_v32 = vcombine.high %v13721_v12, %v13722_v50  ;;  %v904_v6 = vsel %vm223_vm0, %v870_v41, 0.0  ;;  %v977_v63 = vsel %vm223_vm0, %v943_v16, 0.0  ;;  %v12664_v51 = vrot.slane %v1146_v55, %v13686_v2  ;;  %v11072_v16 = vld [vmem:[#allocation6 + $0x7a] sm:$0xff] }
 0x174   :  { %3425 = vmatprep.subr.bf16.mxu0 %v13720_v11  ;;  %v12667_v0 = vrot.slane %v1219_v23, %v13686_v2  ;;  %v833_v25 = vadd.f32 %v832_v13, %v831_v15  ;;  %v905_v5 = vrot.slane %v904_v6, 4  ;;  %v978_v48 = vrot.slane %v977_v63, 4 }
 0x175   :  { %3554 = vmatprep.subr.bf16.mxu1 %v13723_v32  ;;  %v1050_v27 = vsel %vm223_vm0, %v1016_v29, 0.0  ;;  %v1089_v34 = vcombine.high %v12653_v62, %v12653_v62  ;;  %v1162_v59 = vcombine.high %v12664_v51, %v12664_v51  ;;  %v13724_v42 = vcombine.low %v12312_v46, %v13719_v60 }
 0x176   :  { %v1051_v30 = vrot.slane %v1050_v27, 4  ;;  %v1235_v28 = vcombine.high %v12667_v0, %v12667_v0  ;;  %v13725_v39 = vcombine.low %v13721_v12, %v13722_v50  ;;  %v834_v55 = vrot.slane %v833_v25, 2 }
 0x177   :  { %3426 = vmatpush1.bf16.msra.mxu0 %v13724_v42  ;;  %v906_v15 = vadd.f32 %v905_v5, %v904_v6  ;;  %v979_v41 = vadd.f32 %v978_v48, %v977_v63  ;;  %v1292_v17 = vcombine.high %v11072_v16, %v11072_v16  ;;  %v13726_v23 = vcombine.high %v12328_v3, %v12330_v57 }
 0x178   :  { %3555 = vmatpush1.bf16.msra.mxu1 %v13725_v39  ;;  %v13727_v21 = vcombine.high %v12332_v43, %v12346_v24  ;;  %v1052_v49 = vadd.f32 %v1051_v30, %v1050_v27  ;;  %v1123_v46 = vsel %vm223_vm0, %v1089_v34, 0.0  ;;  %v1196_v13 = vsel %vm223_vm0, %v1162_v59, 0.0 }
 0x179   :  { %3427 = vmatprep.subr.bf16.mxu0 %v13726_v23  ;;  %v1269_v29 = vsel %vm223_vm0, %v1235_v28, 0.0  ;;  %v835_v60 = vadd.f32 %v834_v55, %v833_v25  ;;  %v907_v11 = vrot.slane %v906_v15, 2  ;;  %v980_v12 = vrot.slane %v979_v41, 2 }
 0x17a   :  { %3556 = vmatprep.subr.bf16.mxu1 %v13727_v21  ;;  %v1124_v50 = vrot.slane %v1123_v46, 4  ;;  %v1053_v32 = vrot.slane %v1052_v49, 2  ;;  %v1197_v6 = vrot.slane %v1196_v13, 4  ;;  %v1270_v63 = vrot.slane %v1269_v29, 4 }
 0x17b   :  { %v12692_v5 = vrot.slane %v1292_v17, %v13686_v2  ;;  %v13728_v48 = vcombine.low %v12328_v3, %v12330_v57  ;;  %v13729_v27 = vcombine.low %v12332_v43, %v12346_v24  ;;  %v836_v30 = vrot.slane %v835_v60, 1 }
 0x17c   :  { %v908_v34 = vadd.f32 %v907_v11, %v906_v15  ;;  %v981_v25 = vadd.f32 %v980_v12, %v979_v41  ;;  %v1125_v59 = vadd.f32 %v1124_v50, %v1123_v46  ;;  %v13730_v28 = vcombine.high %v12348_v31, %v12350_v58 }
 0x17d   :  { %3428 = vmatpush1.bf16.msra.mxu0 %v13728_v48  ;;  %3557 = vmatpush1.bf16.msra.mxu1 %v13729_v27  ;;  %v13731_v42 = vcombine.high %v12364_v38, %v12366_v40  ;;  %v1054_v39 = vadd.f32 %v1053_v32, %v1052_v49  ;;  %v1198_v55 = vadd.f32 %v1197_v6, %v1196_v13  ;;  %v313_v3 = vrot.slane %v12632_v8, 4 }
 0x17e   :  { %3429 = vmatprep.subr.bf16.mxu0 %v13730_v28  ;;  %v1271_v57 = vadd.f32 %v1270_v63, %v1269_v29  ;;  %v837_v16 = vadd.f32 %v836_v30, %v835_v60  ;;  %v909_v24 = vrot.slane %v908_v34, 1  ;;  %v982_v43 = vrot.slane %v981_v25, 1 }
 0x17f   :  { %3558 = vmatprep.subr.bf16.mxu1 %v13731_v42  ;;  %v1126_v17 = vrot.slane %v1125_v59, 2  ;;  %v1055_v15 = vrot.slane %v1054_v39, 1  ;;  %v1199_v41 = vrot.slane %v1198_v55, 2  ;;  %v1308_v21 = vcombine.high %v12692_v5, %v12692_v5 }
 0x180   :  { %v1272_v23 = vrot.slane %v1271_v57, 2  ;;  %v13732_v46 = vcombine.low %v12348_v31, %v12350_v58  ;;  %v13733_v49 = vcombine.low %v12364_v38, %v12366_v40  ;;  %v848_v13 = vmul.f32 0.5, %v837_v16 }
 0x181   :  { %v910_v29 = vadd.f32 %v909_v24, %v908_v34  ;;  %v983_v60 = vadd.f32 %v982_v43, %v981_v25  ;;  %v1127_v11 = vadd.f32 %v1126_v17, %v1125_v59  ;;  %v13734_v12 = vcombine.high %v12368_v4, %v12370_v56  ;;  %v12745_v24 = vld [vmem:[#allocation7 + $0x820] sm:$0xff] }
 0x182   :  { %3430 = vmatpush1.bf16.msra.mxu0 %v13732_v46  ;;  %3559 = vmatpush1.bf16.msra.mxu1 %v13733_v49  ;;  %v13735_v50 = vcombine.high %v12383_v33, %v12385_v35  ;;  %v1056_v32 = vadd.f32 %v1055_v15, %v1054_v39  ;;  %v1200_v6 = vadd.f32 %v1199_v41, %v1198_v55  ;;  %v1342_v31 = vsel %vm223_vm0, %v1308_v21, 0.0  ;;  %v12750_v41 = vld [vmem:[#allocation7 + $0x808] sm:$0xff] }
 0x183   :  { %3431 = vmatprep.subr.bf16.mxu0 %v13734_v12  ;;  %v1273_v58 = vadd.f32 %v1272_v23, %v1271_v57  ;;  %v921_v63 = vmul.f32 0.5, %v910_v29  ;;  %v994_v38 = vmul.f32 0.5, %v983_v60  ;;  %v1128_v40 = vrot.slane %v1127_v11, 1  ;;  %v12752_v23 = vld [vmem:[#allocation7 + $0x828] sm:$0xff] }
 0x184   :  { %3560 = vmatprep.subr.bf16.mxu1 %v13735_v50  ;;  %v1343_v48 = vrot.slane %v1342_v31, 4  ;;  %v1067_v27 = vmul.f32 0.5, %v1056_v32  ;;  %v1201_v30 = vrot.slane %v1200_v6, 1  ;;  %v1365_v25 = vsel %vm1361_vm1, %v12581_v47, %v12595_v61  ;;  %v13739_v47 = vld [vmem:[#allocation42_spill] sm:$0xff]  ;;  %v13744_v50 = vld [vmem:[#allocation44_spill] sm:$0xff] }
 0x185   :  { %v1274_v34 = vrot.slane %v1273_v58, 1  ;;  %v13736_v59 = vcombine.low %v12368_v4, %v12370_v56  ;;  %v13737_v28 = vcombine.low %v12383_v33, %v12385_v35  ;;  %v1129_v42 = vadd.f32 %v1128_v40, %v1127_v11  ;;  %v12743_v35 = vld [vmem:[#allocation7 + $0x800] sm:$0xff] }
 0x186   :  { %v1344_v39 = vadd.f32 %v1343_v48, %v1342_v31  ;;  %v1370_v55 = vsel %vm223_vm0, %v1365_v25, %v12597_v37  ;;  %v385_v57 = vsel %vm223_vm0, %v12496_v9, 0.0  ;;  %v13738_v16 = vcombine.high %v12387_v54, %v12389_v1 }
 0x187   :  { %3432 = vmatpush1.bf16.msra.mxu0 %v13736_v59  ;;  %3561 = vmatpush1.bf16.msra.mxu1 %v13737_v28  ;;  %v13740_v4 = vcombine.high %v12399_v26, %v13739_v47  ;;  %v1202_v56 = vadd.f32 %v1201_v30, %v1200_v6  ;;  %v1275_v61 = vadd.f32 %v1274_v34, %v1273_v58  ;;  %v386_v37 = vrot.slane %v385_v57, 4  ;;  %v13748_v58 = vld [vmem:[#allocation46_spill] sm:$0xff] }
 0x188   :  { %3433 = vmatprep.subr.bf16.mxu0 %v13738_v16  ;;  %v1376_v33 = vsel %vm1372_vm2, %v1370_v55, %v12599_v14  ;;  %v1140_v43 = vmul.f32 0.5, %v1129_v42  ;;  %v1345_v9 = vrot.slane %v1344_v39, 2  ;;  %v1405_v15 = vsel %vm1361_vm1, %v848_v13, %v921_v63  ;;  %v13749_v63 = vld [vmem:[#allocation47_spill] sm:$0xff]  ;;  %v13750_v34 = vld [vmem:[#allocation34_spill] sm:$0xff] }
 0x189   :  { %3562 = vmatprep.subr.bf16.mxu1 %v13740_v4  ;;  %v1382_v17 = vsel %vm1378_vm3, %v1376_v33, %v12601_v10  ;;  %v1213_v21 = vmul.f32 0.5, %v1202_v56  ;;  %v1286_v46 = vmul.f32 0.5, %v1275_v61  ;;  %v1410_v49 = vsel %vm223_vm0, %v1405_v15, %v994_v38 }
 0x18a   :  { %v1388_v14 = vsel %vm1384_vm4, %v1382_v17, %v12612_v20  ;;  %v13741_v29 = vcombine.low %v12387_v54, %v12389_v1  ;;  %v13742_v10 = vcombine.low %v12399_v26, %v13739_v47  ;;  %v1346_v13 = vadd.f32 %v1345_v9, %v1344_v39  ;;  %v13743_v20 = vld [vmem:[#allocation43_spill] sm:$0xff]  ;;  %v13746_v54 = vld [vmem:[#allocation45_spill] sm:$0xff] }
 0x18b   :  { %v1394_v60 = vsel %vm1390_vm5, %v1388_v14, %v12614_v53  ;;  %v1415_v11 = vsel %vm1372_vm2, %v1410_v49, %v1067_v27  ;;  %v458_v12 = vsel %vm223_vm0, %v12508_v7, 0.0  ;;  %v13745_v32 = vcombine.high %v13743_v20, %v13744_v50  ;;  %v13754_v47 = vld [vmem:[#allocation35_spill] sm:$0xff] }
 0x18c   :  { %3434 = vmatpush1.bf16.msra.mxu0 %v13741_v29  ;;  %3563 = vmatpush1.bf16.msra.mxu1 %v13742_v10  ;;  %v13747_v1 = vcombine.high %v12419_v45, %v13746_v54  ;;  %v1420_v26 = vsel %vm1378_vm3, %v1415_v11, %v1140_v43  ;;  %v459_v6 = vrot.slane %v458_v12, 4  ;;  %v327_v31 = vrot.slane %v13748_v58, 4 }
 0x18d   :  { %3435 = vmatprep.subr.bf16.mxu0 %v13745_v32  ;;  %v400_v53 = vrot.slane %v13749_v63, 4  ;;  %v1347_v38 = vrot.slane %v1346_v13, 1  ;;  %v1400_v40 = vsel %vm1396_vm6, %v1394_v60, %v12648_v18  ;;  %v1425_v7 = vsel %vm1384_vm4, %v1420_v26, %v1213_v21 }
 0x18e   :  { %3564 = vmatprep.subr.bf16.mxu1 %v13747_v1  ;;  %v9406_v48 = vcombine.high %v12743_v35, %v12745_v24  ;;  %v1430_v27 = vsel %vm1390_vm5, %v1425_v7, %v1286_v46  ;;  %v9408_v30 = vcombine.high %v12750_v41, %v12752_v23  ;;  %v13751_v25 = vrot.slane %v13750_v34, 4 }
 0x18f   :  { %v314_v28 = vadd.f32 %v313_v3, %v12632_v8  ;;  %v13752_v18 = vcombine.low %v13743_v20, %v13744_v50  ;;  %v13753_v42 = vcombine.low %v12419_v45, %v13746_v54  ;;  %v1348_v39 = vadd.f32 %v1347_v38, %v1346_v13  ;;  %v13755_v8 = vld [vmem:[#allocation48_spill] sm:$0xff] }
 0x190   :  { %v240_v59 = vadd.f32 %v13751_v25, %v13750_v34  ;;  %v387_v55 = vadd.f32 %v386_v37, %v385_v57  ;;  %v460_v16 = vadd.f32 %v459_v6, %v458_v12  ;;  %v531_v4 = vsel %vm223_vm0, %v13754_v47, 0.0  ;;  %v13756_v57 = vld [vmem:[#allocation49_spill] sm:$0xff] }
 0x191   :  { %3436 = vmatpush1.bf16.msra.mxu0 %v13752_v18  ;;  %3565 = vmatpush1.bf16.msra.mxu1 %v13753_v42  ;;  %v315_v61 = vrot.slane %v314_v28, 2  ;;  %v532_v33 = vrot.slane %v531_v4, 4  ;;  %v604_v3 = vsel %vm223_vm0, %v13755_v8, 0.0  ;;  %v1359_v43 = vmul.f32 0.5, %v1348_v39 }
 0x192   :  { %3448 = vmatprep.subr.bf16.mxu0 %v9406_v48  ;;  %3577 = vmatprep.subr.bf16.mxu1 %v9408_v30  ;;  %v241_v56 = vrot.slane %v240_v59, 2  ;;  %v388_v9 = vrot.slane %v387_v55, 2  ;;  %v461_v17 = vrot.slane %v460_v16, 2  ;;  %v605_v15 = vrot.slane %v604_v3, 4 }
 0x193   :  { %v316_v21 = vadd.f32 %v315_v61, %v314_v28  ;;  %v533_v46 = vadd.f32 %v532_v33, %v531_v4  ;;  %v677_v37 = vsel %vm223_vm0, %v13756_v57, 0.0  ;;  %v1435_v14 = vsel %vm1396_vm6, %v1430_v27, %v1359_v43 }
 0x194   :  { %v242_v45 = vadd.f32 %v241_v56, %v240_v59  ;;  %v389_v49 = vadd.f32 %v388_v9, %v387_v55  ;;  %v462_v29 = vadd.f32 %v461_v17, %v460_v16  ;;  %v606_v10 = vadd.f32 %v605_v15, %v604_v3 }
 0x195   :  { %v12804_v13 = vpack.c.bf16 %v1435_v14, %v1400_v40  ;;  %v317_v11 = vrot.slane %v316_v21, 1  ;;  %v534_v12 = vrot.slane %v533_v46, 2  ;;  %v678_v54 = vrot.slane %v677_v37, 4 }
 0x196   :  { %v243_v60 = vrot.slane %v242_v45, 1  ;;  %v390_v20 = vrot.slane %v389_v49, 1  ;;  %v463_v50 = vrot.slane %v462_v29, 1  ;;  %v607_v32 = vrot.slane %v606_v10, 2 }
 0x197   :  { %3437 = vmatprep.mubr.bf16.mxu0 %v12804_v13  ;;  %3566 = vmatprep.mubr.bf16.mxu1 %v12804_v13  ;;  %v318_v26 = vadd.f32 %v317_v11, %v316_v21  ;;  %v535_v6 = vadd.f32 %v534_v12, %v533_v46  ;;  %v750_v38 = vsel %vm223_vm0, %v12542_v19, 0.0  ;;  %v679_v27 = vadd.f32 %v678_v54, %v677_v37 }
 0x198   :  { %v244_v1 = vadd.f32 %v243_v60, %v242_v45  ;;  %v391_v7 = vadd.f32 %v390_v20, %v389_v49  ;;  %v464_v40 = vadd.f32 %v463_v50, %v462_v29  ;;  %v608_v48 = vadd.f32 %v607_v32, %v606_v10 }
 0x199   :  { %v12812_v34 = vmul.f32 0.5, %v318_v26  ;;  %v536_v25 = vrot.slane %v535_v6, 1  ;;  %v751_v59 = vrot.slane %v750_v38, 4  ;;  %v680_v39 = vrot.slane %v679_v27, 2 }
 0x19a   :  { %v12810_v30 = vmul.f32 0.5, %v244_v1  ;;  %v12814_v28 = vmul.f32 0.5, %v391_v7  ;;  %v12816_v18 = vmul.f32 0.5, %v464_v40  ;;  %v609_v42 = vrot.slane %v608_v48, 1 }
 0x19b   :  { %v537_v55 = vadd.f32 %v536_v25, %v535_v6  ;;  %v752_v16 = vadd.f32 %v751_v59, %v750_v38  ;;  %v824_v19 = vsel %vm223_vm0, %v12604_v36, 0.0  ;;  %v897_v47 = vsel %vm223_vm0, %v12625_v52, 0.0 }
 0x19c   :  { %v610_v4 = vadd.f32 %v609_v42, %v608_v48  ;;  %v681_v56 = vadd.f32 %v680_v39, %v679_v27  ;;  %v825_v61 = vrot.slane %v824_v19, 4  ;;  %v898_v33 = vrot.slane %v897_v47, 4 }
 0x19d   :  { %v12822_v8 = vmul.f32 0.5, %v537_v55  ;;  %v753_v3 = vrot.slane %v752_v16, 2  ;;  %v970_v43 = vsel %vm223_vm0, %v12628_v22, 0.0  ;;  %v1043_v9 = vsel %vm223_vm0, %v12635_v44, 0.0 }
 0x19e   :  { %v12828_v17 = vmul.f32 0.5, %v610_v4  ;;  %v682_v15 = vrot.slane %v681_v56, 1  ;;  %v826_v36 = vadd.f32 %v825_v61, %v824_v19  ;;  %v899_v45 = vadd.f32 %v898_v33, %v897_v47 }
 0x19f   :  { %v754_v21 = vadd.f32 %v753_v3, %v752_v16  ;;  %v971_v52 = vrot.slane %v970_v43, 4  ;;  %v1044_v46 = vrot.slane %v1043_v9, 4  ;;  %v1116_v57 = vsel %vm223_vm0, %v12653_v62, 0.0 }
 0x1a0   :  { %v683_v37 = vadd.f32 %v682_v15, %v681_v56  ;;  %v827_v14 = vrot.slane %v826_v36, 2  ;;  %v900_v49 = vrot.slane %v899_v45, 2  ;;  %v1117_v29 = vrot.slane %v1116_v57, 4 }
 0x1a1   :  { %v755_v10 = vrot.slane %v754_v21, 1  ;;  %v972_v22 = vadd.f32 %v971_v52, %v970_v43  ;;  %v1045_v60 = vadd.f32 %v1044_v46, %v1043_v9  ;;  %v1189_v44 = vsel %vm223_vm0, %v12664_v51, 0.0 }
 0x1a2   :  { %v12834_v11 = vmul.f32 0.5, %v683_v37  ;;  %v828_v12 = vadd.f32 %v827_v14, %v826_v36  ;;  %v901_v20 = vadd.f32 %v900_v49, %v899_v45  ;;  %v1118_v50 = vadd.f32 %v1117_v29, %v1116_v57  ;;  %v12846_v37 = vld [vmem:[#allocation7 + $0x840] sm:$0xff] }
 0x1a3   :  { %v9405_v32 = vcombine.low %v12743_v35, %v12745_v24  ;;  %v973_v54 = vrot.slane %v972_v22, 2  ;;  %v1046_v62 = vrot.slane %v1045_v60, 2  ;;  %v1190_v1 = vrot.slane %v1189_v44, 4  ;;  %v12848_v14 = vld [vmem:[#allocation7 + $0x860] sm:$0xff] }
 0x1a4   :  { %v829_v26 = vrot.slane %v828_v12, 1  ;;  %v902_v6 = vrot.slane %v901_v20, 1  ;;  %v1119_v38 = vrot.slane %v1118_v50, 2  ;;  %v1262_v7 = vsel %vm223_vm0, %v12667_v0, 0.0 }
 0x1a5   :  { %v756_v40 = vadd.f32 %v755_v10, %v754_v21  ;;  %v974_v48 = vadd.f32 %v973_v54, %v972_v22  ;;  %v1047_v51 = vadd.f32 %v1046_v62, %v1045_v60  ;;  %v1191_v27 = vadd.f32 %v1190_v1, %v1189_v44  ;;  %v12854_v60 = vld [vmem:[#allocation7 + $0x848] sm:$0xff]  ;;  %v12863_v54 = vld [vmem:[#allocation7 + $0x8a0] sm:$0xff] }
 0x1a6   :  { %v830_v25 = vadd.f32 %v829_v26, %v828_v12  ;;  %v903_v59 = vadd.f32 %v902_v6, %v901_v20  ;;  %v1120_v42 = vadd.f32 %v1119_v38, %v1118_v50  ;;  %v1263_v39 = vrot.slane %v1262_v7, 4  ;;  %v12859_v20 = vld [vmem:[#allocation7 + $0x868] sm:$0xff]  ;;  %v12861_v50 = vld [vmem:[#allocation7 + $0x880] sm:$0xff] }
 0x1a7   :  { %v975_v55 = vrot.slane %v974_v48, 1  ;;  %v1048_v16 = vrot.slane %v1047_v51, 1  ;;  %v1192_v19 = vrot.slane %v1191_v27, 2  ;;  %v1335_v47 = vsel %vm223_vm0, %v12692_v5, 0.0  ;;  %v12868_v6 = vld [vmem:[#allocation7 + $0x888] sm:$0xff] }
 0x1a8   :  { %v847_v4 = vmul.f32 0.5, %v830_v25  ;;  %v920_v56 = vmul.f32 0.5, %v903_v59  ;;  %v1121_v61 = vrot.slane %v1120_v42, 1  ;;  %v1264_v33 = vadd.f32 %v1263_v39, %v1262_v7  ;;  %v12870_v38 = vld [vmem:[#allocation7 + $0x8a8] sm:$0xff]  ;;  %v12874_v7 = vld [vmem:[#allocation7 + $0x8e0] sm:$0xff] }
 0x1a9   :  { %v976_v3 = vadd.f32 %v975_v55, %v974_v48  ;;  %v1049_v0 = vadd.f32 %v1048_v16, %v1047_v51  ;;  %v1193_v43 = vadd.f32 %v1192_v19, %v1191_v27  ;;  %v1336_v9 = vrot.slane %v1335_v47, 4  ;;  %v12879_v25 = vld [vmem:[#allocation7 + $0x8c8] sm:$0xff]  ;;  %v12889_v16 = vld [vmem:[#allocation7 + $0x900] sm:$0xff] }
 0x1aa   :  { %v1122_v15 = vadd.f32 %v1121_v61, %v1120_v42  ;;  %v1265_v36 = vrot.slane %v1264_v33, 2  ;;  %v1364_v45 = vsel %vm1361_vm1, %v12810_v30, %v12812_v34  ;;  %v1404_v21 = vsel %vm1361_vm1, %v847_v4, %v920_v56  ;;  %v12891_v19 = vld [vmem:[#allocation7 + $0x920] sm:$0xff] }
 0x1ab   :  { %v993_v52 = vmul.f32 0.5, %v976_v3  ;;  %v1066_v46 = vmul.f32 0.5, %v1049_v0  ;;  %v1194_v57 = vrot.slane %v1193_v43, 1  ;;  %v1337_v5 = vadd.f32 %v1336_v9, %v1335_v47  ;;  %v12895_v47 = vld [vmem:[#allocation7 + $0x928] sm:$0xff]  ;;  %v12904_v3 = vld [vmem:[#allocation7 + $0x960] sm:$0xff] }
 0x1ac   :  { %v9407_v49 = vcombine.low %v12750_v41, %v12752_v23  ;;  %v1139_v29 = vmul.f32 0.5, %v1122_v15  ;;  %v1266_v10 = vadd.f32 %v1265_v36, %v1264_v33  ;;  %v1369_v22 = vsel %vm223_vm0, %v1364_v45, %v12814_v28  ;;  %v12902_v33 = vld [vmem:[#allocation7 + $0x940] sm:$0xff]  ;;  %v12906_v0 = vld [vmem:[#allocation7 + $0x948] sm:$0xff] }
 0x1ad   :  { %v1195_v30 = vadd.f32 %v1194_v57, %v1193_v43  ;;  %v1338_v34 = vrot.slane %v1337_v5, 2  ;;  %v1375_v44 = vsel %vm1372_vm2, %v1369_v22, %v12816_v18  ;;  %v1409_v12 = vsel %vm223_vm0, %v1404_v21, %v993_v52  ;;  %v12872_v18 = vld [vmem:[#allocation7 + $0x8c0] sm:$0xff]  ;;  %v12908_v43 = vld [vmem:[#allocation7 + $0x968] sm:$0xff] }
 0x1ae   :  { %v773_v62 = vmul.f32 0.5, %v756_v40  ;;  %v1267_v1 = vrot.slane %v1266_v10, 1  ;;  %v1381_v28 = vsel %vm1378_vm3, %v1375_v44, %v12822_v8  ;;  %v1414_v26 = vsel %vm1372_vm2, %v1409_v12, %v1066_v46  ;;  %v12881_v8 = vld [vmem:[#allocation7 + $0x8e8] sm:$0xff]  ;;  %v12915_v21 = vld [vmem:[#allocation7 + $0x980] sm:$0xff] }
 0x1af   :  { %v1212_v48 = vmul.f32 0.5, %v1195_v30  ;;  %v1339_v51 = vadd.f32 %v1338_v34, %v1337_v5  ;;  %v1387_v27 = vsel %vm1384_vm4, %v1381_v28, %v12828_v17  ;;  %v1419_v40 = vsel %vm1378_vm3, %v1414_v26, %v1139_v29  ;;  %v12893_v17 = vld [vmem:[#allocation7 + $0x908] sm:$0xff]  ;;  %v12917_v52 = vld [vmem:[#allocation7 + $0x9a0] sm:$0xff] }
 0x1b0   :  { %v1268_v59 = vadd.f32 %v1267_v1, %v1266_v10  ;;  %v1393_v42 = vsel %vm1390_vm5, %v1387_v27, %v12834_v11  ;;  %v9413_v39 = vcombine.low %v12846_v37, %v12848_v14  ;;  %v9414_v55 = vcombine.high %v12846_v37, %v12848_v14  ;;  %v12925_v10 = vld [vmem:[#allocation7 + $0x988] sm:$0xff]  ;;  %v9136_v27 = vld.sshfl [vmem:[#allocation6 + $0x20] sm:$0x3 pattern:$0x76325410] }
 0x1b1   :  { %v1340_v4 = vrot.slane %v1339_v51, 1  ;;  %v1424_v56 = vsel %vm1384_vm4, %v1419_v40, %v1212_v48  ;;  %v9415_v11 = vcombine.low %v12854_v60, %v12859_v20  ;;  %v9416_v61 = vcombine.high %v12854_v60, %v12859_v20  ;;  %v12940_v26 = vld [vmem:[#allocation7 + $0x9a8] sm:$0xff]  ;;  %v12942_v48 = vld [vmem:[#allocation7 + $0x9c0] sm:$0xff] }
 0x1b2   :  { %v1285_v9 = vmul.f32 0.5, %v1268_v59  ;;  %v1399_v15 = vsel %vm1396_vm6, %v1393_v42, %v773_v62  ;;  %v9421_v36 = vcombine.low %v12861_v50, %v12863_v54  ;;  %v9422_v45 = vcombine.high %v12861_v50, %v12863_v54  ;;  %v9137_v40 = vld.sshfl [vmem:[#allocation6 + $0x28] sm:$0x3 pattern:$0x76325410] }
 0x1b3   :  { %v1341_v46 = vadd.f32 %v1340_v4, %v1339_v51  ;;  %v9423_v57 = vcombine.low %v12868_v6, %v12870_v38  ;;  %v9424_v5 = vcombine.high %v12868_v6, %v12870_v38  ;;  %v9430_v30 = vcombine.high %v12872_v18, %v12874_v7  ;;  %v12944_v51 = vld [vmem:[#allocation7 + $0x9e0] sm:$0xff]  ;;  %v9138_v59 = vld.sshfl [vmem:[#allocation6 + $0x30] sm:$0x3 pattern:$0x76325410] }
 0x1b4   :  { %v1429_v22 = vsel %vm1390_vm5, %v1424_v56, %v1285_v9  ;;  %v9432_v44 = vcombine.high %v12879_v25, %v12881_v8  ;;  %v9139_v42 = vld.sshfl [vmem:[#allocation6 + $0x38] sm:$0x3 pattern:$0x76325410]  ;;  %v618_v9 = vsel %vm223_vm0, %v9138_v59, 0.0  ;;  %v11408_v35 = vmov 0  }
 0x1b5   :  { %v1358_v12 = vmul.f32 0.5, %v1341_v46  ;;  %v13757_v46 = vld [vmem:[#allocation41_spill] sm:$0xff]  ;;  %v9140_v56 = vld.sshfl [vmem:[#allocation6 + $0x40] sm:$0x3 pattern:$0x76325410] }
 0x1b6   :  { %v13758_v1 = vrot.slane %v13757_v46, 4 }
 0x1b7   :  { %v1434_v28 = vsel %vm1396_vm6, %v1429_v22, %v1358_v12  ;;  %v472_v22 = vsel %vm223_vm0, %v9136_v27, 0.0  ;;  %v545_v12 = vsel %vm223_vm0, %v9137_v40, 0.0  ;;  %v619_v40 = vrot.slane %v618_v9, 4 }
 0x1b8   :  { %v12961_v34 = vpack.c.bf16 %v1434_v28, %v1399_v15  ;;  %v254_v62 = vadd.f32 %v13758_v1, %v13757_v46  ;;  %v328_v15 = vadd.f32 %v327_v31, %v13748_v58  ;;  %v401_v28 = vadd.f32 %v400_v53, %v13749_v63  ;;  %v13000_v46 = vld [vmem:[#allocation7 + $0x9e8] sm:$0xff] }
 0x1b9   :  { %v691_v1 = vsel %vm223_vm0, %v9139_v42, 0.0  ;;  %v473_v53 = vrot.slane %v472_v22, 4  ;;  %v546_v27 = vrot.slane %v545_v12, 4  ;;  %v764_v42 = vsel %vm223_vm0, %v9140_v56, 0.0 }
 0x1ba   :  { %3438 = vmatmul.mubr.bf16.vlgmr.msra.gmra.mrb[0].mxu0 %v12961_v34  ;;  %3567 = vmatmul.mubr.bf16.vlgmr.msra.gmra.mrb[0].mxu1 %v12961_v34  ;;  %v255_v58 = vrot.slane %v254_v62, 2  ;;  %v329_v31 = vrot.slane %v328_v15, 2  ;;  %v402_v63 = vrot.slane %v401_v28, 2  ;;  %v692_v59 = vrot.slane %v691_v1, 4 }
 0x1bb   :  { %3449 = vmatpush1.bf16.msra.mxu0 %v9405_v32  ;;  %3578 = vmatpush1.bf16.msra.mxu1 %v9407_v49  ;;  %v765_v32 = vrot.slane %v764_v42, 4  ;;  %v12998_v49 = vld [vmem:[#allocation7 + $0x9c8] sm:$0xff]  ;;  %v620_v4 = vadd.f32 %v619_v40, %v618_v9 }
 0x1bc   :  { %3450 = vmatprep.subr.bf16.mxu0 %v9414_v55  ;;  %3579 = vmatprep.subr.bf16.mxu1 %v9416_v61  ;;  %v256_v24 = vadd.f32 %v255_v58, %v254_v62  ;;  %v330_v41 = vadd.f32 %v329_v31, %v328_v15  ;;  %v403_v23 = vadd.f32 %v402_v63, %v401_v28  ;;  %v9143_v58 = vld.sshfl [vmem:[#allocation6 + $0x5a] sm:$0x3 pattern:$0x76325410] }
 0x1bd   :  { %3480 = vmatprep.mubr.bf16.mxu0 %v11408_v35  ;;  %3609 = vmatprep.mubr.bf16.mxu1 %v11408_v35  ;;  %v474_v55 = vadd.f32 %v473_v53, %v472_v22  ;;  %v547_v61 = vadd.f32 %v546_v27, %v545_v12  ;;  %v693_v29 = vadd.f32 %v692_v59, %v691_v1  ;;  %v621_v37 = vrot.slane %v620_v4, 2  ;;  %v9142_v12 = vld.sshfl [vmem:[#allocation6 + $0x52] sm:$0x3 pattern:$0x76325410] }
 0x1be   :  { %v257_v62 = vrot.slane %v256_v24, 1  ;;  %v331_v56 = vrot.slane %v330_v41, 1  ;;  %v404_v15 = vrot.slane %v403_v23, 1  ;;  %v766_v28 = vadd.f32 %v765_v32, %v764_v42 }
 0x1bf   :  { %3451 = vmatpush1.bf16.msra.mxu0 %v9413_v39  ;;  %3580 = vmatpush1.bf16.msra.mxu1 %v9415_v11  ;;  %v475_v9 = vrot.slane %v474_v55, 2  ;;  %v548_v22 = vrot.slane %v547_v61, 2  ;;  %v694_v14 = vrot.slane %v693_v29, 2  ;;  %v622_v53 = vadd.f32 %v621_v37, %v620_v4 }
 0x1c0   :  { %3452 = vmatprep.subr.bf16.mxu0 %v9422_v45  ;;  %3581 = vmatprep.subr.bf16.mxu1 %v9424_v5  ;;  %v9141_v39 = vld.sshfl [vmem:[#allocation6 + $0x4a] sm:$0x3 pattern:$0x76325410]  ;;  %v258_v60 = vadd.f32 %v257_v62, %v256_v24  ;;  %v332_v20 = vadd.f32 %v331_v56, %v330_v41  ;;  %v405_v11 = vadd.f32 %v404_v15, %v403_v23  ;;  %v767_v1 = vrot.slane %v766_v28, 2 }
 0x1c1   :  { %v476_v31 = vadd.f32 %v475_v9, %v474_v55  ;;  %v549_v63 = vadd.f32 %v548_v22, %v547_v61  ;;  %v695_v27 = vadd.f32 %v694_v14, %v693_v29  ;;  %v9463_v45 = vcombine.low %v12998_v49, %v13000_v46  ;;  %v9144_v42 = vld.sshfl [vmem:[#allocation6 + $0x62] sm:$0x3 pattern:$0x76325410] }
 0x1c2   :  { %v13022_v5 = vmul.f32 0.5, %v258_v60  ;;  %v13024_v40 = vmul.f32 0.5, %v332_v20  ;;  %v768_v59 = vadd.f32 %v767_v1, %v766_v28  ;;  %v623_v6 = vrot.slane %v622_v53, 1 }
 0x1c3   :  { %3453 = vmatpush1.bf16.msra.mxu0 %v9421_v36  ;;  %3582 = vmatpush1.bf16.msra.mxu1 %v9423_v57  ;;  %v477_v50 = vrot.slane %v476_v31, 1  ;;  %v550_v54 = vrot.slane %v549_v63, 1  ;;  %v696_v38 = vrot.slane %v695_v27, 1  ;;  %v838_v57 = vsel %vm223_vm0, %v9141_v39, 0.0 }
 0x1c4   :  { %3454 = vmatprep.subr.bf16.mxu0 %v9430_v30  ;;  %3583 = vmatprep.subr.bf16.mxu1 %v9432_v44  ;;  %v769_v36 = vrot.slane %v768_v59, 1  ;;  %v911_v29 = vsel %vm223_vm0, %v9142_v12, 0.0  ;;  %v984_v4 = vsel %vm223_vm0, %v9143_v58, 0.0  ;;  %v13035_v30 = vmul.f32 0.5, %v405_v11 }
 0x1c5   :  { %v9145_v24 = vld.sshfl [vmem:[#allocation6 + $0x6a] sm:$0x3 pattern:$0x76325410]  ;;  %v478_v32 = vadd.f32 %v477_v50, %v476_v31  ;;  %v551_v55 = vadd.f32 %v550_v54, %v549_v63  ;;  %v624_v44 = vadd.f32 %v623_v6, %v622_v53  ;;  %v13759_v61 = vcombine.low %v12872_v18, %v12874_v7 }
 0x1c6   :  { %v9146_v41 = vld.sshfl [vmem:[#allocation6 + $0x72] sm:$0x3 pattern:$0x76325410]  ;;  %v13760_v62 = vcombine.low %v12879_v25, %v12881_v8  ;;  %v9464_v56 = vcombine.high %v12998_v49, %v13000_v46  ;;  %v839_v15 = vrot.slane %v838_v57, 4  ;;  %v912_v28 = vrot.slane %v911_v29, 4 }
 0x1c7   :  { %v9147_v23 = vld.sshfl [vmem:[#allocation6 + $0x7a] sm:$0x3 pattern:$0x76325410]  ;;  %3455 = vmatpush1.bf16.msra.mxu0 %v13759_v61  ;;  %v985_v9 = vrot.slane %v984_v4, 4  ;;  %v13761_v22 = vcombine.high %v12889_v16, %v12891_v19  ;;  %v13762_v37 = vcombine.high %v12893_v17, %v12895_v47  ;;  %v13051_v18 = vmul.f32 0.5, %v478_v32 }
 0x1c8   :  { %3584 = vmatpush1.bf16.msra.mxu1 %v13760_v62  ;;  %v13053_v7 = vmul.f32 0.5, %v551_v55  ;;  %v13055_v25 = vadd.f32 %v696_v38, %v695_v27  ;;  %v13057_v8 = vadd.f32 %v769_v36, %v768_v59  ;;  %v13059_v14 = vmul.f32 0.5, %v624_v44  ;;  %v9148_v20 = vld.sshfl [vmem:[#allocation6 + $0x82] sm:$0x3 pattern:$0x76325410] }
 0x1c9   :  { %3456 = vmatprep.subr.bf16.mxu0 %v13761_v22  ;;  %3585 = vmatprep.subr.bf16.mxu1 %v13762_v37  ;;  %v840_v39 = vadd.f32 %v839_v15, %v838_v57  ;;  %v913_v12 = vadd.f32 %v912_v28, %v911_v29  ;;  %v986_v60 = vadd.f32 %v985_v9, %v984_v4  ;;  %v1057_v11 = vsel %vm223_vm0, %v9144_v42, 0.0 }
 0x1ca   :  { %v1130_v1 = vsel %vm223_vm0, %v9145_v24, 0.0  ;;  %v1203_v58 = vsel %vm223_vm0, %v9146_v41, 0.0  ;;  %v1276_v31 = vsel %vm223_vm0, %v9147_v23, 0.0  ;;  %v13763_v63 = vcombine.low %v12889_v16, %v12891_v19 }
 0x1cb   :  { %v13764_v53 = vcombine.low %v12893_v17, %v12895_v47  ;;  %v841_v27 = vrot.slane %v840_v39, 2  ;;  %v914_v59 = vrot.slane %v913_v12, 2  ;;  %v987_v50 = vrot.slane %v986_v60, 2 }
 0x1cc   :  { %3457 = vmatpush1.bf16.msra.mxu0 %v13763_v63  ;;  %v1058_v54 = vrot.slane %v1057_v11, 4  ;;  %v13765_v6 = vcombine.high %v12902_v33, %v12904_v3  ;;  %v13766_v38 = vcombine.high %v12906_v0, %v12908_v43  ;;  %v1131_v36 = vrot.slane %v1130_v1, 4 }
 0x1cd   :  { %3586 = vmatpush1.bf16.msra.mxu1 %v13764_v53  ;;  %v1204_v57 = vrot.slane %v1203_v58, 4  ;;  %v1277_v16 = vrot.slane %v1276_v31, 4  ;;  %v1349_v19 = vsel %vm223_vm0, %v9148_v20, 0.0  ;;  %v842_v29 = vadd.f32 %v841_v27, %v840_v39 }
 0x1ce   :  { %3458 = vmatprep.subr.bf16.mxu0 %v13765_v6  ;;  %3587 = vmatprep.subr.bf16.mxu1 %v13766_v38  ;;  %v915_v17 = vadd.f32 %v914_v59, %v913_v12  ;;  %v988_v47 = vadd.f32 %v987_v50, %v986_v60  ;;  %v1059_v4 = vadd.f32 %v1058_v54, %v1057_v11  ;;  %v1350_v23 = vrot.slane %v1349_v19, 4 }
 0x1cf   :  { %v1132_v42 = vadd.f32 %v1131_v36, %v1130_v1  ;;  %v1205_v24 = vadd.f32 %v1204_v57, %v1203_v58  ;;  %v1278_v41 = vadd.f32 %v1277_v16, %v1276_v31  ;;  %v13767_v32 = vcombine.low %v12902_v33, %v12904_v3  ;;  %v13090_v58 = vld [vmem:[#allocation7 + $0x10] sm:$0xff] }
 0x1d0   :  { %v13768_v55 = vcombine.low %v12906_v0, %v12908_v43  ;;  %v843_v44 = vrot.slane %v842_v29, 1  ;;  %v916_v61 = vrot.slane %v915_v17, 1  ;;  %v989_v62 = vrot.slane %v988_v47, 1  ;;  %v13092_v31 = vld [vmem:[#allocation7 + $0x30] sm:$0xff] }
 0x1d1   :  { %3459 = vmatpush1.bf16.msra.mxu0 %v13767_v32  ;;  %v1060_v15 = vrot.slane %v1059_v4, 2  ;;  %v13769_v28 = vcombine.high %v12915_v21, %v12917_v52  ;;  %v13770_v9 = vcombine.high %v12925_v10, %v12940_v26  ;;  %v1133_v22 = vrot.slane %v1132_v42, 2 }
 0x1d2   :  { %3588 = vmatpush1.bf16.msra.mxu1 %v13768_v55  ;;  %v1206_v37 = vrot.slane %v1205_v24, 2  ;;  %v1279_v33 = vrot.slane %v1278_v41, 2  ;;  %v1351_v3 = vadd.f32 %v1350_v23, %v1349_v19  ;;  %v844_v39 = vadd.f32 %v843_v44, %v842_v29  ;;  %v1440_v19 = vld [vmem:[#allocation7 + $0x18] sm:$0xff] }
 0x1d3   :  { %3460 = vmatprep.subr.bf16.mxu0 %v13769_v28  ;;  %3589 = vmatprep.subr.bf16.mxu1 %v13770_v9  ;;  %v917_v12 = vadd.f32 %v916_v61, %v915_v17  ;;  %v990_v0 = vadd.f32 %v989_v62, %v988_v47  ;;  %v1061_v43 = vadd.f32 %v1060_v15, %v1059_v4  ;;  %v702_v57 = vmul.f32 0.5, %v13055_v25  ;;  %v1448_v44 = vld [vmem:[#allocation7 + $0x58] sm:$0xff] }
 0x1d4   :  { %v1134_v60 = vadd.f32 %v1133_v22, %v1132_v42  ;;  %v1207_v20 = vadd.f32 %v1206_v37, %v1205_v24  ;;  %v1280_v11 = vadd.f32 %v1279_v33, %v1278_v41  ;;  %v1352_v1 = vrot.slane %v1351_v3, 2  ;;  %v1444_v42 = vld [vmem:[#allocation7 + $0x38] sm:$0xff] }
 0x1d5   :  { %v13771_v63 = vcombine.low %v12915_v21, %v12917_v52  ;;  %v13772_v53 = vcombine.low %v12925_v10, %v12940_v26  ;;  %v849_v27 = vmul.f32 0.5, %v844_v39  ;;  %v922_v59 = vmul.f32 0.5, %v917_v12  ;;  %v1452_v28 = vld [vmem:[#allocation7 + $0x78] sm:$0xff]  ;;  %v1455_v39 = vld [vmem:[#allocation7 + $0x90] sm:$0xff] }
 0x1d6   :  { %v995_v50 = vmul.f32 0.5, %v990_v0  ;;  %v1062_v54 = vrot.slane %v1061_v43, 1  ;;  %v13773_v6 = vcombine.high %v12942_v48, %v12944_v51  ;;  %v1135_v38 = vrot.slane %v1134_v60, 1  ;;  %v1459_v12 = vld [vmem:[#allocation7 + $0xb0] sm:$0xff]  ;;  %v1456_v0 = vld [vmem:[#allocation7 + $0x98] sm:$0xff] }
 0x1d7   :  { %3461 = vmatpush1.bf16.msra.mxu0 %v13771_v63  ;;  %3590 = vmatpush1.bf16.msra.mxu1 %v13772_v53  ;;  %v1208_v36 = vrot.slane %v1207_v20, 1  ;;  %v1281_v21 = vrot.slane %v1280_v11, 1  ;;  %v1353_v52 = vadd.f32 %v1352_v1, %v1351_v3  ;;  %v1366_v26 = vsel %vm1361_vm1, %v13022_v5, %v13024_v40  ;;  %v1463_v63 = vld [vmem:[#allocation7 + $0xd0] sm:$0xff] }
 0x1d8   :  { %3462 = vmatprep.subr.bf16.mxu0 %v13773_v6  ;;  %3591 = vmatprep.subr.bf16.mxu1 %v9464_v56  ;;  %v1063_v10 = vadd.f32 %v1062_v54, %v1061_v43  ;;  %v1406_v16 = vsel %vm1361_vm1, %v849_v27, %v922_v59  ;;  %v1136_v29 = vadd.f32 %v1135_v38, %v1134_v60  ;;  %v1467_v53 = vld [vmem:[#allocation7 + $0xf0] sm:$0xff]  ;;  %v1468_v59 = vld [vmem:[#allocation7 + $0xf8] sm:$0xff] }
 0x1d9   :  { %v1209_v17 = vadd.f32 %v1208_v36, %v1207_v20  ;;  %v1282_v47 = vadd.f32 %v1281_v21, %v1280_v11  ;;  %v1354_v4 = vrot.slane %v1353_v52, 1  ;;  %v13774_v56 = vcombine.low %v12942_v48, %v12944_v51  ;;  %v1460_v20 = vld [vmem:[#allocation7 + $0xb8] sm:$0xff]  ;;  %v1471_v38 = vld [vmem:[#allocation7 + $0x110] sm:$0xff] }
 0x1da   :  { %v1068_v25 = vmul.f32 0.5, %v1063_v10  ;;  %v1371_v5 = vsel %vm223_vm0, %v1366_v26, %v13035_v30  ;;  %v1411_v40 = vsel %vm223_vm0, %v1406_v16, %v995_v50  ;;  %v9154_v24 = vcombine.high %v13090_v58, %v13092_v31  ;;  %v1451_v30 = vld [vmem:[#allocation7 + $0x70] sm:$0xff]  ;;  %v13775_v50 = vld [vmem:[#allocation36_spill] sm:$0xff] }
 0x1db   :  { %3463 = vmatpush1.bf16.msra.mxu0 %v13774_v56  ;;  %3592 = vmatpush1.bf16.msra.mxu1 %v9463_v45  ;;  %v1141_v41 = vmul.f32 0.5, %v1136_v29  ;;  %v1214_v23 = vmul.f32 0.5, %v1209_v17  ;;  %v1287_v32 = vmul.f32 0.5, %v1282_v47  ;;  %v1355_v55 = vadd.f32 %v1354_v4, %v1353_v52  ;;  %v1447_v45 = vld [vmem:[#allocation7 + $0x50] sm:$0xff]  ;;  %v1472_v21 = vld [vmem:[#allocation7 + $0x118] sm:$0xff] }
 0x1dc   :  { %v775_v48 = vmul.f32 0.5, %v13057_v8  ;;  %v1377_v51 = vsel %vm1372_vm2, %v1371_v5, %v13051_v18  ;;  %v1416_v49 = vsel %vm1372_vm2, %v1411_v40, %v1068_v25  ;;  %3620 = vmatprep.subr.bf16.mxu0 %v9154_v24  ;;  %v9156_v46 = vcombine.high %v1440_v19, %v1444_v42  ;;  %v1475_v36 = vld [vmem:[#allocation7 + $0x130] sm:$0xff]  ;;  %v1476_v10 = vld [vmem:[#allocation7 + $0x138] sm:$0xff] }
 0x1dd   :  { %v1360_v61 = vmul.f32 0.5, %v1355_v55  ;;  %v1383_v62 = vsel %vm1378_vm3, %v1377_v51, %v13053_v7  ;;  %v1421_v15 = vsel %vm1378_vm3, %v1416_v49, %v1141_v41  ;;  %v9153_v7 = vcombine.low %v13090_v58, %v13092_v31  ;;  %v1464_v58 = vld [vmem:[#allocation7 + $0xd8] sm:$0xff]  ;;  %v1483_v29 = vld [vmem:[#allocation7 + $0x170] sm:$0xff] }
 0x1de   :  { %v1389_v8 = vsel %vm1384_vm4, %v1383_v62, %v13059_v14  ;;  %v1426_v9 = vsel %vm1384_vm4, %v1421_v15, %v1214_v23  ;;  %3749 = vmatprep.subr.bf16.mxu1 %v9156_v46  ;;  %v9155_v3 = vcombine.low %v1440_v19, %v1444_v42  ;;  %v9162_v14 = vcombine.high %v1447_v45, %v1451_v30  ;;  %v1479_v19 = vld [vmem:[#allocation7 + $0x150] sm:$0xff]  ;;  %v1480_v17 = vld [vmem:[#allocation7 + $0x158] sm:$0xff] }
 0x1df   :  { %v1395_v18 = vsel %vm1390_vm5, %v1389_v8, %v702_v57  ;;  %v1431_v22 = vsel %vm1390_vm5, %v1426_v9, %v1287_v32  ;;  %v9164_v60 = vcombine.high %v1448_v44, %v1452_v28  ;;  %v9161_v11 = vcombine.low %v1447_v45, %v1451_v30  ;;  %v1484_v42 = vld [vmem:[#allocation7 + $0x178] sm:$0xff]  ;;  %v1487_v5 = vld [vmem:[#allocation7 + $0x190] sm:$0xff] }
 0x1e0   :  { %v1401_v37 = vsel %vm1396_vm6, %v1395_v18, %v775_v48  ;;  %v1436_v33 = vsel %vm1396_vm6, %v1431_v22, %v1360_v61  ;;  %v9163_v1 = vcombine.low %v1448_v44, %v1452_v28  ;;  %v9170_v31 = vcombine.high %v1455_v39, %v1459_v12  ;;  %v1491_v40 = vld [vmem:[#allocation7 + $0x1b0] sm:$0xff]  ;;  %v1488_v24 = vld [vmem:[#allocation7 + $0x198] sm:$0xff] }
 0x1e1   :  { %v13138_v43 = vpack.c.bf16 %v1436_v33, %v1401_v37  ;;  %v9172_v27 = vcombine.high %v1456_v0, %v1460_v20  ;;  %v9169_v54 = vcombine.low %v1455_v39, %v1459_v12  ;;  %v9171_v6 = vcombine.low %v1456_v0, %v1460_v20  ;;  %v1492_v32 = vld [vmem:[#allocation7 + $0x1b8] sm:$0xff]  ;;  %v1495_v51 = vld [vmem:[#allocation7 + $0x1d0] sm:$0xff] }
 0x1e2   :  { %v9178_v52 = vcombine.high %v1463_v63, %v1467_v53  ;;  %v9180_v57 = vcombine.high %v1464_v58, %v1468_v59  ;;  %v9177_v26 = vcombine.low %v1463_v63, %v1467_v53  ;;  %v9179_v16 = vcombine.low %v1464_v58, %v1468_v59  ;;  %v1499_v49 = vld [vmem:[#allocation7 + $0x1f0] sm:$0xff]  ;;  %v1496_v46 = vld [vmem:[#allocation7 + $0x1d8] sm:$0xff] }
 0x1e3   :  { %3481 = vmatmul.mubr.bf16.vlgmr.msra.gmra.mrb[0].mxu0 %v13138_v43  ;;  %3610 = vmatmul.mubr.bf16.vlgmr.msra.gmra.mrb[0].mxu1 %v13138_v43  ;;  %v9186_v47 = vcombine.high %v1471_v38, %v1475_v36  ;;  %v9188_v4 = vcombine.high %v1472_v21, %v1476_v10  ;;  %v9185_v56 = vcombine.low %v1471_v38, %v1475_v36  ;;  %v1500_v44 = vld [vmem:[#allocation7 + $0x1f8] sm:$0xff]  ;;  %v1503_v15 = vld [vmem:[#allocation7 + $0x210] sm:$0xff] }
 0x1e4   :  { %3621 = vmatpush1.bf16.msra.mxu0 %v9153_v7  ;;  %3750 = vmatpush1.bf16.msra.mxu1 %v9155_v3  ;;  %v9187_v25 = vcombine.low %v1472_v21, %v1476_v10  ;;  %v9194_v41 = vcombine.high %v1479_v19, %v1483_v29  ;;  %v9196_v23 = vcombine.high %v1480_v17, %v1484_v42  ;;  %v1507_v28 = vld [vmem:[#allocation7 + $0x230] sm:$0xff]  ;;  %v1504_v8 = vld [vmem:[#allocation7 + $0x218] sm:$0xff] }
 0x1e5   :  { %3622 = vmatprep.subr.bf16.mxu0 %v9162_v14  ;;  %3751 = vmatprep.subr.bf16.mxu1 %v9164_v60  ;;  %v9193_v55 = vcombine.low %v1479_v19, %v1483_v29  ;;  %v9195_v48 = vcombine.low %v1480_v17, %v1484_v42  ;;  %v9202_v45 = vcombine.high %v1487_v5, %v1491_v40  ;;  %v1508_v22 = vld [vmem:[#allocation7 + $0x238] sm:$0xff]  ;;  %v1511_v7 = vld [vmem:[#allocation7 + $0x250] sm:$0xff] }
 0x1e6   :  { %3652 = vmatprep.mubr.bf16.mxu0 %v13775_v50  ;;  %3781 = vmatprep.mubr.bf16.mxu1 %v13775_v50  ;;  %v9204_v30 = vcombine.high %v1488_v24, %v1492_v32  ;;  %v9201_v61 = vcombine.low %v1487_v5, %v1491_v40  ;;  %v9203_v62 = vcombine.low %v1488_v24, %v1492_v32  ;;  %v1515_v3 = vld [vmem:[#allocation7 + $0x270] sm:$0xff]  ;;  %v1512_v39 = vld [vmem:[#allocation7 + $0x258] sm:$0xff] }
 0x1e7   :  { %v9210_v9 = vcombine.high %v1495_v51, %v1499_v49  ;;  %v9212_v18 = vcombine.high %v1496_v46, %v1500_v44  ;;  %v9209_v37 = vcombine.low %v1495_v51, %v1499_v49  ;;  %v9211_v33 = vcombine.low %v1496_v46, %v1500_v44  ;;  %v1516_v14 = vld [vmem:[#allocation7 + $0x278] sm:$0xff]  ;;  %v1527_v50 = vld [vmem:[#allocation7 + $0x2d0] sm:$0xff] }
 0x1e8   :  { %3623 = vmatpush1.bf16.msra.mxu0 %v9161_v11  ;;  %3752 = vmatpush1.bf16.msra.mxu1 %v9163_v1  ;;  %v9218_v12 = vcombine.high %v1503_v15, %v1507_v28  ;;  %v9220_v0 = vcombine.high %v1504_v8, %v1508_v22  ;;  %v9217_v60 = vcombine.low %v1503_v15, %v1507_v28  ;;  %v1519_v11 = vld [vmem:[#allocation7 + $0x290] sm:$0xff]  ;;  %v1520_v63 = vld [vmem:[#allocation7 + $0x298] sm:$0xff] }
 0x1e9   :  { %3624 = vmatprep.subr.bf16.mxu0 %v9170_v31  ;;  %3753 = vmatprep.subr.bf16.mxu1 %v9172_v27  ;;  %v9219_v20 = vcombine.low %v1504_v8, %v1508_v22  ;;  %v1523_v1 = vld [vmem:[#allocation7 + $0x2b0] sm:$0xff]  ;;  %v1524_v53 = vld [vmem:[#allocation7 + $0x2b8] sm:$0xff]  ;;  %v9226_v58 = vcombine.high %v1511_v7, %v1515_v3  ;;  %v9228_v31 = vcombine.high %v1512_v39, %v1516_v14 }
 0x1ea   :  { %v9225_v27 = vcombine.low %v1511_v7, %v1515_v3  ;;  %v9227_v59 = vcombine.low %v1512_v39, %v1516_v14  ;;  %v1532_v38 = vld [vmem:[#allocation7 + $0x2f8] sm:$0xff]  ;;  %v9234_v36 = vcombine.high %v1519_v11, %v1523_v1  ;;  %v9236_v21 = vcombine.high %v1520_v63, %v1524_v53  ;;  %v1535_v10 = vld [vmem:[#allocation7 + $0x310] sm:$0xff] }
 0x1eb   :  { %v1540_v19 = vld [vmem:[#allocation7 + $0x338] sm:$0xff]  ;;  %v1543_v42 = vld [vmem:[#allocation7 + $0x350] sm:$0xff] }
 0x1ec   :  { %3625 = vmatpush1.bf16.msra.mxu0 %v9169_v54  ;;  %3754 = vmatpush1.bf16.msra.mxu1 %v9171_v6  ;;  %v1531_v54 = vld [vmem:[#allocation7 + $0x2f0] sm:$0xff]  ;;  %v1528_v6 = vld [vmem:[#allocation7 + $0x2d8] sm:$0xff] }
 0x1ed   :  { %3626 = vmatprep.subr.bf16.mxu0 %v9178_v52  ;;  %3755 = vmatprep.subr.bf16.mxu1 %v9180_v57  ;;  %v9233_v52 = vcombine.low %v1519_v11, %v1523_v1  ;;  %v9235_v57 = vcombine.low %v1520_v63, %v1524_v53  ;;  %v9242_v29 = vcombine.high %v1527_v50, %v1531_v54  ;;  %v1548_v5 = vld [vmem:[#allocation7 + $0x378] sm:$0xff]  ;;  %v1551_v32 = vld [vmem:[#allocation7 + $0x390] sm:$0xff] }
 0x1ee   :  { %v9244_v17 = vcombine.high %v1528_v6, %v1532_v38  ;;  %v1556_v51 = vld [vmem:[#allocation7 + $0x3b8] sm:$0xff]  ;;  %v1559_v44 = vld [vmem:[#allocation7 + $0x3d0] sm:$0xff] }
 0x1ef   :  { %v1564_v15 = vld [vmem:[#allocation7 + $0x3f8] sm:$0xff]  ;;  %v1567_v22 = vld [vmem:[#allocation7 + $0x410] sm:$0xff] }
 0x1f0   :  { %3627 = vmatpush1.bf16.msra.mxu0 %v9177_v26  ;;  %3756 = vmatpush1.bf16.msra.mxu1 %v9179_v16  ;;  %v1539_v26 = vld [vmem:[#allocation7 + $0x330] sm:$0xff]  ;;  %v1536_v16 = vld [vmem:[#allocation7 + $0x318] sm:$0xff] }
 0x1f1   :  { %3628 = vmatprep.subr.bf16.mxu0 %v9186_v47  ;;  %3757 = vmatprep.subr.bf16.mxu1 %v9188_v4  ;;  %v9241_v47 = vcombine.low %v1527_v50, %v1531_v54  ;;  %v9243_v4 = vcombine.low %v1528_v6, %v1532_v38  ;;  %v9250_v40 = vcombine.high %v1535_v10, %v1539_v26  ;;  %v1572_v7 = vld [vmem:[#allocation7 + $0x438] sm:$0xff]  ;;  %v1575_v14 = vld [vmem:[#allocation7 + $0x450] sm:$0xff]  ;;  %v13776_v38 = vld [vmem:[#allocation37_spill] sm:$0xff] }
 0x1f2   :  { %v9252_v24 = vcombine.high %v1536_v16, %v1540_v19  ;;  %v1580_v11 = vld [vmem:[#allocation7 + $0x478] sm:$0xff] }
 0x1f3   :  { %v1588_v50 = vld [vmem:[#allocation7 + $0x4b8] sm:$0xff] }
 0x1f4   :  { %3629 = vmatpush1.bf16.msra.mxu0 %v9185_v56  ;;  %3758 = vmatpush1.bf16.msra.mxu1 %v9187_v25  ;;  %v1547_v56 = vld [vmem:[#allocation7 + $0x370] sm:$0xff]  ;;  %v1544_v25 = vld [vmem:[#allocation7 + $0x358] sm:$0xff] }
 0x1f5   :  { %3630 = vmatprep.subr.bf16.mxu0 %v9194_v41  ;;  %3759 = vmatprep.subr.bf16.mxu1 %v9196_v23  ;;  %v9249_v41 = vcombine.low %v1535_v10, %v1539_v26  ;;  %v9251_v23 = vcombine.low %v1536_v16, %v1540_v19  ;;  %v9258_v49 = vcombine.high %v1543_v42, %v1547_v56  ;;  %v1592_v10 = vld [vmem:[#allocation7 + $0x4d8] sm:$0xff] }
 0x1f6   :  { %v9260_v46 = vcombine.high %v1544_v25, %v1548_v5  ;;  %v1596_v26 = vld [vmem:[#allocation7 + $0x4f8] sm:$0xff] }
 0x1f8   :  { %3631 = vmatpush1.bf16.msra.mxu0 %v9193_v55  ;;  %3760 = vmatpush1.bf16.msra.mxu1 %v9195_v48  ;;  %v1555_v55 = vld [vmem:[#allocation7 + $0x3b0] sm:$0xff]  ;;  %v1552_v48 = vld [vmem:[#allocation7 + $0x398] sm:$0xff] }
 0x1f9   :  { %3632 = vmatprep.subr.bf16.mxu0 %v9202_v45  ;;  %3761 = vmatprep.subr.bf16.mxu1 %v9204_v30  ;;  %v9257_v45 = vcombine.low %v1543_v42, %v1547_v56  ;;  %v9259_v30 = vcombine.low %v1544_v25, %v1548_v5  ;;  %v9266_v28 = vcombine.high %v1551_v32, %v1555_v55  ;;  %v1600_v42 = vld [vmem:[#allocation7 + $0x518] sm:$0xff] }
 0x1fa   :  { %v9268_v8 = vcombine.high %v1552_v48, %v1556_v51  ;;  %v1604_v56 = vld [vmem:[#allocation7 + $0x538] sm:$0xff]  ;;  %v9308_v5 = vcombine.high %v1592_v10, %v1596_v26 }
 0x1fc   :  { %3633 = vmatpush1.bf16.msra.mxu0 %v9201_v61  ;;  %3762 = vmatpush1.bf16.msra.mxu1 %v9203_v62  ;;  %v1563_v61 = vld [vmem:[#allocation7 + $0x3f0] sm:$0xff]  ;;  %v1560_v62 = vld [vmem:[#allocation7 + $0x3d8] sm:$0xff] }
 0x1fd   :  { %3634 = vmatprep.subr.bf16.mxu0 %v9210_v9  ;;  %3763 = vmatprep.subr.bf16.mxu1 %v9212_v18  ;;  %v9265_v9 = vcombine.low %v1551_v32, %v1555_v55  ;;  %v9267_v18 = vcombine.low %v1552_v48, %v1556_v51  ;;  %v9274_v3 = vcombine.high %v1559_v44, %v1563_v61  ;;  %v1608_v32 = vld [vmem:[#allocation7 + $0x558] sm:$0xff] }
 0x1fe   :  { %v9276_v39 = vcombine.high %v1560_v62, %v1564_v15  ;;  %v9316_v48 = vcombine.high %v1600_v42, %v1604_v56 }
 0x200   :  { %3635 = vmatpush1.bf16.msra.mxu0 %v9209_v37  ;;  %3764 = vmatpush1.bf16.msra.mxu1 %v9211_v33  ;;  %v1571_v37 = vld [vmem:[#allocation7 + $0x430] sm:$0xff]  ;;  %v1568_v33 = vld [vmem:[#allocation7 + $0x418] sm:$0xff] }
 0x201   :  { %3636 = vmatprep.subr.bf16.mxu0 %v9218_v12  ;;  %3765 = vmatprep.subr.bf16.mxu1 %v9220_v0  ;;  %v9273_v12 = vcombine.low %v1559_v44, %v1563_v61  ;;  %v9275_v0 = vcombine.low %v1560_v62, %v1564_v15  ;;  %v9282_v1 = vcombine.high %v1567_v22, %v1571_v37  ;;  %v1620_v44 = vld [vmem:[#allocation7 + $0x5b8] sm:$0xff] }
 0x202   :  { %v9284_v63 = vcombine.high %v1568_v33, %v1572_v7  ;;  %v9281_v53 = vcombine.low %v1567_v22, %v1571_v37  ;;  %v1628_v22 = vld [vmem:[#allocation7 + $0x5f8] sm:$0xff] }
 0x204   :  { %3637 = vmatpush1.bf16.msra.mxu0 %v9217_v60  ;;  %3766 = vmatpush1.bf16.msra.mxu1 %v9219_v20  ;;  %v1579_v60 = vld [vmem:[#allocation7 + $0x470] sm:$0xff]  ;;  %v1576_v20 = vld [vmem:[#allocation7 + $0x458] sm:$0xff] }
 0x205   :  { %3638 = vmatprep.subr.bf16.mxu0 %v9226_v58  ;;  %3767 = vmatprep.subr.bf16.mxu1 %v9228_v31  ;;  %v9283_v58 = vcombine.low %v1568_v33, %v1572_v7  ;;  %v1583_v31 = vld [vmem:[#allocation7 + $0x490] sm:$0xff]  ;;  %v9290_v54 = vcombine.high %v1575_v14, %v1579_v60  ;;  %v9292_v6 = vcombine.high %v1576_v20, %v1580_v11 }
 0x208   :  { %3639 = vmatpush1.bf16.msra.mxu0 %v9225_v27  ;;  %3768 = vmatpush1.bf16.msra.mxu1 %v9227_v59  ;;  %v1587_v27 = vld [vmem:[#allocation7 + $0x4b0] sm:$0xff]  ;;  %v1584_v59 = vld [vmem:[#allocation7 + $0x498] sm:$0xff] }
 0x209   :  { %3640 = vmatprep.subr.bf16.mxu0 %v9234_v36  ;;  %3769 = vmatprep.subr.bf16.mxu1 %v9236_v21  ;;  %v9289_v36 = vcombine.low %v1575_v14, %v1579_v60  ;;  %v9291_v21 = vcombine.low %v1576_v20, %v1580_v11  ;;  %v9298_v16 = vcombine.high %v1583_v31, %v1587_v27  ;;  %v1635_v14 = vld [vmem:[#allocation7 + $0x630] sm:$0xff]  ;;  %v1632_v60 = vld [vmem:[#allocation7 + $0x618] sm:$0xff] }
 0x20a   :  { %v9300_v19 = vcombine.high %v1584_v59, %v1588_v50  ;;  %v1636_v20 = vld [vmem:[#allocation7 + $0x638] sm:$0xff] }
 0x20c   :  { %3641 = vmatpush1.bf16.msra.mxu0 %v9233_v52  ;;  %3770 = vmatpush1.bf16.msra.mxu1 %v9235_v57  ;;  %v1591_v52 = vld [vmem:[#allocation7 + $0x4d0] sm:$0xff] }
 0x20d   :  { %3642 = vmatprep.subr.bf16.mxu0 %v9242_v29  ;;  %3771 = vmatprep.subr.bf16.mxu1 %v9244_v17  ;;  %v1595_v57 = vld [vmem:[#allocation7 + $0x4f0] sm:$0xff]  ;;  %v9297_v29 = vcombine.low %v1583_v31, %v1587_v27  ;;  %v9299_v17 = vcombine.low %v1584_v59, %v1588_v50  ;;  %v1640_v27 = vld [vmem:[#allocation7 + $0x658] sm:$0xff] }
 0x20e   :  { %v9306_v25 = vcombine.high %v1591_v52, %v1595_v57  ;;  %v1643_v31 = vld [vmem:[#allocation7 + $0x670] sm:$0xff]  ;;  %v1644_v59 = vld [vmem:[#allocation7 + $0x678] sm:$0xff] }
 0x210   :  { %3643 = vmatpush1.bf16.msra.mxu0 %v9241_v47  ;;  %3772 = vmatpush1.bf16.msra.mxu1 %v9243_v4  ;;  %v1599_v47 = vld [vmem:[#allocation7 + $0x510] sm:$0xff] }
 0x211   :  { %3644 = vmatprep.subr.bf16.mxu0 %v9250_v40  ;;  %3773 = vmatprep.subr.bf16.mxu1 %v9252_v24  ;;  %v1603_v4 = vld [vmem:[#allocation7 + $0x530] sm:$0xff]  ;;  %v9305_v40 = vcombine.low %v1591_v52, %v1595_v57  ;;  %v9307_v24 = vcombine.low %v1592_v10, %v1596_v26  ;;  %v1648_v52 = vld [vmem:[#allocation7 + $0x698] sm:$0xff]  ;;  %v9355_v26 = vcombine.low %v1640_v27, %v1644_v59 }
 0x212   :  { %v9314_v55 = vcombine.high %v1599_v47, %v1603_v4  ;;  %v9313_v51 = vcombine.low %v1599_v47, %v1603_v4  ;;  %v1652_v57 = vld [vmem:[#allocation7 + $0x6b8] sm:$0xff] }
 0x213   :  { %v9364_v4 = vcombine.high %v1648_v52, %v1652_v57 }
 0x214   :  { %3645 = vmatpush1.bf16.msra.mxu0 %v9249_v41  ;;  %3774 = vmatpush1.bf16.msra.mxu1 %v9251_v23  ;;  %v1607_v41 = vld [vmem:[#allocation7 + $0x550] sm:$0xff] }
 0x215   :  { %3646 = vmatprep.subr.bf16.mxu0 %v9258_v49  ;;  %3775 = vmatprep.subr.bf16.mxu1 %v9260_v46  ;;  %v1611_v23 = vld [vmem:[#allocation7 + $0x570] sm:$0xff]  ;;  %v9315_v49 = vcombine.low %v1600_v42, %v1604_v56  ;;  %v9363_v56 = vcombine.low %v1648_v52, %v1652_v57 }
 0x216   :  { %v1615_v46 = vld [vmem:[#allocation7 + $0x590] sm:$0xff]  ;;  %v9322_v61 = vcombine.high %v1607_v41, %v1611_v23  ;;  %v9321_v15 = vcombine.low %v1607_v41, %v1611_v23 }
 0x218   :  { %3647 = vmatpush1.bf16.msra.mxu0 %v9257_v45  ;;  %3776 = vmatpush1.bf16.msra.mxu1 %v9259_v30  ;;  %v1619_v45 = vld [vmem:[#allocation7 + $0x5b0] sm:$0xff]  ;;  %v1616_v30 = vld [vmem:[#allocation7 + $0x598] sm:$0xff] }
 0x219   :  { %3648 = vmatprep.subr.bf16.mxu0 %v9266_v28  ;;  %3777 = vmatprep.subr.bf16.mxu1 %v9268_v8  ;;  %v1623_v8 = vld [vmem:[#allocation7 + $0x5d0] sm:$0xff]  ;;  %v9330_v37 = vcombine.high %v1615_v46, %v1619_v45  ;;  %v9332_v33 = vcombine.high %v1616_v30, %v1620_v44  ;;  %v9329_v7 = vcombine.low %v1615_v46, %v1619_v45 }
 0x21c   :  { %3649 = vmatpush1.bf16.msra.mxu0 %v9265_v9  ;;  %3778 = vmatpush1.bf16.msra.mxu1 %v9267_v18  ;;  %v1627_v9 = vld [vmem:[#allocation7 + $0x5f0] sm:$0xff]  ;;  %v1624_v18 = vld [vmem:[#allocation7 + $0x5d8] sm:$0xff] }
 0x21d   :  { %3650 = vmatprep.subr.bf16.mxu0 %v9274_v3  ;;  %3779 = vmatprep.subr.bf16.mxu1 %v9276_v39  ;;  %v9331_v3 = vcombine.low %v1616_v30, %v1620_v44  ;;  %v1631_v39 = vld [vmem:[#allocation7 + $0x610] sm:$0xff]  ;;  %v9337_v11 = vcombine.low %v1623_v8, %v1627_v9 }
 0x21e   :  { %v9345_v50 = vcombine.low %v1631_v39, %v1635_v14 }
 0x220   :  { %3651 = vmatpush1.bf16.msra.mxu0 %v9273_v12  ;;  %3780 = vmatpush1.bf16.msra.mxu1 %v9275_v0  ;;  %v9338_v12 = vcombine.high %v1623_v8, %v1627_v9  ;;  %v9340_v0 = vcombine.high %v1624_v18, %v1628_v22 }
 0x221   :  { %3663 = vmatprep.subr.bf16.mxu0 %v9282_v1  ;;  %3792 = vmatprep.subr.bf16.mxu1 %v9284_v63  ;;  %v9339_v1 = vcombine.low %v1624_v18, %v1628_v22  ;;  %v9346_v63 = vcombine.high %v1631_v39, %v1635_v14 }
 0x223   :  { %3653 = vmatmul.mubr.bf16.vlgmr.msra.gmra.mrb[4].mxu0 %v13776_v38  ;;  %3782 = vmatmul.mubr.bf16.vlgmr.msra.gmra.mrb[4].mxu1 %v13776_v38  ;;  %v9356_v38 = vcombine.high %v1640_v27, %v1644_v59 }
 0x224   :  { %3664 = vmatpush1.bf16.msra.mxu0 %v9281_v53  ;;  %3793 = vmatpush1.bf16.msra.mxu1 %v9283_v58  ;;  %v9348_v53 = vcombine.high %v1632_v60, %v1636_v20  ;;  %v1639_v58 = vld [vmem:[#allocation7 + $0x650] sm:$0xff] }
 0x225   :  { %3665 = vmatprep.subr.bf16.mxu0 %v9290_v54  ;;  %3794 = vmatprep.subr.bf16.mxu1 %v9292_v6  ;;  %v9347_v54 = vcombine.low %v1632_v60, %v1636_v20  ;;  %v9354_v6 = vcombine.high %v1639_v58, %v1643_v31  ;;  %v9353_v10 = vcombine.low %v1639_v58, %v1643_v31 }
 0x226   :  { %3695 = vmatprep.mubr.bf16.mxu0 %v12804_v13  ;;  %3824 = vmatprep.mubr.bf16.mxu1 %v12804_v13  ;;  %v1612_v13 = vld [vmem:[#allocation7 + $0x578] sm:$0xff] }
 0x227   :  { %v9324_v62 = vcombine.high %v1608_v32, %v1612_v13  ;;  %v9323_v28 = vcombine.low %v1608_v32, %v1612_v13 }
 0x228   :  { %3666 = vmatpush1.bf16.msra.mxu0 %v9289_v36  ;;  %3795 = vmatpush1.bf16.msra.mxu1 %v9291_v21  ;;  %v1647_v36 = vld [vmem:[#allocation7 + $0x690] sm:$0xff] }
 0x229   :  { %3667 = vmatprep.subr.bf16.mxu0 %v9298_v16  ;;  %3796 = vmatprep.subr.bf16.mxu1 %v9300_v19  ;;  %v1651_v21 = vld [vmem:[#allocation7 + $0x6b0] sm:$0xff] }
 0x22a   :  { %v1655_v16 = vld [vmem:[#allocation7 + $0x6d0] sm:$0xff]  ;;  %v9362_v47 = vcombine.high %v1647_v36, %v1651_v21  ;;  %v9361_v42 = vcombine.low %v1647_v36, %v1651_v21 }
 0x22b   :  { %v1659_v19 = vld [vmem:[#allocation7 + $0x6f0] sm:$0xff] }
 0x22c   :  { %3668 = vmatpush1.bf16.msra.mxu0 %v9297_v29  ;;  %3797 = vmatpush1.bf16.msra.mxu1 %v9299_v17  ;;  %v1656_v29 = vld [vmem:[#allocation7 + $0x6d8] sm:$0xff]  ;;  %v9370_v41 = vcombine.high %v1655_v16, %v1659_v19  ;;  %v9369_v32 = vcombine.low %v1655_v16, %v1659_v19 }
 0x22d   :  { %3669 = vmatprep.subr.bf16.mxu0 %v9306_v25  ;;  %3798 = vmatprep.subr.bf16.mxu1 %v9308_v5  ;;  %v1660_v17 = vld [vmem:[#allocation7 + $0x6f8] sm:$0xff]  ;;  %v1663_v25 = vld [vmem:[#allocation7 + $0x710] sm:$0xff] }
 0x22e   :  { %v1667_v5 = vld [vmem:[#allocation7 + $0x730] sm:$0xff]  ;;  %v9372_v23 = vcombine.high %v1656_v29, %v1660_v17  ;;  %v9371_v13 = vcombine.low %v1656_v29, %v1660_v17  ;;  %v1712_v16 = vld [vmem:[#allocation7 + $0x898] sm:$0xff] }
 0x22f   :  { %v9378_v46 = vcombine.high %v1663_v25, %v1667_v5  ;;  %v9377_v30 = vcombine.low %v1663_v25, %v1667_v5  ;;  %v1716_v19 = vld [vmem:[#allocation7 + $0x8b8] sm:$0xff] }
 0x230   :  { %3670 = vmatpush1.bf16.msra.mxu0 %v9305_v40  ;;  %3799 = vmatpush1.bf16.msra.mxu1 %v9307_v24  ;;  %v1664_v40 = vld [vmem:[#allocation7 + $0x718] sm:$0xff] }
 0x231   :  { %3671 = vmatprep.subr.bf16.mxu0 %v9314_v55  ;;  %3800 = vmatprep.subr.bf16.mxu1 %v9316_v48  ;;  %v1668_v24 = vld [vmem:[#allocation7 + $0x738] sm:$0xff]  ;;  %v1671_v55 = vld [vmem:[#allocation7 + $0x750] sm:$0xff] }
 0x232   :  { %v1675_v48 = vld [vmem:[#allocation7 + $0x770] sm:$0xff]  ;;  %v9380_v45 = vcombine.high %v1664_v40, %v1668_v24  ;;  %v9379_v44 = vcombine.low %v1664_v40, %v1668_v24  ;;  %v1720_v25 = vld [vmem:[#allocation7 + $0x8d8] sm:$0xff] }
 0x233   :  { %v9386_v8 = vcombine.high %v1671_v55, %v1675_v48  ;;  %v9385_v18 = vcombine.low %v1671_v55, %v1675_v48  ;;  %v1724_v5 = vld [vmem:[#allocation7 + $0x8f8] sm:$0xff] }
 0x234   :  { %3672 = vmatpush1.bf16.msra.mxu0 %v9313_v51  ;;  %3801 = vmatpush1.bf16.msra.mxu1 %v9315_v49  ;;  %v1672_v51 = vld [vmem:[#allocation7 + $0x758] sm:$0xff] }
 0x235   :  { %3673 = vmatprep.subr.bf16.mxu0 %v9322_v61  ;;  %3802 = vmatprep.subr.bf16.mxu1 %v9324_v62  ;;  %v1676_v49 = vld [vmem:[#allocation7 + $0x778] sm:$0xff]  ;;  %v1679_v61 = vld [vmem:[#allocation7 + $0x790] sm:$0xff] }
 0x236   :  { %v1683_v62 = vld [vmem:[#allocation7 + $0x7b0] sm:$0xff]  ;;  %v9388_v9 = vcombine.high %v1672_v51, %v1676_v49  ;;  %v9387_v22 = vcombine.low %v1672_v51, %v1676_v49  ;;  %v1732_v55 = vld [vmem:[#allocation7 + $0x938] sm:$0xff]  ;;  %v9435_v51 = vcombine.low %v1720_v25, %v1724_v5 }
 0x237   :  { %v9394_v39 = vcombine.high %v1679_v61, %v1683_v62 }
 0x238   :  { %3674 = vmatpush1.bf16.msra.mxu0 %v9321_v15  ;;  %3803 = vmatpush1.bf16.msra.mxu1 %v9323_v28  ;;  %v1680_v15 = vld [vmem:[#allocation7 + $0x798] sm:$0xff] }
 0x239   :  { %3675 = vmatprep.subr.bf16.mxu0 %v9330_v37  ;;  %3804 = vmatprep.subr.bf16.mxu1 %v9332_v33  ;;  %v1684_v28 = vld [vmem:[#allocation7 + $0x7b8] sm:$0xff]  ;;  %v1687_v37 = vld [vmem:[#allocation7 + $0x7d0] sm:$0xff] }
 0x23a   :  { %v1691_v33 = vld [vmem:[#allocation7 + $0x7f0] sm:$0xff]  ;;  %v9395_v14 = vcombine.low %v1680_v15, %v1684_v28 }
 0x23b   :  { %v9402_v60 = vcombine.high %v1687_v37, %v1691_v33  ;;  %v9401_v58 = vcombine.low %v1687_v37, %v1691_v33  ;;  %v1748_v37 = vld [vmem:[#allocation7 + $0x9b8] sm:$0xff] }
 0x23c   :  { %3676 = vmatpush1.bf16.msra.mxu0 %v9329_v7  ;;  %3805 = vmatpush1.bf16.msra.mxu1 %v9331_v3  ;;  %v1688_v7 = vld [vmem:[#allocation7 + $0x7d8] sm:$0xff] }
 0x23d   :  { %3677 = vmatprep.subr.bf16.mxu0 %v9338_v12  ;;  %3806 = vmatprep.subr.bf16.mxu1 %v9340_v0  ;;  %v1692_v3 = vld [vmem:[#allocation7 + $0x7f8] sm:$0xff]  ;;  %v9396_v12 = vcombine.high %v1680_v15, %v1684_v28  ;;  %v9393_v0 = vcombine.low %v1679_v61, %v1683_v62 }
 0x23e   :  { %v9404_v20 = vcombine.high %v1688_v7, %v1692_v3  ;;  %v9403_v31 = vcombine.low %v1688_v7, %v1692_v3  ;;  %v1740_v61 = vld [vmem:[#allocation7 + $0x978] sm:$0xff] }
 0x240   :  { %3678 = vmatpush1.bf16.msra.mxu0 %v9337_v11  ;;  %3807 = vmatpush1.bf16.msra.mxu1 %v9339_v1  ;;  %v1695_v11 = vld [vmem:[#allocation7 + $0x810] sm:$0xff] }
 0x241   :  { %3679 = vmatprep.subr.bf16.mxu0 %v9346_v63  ;;  %3808 = vmatprep.subr.bf16.mxu1 %v9348_v53  ;;  %v1699_v1 = vld [vmem:[#allocation7 + $0x830] sm:$0xff]  ;;  %v1696_v63 = vld [vmem:[#allocation7 + $0x818] sm:$0xff] }
 0x242   :  { %v1700_v53 = vld [vmem:[#allocation7 + $0x838] sm:$0xff]  ;;  %v9410_v27 = vcombine.high %v1695_v11, %v1699_v1  ;;  %v9409_v36 = vcombine.low %v1695_v11, %v1699_v1 }
 0x243   :  { %v9412_v59 = vcombine.high %v1696_v63, %v1700_v53  ;;  %v9411_v21 = vcombine.low %v1696_v63, %v1700_v53 }
 0x244   :  { %3680 = vmatpush1.bf16.msra.mxu0 %v9345_v50  ;;  %3809 = vmatpush1.bf16.msra.mxu1 %v9347_v54  ;;  %v1703_v50 = vld [vmem:[#allocation7 + $0x850] sm:$0xff] }
 0x245   :  { %3681 = vmatprep.subr.bf16.mxu0 %v9354_v6  ;;  %3810 = vmatprep.subr.bf16.mxu1 %v9356_v38  ;;  %v1707_v54 = vld [vmem:[#allocation7 + $0x870] sm:$0xff]  ;;  %v1704_v6 = vld [vmem:[#allocation7 + $0x858] sm:$0xff] }
 0x246   :  { %v1708_v38 = vld [vmem:[#allocation7 + $0x878] sm:$0xff]  ;;  %v9418_v52 = vcombine.high %v1703_v50, %v1707_v54  ;;  %v9417_v29 = vcombine.low %v1703_v50, %v1707_v54  ;;  %v10306_v54 = vld [vmem:[#allocation9 + $0x24] ss:$8 sps:$4 sm:$0xff]  }
 0x247   :  { %v9420_v57 = vcombine.high %v1704_v6, %v1708_v38  ;;  %v9419_v17 = vcombine.low %v1704_v6, %v1708_v38  ;;  %v10301_v50 = vld [vmem:[#allocation9 + $0x10] ss:$8 sps:$4 sm:$0xff]   ;;  %v10304_v6 = vld [vmem:[#allocation9 + $0x20] ss:$8 sps:$4 sm:$0xff]   ;;  %v10309_v38 = vld [vmem:[#allocation9 + $0x34] ss:$8 sps:$4 sm:$0xff]  }
 0x248   :  { %3682 = vmatpush1.bf16.msra.mxu0 %v9353_v10  ;;  %3811 = vmatpush1.bf16.msra.mxu1 %v9355_v26  ;;  %v1711_v10 = vld [vmem:[#allocation7 + $0x890] sm:$0xff] }
 0x249   :  { %3683 = vmatprep.subr.bf16.mxu0 %v9362_v47  ;;  %3812 = vmatprep.subr.bf16.mxu1 %v9364_v4  ;;  %v1715_v26 = vld [vmem:[#allocation7 + $0x8b0] sm:$0xff]  ;;  %v9428_v4 = vcombine.high %v1712_v16, %v1716_v19 }
 0x24a   :  { %v9426_v47 = vcombine.high %v1711_v10, %v1715_v26  ;;  %v9425_v40 = vcombine.low %v1711_v10, %v1715_v26  ;;  %v10313_v10 = vld [vmem:[#allocation9 + $0x50] ss:$8 sps:$4 sm:$0xff]   ;;  %v10316_v26 = vld [vmem:[#allocation9 + $0x60] ss:$8 sps:$4 sm:$0xff]  }
 0x24c   :  { %3684 = vmatpush1.bf16.msra.mxu0 %v9361_v42  ;;  %3813 = vmatpush1.bf16.msra.mxu1 %v9363_v56  ;;  %v1719_v42 = vld [vmem:[#allocation7 + $0x8d0] sm:$0xff] }
 0x24d   :  { %3685 = vmatprep.subr.bf16.mxu0 %v9370_v41  ;;  %3814 = vmatprep.subr.bf16.mxu1 %v9372_v23  ;;  %v1723_v56 = vld [vmem:[#allocation7 + $0x8f0] sm:$0xff]  ;;  %v9436_v41 = vcombine.high %v1720_v25, %v1724_v5 }
 0x24e   :  { %v9434_v24 = vcombine.high %v1719_v42, %v1723_v56  ;;  %v1727_v23 = vld [vmem:[#allocation7 + $0x910] sm:$0xff]  ;;  %v9433_v48 = vcombine.low %v1719_v42, %v1723_v56  ;;  %v10330_v42 = vld [vmem:[#allocation9 + $0xa4] ss:$8 sps:$4 sm:$0xff]   ;;  %v10328_v56 = vld [vmem:[#allocation9 + $0xa0] ss:$8 sps:$4 sm:$0xff]  }
 0x24f   :  { %v10333_v25 = vld [vmem:[#allocation9 + $0xb4] ss:$8 sps:$4 sm:$0xff]   ;;  %v10331_v5 = vld [vmem:[#allocation9 + $0xb0] ss:$8 sps:$4 sm:$0xff]  }
 0x250   :  { %3686 = vmatpush1.bf16.msra.mxu0 %v9369_v32  ;;  %3815 = vmatpush1.bf16.msra.mxu1 %v9371_v13  ;;  %v1731_v32 = vld [vmem:[#allocation7 + $0x930] sm:$0xff]  ;;  %v1728_v13 = vld [vmem:[#allocation7 + $0x918] sm:$0xff] }
 0x251   :  { %3687 = vmatprep.subr.bf16.mxu0 %v9378_v46  ;;  %3816 = vmatprep.subr.bf16.mxu1 %v9380_v45  ;;  %v9442_v49 = vcombine.high %v1727_v23, %v1731_v32  ;;  %v9444_v46 = vcombine.high %v1728_v13, %v1732_v55  ;;  %v1735_v45 = vld [vmem:[#allocation7 + $0x950] sm:$0xff]  ;;  %v9441_v62 = vcombine.low %v1727_v23, %v1731_v32 }
 0x252   :  { %v9443_v15 = vcombine.low %v1728_v13, %v1732_v55 }
 0x254   :  { %3688 = vmatpush1.bf16.msra.mxu0 %v9377_v30  ;;  %3817 = vmatpush1.bf16.msra.mxu1 %v9379_v44  ;;  %v1739_v30 = vld [vmem:[#allocation7 + $0x970] sm:$0xff]  ;;  %v1736_v44 = vld [vmem:[#allocation7 + $0x958] sm:$0xff] }
 0x255   :  { %3689 = vmatprep.subr.bf16.mxu0 %v9386_v8  ;;  %3818 = vmatprep.subr.bf16.mxu1 %v9388_v9  ;;  %v9450_v28 = vcombine.high %v1735_v45, %v1739_v30  ;;  %v9452_v8 = vcombine.high %v1736_v44, %v1740_v61  ;;  %v1743_v9 = vld [vmem:[#allocation7 + $0x990] sm:$0xff]  ;;  %v9449_v33 = vcombine.low %v1735_v45, %v1739_v30  ;;  %v10342_v45 = vld [vmem:[#allocation9 + $0xe4] ss:$8 sps:$4 sm:$0xff]   ;;  %v10340_v30 = vld [vmem:[#allocation9 + $0xe0] ss:$8 sps:$4 sm:$0xff]  }
 0x256   :  { %v9451_v7 = vcombine.low %v1736_v44, %v1740_v61  ;;  %v10345_v44 = vld [vmem:[#allocation9 + $0xf4] ss:$8 sps:$4 sm:$0xff]   ;;  %v10343_v61 = vld [vmem:[#allocation9 + $0xf0] ss:$8 sps:$4 sm:$0xff]  }
 0x258   :  { %3690 = vmatpush1.bf16.msra.mxu0 %v9385_v18  ;;  %3819 = vmatpush1.bf16.msra.mxu1 %v9387_v22  ;;  %v1747_v18 = vld [vmem:[#allocation7 + $0x9b0] sm:$0xff]  ;;  %v1744_v22 = vld [vmem:[#allocation7 + $0x998] sm:$0xff] }
 0x259   :  { %3691 = vmatprep.subr.bf16.mxu0 %v9394_v39  ;;  %3820 = vmatprep.subr.bf16.mxu1 %v9396_v12  ;;  %v9458_v3 = vcombine.high %v1743_v9, %v1747_v18  ;;  %v9460_v39 = vcombine.high %v1744_v22, %v1748_v37  ;;  %v1751_v12 = vld [vmem:[#allocation7 + $0x9d0] sm:$0xff]  ;;  %v9459_v11 = vcombine.low %v1744_v22, %v1748_v37 }
 0x25c   :  { %3692 = vmatpush1.bf16.msra.mxu0 %v9393_v0  ;;  %3821 = vmatpush1.bf16.msra.mxu1 %v9395_v14  ;;  %v1755_v0 = vld [vmem:[#allocation7 + $0x9f0] sm:$0xff]  ;;  %v1752_v14 = vld [vmem:[#allocation7 + $0x9d8] sm:$0xff] }
 0x25d   :  { %3693 = vmatprep.subr.bf16.mxu0 %v9402_v60  ;;  %3822 = vmatprep.subr.bf16.mxu1 %v9404_v20  ;;  %v1756_v60 = vld [vmem:[#allocation7 + $0x9f8] sm:$0xff]  ;;  %v9457_v20 = vcombine.low %v1743_v9, %v1747_v18  ;;  %v9466_v1 = vcombine.high %v1751_v12, %v1755_v0  ;;  %v9465_v53 = vcombine.low %v1751_v12, %v1755_v0  ;;  %v10397_v9 = vld [vmem:[#allocation10 + $0x8] sm:$0xff]  }
 0x25e   :  { %v9468_v63 = vcombine.high %v1752_v14, %v1756_v60 }
 0x260   :  { %3694 = vmatpush1.bf16.msra.mxu0 %v9401_v58  ;;  %3823 = vmatpush1.bf16.msra.mxu1 %v9403_v31  ;;  %v9467_v58 = vcombine.low %v1752_v14, %v1756_v60  ;;  %v10300_v31 = vld [vmem:[#allocation9 + $0x4] ss:$8 sps:$4 sm:$0xff]  }
 0x261   :  { %3706 = vmatprep.subr.bf16.mxu0 %v9410_v27  ;;  %3835 = vmatprep.subr.bf16.mxu1 %v9412_v59  ;;  %v10298_v27 = vld [vmem:[#allocation9] ss:$8 sps:$4 sm:$0xff]   ;;  %v10303_v59 = vld [vmem:[#allocation9 + $0x14] ss:$8 sps:$4 sm:$0xff]  }
 0x263   :  { %3696 = vmatmul.mubr.bf16.vlgmr.msra.gmra.mrb[4].mxu0 %v12961_v34  ;;  %3825 = vmatmul.mubr.bf16.vlgmr.msra.gmra.mrb[4].mxu1 %v12961_v34  ;;  %v9427_v34 = vcombine.low %v1712_v16, %v1716_v19  ;;  %v10321_v16 = vld [vmem:[#allocation9 + $0x74] ss:$8 sps:$4 sm:$0xff]   ;;  %v10319_v19 = vld [vmem:[#allocation9 + $0x70] ss:$8 sps:$4 sm:$0xff]  }
 0x264   :  { %3707 = vmatpush1.bf16.msra.mxu0 %v9409_v36  ;;  %3836 = vmatpush1.bf16.msra.mxu1 %v9411_v21  ;;  %v10307_v36 = vld [vmem:[#allocation9 + $0x30] ss:$8 sps:$4 sm:$0xff]   ;;  %v10312_v21 = vld [vmem:[#allocation9 + $0x44] ss:$8 sps:$4 sm:$0xff]  }
 0x265   :  { %3708 = vmatprep.subr.bf16.mxu0 %v9418_v52  ;;  %3837 = vmatprep.subr.bf16.mxu1 %v9420_v57  ;;  %v10310_v52 = vld [vmem:[#allocation9 + $0x40] ss:$8 sps:$4 sm:$0xff]   ;;  %v10315_v57 = vld [vmem:[#allocation9 + $0x54] ss:$8 sps:$4 sm:$0xff]  }
 0x266   :  { %3738 = vmatprep.mubr.bf16.mxu0 %v11408_v35  ;;  %3867 = vmatprep.mubr.bf16.mxu1 %v11408_v35 }
 0x268   :  { %3709 = vmatpush1.bf16.msra.mxu0 %v9417_v29  ;;  %3838 = vmatpush1.bf16.msra.mxu1 %v9419_v17  ;;  %v10324_v29 = vld [vmem:[#allocation9 + $0x84] ss:$8 sps:$4 sm:$0xff]   ;;  %v10322_v17 = vld [vmem:[#allocation9 + $0x80] ss:$8 sps:$4 sm:$0xff]  }
 0x269   :  { %3710 = vmatprep.subr.bf16.mxu0 %v9426_v47  ;;  %3839 = vmatprep.subr.bf16.mxu1 %v9428_v4  ;;  %v10327_v47 = vld [vmem:[#allocation9 + $0x94] ss:$8 sps:$4 sm:$0xff]   ;;  %v10325_v4 = vld [vmem:[#allocation9 + $0x90] ss:$8 sps:$4 sm:$0xff]  }
 0x26c   :  { %3711 = vmatpush1.bf16.msra.mxu0 %v9425_v40  ;;  %3840 = vmatpush1.bf16.msra.mxu1 %v9427_v34  ;;  %v10336_v40 = vld [vmem:[#allocation9 + $0xc4] ss:$8 sps:$4 sm:$0xff]   ;;  %v10334_v34 = vld [vmem:[#allocation9 + $0xc0] ss:$8 sps:$4 sm:$0xff]  }
 0x26d   :  { %3712 = vmatprep.subr.bf16.mxu0 %v9434_v24  ;;  %3841 = vmatprep.subr.bf16.mxu1 %v9436_v41  ;;  %v10339_v24 = vld [vmem:[#allocation9 + $0xd4] ss:$8 sps:$4 sm:$0xff]   ;;  %v10337_v41 = vld [vmem:[#allocation9 + $0xd0] ss:$8 sps:$4 sm:$0xff]  }
 0x270   :  { %3713 = vmatpush1.bf16.msra.mxu0 %v9433_v48  ;;  %3842 = vmatpush1.bf16.msra.mxu1 %v9435_v51 }
 0x271   :  { %3714 = vmatprep.subr.bf16.mxu0 %v9442_v49  ;;  %3843 = vmatprep.subr.bf16.mxu1 %v9444_v46 }
 0x274   :  { %3715 = vmatpush1.bf16.msra.mxu0 %v9441_v62  ;;  %3844 = vmatpush1.bf16.msra.mxu1 %v9443_v15  ;;  %v10348_v62 = vld [vmem:[#allocation9 + $0x104] ss:$8 sps:$4 sm:$0xff]  }
 0x275   :  { %3716 = vmatprep.subr.bf16.mxu0 %v9450_v28  ;;  %3845 = vmatprep.subr.bf16.mxu1 %v9452_v8  ;;  %v10394_v15 = vld [vmem:[#allocation10 + $0x40] sm:$0xff]   ;;  %v10396_v8 = vld [vmem:[#allocation10 + $0x48] sm:$0xff]  }
 0x276   :  { %v10395_v28 = vld [vmem:[#allocation10] sm:$0xff]  }
 0x278   :  { %3717 = vmatpush1.bf16.msra.mxu0 %v9449_v33  ;;  %3846 = vmatpush1.bf16.msra.mxu1 %v9451_v7 }
 0x279   :  { %3718 = vmatprep.subr.bf16.mxu0 %v9458_v3  ;;  %3847 = vmatprep.subr.bf16.mxu1 %v9460_v39 }
 0x27c   :  { %3719 = vmatpush1.bf16.msra.mxu0 %v9457_v20  ;;  %3848 = vmatpush1.bf16.msra.mxu1 %v9459_v11 }
 0x27d   :  { %3720 = vmatprep.subr.bf16.mxu0 %v9466_v1  ;;  %3849 = vmatprep.subr.bf16.mxu1 %v9468_v63 }
 0x280   :  { %3721 = vmatpush1.bf16.msra.mxu0 %v9465_v53  ;;  %3850 = vmatpush1.bf16.msra.mxu1 %v9467_v58 }
 0x281   :  { %4290 = vmatprep.subr.bf16.mxu0 %v10300_v31  ;;  %10013 = vmatprep.subr.bf16.mxu1 %v10394_v15  ;;  %v10379_v15 = vld [vmem:[#allocation9 + $0x1b0] ss:$8 sps:$4 sm:$0xff]  }
 0x283   :  { %3739 = vmatmul.mubr.bf16.vlgmr.msra.gmra.mrb[4].mxu0 %v13138_v43  ;;  %3868 = vmatmul.mubr.bf16.vlgmr.msra.gmra.mrb[4].mxu1 %v13138_v43  ;;  %v10318_v43 = vld [vmem:[#allocation9 + $0x64] ss:$8 sps:$4 sm:$0xff]  }
 0x284   :  { %4291 = vmatpush1.bf16.msra.mxu0 %v10298_v27  ;;  %10014 = vmatpush3.bf16.msra.mxu1 %v10395_v28  ;;  %v10384_v28 = vld [vmem:[#allocation9 + $0x1c4] ss:$8 sps:$4 sm:$0xff]  }
 0x285   :  { %4292 = vmatprep.subr.bf16.mxu0 %v10303_v59  ;;  %10015 = vmatprep.subr.bf16.mxu1 %v10396_v8  ;;  %v10382_v8 = vld [vmem:[#allocation9 + $0x1c0] ss:$8 sps:$4 sm:$0xff]  }
 0x288   :  { %4293 = vmatpush1.bf16.msra.mxu0 %v10301_v50  ;;  %10016 = vmatpush3.bf16.msra.mxu1 %v10397_v9  ;;  %v10387_v9 = vld [vmem:[#allocation9 + $0x1d4] ss:$8 sps:$4 sm:$0xff]  }
 0x289   :  { %4294 = vmatprep.subr.bf16.mxu0 %v10306_v54 }
 0x28c   :  { %4295 = vmatpush1.bf16.msra.mxu0 %v10304_v6 }
 0x28d   :  { %4296 = vmatprep.subr.bf16.mxu0 %v10309_v38 }
 0x290   :  { %4297 = vmatpush1.bf16.msra.mxu0 %v10307_v36 }
 0x291   :  { %4298 = vmatprep.subr.bf16.mxu0 %v10312_v21 }
 0x294   :  { %4299 = vmatpush1.bf16.msra.mxu0 %v10310_v52 }
 0x295   :  { %4300 = vmatprep.subr.bf16.mxu0 %v10315_v57 }
 0x298   :  { %4301 = vmatpush1.bf16.msra.mxu0 %v10313_v10 }
 0x299   :  { %4302 = vmatprep.subr.bf16.mxu0 %v10318_v43 }
 0x29c   :  { %4303 = vmatpush1.bf16.msra.mxu0 %v10316_v26 }
 0x29d   :  { %4304 = vmatprep.subr.bf16.mxu0 %v10321_v16 }
 0x2a0   :  { %4305 = vmatpush1.bf16.msra.mxu0 %v10319_v19 }
 0x2a1   :  { %4306 = vmatprep.subr.bf16.mxu0 %v10324_v29 }
 0x2a4   :  { %4307 = vmatpush1.bf16.msra.mxu0 %v10322_v17 }
 0x2a5   :  { %4308 = vmatprep.subr.bf16.mxu0 %v10327_v47  ;;  %v10346_v47 = vld [vmem:[#allocation9 + $0x100] ss:$8 sps:$4 sm:$0xff]  }
 0x2a8   :  { %4309 = vmatpush1.bf16.msra.mxu0 %v10325_v4 }
 0x2a9   :  { %4310 = vmatprep.subr.bf16.mxu0 %v10330_v42  ;;  %v10351_v42 = vld [vmem:[#allocation9 + $0x114] ss:$8 sps:$4 sm:$0xff]  }
 0x2ac   :  { %4311 = vmatpush1.bf16.msra.mxu0 %v10328_v56  ;;  %v10349_v56 = vld [vmem:[#allocation9 + $0x110] ss:$8 sps:$4 sm:$0xff]  }
 0x2ad   :  { %4312 = vmatprep.subr.bf16.mxu0 %v10333_v25  ;;  %v10354_v25 = vld [vmem:[#allocation9 + $0x124] ss:$8 sps:$4 sm:$0xff]  }
 0x2b0   :  { %4313 = vmatpush1.bf16.msra.mxu0 %v10331_v5  ;;  %v10352_v5 = vld [vmem:[#allocation9 + $0x120] ss:$8 sps:$4 sm:$0xff]  }
 0x2b1   :  { %4314 = vmatprep.subr.bf16.mxu0 %v10336_v40  ;;  %v10357_v40 = vld [vmem:[#allocation9 + $0x134] ss:$8 sps:$4 sm:$0xff]  }
 0x2b4   :  { %4315 = vmatpush1.bf16.msra.mxu0 %v10334_v34  ;;  %v10355_v34 = vld [vmem:[#allocation9 + $0x130] ss:$8 sps:$4 sm:$0xff]  }
 0x2b5   :  { %4316 = vmatprep.subr.bf16.mxu0 %v10339_v24  ;;  %v10360_v24 = vld [vmem:[#allocation9 + $0x144] ss:$8 sps:$4 sm:$0xff]  }
 0x2b6   :  { %v3482_v23 = vpop.f32.mrb[0].mxu0  ;;  %v3611_v32 = vpop.f32.mrb[0].mxu1 }
 0x2b7   :  { %v3484_v13 = vpop.f32.mrb[1].mxu0  ;;  %v3613_v55 = vpop.f32.mrb[1].mxu1  ;;  %v3878_v18 = vmul.f32 %v3482_v23, %v3482_v23  ;;  %v3880_v22 = vmul.f32 %v3611_v32, %v3611_v32  ;;  %v10363_v23 = vld [vmem:[#allocation9 + $0x154] ss:$8 sps:$4 sm:$0xff]   ;;  %v10361_v32 = vld [vmem:[#allocation9 + $0x150] ss:$8 sps:$4 sm:$0xff]  }
 0x2b8   :  { %v3486_v48 = vpop.f32.mrb[2].mxu0  ;;  %v3615_v51 = vpop.f32.mrb[2].mxu1  ;;  %4317 = vmatpush1.bf16.msra.mxu0 %v10337_v41  ;;  %v3879_v37 = vmul.f32 %v3484_v13, %v3484_v13  ;;  %v3881_v33 = vmul.f32 %v3613_v55, %v3613_v55  ;;  %v10358_v41 = vld [vmem:[#allocation9 + $0x140] ss:$8 sps:$4 sm:$0xff]   ;;  %v10366_v13 = vld [vmem:[#allocation9 + $0x164] ss:$8 sps:$4 sm:$0xff]  }
 0x2b9   :  { %v3488_v49 = vpop.f32.mrb[3].mxu0  ;;  %v3617_v46 = vpop.f32.mrb[3].mxu1  ;;  %4318 = vmatprep.subr.bf16.mxu0 %v10342_v45  ;;  %v3882_v39 = vmul.f32 %v3486_v48, %v3486_v48  ;;  %v3884_v12 = vmul.f32 %v3615_v51, %v3615_v51  ;;  %v10364_v55 = vld [vmem:[#allocation9 + $0x160] ss:$8 sps:$4 sm:$0xff]   ;;  %v10369_v48 = vld [vmem:[#allocation9 + $0x174] ss:$8 sps:$4 sm:$0xff]  }
 0x2ba   :  { %v3883_v11 = vmul.f32 %v3488_v49, %v3488_v49  ;;  %v3885_v1 = vmul.f32 %v3617_v46, %v3617_v46  ;;  %v10367_v51 = vld [vmem:[#allocation9 + $0x170] ss:$8 sps:$4 sm:$0xff]   ;;  %v10372_v49 = vld [vmem:[#allocation9 + $0x184] ss:$8 sps:$4 sm:$0xff]   ;;  %v10370_v46 = vld [vmem:[#allocation9 + $0x180] ss:$8 sps:$4 sm:$0xff]  }
 0x2bb   :  { %v10375_v45 = vld [vmem:[#allocation9 + $0x194] ss:$8 sps:$4 sm:$0xff]  }
 0x2bc   :  { %4319 = vmatpush1.bf16.msra.mxu0 %v10340_v30  ;;  %v10373_v30 = vld [vmem:[#allocation9 + $0x190] ss:$8 sps:$4 sm:$0xff]  }
 0x2bd   :  { %4320 = vmatprep.subr.bf16.mxu0 %v10345_v44  ;;  %v10378_v44 = vld [vmem:[#allocation9 + $0x1a4] ss:$8 sps:$4 sm:$0xff]  }
 0x2c0   :  { %4321 = vmatpush1.bf16.msra.mxu0 %v10343_v61  ;;  %v10376_v61 = vld [vmem:[#allocation9 + $0x1a0] ss:$8 sps:$4 sm:$0xff]  }
 0x2c1   :  { %4333 = vmatprep.subr.bf16.mxu0 %v10348_v62  ;;  %v10381_v62 = vld [vmem:[#allocation9 + $0x1b4] ss:$8 sps:$4 sm:$0xff]  }
 0x356   :  { %v3740_v7 = vpop.f32.mrb[4].mxu0  ;;  %v3869_v3 = vpop.f32.mrb[4].mxu1 }
 0x357   :  { %v3886_v0 = vmul.f32 %v3740_v7, %v3740_v7  ;;  %v3888_v14 = vmul.f32 %v3869_v3, %v3869_v3  ;;  %v3742_v60 = vpop.f32.mrb[5].mxu0  ;;  %v3871_v20 = vpop.f32.mrb[5].mxu1  ;;  %v10391_v7 = vld [vmem:[#allocation9 + $0x1f0] ss:$8 sps:$4 sm:$0xff]  }
 0x358   :  { %v3887_v63 = vmul.f32 %v3742_v60, %v3742_v60  ;;  %v3889_v53 = vmul.f32 %v3871_v20, %v3871_v20  ;;  %v3744_v58 = vpop.f32.mrb[6].mxu0  ;;  %v3873_v31 = vpop.f32.mrb[6].mxu1  ;;  %v10398_v3 = vld [vmem:[#allocation10 + $0x50] sm:$0xff]   ;;  %v10403_v60 = vld [vmem:[#allocation10 + $0x20] sm:$0xff]   ;;  %v10404_v20 = vld [vmem:[#allocation10 + $0x68] sm:$0xff]  }
 0x359   :  { %v3894_v27 = vadd.f32 %v3886_v0, %v3878_v18  ;;  %v13154_v59 = vadd.f32 %v3888_v14, %v3880_v22  ;;  %v3890_v50 = vmul.f32 %v3744_v58, %v3744_v58  ;;  %v3892_v54 = vmul.f32 %v3873_v31, %v3873_v31  ;;  %v3746_v6 = vpop.f32.mrb[7].mxu0  ;;  %v3875_v38 = vpop.f32.mrb[7].mxu1  ;;  %v10385_v18 = vld [vmem:[#allocation9 + $0x1d0] ss:$8 sps:$4 sm:$0xff]   ;;  %v10390_v22 = vld [vmem:[#allocation9 + $0x1e4] ss:$8 sps:$4 sm:$0xff]   ;;  %10017 = vmatprep.subr.bf16.mxu1 %v10398_v3 }
 0x35a   :  { %v3895_v36 = vadd.f32 %v3887_v63, %v3879_v37  ;;  %v3897_v21 = vadd.f32 %v3889_v53, %v3881_v33  ;;  %v3891_v52 = vmul.f32 %v3746_v6, %v3746_v6  ;;  %v3893_v57 = vmul.f32 %v3875_v38, %v3875_v38  ;;  %v10388_v37 = vld [vmem:[#allocation9 + $0x1e0] ss:$8 sps:$4 sm:$0xff]   ;;  %v10393_v33 = vld [vmem:[#allocation9 + $0x1f4] ss:$8 sps:$4 sm:$0xff]  }
 0x35b   :  { %v3898_v10 = vadd.f32 %v3890_v50, %v3882_v39  ;;  %v13156_v43 = vadd.f32 %v3892_v54, %v3884_v12  ;;  %v10399_v39 = vld [vmem:[#allocation10 + $0x10] sm:$0xff]   ;;  %v10400_v12 = vld [vmem:[#allocation10 + $0x58] sm:$0xff]   ;;  %v10402_v14 = vld [vmem:[#allocation10 + $0x60] sm:$0xff]  }
 0x35c   :  { %v3899_v26 = vadd.f32 %v3891_v52, %v3883_v11  ;;  %v3901_v16 = vadd.f32 %v3893_v57, %v3885_v1  ;;  %10018 = vmatpush3.bf16.msra.mxu1 %v10399_v39  ;;  %v10401_v0 = vld [vmem:[#allocation10 + $0x18] sm:$0xff]   ;;  %v10405_v11 = vld [vmem:[#allocation10 + $0x28] sm:$0xff]   ;;  %v10406_v1 = vld [vmem:[#allocation10 + $0x70] sm:$0xff]  }
 0x35d   :  { %v3966_v19 = vpack.c.bf16 %v3898_v10, %v3894_v27  ;;  %v3968_v29 = vpack.c.bf16 %v13156_v43, %v13154_v59  ;;  %10019 = vmatprep.subr.bf16.mxu1 %v10400_v12  ;;  %v10407_v63 = vld [vmem:[#allocation10 + $0x30] sm:$0xff]   ;;  %v10408_v53 = vld [vmem:[#allocation10 + $0x78] sm:$0xff]  }
 0x35e   :  { %v3967_v17 = vpack.c.bf16 %v3899_v26, %v3895_v36  ;;  %v3969_v4 = vpack.c.bf16 %v3901_v16, %v3897_v21  ;;  %v10409_v58 = vld [vmem:[#allocation10 + $0x38] sm:$0xff]  }
 0x360   :  { %4322 = vmatprep.mubr.bf16.mxu0 %v3967_v17  ;;  %10020 = vmatpush3.bf16.msra.mxu1 %v10401_v0 }
 0x361   :  { %4323 = vmatmul.mubr.bf16.vlgmr.msra.gmra.mrb[8].mxu0 %v3966_v19  ;;  %10021 = vmatprep.subr.bf16.mxu1 %v10402_v14 }
 0x362   :  { %4334 = vmatpush1.bf16.msra.mxu0 %v10346_v47  ;;  %4365 = vmatprep.mubr.bf16.mxu0 %v3969_v4 }
 0x363   :  { %4335 = vmatprep.subr.bf16.mxu0 %v10351_v42 }
 0x364   :  { %10022 = vmatpush3.bf16.msra.mxu1 %v10403_v60 }
 0x365   :  { %10023 = vmatprep.subr.bf16.mxu1 %v10404_v20 }
 0x366   :  { %4336 = vmatpush1.bf16.msra.mxu0 %v10349_v56 }
 0x367   :  { %4337 = vmatprep.subr.bf16.mxu0 %v10354_v25 }
 0x368   :  { %10024 = vmatpush3.bf16.msra.mxu1 %v10405_v11  ;;  %v9550_v11 = vld [vmem:[#allocation18 + $0x1] ss:$0 sm:$0xff] }
 0x369   :  { %10025 = vmatprep.subr.bf16.mxu1 %v10406_v1 }
 0x36a   :  { %4338 = vmatpush1.bf16.msra.mxu0 %v10352_v5 }
 0x36b   :  { %4339 = vmatprep.subr.bf16.mxu0 %v10357_v40 }
 0x36c   :  { %10026 = vmatpush3.bf16.msra.mxu1 %v10407_v63 }
 0x36d   :  { %10027 = vmatprep.subr.bf16.mxu1 %v10408_v53 }
 0x36e   :  { %4340 = vmatpush1.bf16.msra.mxu0 %v10355_v34 }
 0x36f   :  { %4341 = vmatprep.subr.bf16.mxu0 %v10360_v24 }
 0x370   :  { %10028 = vmatpush3.bf16.msra.mxu1 %v10409_v58 }
 0x372   :  { %4342 = vmatpush1.bf16.msra.mxu0 %v10358_v41 }
 0x373   :  { %4343 = vmatprep.subr.bf16.mxu0 %v10363_v23  ;;  %v9533_v23 = vld [vmem:[#allocation18] ss:$0 sm:$0xff] }
 0x376   :  { %4344 = vmatpush1.bf16.msra.mxu0 %v10361_v32 }
 0x377   :  { %4345 = vmatprep.subr.bf16.mxu0 %v10366_v13 }
 0x37a   :  { %4346 = vmatpush1.bf16.msra.mxu0 %v10364_v55 }
 0x37b   :  { %4347 = vmatprep.subr.bf16.mxu0 %v10369_v48 }
 0x37e   :  { %4348 = vmatpush1.bf16.msra.mxu0 %v10367_v51 }
 0x37f   :  { %4349 = vmatprep.subr.bf16.mxu0 %v10372_v49 }
 0x382   :  { %4350 = vmatpush1.bf16.msra.mxu0 %v10370_v46 }
 0x383   :  { %4351 = vmatprep.subr.bf16.mxu0 %v10375_v45 }
 0x386   :  { %4352 = vmatpush1.bf16.msra.mxu0 %v10373_v30 }
 0x387   :  { %4353 = vmatprep.subr.bf16.mxu0 %v10378_v44 }
 0x38a   :  { %4354 = vmatpush1.bf16.msra.mxu0 %v10376_v61 }
 0x38b   :  { %4355 = vmatprep.subr.bf16.mxu0 %v10381_v62 }
 0x38e   :  { %4356 = vmatpush1.bf16.msra.mxu0 %v10379_v15 }
 0x38f   :  { %4357 = vmatprep.subr.bf16.mxu0 %v10384_v28 }
 0x392   :  { %4358 = vmatpush1.bf16.msra.mxu0 %v10382_v8 }
 0x393   :  { %4359 = vmatprep.subr.bf16.mxu0 %v10387_v9 }
 0x396   :  { %4360 = vmatpush1.bf16.msra.mxu0 %v10385_v18 }
 0x397   :  { %4361 = vmatprep.subr.bf16.mxu0 %v10390_v22 }
 0x39a   :  { %4362 = vmatpush1.bf16.msra.mxu0 %v10388_v37 }
 0x39b   :  { %4363 = vmatprep.subr.bf16.mxu0 %v10393_v33 }
 0x39e   :  { %4364 = vmatpush1.bf16.msra.mxu0 %v10391_v7  ;;  %v13777_v7 = vld [vmem:[#allocation33_spill] sm:$0xff] }
 0x39f   :  { %v4616_v3 = vand.u32 7, %v13777_v7  ;;  %v4611_v39 = vadd.s32 8, %v13777_v7  ;;  %vm4638_vm10 = vcmp.lt.s32.totalorder %v13777_v7, 3  ;;  %vm4666_vm11 = vcmp.lt.s32.totalorder %v13777_v7, 2 }
 0x3a0   :  { %vm4694_vm12 = vcmp.lt.s32.totalorder %v13777_v7, 1  ;;  %vm4743_vm14 = vcmp.lt.s32.totalorder %v13777_v7, 7  ;;  %vm4771_vm4 = vcmp.lt.s32.totalorder %v13777_v7, 6  ;;  %vm4799_vm6 = vcmp.lt.s32.totalorder %v13777_v7, 5 }
 0x3a1   :  { %4366 = vmatmul.mubr.bf16.vlgmr.msra.gmra.mrb[8].mxu0 %v3968_v29  ;;  %v4641_v12 = vadd.s32 4294967293, %v4616_v3  ;;  %v4669_v0 = vadd.s32 4294967294, %v4616_v3  ;;  %v4697_v14 = vadd.s32 4294967295, %v4616_v3  ;;  %v13166_v60 = vand.u32 7, %v4611_v39  ;;  %v9561_v39 = vld [vmem:[#allocation18 + $0xc] ss:$0 sm:$0xff] }
 0x3a2   :  { %v4746_v1 = vadd.s32 1, %v4616_v3  ;;  %v4774_v53 = vadd.s32 2, %v4616_v3  ;;  %v4802_v58 = vadd.s32 3, %v4616_v3 }
 0x3a3   :  { %vm4643_vm7 = vcmp.ge.s32.totalorder %v4641_v12, 0  ;;  %vm4671_vm8 = vcmp.ge.s32.totalorder %v4669_v0, 0  ;;  %vm4699_vm9 = vcmp.ge.s32.totalorder %v4697_v14, 0 }
 0x3a4   :  { %vm4750_vm13 = vcmp.lt.s32.totalorder %v4746_v1, 8  ;;  %vm4778_vm15 = vcmp.lt.s32.totalorder %v4774_v53, 8  ;;  %vm4806_vm0 = vcmp.lt.s32.totalorder %v4802_v58, 8  ;;  %v9564_v53 = vld [vmem:[#allocation18 + $0xd] ss:$0 sm:$0xff] }
 0x474   :  { %v4367_v31 = vpop.f32.mrb[8].mxu0 }
 0x475   :  { %v4376_v27 = vmax.f32 %v4367_v31, 1e-10  ;;  %v4369_v59 = vpop.f32.mrb[9].mxu0  ;;  %v4642_v31 = vadd.s32 4294967293, %v13166_v60 }
 0x476   :  { %v4377_v50 = vmax.f32 %v4369_v59, 1e-10  ;;  %v4371_v54 = vpop.f32.mrb[10].mxu0  ;;  %v9551_v59 = vld [vmem:[#allocation18 + $0x2] ss:$0 sm:$0xff] }
 0x477   :  { %10978 = vlog2.f32 %v4376_v27  ;;  %v4378_v6 = vmax.f32 %v4371_v54, 1e-10  ;;  %v4373_v38 = vpop.f32.mrb[11].mxu0  ;;  %v4670_v27 = vadd.s32 4294967294, %v13166_v60  ;;  %v4698_v54 = vadd.s32 4294967295, %v13166_v60 }
 0x478   :  { %10980 = vlog2.f32 %v4377_v50  ;;  %v4379_v36 = vmax.f32 %v4373_v38, 1e-10  ;;  %v11409_v38 = vmov 0.0   ;;  %vm4644_vm2 = vcmp.ge.s32.totalorder %v4642_v31, 0 }
 0x479   :  { %10982 = vlog2.f32 %v4378_v6  ;;  %vm4672_vm3 = vcmp.ge.s32.totalorder %v4670_v27, 0  ;;  %vm4700_vm5 = vcmp.ge.s32.totalorder %v4698_v54, 0 }
 0x47a   :  { %10984 = vlog2.f32 %v4379_v36  ;;  %v13175_v36 = vsel %vm4643_vm7, 1.0, %v11409_v38 }
 0x481   :  { %v10979_v21 = vpop.eup %10978 }
 0x482   :  { %v10981_v52 = vpop.eup %10980  ;;  %v4381_v57 = vmul.f32 0.6931472, %v10979_v21  ;;  %v13178_v21 = vsel %vm4671_vm8, 1.0, %v11409_v38 }
 0x483   :  { %v10983_v10 = vpop.eup %10982  ;;  %v4383_v43 = vmul.f32 0.6931472, %v10981_v52 }
 0x484   :  { %v10985_v26 = vpop.eup %10984  ;;  %v4388_v16 = vmul.f32 0.4342945, %v4381_v57  ;;  %v4385_v19 = vmul.f32 0.6931472, %v10983_v10  ;;  %v13183_v57 = vsel %vm4699_vm9, 1.0, %v11409_v38 }
 0x485   :  { %v4389_v29 = vmul.f32 0.4342945, %v4383_v43  ;;  %v4387_v17 = vmul.f32 0.6931472, %v10985_v26  ;;  %v13189_v26 = vsel %vm4750_vm13, 1.0, %v11409_v38 }
 0x486   :  { %v4390_v47 = vmul.f32 0.4342945, %v4385_v19  ;;  %v4392_v42 = vmul.f32 10.0, %v4388_v16  ;;  %v13193_v16 = vsel %vm4778_vm15, 1.0, %v11409_v38  ;;  %v4747_v19 = vadd.s32 1, %v13166_v60 }
 0x487   :  { %v4391_v4 = vmul.f32 0.4342945, %v4387_v17  ;;  %v4393_v25 = vmul.f32 10.0, %v4389_v29  ;;  %v4775_v29 = vadd.s32 2, %v13166_v60 }
 0x488   :  { %v4394_v56 = vmul.f32 10.0, %v4390_v47  ;;  %v13201_v47 = vsel %vm4806_vm0, 1.0, %v11409_v38  ;;  %vm4751_vm7 = vcmp.lt.s32.totalorder %v4747_v19, 8 }
 0x489   :  { %v4395_v5 = vmul.f32 10.0, %v4391_v4  ;;  %v13204_v4 = vsel %vm4644_vm2, 1.0, %v11409_v38  ;;  %vm4779_vm8 = vcmp.lt.s32.totalorder %v4775_v29, 8  ;;  %v13242_v3 = vsel %vm4751_vm7, 1.0, %v11409_v38 }
 0x48a   :  { %v4428_v40 = vpack.c.bf16 %v4394_v56, %v4392_v42  ;;  %v13207_v42 = vsel %vm4672_vm3, 1.0, %v11409_v38 }
 0x48b   :  { %v4429_v34 = vpack.c.bf16 %v4395_v5, %v4393_v25 }
 0x48d   :  { %4563 = vmatprep.mubr.bf16.mxu1 %v4429_v34 }
 0x48e   :  { %4564 = vmatmul.mubr.bf16.vlgmr.msra.gmra.mrb[8].mxu1 %v4428_v40  ;;  %v13213_v40 = vsel %vm4700_vm5, 1.0, %v11409_v38 }
 0x48f   :  { %5109 = vmatprep.mubr.bf16.mxu1 %v11408_v35 }
 0x561   :  { %v10029_v24 = vpop.f32.mrb[8].mxu1 }
 0x562   :  { %v10030_v41 = vpop.f32.mrb[9].mxu1 }
 0x563   :  { %v10031_v32 = vadd.f32 %v10030_v41, %v10029_v24  ;;  %v10032_v13 = vpop.f32.mrb[10].mxu1 }
 0x564   :  { %v10033_v55 = vpop.f32.mrb[11].mxu1 }
 0x565   :  { %v10034_v48 = vadd.f32 %v10033_v55, %v10032_v13  ;;  %v4566_v51 = vadd.f32 %v10031_v32, %v9533_v23 }
 0x567   :  { %4574 = vadd.xlane.f32.xlu0 %v4566_v51  ;;  %v4569_v49 = vadd.f32 %v10034_v48, %v9533_v23  ;;  %v9554_v48 = vld [vmem:[#allocation18 + $0x9] ss:$0 sm:$0xff] }
 0x56b   :  { %4576 = vadd.xlane.f32.xlu0 %v4569_v49 }
 0x5f4   :  { %v4575_v46 = vpop.xlane.xlu0 %4574 }
 0x5f5   :  { %v4579_v45 = vmul.f32 0.0078125, %v4575_v46 }
 0x5f7   :  { %v4581_v30 = vsub.f32 %v4566_v51, %v4579_v45 }
 0x5f8   :  { %v4577_v44 = vpop.xlane.xlu0 %4576 }
 0x5f9   :  { %v4580_v61 = vmul.f32 0.0078125, %v4577_v44  ;;  %v4583_v62 = vmul.f32 %v4581_v30, %v4581_v30 }
 0x5fb   :  { %v4582_v15 = vsub.f32 %v4569_v49, %v4580_v61  ;;  %4585 = vadd.xlane.f32.xlu1 %v4583_v62  ;;  %v9557_v49 = vld [vmem:[#allocation18 + $0xa] ss:$0 sm:$0xff] }
 0x5fd   :  { %v4584_v28 = vmul.f32 %v4582_v15, %v4582_v15 }
 0x5ff   :  { %4587 = vadd.xlane.f32.xlu1 %v4584_v28 }
 0x688   :  { %v4586_v8 = vpop.xlane.xlu1 %4585 }
 0x689   :  { %v4589_v9 = vmul.f32 0.0078125, %v4586_v8 }
 0x68b   :  { %v4591_v18 = vadd.f32 1e-06, %v4589_v9 }
 0x68c   :  { %v4588_v22 = vpop.xlane.xlu1 %4587 }
 0x68d   :  { %10986 = vrsqrt.f32 %v4591_v18  ;;  %v4590_v37 = vmul.f32 0.0078125, %v4588_v22  ;;  %v4803_v18 = vadd.s32 3, %v13166_v60 }
 0x68f   :  { %v4592_v33 = vadd.f32 1e-06, %v4590_v37  ;;  %vm4807_vm9 = vcmp.lt.s32.totalorder %v4803_v18, 8 }
 0x691   :  { %10988 = vrsqrt.f32 %v4592_v33 }
 0x697   :  { %v10987_v20 = vpop.eup %10986 }
 0x698   :  { %v4595_v63 = vmul.f32 %v10987_v20, %v4581_v30 }
 0x69a   :  { %v4601_v50 = vmul.f32 %v9550_v11, %v4595_v63 }
 0x69b   :  { %v10989_v6 = vpop.eup %10988 }
 0x69c   :  { %v4596_v52 = vmul.f32 %v10989_v6, %v4582_v15  ;;  %v13186_v10 = vadd.f32 %v9551_v59, %v4601_v50  ;;  %v9560_v15 = vld [vmem:[#allocation18 + $0xb] ss:$0 sm:$0xff] }
 0x69e   :  { %v4602_v43 = vmul.f32 %v9550_v11, %v4596_v52  ;;  %v4636_v56 = vrot.slane %v13186_v10, 5  ;;  %v4664_v25 = vrot.slane %v13186_v10, 6  ;;  %v4692_v5 = vrot.slane %v13186_v10, 7  ;;  %v9567_v52 = vld [vmem:[#allocation18 + $0xe] ss:$0 sm:$0xff] }
 0x69f   :  { %v4741_v32 = vrot.slane %v13186_v10, 1  ;;  %v4769_v28 = vrot.slane %v13186_v10, 2  ;;  %v4797_v33 = vrot.slane %v13186_v10, 3  ;;  %v4737_v50 = vmul.f32 %v9561_v39, %v13186_v10 }
 0x6a0   :  { %v13198_v17 = vadd.f32 %v9551_v59, %v4602_v43 }
 0x6a2   :  { %v4637_v34 = vrot.slane %v13198_v17, 5  ;;  %v4665_v24 = vrot.slane %v13198_v17, 6  ;;  %v4693_v41 = vrot.slane %v13198_v17, 7  ;;  %v4742_v23 = vrot.slane %v13198_v17, 1 }
 0x6a3   :  { %v4770_v13 = vrot.slane %v13198_v17, 2  ;;  %v4798_v45 = vrot.slane %v13198_v17, 3 }
 0x6a4   :  { %v4640_v55 = vsel %vm4638_vm10, %v4637_v34, %v4636_v56  ;;  %v4668_v51 = vsel %vm4666_vm11, %v4665_v24, %v4664_v25  ;;  %v4696_v46 = vsel %vm4694_vm12, %v4693_v41, %v4692_v5  ;;  %v4744_v62 = vsel %vm4743_vm14, %v4741_v32, %v4742_v23 }
 0x6a5   :  { %v4654_v30 = vmul.f32 %v13175_v36, %v4640_v55  ;;  %v4682_v44 = vmul.f32 %v13178_v21, %v4668_v51  ;;  %v4710_v61 = vmul.f32 %v13183_v57, %v4696_v46  ;;  %v4639_v8 = vsel %vm4638_vm10, %v4636_v56, %v4637_v34 }
 0x6a6   :  { %v4667_v9 = vsel %vm4666_vm11, %v4664_v25, %v4665_v24  ;;  %v4759_v12 = vmul.f32 %v13189_v26, %v4744_v62  ;;  %v4772_v0 = vsel %vm4771_vm4, %v4769_v28, %v4770_v13  ;;  %v4655_v14 = vmul.f32 %v13204_v4, %v4639_v8  ;;  %v9570_v24 = vld [vmem:[#allocation18 + $0xf] ss:$0 sm:$0xff] }
 0x6a7   :  { %v4660_v22 = vmul.f32 %v9554_v48, %v4654_v30  ;;  %v4688_v37 = vmul.f32 %v9557_v49, %v4682_v44  ;;  %v4683_v20 = vmul.f32 %v13207_v42, %v4667_v9  ;;  %v4716_v60 = vmul.f32 %v9560_v15, %v4710_v61 }
 0x6a8   :  { %v4800_v1 = vsel %vm4799_vm6, %v4797_v33, %v4798_v45  ;;  %v4695_v63 = vsel %vm4694_vm12, %v4692_v5, %v4693_v41  ;;  %v4661_v58 = vmul.f32 %v9554_v48, %v4655_v14  ;;  %v4745_v27 = vsel %vm4743_vm14, %v4742_v23, %v4741_v32 }
 0x6a9   :  { %v4690_v11 = vadd.f32 %v4688_v37, %v4660_v22  ;;  %v4689_v31 = vmul.f32 %v9557_v49, %v4683_v20  ;;  %v4787_v54 = vmul.f32 %v13193_v16, %v4772_v0  ;;  %v4711_v6 = vmul.f32 %v13213_v40, %v4695_v63  ;;  %v10410_v22 = vld [vmem:[#allocation12] ss:$16 sps:$4 sm:$0xff]   ;;  %v10412_v37 = vld [vmem:[#allocation12 + $0x4] ss:$16 sps:$4 sm:$0xff]  }
 0x6aa   :  { %v4815_v43 = vmul.f32 %v13201_v47, %v4800_v1  ;;  %v4773_v56 = vsel %vm4771_vm4, %v4770_v13, %v4769_v28  ;;  %v13263_v25 = vsel %vm4779_vm8, 1.0, %v11409_v38  ;;  %v4765_v34 = vmul.f32 %v9564_v53, %v4759_v12  ;;  %5077 = vmatprep.subr.bf16.mxu1 %v10412_v37  ;;  %v10418_v12 = vld [vmem:[#allocation12 + $0x44] ss:$16 sps:$4 sm:$0xff]   ;;  %v10416_v0 = vld [vmem:[#allocation12 + $0x40] ss:$16 sps:$4 sm:$0xff]  }
 0x6ab   :  { %v4718_v59 = vadd.f32 %v4716_v60, %v4690_v11  ;;  %v4691_v19 = vadd.f32 %v4689_v31, %v4661_v58  ;;  %v4717_v41 = vmul.f32 %v9560_v15, %v4711_v6  ;;  %v4760_v23 = vmul.f32 %v13242_v3, %v4745_v27  ;;  %5078 = vmatpush1.bf16.msra.mxu1 %v10410_v22  ;;  %v10421_v31 = vld [vmem:[#allocation12 + $0x64] ss:$16 sps:$4 sm:$0xff]   ;;  %v10419_v27 = vld [vmem:[#allocation12 + $0x60] ss:$16 sps:$4 sm:$0xff]   ;;  %v10440_v22 = vld [vmem:[#allocation12 + $0x48] ss:$16 sps:$4 sm:$0xff]  }
 0x6ac   :  { %v4738_v32 = vmul.f32 %v9561_v39, %v13198_v17  ;;  %v4801_v55 = vsel %vm4799_vm6, %v4798_v45, %v4797_v33  ;;  %v13271_v48 = vsel %vm4807_vm9, 1.0, %v11409_v38  ;;  %v4793_v51 = vmul.f32 %v9567_v52, %v4787_v54  ;;  %v10415_v33 = vld [vmem:[#allocation12 + $0x24] ss:$16 sps:$4 sm:$0xff]   ;;  %v10413_v39 = vld [vmem:[#allocation12 + $0x20] ss:$16 sps:$4 sm:$0xff]  }
 0x6ad   :  { %v4739_v5 = vadd.f32 %v4737_v50, %v4718_v59  ;;  %v4719_v29 = vadd.f32 %v4717_v41, %v4691_v19  ;;  %v4788_v49 = vmul.f32 %v13263_v25, %v4773_v56  ;;  %v4821_v46 = vmul.f32 %v9570_v24, %v4815_v43  ;;  %5079 = vmatprep.subr.bf16.mxu1 %v10415_v33  ;;  %v10424_v59 = vld [vmem:[#allocation12 + $0x84] ss:$16 sps:$4 sm:$0xff]   ;;  %v10422_v50 = vld [vmem:[#allocation12 + $0x80] ss:$16 sps:$4 sm:$0xff]   ;;  %v10445_v37 = vld [vmem:[#allocation12 + $0x6c] ss:$16 sps:$4 sm:$0xff]  }
 0x6ae   :  { %v4766_v61 = vmul.f32 %v9564_v53, %v4760_v23  ;;  %v4816_v62 = vmul.f32 %v13271_v48, %v4801_v55  ;;  %v10427_v54 = vld [vmem:[#allocation12 + $0xa4] ss:$16 sps:$4 sm:$0xff]   ;;  %v10425_v6 = vld [vmem:[#allocation12 + $0xa0] ss:$16 sps:$4 sm:$0xff]   ;;  %v10443_v33 = vld [vmem:[#allocation12 + $0x68] ss:$16 sps:$4 sm:$0xff]  }
 0x6af   :  { %v4767_v13 = vadd.f32 %v4765_v34, %v4739_v5  ;;  %v4740_v44 = vadd.f32 %v4738_v32, %v4719_v29  ;;  %v4794_v8 = vmul.f32 %v9567_v52, %v4788_v49  ;;  %5080 = vmatpush1.bf16.msra.mxu1 %v10413_v39  ;;  %v10430_v52 = vld [vmem:[#allocation12 + $0xc4] ss:$16 sps:$4 sm:$0xff]   ;;  %v10428_v43 = vld [vmem:[#allocation12 + $0xc0] ss:$16 sps:$4 sm:$0xff]   ;;  %v10436_v5 = vld [vmem:[#allocation12 + $0xc] ss:$16 sps:$4 sm:$0xff]  }
 0x6b0   :  { %v4822_v9 = vmul.f32 %v9570_v24, %v4816_v62  ;;  %5081 = vmatprep.subr.bf16.mxu1 %v10418_v12  ;;  %v10433_v19 = vld [vmem:[#allocation12 + $0xe4] ss:$16 sps:$4 sm:$0xff]   ;;  %v10431_v56 = vld [vmem:[#allocation12 + $0xe0] ss:$16 sps:$4 sm:$0xff]   ;;  %v10448_v39 = vld [vmem:[#allocation12 + $0x8c] ss:$16 sps:$4 sm:$0xff]  }
 0x6b1   :  { %v4795_v30 = vadd.f32 %v4793_v51, %v4767_v13  ;;  %v4768_v28 = vadd.f32 %v4766_v61, %v4740_v44  ;;  %v9571_v51 = vld [vmem:[#allocation18 + $0x5] ss:$0 sm:$0xff]  ;;  %v10446_v12 = vld [vmem:[#allocation12 + $0x88] ss:$16 sps:$4 sm:$0xff]  }
 0x6b3   :  { %v4823_v15 = vadd.f32 %v4821_v46, %v4795_v30  ;;  %v4796_v45 = vadd.f32 %v4794_v8, %v4768_v28  ;;  %5082 = vmatpush1.bf16.msra.mxu1 %v10416_v0  ;;  %v9572_v30 = vld [vmem:[#allocation18 + $0x6] ss:$0 sm:$0xff]  ;;  %v10434_v28 = vld [vmem:[#allocation12 + $0x8] ss:$16 sps:$4 sm:$0xff]   ;;  %v10451_v0 = vld [vmem:[#allocation12 + $0xac] ss:$16 sps:$4 sm:$0xff]  }
 0x6b4   :  { %5083 = vmatprep.subr.bf16.mxu1 %v10421_v31  ;;  %v10461_v31 = vld [vmem:[#allocation13 + $0x8] sm:$0xff]  }
 0x6b5   :  { %4827 = vadd.xlane.f32.xlu0 %v4823_v15  ;;  %v4824_v18 = vadd.f32 %v4822_v9, %v4796_v45  ;;  %v10439_v45 = vld [vmem:[#allocation12 + $0x2c] ss:$16 sps:$4 sm:$0xff]   ;;  %v10437_v9 = vld [vmem:[#allocation12 + $0x28] ss:$16 sps:$4 sm:$0xff]  }
 0x6b7   :  { %4829 = vadd.xlane.f32.xlu1 %v4824_v18  ;;  %5084 = vmatpush1.bf16.msra.mxu1 %v10419_v27  ;;  %v10462_v27 = vld [vmem:[#allocation13 + $0x50] sm:$0xff]  }
 0x6b8   :  { %5085 = vmatprep.subr.bf16.mxu1 %v10424_v59  ;;  %v10463_v59 = vld [vmem:[#allocation13 + $0x10] sm:$0xff]  }
 0x6bb   :  { %5086 = vmatpush1.bf16.msra.mxu1 %v10422_v50  ;;  %v10464_v50 = vld [vmem:[#allocation13 + $0x58] sm:$0xff]  }
 0x6bc   :  { %5087 = vmatprep.subr.bf16.mxu1 %v10427_v54  ;;  %v10465_v54 = vld [vmem:[#allocation13 + $0x18] sm:$0xff]  }
 0x6bf   :  { %5088 = vmatpush1.bf16.msra.mxu1 %v10425_v6  ;;  %v10466_v6 = vld [vmem:[#allocation13 + $0x60] sm:$0xff]  }
 0x6c0   :  { %5089 = vmatprep.subr.bf16.mxu1 %v10430_v52  ;;  %v10467_v52 = vld [vmem:[#allocation13 + $0x20] sm:$0xff]  }
 0x6c3   :  { %5090 = vmatpush1.bf16.msra.mxu1 %v10428_v43  ;;  %v10468_v43 = vld [vmem:[#allocation13 + $0x68] sm:$0xff]  }
 0x6c4   :  { %5091 = vmatprep.subr.bf16.mxu1 %v10433_v19  ;;  %v10469_v19 = vld [vmem:[#allocation13 + $0x28] sm:$0xff]  }
 0x6c7   :  { %5092 = vmatpush1.bf16.msra.mxu1 %v10431_v56  ;;  %v10470_v56 = vld [vmem:[#allocation13 + $0x70] sm:$0xff]  }
 0x6c8   :  { %5120 = vmatprep.subr.bf16.mxu1 %v10436_v5  ;;  %v10471_v5 = vld [vmem:[#allocation13 + $0x30] sm:$0xff]  }
 0x742   :  { %v4828_v14 = vpop.xlane.xlu0 %4827 }
 0x743   :  { %v4831_v20 = vmul.f32 0.0078125, %v4828_v14  ;;  %v10449_v14 = vld [vmem:[#allocation12 + $0xa8] ss:$16 sps:$4 sm:$0xff]  }
 0x744   :  { %v4830_v60 = vpop.xlane.xlu1 %4829 }
 0x745   :  { %v4833_v11 = vsub.f32 %v4823_v15, %v4831_v20  ;;  %v4832_v1 = vmul.f32 0.0078125, %v4830_v60  ;;  %v10454_v20 = vld [vmem:[#allocation12 + $0xcc] ss:$16 sps:$4 sm:$0xff]  }
 0x746   :  { %v10457_v60 = vld [vmem:[#allocation12 + $0xec] ss:$16 sps:$4 sm:$0xff]  }
 0x747   :  { %v4835_v63 = vmul.f32 %v4833_v11, %v4833_v11  ;;  %v4834_v53 = vsub.f32 %v4824_v18, %v4832_v1  ;;  %v10442_v18 = vld [vmem:[#allocation12 + $0x4c] ss:$16 sps:$4 sm:$0xff]   ;;  %v10455_v1 = vld [vmem:[#allocation12 + $0xe8] ss:$16 sps:$4 sm:$0xff]  }
 0x749   :  { %4837 = vadd.xlane.f32.xlu0 %v4835_v63  ;;  %v4836_v58 = vmul.f32 %v4834_v53, %v4834_v53  ;;  %v10458_v63 = vld [vmem:[#allocation13 + $0x40] sm:$0xff]  }
 0x74b   :  { %4839 = vadd.xlane.f32.xlu1 %v4836_v58  ;;  %v10460_v58 = vld [vmem:[#allocation13 + $0x48] sm:$0xff]  }
 0x7d6   :  { %v4838_v34 = vpop.xlane.xlu0 %4837 }
 0x7d7   :  { %v4841_v24 = vmul.f32 0.0078125, %v4838_v34  ;;  %v10472_v34 = vld [vmem:[#allocation13 + $0x78] sm:$0xff]  }
 0x7d8   :  { %v4840_v23 = vpop.xlane.xlu1 %4839 }
 0x7d9   :  { %v4843_v41 = vadd.f32 1e-06, %v4841_v24  ;;  %v4842_v32 = vmul.f32 0.0078125, %v4840_v23  ;;  %v10473_v24 = vld [vmem:[#allocation13 + $0x38] sm:$0xff]   ;;  %v10475_v23 = vld [vmem:[#allocation13 + $0x80] sm:$0xff]  }
 0x7db   :  { %10990 = vrsqrt.f32 %v4843_v41  ;;  %v4844_v55 = vadd.f32 1e-06, %v4842_v32  ;;  %v10474_v41 = vld [vmem:[#allocation13 + $0xc0] sm:$0xff]   ;;  %v10476_v32 = vld [vmem:[#allocation13 + $0xc8] sm:$0xff]  }
 0x7dc   :  { %10057 = vmatprep.subr.bf16.mxu0 %v10474_v41 }
 0x7dd   :  { %10992 = vrsqrt.f32 %v4844_v55  ;;  %10058 = vmatpush3.bf16.msra.mxu0 %v10475_v23  ;;  %v10477_v55 = vld [vmem:[#allocation13 + $0x88] sm:$0xff]  }
 0x7de   :  { %10059 = vmatprep.subr.bf16.mxu0 %v10476_v32 }
 0x7e1   :  { %10060 = vmatpush3.bf16.msra.mxu0 %v10477_v55 }
 0x7e5   :  { %v10991_v13 = vpop.eup %10990 }
 0x7e6   :  { %v4847_v29 = vmul.f32 %v10991_v13, %v4833_v11  ;;  %v10452_v11 = vld [vmem:[#allocation12 + $0xc8] ss:$16 sps:$4 sm:$0xff]   ;;  %v10478_v13 = vld [vmem:[#allocation13 + $0xd0] sm:$0xff]  }
 0x7e7   :  { %v10993_v46 = vpop.eup %10992  ;;  %10061 = vmatprep.subr.bf16.mxu0 %v10478_v13 }
 0x7e8   :  { %v4853_v49 = vmul.f32 %v9571_v51, %v4847_v29  ;;  %v4848_v44 = vmul.f32 %v10993_v46, %v4834_v53  ;;  %v10459_v53 = vld [vmem:[#allocation13] sm:$0xff]   ;;  %v10480_v29 = vld [vmem:[#allocation13 + $0xd8] sm:$0xff]  }
 0x7e9   :  { %v10482_v46 = vld [vmem:[#allocation13 + $0xe0] sm:$0xff]  }
 0x7ea   :  { %v4854_v61 = vmul.f32 %v9571_v51, %v4848_v44  ;;  %v4859_v62 = vadd.f32 %v9572_v30, %v4853_v49  ;;  %v10479_v51 = vld [vmem:[#allocation13 + $0x90] sm:$0xff]   ;;  %v10481_v49 = vld [vmem:[#allocation13 + $0x98] sm:$0xff]   ;;  %v10484_v44 = vld [vmem:[#allocation13 + $0xe8] sm:$0xff]  }
 0x7eb   :  { %10062 = vmatpush3.bf16.msra.mxu0 %v10479_v51 }
 0x7ec   :  { %v4860_v15 = vadd.f32 %v9572_v30, %v4854_v61  ;;  %10063 = vmatprep.subr.bf16.mxu0 %v10480_v29  ;;  %v10483_v30 = vld [vmem:[#allocation13 + $0xa0] sm:$0xff]   ;;  %v10485_v61 = vld [vmem:[#allocation13 + $0xa8] sm:$0xff]  }
 0x7ee   :  { %v4893_v8 = vpack.c.bf16 %v4860_v15, %v4859_v62  ;;  %v10486_v62 = vld [vmem:[#allocation13 + $0xf0] sm:$0xff]  }
 0x7ef   :  { %10064 = vmatpush3.bf16.msra.mxu0 %v10481_v49  ;;  %v10487_v15 = vld [vmem:[#allocation13 + $0xb0] sm:$0xff]   ;;  %v13285_v49 = vsub.s32 2, %v13777_v7 }
 0x7f0   :  { %5110 = vmatmul.mubr.bf16.vlgmr.msra.gmra.mrb[12].mxu1 %v4893_v8  ;;  %10065 = vmatprep.subr.bf16.mxu0 %v10482_v46 }
 0x7f1   :  { %5121 = vmatpush1.bf16.msra.mxu1 %v10434_v28  ;;  %5152 = vmatprep.mubr.bf16.mxu1 %v11408_v35  ;;  %v10488_v28 = vld [vmem:[#allocation13 + $0xf8] sm:$0xff]  }
 0x7f2   :  { %5122 = vmatprep.subr.bf16.mxu1 %v10439_v45  ;;  %v13277_v45 = vsub.s32 0, %v13777_v7 }
 0x7f3   :  { %10066 = vmatpush3.bf16.msra.mxu0 %v10483_v30 }
 0x7f4   :  { %10067 = vmatprep.subr.bf16.mxu0 %v10484_v44 }
 0x7f5   :  { %5123 = vmatpush1.bf16.msra.mxu1 %v10437_v9  ;;  %v4895_v9 = vld [vmem:[#allocation19 + $0x2] ss:$4 sm:$0xf] }
 0x7f6   :  { %5124 = vmatprep.subr.bf16.mxu1 %v10442_v18  ;;  %v13280_v18 = vsub.s32 1, %v13777_v7 }
 0x7f7   :  { %10068 = vmatpush3.bf16.msra.mxu0 %v10485_v61 }
 0x7f8   :  { %10069 = vmatprep.subr.bf16.mxu0 %v10486_v62  ;;  %v13288_v62 = vsub.s32 3, %v13777_v7 }
 0x7f9   :  { %5125 = vmatpush1.bf16.msra.mxu1 %v10440_v22  ;;  %v4900_v22 = vrot.slane %v4895_v9, %v13277_v45 }
 0x7fa   :  { %5126 = vmatprep.subr.bf16.mxu1 %v10445_v37  ;;  %v4904_v37 = vrot.slane %v4895_v9, %v13280_v18 }
 0x7fb   :  { %10070 = vmatpush3.bf16.msra.mxu0 %v10487_v15 }
 0x7fc   :  { %10071 = vmatprep.subr.bf16.mxu0 %v10488_v28 }
 0x7fd   :  { %5127 = vmatpush1.bf16.msra.mxu1 %v10443_v33 }
 0x7fe   :  { %5128 = vmatprep.subr.bf16.mxu1 %v10448_v39 }
 0x801   :  { %5129 = vmatpush1.bf16.msra.mxu1 %v10446_v12 }
 0x802   :  { %5130 = vmatprep.subr.bf16.mxu1 %v10451_v0 }
 0x805   :  { %5131 = vmatpush1.bf16.msra.mxu1 %v10449_v14 }
 0x806   :  { %5132 = vmatprep.subr.bf16.mxu1 %v10454_v20 }
 0x809   :  { %5133 = vmatpush1.bf16.msra.mxu1 %v10452_v11 }
 0x80a   :  { %5134 = vmatprep.subr.bf16.mxu1 %v10457_v60 }
 0x80d   :  { %5135 = vmatpush1.bf16.msra.mxu1 %v10455_v1 }
 0x80e   :  { %10035 = vmatprep.subr.bf16.mxu1 %v10458_v63 }
 0x810   :  { %5153 = vmatmul.mubr.bf16.vlgmr.msra.gmra.mrb[16].mxu1 %v4893_v8  ;;  %v10489_v8 = vld [vmem:[#allocation13 + $0xb8] sm:$0xff]  }
 0x811   :  { %10036 = vmatpush3.bf16.msra.mxu1 %v10459_v53  ;;  %10072 = vmatpush3.bf16.msra.mxu0 %v10489_v8 }
 0x812   :  { %10037 = vmatprep.subr.bf16.mxu1 %v10460_v58 }
 0x815   :  { %10038 = vmatpush3.bf16.msra.mxu1 %v10461_v31 }
 0x816   :  { %10039 = vmatprep.subr.bf16.mxu1 %v10462_v27 }
 0x819   :  { %10040 = vmatpush3.bf16.msra.mxu1 %v10463_v59 }
 0x81a   :  { %10041 = vmatprep.subr.bf16.mxu1 %v10464_v50 }
 0x81d   :  { %10042 = vmatpush3.bf16.msra.mxu1 %v10465_v54 }
 0x81e   :  { %10043 = vmatprep.subr.bf16.mxu1 %v10466_v6 }
 0x821   :  { %10044 = vmatpush3.bf16.msra.mxu1 %v10467_v52 }
 0x822   :  { %10045 = vmatprep.subr.bf16.mxu1 %v10468_v43 }
 0x825   :  { %10046 = vmatpush3.bf16.msra.mxu1 %v10469_v19 }
 0x826   :  { %10047 = vmatprep.subr.bf16.mxu1 %v10470_v56 }
 0x829   :  { %10048 = vmatpush3.bf16.msra.mxu1 %v10471_v5 }
 0x82a   :  { %10049 = vmatprep.subr.bf16.mxu1 %v10472_v34 }
 0x82d   :  { %10050 = vmatpush3.bf16.msra.mxu1 %v10473_v24 }
 0x8c3   :  { %v5111_v33 = vpop.f32.mrb[12].mxu1 }
 0x8c4   :  { %v5112_v39 = vadd.f32 %v5111_v33, %v4900_v22  ;;  %v5113_v12 = vpop.f32.mrb[13].mxu1 }
 0x8c5   :  { %v5114_v0 = vadd.f32 %v5113_v12, %v4904_v37  ;;  %v5115_v14 = vpop.f32.mrb[14].mxu1 }
 0x8c6   :  { %v5163_v20 = vmul.f32 %v5112_v39, %v5112_v39  ;;  %v5116_v11 = vadd.f32 %v5115_v14, %v4900_v22  ;;  %v5117_v60 = vpop.f32.mrb[15].mxu1  ;;  %v4908_v22 = vrot.slane %v4895_v9, %v13285_v49  ;;  %v4912_v14 = vrot.slane %v4895_v9, %v13288_v62 }
 0x8c7   :  { %v5164_v1 = vmul.f32 %v5114_v0, %v5114_v0  ;;  %v5118_v63 = vadd.f32 %v5117_v60, %v4904_v37 }
 0x8c8   :  { %v5171_v53 = vmul.f32 %v5163_v20, %v5112_v39  ;;  %v5167_v58 = vmul.f32 %v5116_v11, %v5116_v11 }
 0x8c9   :  { %v5172_v31 = vmul.f32 %v5164_v1, %v5114_v0  ;;  %v5168_v27 = vmul.f32 %v5118_v63, %v5118_v63 }
 0x8ca   :  { %v5179_v59 = vmul.f32 0.044715, %v5171_v53  ;;  %v5175_v50 = vmul.f32 %v5167_v58, %v5116_v11 }
 0x8cb   :  { %v5180_v54 = vmul.f32 0.044715, %v5172_v31  ;;  %v5176_v6 = vmul.f32 %v5168_v27, %v5118_v63 }
 0x8cc   :  { %v5187_v52 = vadd.f32 %v5179_v59, %v5112_v39  ;;  %v5183_v43 = vmul.f32 0.044715, %v5175_v50 }
 0x8cd   :  { %v5188_v19 = vadd.f32 %v5180_v54, %v5114_v0  ;;  %v5184_v56 = vmul.f32 0.044715, %v5176_v6 }
 0x8ce   :  { %v5195_v5 = vmul.f32 0.7978846, %v5187_v52  ;;  %v5191_v34 = vadd.f32 %v5183_v43, %v5116_v11 }
 0x8cf   :  { %v5196_v24 = vmul.f32 0.7978846, %v5188_v19  ;;  %v5192_v41 = vadd.f32 %v5184_v56, %v5118_v63 }
 0x8d0   :  { %10994 = vtanh.f32 %v5195_v5  ;;  %v5199_v23 = vmul.f32 0.7978846, %v5191_v34 }
 0x8d1   :  { %10996 = vtanh.f32 %v5196_v24  ;;  %v5200_v32 = vmul.f32 0.7978846, %v5192_v41 }
 0x8d2   :  { %10998 = vtanh.f32 %v5199_v23 }
 0x8d3   :  { %11000 = vtanh.f32 %v5200_v32 }
 0x8da   :  { %v10995_v55 = vpop.eup %10994 }
 0x8db   :  { %v10997_v13 = vpop.eup %10996  ;;  %v5211_v51 = vadd.f32 1.0, %v10995_v55 }
 0x8dc   :  { %v10999_v29 = vpop.eup %10998  ;;  %v5212_v46 = vadd.f32 1.0, %v10997_v13 }
 0x8dd   :  { %v11001_v30 = vpop.eup %11000  ;;  %v5219_v44 = vmul.f32 0.5, %v5211_v51  ;;  %v5215_v61 = vadd.f32 1.0, %v10999_v29 }
 0x8de   :  { %v5216_v15 = vadd.f32 1.0, %v11001_v30  ;;  %v5220_v28 = vmul.f32 0.5, %v5212_v46 }
 0x8df   :  { %v5223_v8 = vmul.f32 0.5, %v5215_v61  ;;  %v5227_v33 = vmul.f32 %v5219_v44, %v5112_v39 }
 0x8e0   :  { %v5224_v37 = vmul.f32 0.5, %v5216_v15  ;;  %v5228_v20 = vmul.f32 %v5220_v28, %v5114_v0 }
 0x8e1   :  { %v5231_v12 = vmul.f32 %v5223_v8, %v5116_v11 }
 0x8e2   :  { %v5232_v60 = vmul.f32 %v5224_v37, %v5118_v63 }
 0x8e3   :  { %v5154_v1 = vpop.f32.mrb[16].mxu1  ;;  %v5299_v53 = vpack.c.bf16 %v5231_v12, %v5227_v33 }
 0x8e4   :  { %v5155_v58 = vadd.f32 %v5154_v1, %v4908_v22  ;;  %v5156_v31 = vpop.f32.mrb[17].mxu1  ;;  %v5300_v27 = vpack.c.bf16 %v5232_v60, %v5228_v20 }
 0x8e5   :  { %v5157_v59 = vadd.f32 %v5156_v31, %v4912_v14  ;;  %v5158_v50 = vpop.f32.mrb[18].mxu1 }
 0x8e6   :  { %v5165_v54 = vmul.f32 %v5155_v58, %v5155_v58  ;;  %v5159_v6 = vadd.f32 %v5158_v50, %v4908_v22  ;;  %v5160_v52 = vpop.f32.mrb[19].mxu1  ;;  %5532 = vmatprep.mubr.bf16.mxu1 %v5300_v27 }
 0x8e7   :  { %v5166_v43 = vmul.f32 %v5157_v59, %v5157_v59  ;;  %v5161_v19 = vadd.f32 %v5160_v52, %v4912_v14  ;;  %5533 = vmatmul.mubr.bf16.vlgmr.msra.gmra.mrb[20].mxu1 %v5299_v53 }
 0x8e8   :  { %v5173_v39 = vmul.f32 %v5165_v54, %v5155_v58  ;;  %v5169_v11 = vmul.f32 %v5159_v6, %v5159_v6  ;;  %5977 = vmatprep.mubr.bf16.mxu1 %v11408_v35 }
 0x8e9   :  { %v5174_v9 = vmul.f32 %v5166_v43, %v5157_v59  ;;  %v5170_v0 = vmul.f32 %v5161_v19, %v5161_v19 }
 0x8ea   :  { %v5181_v63 = vmul.f32 0.044715, %v5173_v39  ;;  %v5177_v56 = vmul.f32 %v5169_v11, %v5159_v6 }
 0x8eb   :  { %v5182_v5 = vmul.f32 0.044715, %v5174_v9  ;;  %v5178_v34 = vmul.f32 %v5170_v0, %v5161_v19 }
 0x8ec   :  { %v5189_v24 = vadd.f32 %v5181_v63, %v5155_v58  ;;  %v5185_v41 = vmul.f32 0.044715, %v5177_v56  ;;  %v9605_v63 = vld [vmem:[#allocation18 + $0x7] ss:$0 sm:$0xff] }
 0x8ed   :  { %v5190_v23 = vadd.f32 %v5182_v5, %v5157_v59  ;;  %v5186_v32 = vmul.f32 0.044715, %v5178_v34 }
 0x8ee   :  { %v5197_v55 = vmul.f32 0.7978846, %v5189_v24  ;;  %v5193_v13 = vadd.f32 %v5185_v41, %v5159_v6 }
 0x8ef   :  { %v5198_v51 = vmul.f32 0.7978846, %v5190_v23  ;;  %v5194_v29 = vadd.f32 %v5186_v32, %v5161_v19 }
 0x8f0   :  { %11002 = vtanh.f32 %v5197_v55  ;;  %v5201_v46 = vmul.f32 0.7978846, %v5193_v13 }
 0x8f1   :  { %11004 = vtanh.f32 %v5198_v51  ;;  %v5202_v30 = vmul.f32 0.7978846, %v5194_v29 }
 0x8f2   :  { %11006 = vtanh.f32 %v5201_v46 }
 0x8f3   :  { %11008 = vtanh.f32 %v5202_v30 }
 0x8fa   :  { %v11003_v44 = vpop.eup %11002 }
 0x8fb   :  { %v11005_v61 = vpop.eup %11004  ;;  %v5213_v15 = vadd.f32 1.0, %v11003_v44 }
 0x8fc   :  { %v11007_v28 = vpop.eup %11006  ;;  %v5214_v8 = vadd.f32 1.0, %v11005_v61 }
 0x8fd   :  { %v11009_v22 = vpop.eup %11008  ;;  %v5221_v37 = vmul.f32 0.5, %v5213_v15  ;;  %v5217_v33 = vadd.f32 1.0, %v11007_v28 }
 0x8fe   :  { %v5218_v12 = vadd.f32 1.0, %v11009_v22  ;;  %v5222_v14 = vmul.f32 0.5, %v5214_v8 }
 0x8ff   :  { %v5225_v20 = vmul.f32 0.5, %v5217_v33  ;;  %v5229_v1 = vmul.f32 %v5221_v37, %v5155_v58  ;;  %v9639_v37 = vld [vmem:[#allocation18 + $0x14] ss:$0 sm:$0xff] }
 0x900   :  { %v5226_v60 = vmul.f32 0.5, %v5218_v12  ;;  %v5230_v31 = vmul.f32 %v5222_v14, %v5157_v59  ;;  %v9638_v59 = vld [vmem:[#allocation18 + $0x8] ss:$0 sm:$0xff]  ;;  %v9640_v12 = vld [vmem:[#allocation18 + $0x15] ss:$0 sm:$0xff] }
 0x901   :  { %v5233_v53 = vmul.f32 %v5225_v20, %v5159_v6 }
 0x902   :  { %v5234_v27 = vmul.f32 %v5226_v60, %v5161_v19 }
 0x903   :  { %v5301_v50 = vpack.c.bf16 %v5233_v53, %v5229_v1 }
 0x904   :  { %v5302_v54 = vpack.c.bf16 %v5234_v27, %v5230_v31  ;;  %v9641_v27 = vld [vmem:[#allocation18 + $0x16] ss:$0 sm:$0xff] }
 0x906   :  { %5573 = vmatprep.mubr.bf16.mxu0 %v5302_v54 }
 0x907   :  { %5574 = vmatmul.mubr.bf16.vlgmr.msra.gmra.mrb[12].mxu0 %v5301_v50 }
 0x908   :  { %6020 = vmatprep.mubr.bf16.mxu0 %v11408_v35 }
 0x9ba   :  { %v10051_v52 = vpop.f32.mrb[20].mxu1 }
 0x9bb   :  { %v10052_v43 = vpop.f32.mrb[21].mxu1 }
 0x9bc   :  { %v10053_v39 = vadd.f32 %v10052_v43, %v10051_v52  ;;  %v10054_v11 = vpop.f32.mrb[22].mxu1 }
 0x9bd   :  { %v10055_v9 = vpop.f32.mrb[23].mxu1 }
 0x9be   :  { %v10056_v0 = vadd.f32 %v10055_v9, %v10054_v11  ;;  %v5535_v34 = vadd.f32 %v10053_v39, %v9605_v63  ;;  %v9642_v11 = vld [vmem:[#allocation18 + $0x17] ss:$0 sm:$0xff] }
 0x9c0   :  { %v5538_v24 = vadd.f32 %v10056_v0, %v9605_v63 }
 0x9da   :  { %v10073_v56 = vpop.f32.mrb[12].mxu0 }
 0x9db   :  { %v10074_v5 = vpop.f32.mrb[13].mxu0 }
 0x9dc   :  { %v10075_v58 = vadd.f32 %v10074_v5, %v10073_v56  ;;  %v10076_v6 = vpop.f32.mrb[14].mxu0 }
 0x9dd   :  { %v10077_v19 = vpop.f32.mrb[15].mxu0 }
 0x9de   :  { %v5576_v41 = vadd.f32 %v10075_v58, %v5535_v34  ;;  %v10078_v23 = vadd.f32 %v10077_v19, %v10076_v6  ;;  %v9643_v58 = vld [vmem:[#allocation18 + $0x18] ss:$0 sm:$0xff] }
 0x9e0   :  { %v5587_v32 = vmul.f32 %v9638_v59, %v5576_v41  ;;  %v5579_v55 = vadd.f32 %v10078_v23, %v5538_v24  ;;  %v9644_v41 = vld [vmem:[#allocation18 + $0x19] ss:$0 sm:$0xff] }
 0x9e2   :  { %v13295_v13 = vadd.f32 %v5587_v32, %v13186_v10  ;;  %v5588_v51 = vmul.f32 %v9638_v59, %v5579_v55 }
 0x9e4   :  { %v13298_v29 = vadd.f32 %v5588_v51, %v13198_v17  ;;  %v5591_v46 = vrot.slane %v13295_v13, 5  ;;  %v5606_v30 = vrot.slane %v13295_v13, 6  ;;  %v5621_v44 = vrot.slane %v13295_v13, 7 }
 0x9e5   :  { %v5647_v10 = vrot.slane %v13295_v13, 1  ;;  %v5662_v50 = vrot.slane %v13295_v13, 2  ;;  %v5643_v24 = vmul.f32 %v9642_v11, %v13295_v13 }
 0x9e6   :  { %v5592_v61 = vrot.slane %v13298_v29, 5  ;;  %v5607_v15 = vrot.slane %v13298_v29, 6  ;;  %v5622_v28 = vrot.slane %v13298_v29, 7  ;;  %v5648_v8 = vrot.slane %v13298_v29, 1 }
 0x9e7   :  { %v5663_v22 = vrot.slane %v13298_v29, 2  ;;  %v5678_v20 = vrot.slane %v13298_v29, 3 }
 0x9e8   :  { %v5594_v17 = vsel %vm4638_vm10, %v5592_v61, %v5591_v46  ;;  %v5609_v33 = vsel %vm4666_vm11, %v5607_v15, %v5606_v30  ;;  %v5624_v14 = vsel %vm4694_vm12, %v5622_v28, %v5621_v44  ;;  %v5649_v31 = vsel %vm4743_vm14, %v5647_v10, %v5648_v8 }
 0x9e9   :  { %v5596_v60 = vmul.f32 %v13175_v36, %v5594_v17  ;;  %v5611_v1 = vmul.f32 %v13178_v21, %v5609_v33  ;;  %v5626_v53 = vmul.f32 %v13183_v57, %v5624_v14  ;;  %v5593_v54 = vsel %vm4638_vm10, %v5591_v46, %v5592_v61 }
 0x9ea   :  { %v5608_v52 = vsel %vm4666_vm11, %v5606_v30, %v5607_v15  ;;  %v5677_v36 = vrot.slane %v13295_v13, 3  ;;  %v5652_v21 = vmul.f32 %v13189_v26, %v5649_v31  ;;  %v5664_v57 = vsel %vm4771_vm4, %v5662_v50, %v5663_v22  ;;  %v9645_v30 = vld [vmem:[#allocation18 + $0x1a] ss:$0 sm:$0xff]  ;;  %v10492_v31 = vld [vmem:[#allocation12 + $0x104] ss:$16 sps:$4 sm:$0xff]  }
 0x9eb   :  { %v5602_v43 = vmul.f32 %v9639_v37, %v5596_v60  ;;  %v5617_v39 = vmul.f32 %v9640_v12, %v5611_v1  ;;  %v5597_v9 = vmul.f32 %v13204_v4, %v5593_v54  ;;  %v5612_v0 = vmul.f32 %v13207_v42, %v5608_v52  ;;  %v10498_v54 = vld [vmem:[#allocation12 + $0x124] ss:$16 sps:$4 sm:$0xff]   ;;  %5945 = vmatprep.subr.bf16.mxu1 %v10492_v31  ;;  %v10496_v52 = vld [vmem:[#allocation12 + $0x120] ss:$16 sps:$4 sm:$0xff]  }
 0x9ec   :  { %v5632_v56 = vmul.f32 %v9641_v27, %v5626_v53  ;;  %v5679_v5 = vsel %vm4799_vm6, %v5677_v36, %v5678_v20  ;;  %v5623_v34 = vsel %vm4694_vm12, %v5621_v44, %v5622_v28  ;;  %v5650_v26 = vsel %vm4743_vm14, %v5648_v8, %v5647_v10 }
 0x9ed   :  { %v5619_v63 = vadd.f32 %v5617_v39, %v5602_v43  ;;  %v5603_v6 = vmul.f32 %v9639_v37, %v5597_v9  ;;  %v5618_v59 = vmul.f32 %v9640_v12, %v5612_v0  ;;  %v5667_v4 = vmul.f32 %v13193_v16, %v5664_v57  ;;  %v10504_v43 = vld [vmem:[#allocation12 + $0x144] ss:$16 sps:$4 sm:$0xff]   ;;  %v10507_v39 = vld [vmem:[#allocation12 + $0x14c] ss:$16 sps:$4 sm:$0xff]  }
 0x9ee   :  { %v5627_v42 = vmul.f32 %v13213_v40, %v5623_v34  ;;  %v5682_v23 = vmul.f32 %v13201_v47, %v5679_v5  ;;  %v5665_v55 = vsel %vm4771_vm4, %v5663_v22, %v5662_v50  ;;  %v5658_v46 = vmul.f32 %v9643_v58, %v5652_v21  ;;  %v10495_v50 = vld [vmem:[#allocation12 + $0x10c] ss:$16 sps:$4 sm:$0xff]  }
 0x9ef   :  { %v5634_v19 = vadd.f32 %v5632_v56, %v5619_v63  ;;  %v5620_v32 = vadd.f32 %v5618_v59, %v5603_v6  ;;  %v5653_v61 = vmul.f32 %v13242_v3, %v5650_v26  ;;  %v5644_v15 = vmul.f32 %v9642_v11, %v13298_v29  ;;  %5988 = vmatprep.subr.bf16.mxu0 %v10495_v50  ;;  %v10505_v11 = vld [vmem:[#allocation12 + $0x148] ss:$16 sps:$4 sm:$0xff]   ;;  %v10513_v6 = vld [vmem:[#allocation12 + $0x16c] ss:$16 sps:$4 sm:$0xff]   ;;  %v10508_v59 = vld [vmem:[#allocation12 + $0x160] ss:$16 sps:$4 sm:$0xff]  }
 0x9f0   :  { %v5633_v44 = vmul.f32 %v9641_v27, %v5627_v42  ;;  %v5680_v16 = vsel %vm4799_vm6, %v5678_v20, %v5677_v36  ;;  %v5673_v40 = vmul.f32 %v9644_v41, %v5667_v4  ;;  %v5668_v47 = vmul.f32 %v13263_v25, %v5665_v55  ;;  %v10490_v20 = vld [vmem:[#allocation12 + $0x100] ss:$16 sps:$4 sm:$0xff]   ;;  %v10493_v27 = vld [vmem:[#allocation12 + $0x108] ss:$16 sps:$4 sm:$0xff]   ;;  %v10501_v25 = vld [vmem:[#allocation12 + $0x12c] ss:$16 sps:$4 sm:$0xff]  }
 0x9f1   :  { %v5645_v51 = vadd.f32 %v5643_v24, %v5634_v19  ;;  %v5688_v10 = vmul.f32 %v9645_v30, %v5682_v23  ;;  %v5659_v22 = vmul.f32 %v9643_v58, %v5653_v61  ;;  %v5683_v33 = vmul.f32 %v13271_v48, %v5680_v16  ;;  %5946 = vmatpush1.bf16.msra.mxu1 %v10490_v20  ;;  %v10499_v48 = vld [vmem:[#allocation12 + $0x128] ss:$16 sps:$4 sm:$0xff]   ;;  %v10502_v36 = vld [vmem:[#allocation12 + $0x140] ss:$16 sps:$4 sm:$0xff]   ;;  %v10510_v58 = vld [vmem:[#allocation12 + $0x164] ss:$16 sps:$4 sm:$0xff]  }
 0x9f2   :  { %v5635_v8 = vadd.f32 %v5633_v44, %v5620_v32  ;;  %v5674_v60 = vmul.f32 %v9644_v41, %v5668_v47  ;;  %5989 = vmatpush1.bf16.msra.mxu0 %v10493_v27  ;;  %5947 = vmatprep.subr.bf16.mxu1 %v10498_v54  ;;  %v10511_v26 = vld [vmem:[#allocation12 + $0x168] ss:$16 sps:$4 sm:$0xff]   ;;  %v10516_v19 = vld [vmem:[#allocation12 + $0x184] ss:$16 sps:$4 sm:$0xff]   ;;  %v10519_v24 = vld [vmem:[#allocation12 + $0x18c] ss:$16 sps:$4 sm:$0xff]  }
 0x9f3   :  { %v5660_v28 = vadd.f32 %v5658_v46, %v5645_v51  ;;  %v5689_v1 = vmul.f32 %v9645_v30, %v5683_v33  ;;  %5990 = vmatprep.subr.bf16.mxu0 %v10501_v25  ;;  %v10514_v4 = vld [vmem:[#allocation12 + $0x180] ss:$16 sps:$4 sm:$0xff]   ;;  %v10517_v42 = vld [vmem:[#allocation12 + $0x188] ss:$16 sps:$4 sm:$0xff]   ;;  %v10522_v41 = vld [vmem:[#allocation12 + $0x1a4] ss:$16 sps:$4 sm:$0xff]  }
 0x9f4   :  { %v5646_v37 = vadd.f32 %v5644_v15, %v5635_v8  ;;  %v10525_v23 = vld [vmem:[#allocation12 + $0x1ac] ss:$16 sps:$4 sm:$0xff]   ;;  %v10520_v32 = vld [vmem:[#allocation12 + $0x1a0] ss:$16 sps:$4 sm:$0xff]   ;;  %v10523_v55 = vld [vmem:[#allocation12 + $0x1a8] ss:$16 sps:$4 sm:$0xff]  }
 0x9f5   :  { %v5675_v17 = vadd.f32 %v5673_v40, %v5660_v28  ;;  %5948 = vmatpush1.bf16.msra.mxu1 %v10496_v52  ;;  %v10528_v51 = vld [vmem:[#allocation12 + $0x1c4] ss:$16 sps:$4 sm:$0xff]   ;;  %v10531_v46 = vld [vmem:[#allocation12 + $0x1cc] ss:$16 sps:$4 sm:$0xff]   ;;  %v10526_v30 = vld [vmem:[#allocation12 + $0x1c0] ss:$16 sps:$4 sm:$0xff]  }
 0x9f6   :  { %v5661_v14 = vadd.f32 %v5659_v22, %v5646_v37  ;;  %5991 = vmatpush1.bf16.msra.mxu0 %v10499_v48  ;;  %5949 = vmatprep.subr.bf16.mxu1 %v10504_v43  ;;  %v10529_v44 = vld [vmem:[#allocation12 + $0x1c8] ss:$16 sps:$4 sm:$0xff]   ;;  %v10534_v61 = vld [vmem:[#allocation12 + $0x1e4] ss:$16 sps:$4 sm:$0xff]   ;;  %v10537_v15 = vld [vmem:[#allocation12 + $0x1ec] ss:$16 sps:$4 sm:$0xff]  }
 0x9f7   :  { %v5690_v12 = vadd.f32 %v5688_v10, %v5675_v17  ;;  %5992 = vmatprep.subr.bf16.mxu0 %v10507_v39  ;;  %v10532_v16 = vld [vmem:[#allocation12 + $0x1e0] ss:$16 sps:$4 sm:$0xff]   ;;  %v10535_v28 = vld [vmem:[#allocation12 + $0x1e8] ss:$16 sps:$4 sm:$0xff]   ;;  %vm6963_vm10 = vcmask 7168  }
 0x9f8   :  { %v5676_v3 = vadd.f32 %v5674_v60, %v5661_v14  ;;  %v9646_v33 = vld [vmem:[#allocation18 + $0x10] ss:$0 sm:$0xff]  ;;  %v10538_v50 = vld [vmem:[#allocation13 + $0x140] sm:$0xff]   ;;  %v10542_v48 = vld [vmem:[#allocation13 + $0x148] sm:$0xff]  }
 0x9f9   :  { %5694 = vadd.xlane.f32.xlu0 %v5690_v12  ;;  %5950 = vmatpush1.bf16.msra.mxu1 %v10502_v36  ;;  %v10539_v54 = vld [vmem:[#allocation13 + $0x1c0] sm:$0xff]   ;;  %v10543_v43 = vld [vmem:[#allocation13 + $0x1c8] sm:$0xff]  }
 0x9fa   :  { %v5691_v53 = vadd.f32 %v5689_v1, %v5676_v3  ;;  %5993 = vmatpush1.bf16.msra.mxu0 %v10505_v11  ;;  %5951 = vmatprep.subr.bf16.mxu1 %v10510_v58  ;;  %v9647_v3 = vld [vmem:[#allocation18 + $0x11] ss:$0 sm:$0xff]  ;;  %v10540_v25 = vld [vmem:[#allocation13 + $0x100] sm:$0xff]   ;;  %v10544_v39 = vld [vmem:[#allocation13 + $0x108] sm:$0xff]  }
 0x9fb   :  { %5994 = vmatprep.subr.bf16.mxu0 %v10513_v6  ;;  %v10541_v52 = vld [vmem:[#allocation13 + $0x180] sm:$0xff]   ;;  %v10545_v36 = vld [vmem:[#allocation13 + $0x188] sm:$0xff]   ;;  %v10546_v11 = vld [vmem:[#allocation13 + $0x150] sm:$0xff]  }
 0x9fc   :  { %5696 = vadd.xlane.f32.xlu1 %v5691_v53  ;;  %v10555_v58 = vld [vmem:[#allocation13 + $0x1e0] sm:$0xff]  }
 0x9fd   :  { %5952 = vmatpush1.bf16.msra.mxu1 %v10508_v59  ;;  %v10556_v6 = vld [vmem:[#allocation13 + $0x120] sm:$0xff]  }
 0x9fe   :  { %5995 = vmatpush1.bf16.msra.mxu0 %v10511_v26  ;;  %5953 = vmatprep.subr.bf16.mxu1 %v10516_v19  ;;  %v10557_v59 = vld [vmem:[#allocation13 + $0x1a0] sm:$0xff]   ;;  %v10558_v26 = vld [vmem:[#allocation13 + $0x168] sm:$0xff]  }
 0x9ff   :  { %5996 = vmatprep.subr.bf16.mxu0 %v10519_v24  ;;  %v10559_v19 = vld [vmem:[#allocation13 + $0x1e8] sm:$0xff]  }
 0xa00   :  { %v10560_v24 = vld [vmem:[#allocation13 + $0x128] sm:$0xff]  }
 0xa01   :  { %5954 = vmatpush1.bf16.msra.mxu1 %v10514_v4  ;;  %v10561_v4 = vld [vmem:[#allocation13 + $0x1a8] sm:$0xff]  }
 0xa02   :  { %5997 = vmatpush1.bf16.msra.mxu0 %v10517_v42  ;;  %5955 = vmatprep.subr.bf16.mxu1 %v10522_v41  ;;  %v10562_v42 = vld [vmem:[#allocation13 + $0x170] sm:$0xff]  }
 0xa03   :  { %5998 = vmatprep.subr.bf16.mxu0 %v10525_v23  ;;  %v10563_v41 = vld [vmem:[#allocation13 + $0x1f0] sm:$0xff]  }
 0xa04   :  { %v10564_v23 = vld [vmem:[#allocation13 + $0x130] sm:$0xff]  }
 0xa05   :  { %5956 = vmatpush1.bf16.msra.mxu1 %v10520_v32  ;;  %v10565_v32 = vld [vmem:[#allocation13 + $0x1b0] sm:$0xff]  }
 0xa06   :  { %5999 = vmatpush1.bf16.msra.mxu0 %v10523_v55  ;;  %5957 = vmatprep.subr.bf16.mxu1 %v10528_v51  ;;  %v10566_v55 = vld [vmem:[#allocation13 + $0x178] sm:$0xff]  }
 0xa07   :  { %6000 = vmatprep.subr.bf16.mxu0 %v10531_v46  ;;  %v10567_v51 = vld [vmem:[#allocation13 + $0x1f8] sm:$0xff]  }
 0xa08   :  { %v10568_v46 = vld [vmem:[#allocation13 + $0x138] sm:$0xff]  }
 0xa09   :  { %5958 = vmatpush1.bf16.msra.mxu1 %v10526_v30  ;;  %v10569_v30 = vld [vmem:[#allocation13 + $0x1b8] sm:$0xff]  }
 0xa0a   :  { %6001 = vmatpush1.bf16.msra.mxu0 %v10529_v44  ;;  %5959 = vmatprep.subr.bf16.mxu1 %v10534_v61  ;;  %v5763_v44 = vld [vmem:[#allocation19 + $0x3] ss:$4 sm:$0xf] }
 0xa0b   :  { %6002 = vmatprep.subr.bf16.mxu0 %v10537_v15  ;;  %v5768_v61 = vrot.slane %v5763_v44, %v13277_v45  ;;  %v5776_v15 = vrot.slane %v5763_v44, %v13285_v49 }
 0xa0d   :  { %5960 = vmatpush1.bf16.msra.mxu1 %v10532_v16  ;;  %v5772_v16 = vrot.slane %v5763_v44, %v13280_v18 }
 0xa0e   :  { %6003 = vmatpush1.bf16.msra.mxu0 %v10535_v28  ;;  %10079 = vmatprep.subr.bf16.mxu1 %v10538_v50  ;;  %v5780_v28 = vrot.slane %v5763_v44, %v13288_v62 }
 0xa0f   :  { %10101 = vmatprep.subr.bf16.mxu0 %v10539_v54 }
 0xa86   :  { %v5695_v21 = vpop.xlane.xlu0 %5694 }
 0xa87   :  { %v5698_v57 = vmul.f32 0.0078125, %v5695_v21  ;;  %v10547_v21 = vld [vmem:[#allocation13 + $0x1d0] sm:$0xff]  }
 0xa89   :  { %v5700_v9 = vsub.f32 %v5690_v12, %v5698_v57  ;;  %v5697_v0 = vpop.xlane.xlu1 %5696  ;;  %v10548_v57 = vld [vmem:[#allocation13 + $0x110] sm:$0xff]  }
 0xa8a   :  { %v5699_v63 = vmul.f32 0.0078125, %v5697_v0  ;;  %v10550_v0 = vld [vmem:[#allocation13 + $0x158] sm:$0xff]  }
 0xa8b   :  { %v5702_v56 = vmul.f32 %v5700_v9, %v5700_v9 }
 0xa8c   :  { %v5701_v5 = vsub.f32 %v5691_v53, %v5699_v63  ;;  %v10551_v63 = vld [vmem:[#allocation13 + $0x1d8] sm:$0xff]  }
 0xa8d   :  { %5704 = vadd.xlane.f32.xlu0 %v5702_v56  ;;  %v10552_v56 = vld [vmem:[#allocation13 + $0x118] sm:$0xff]  }
 0xa8e   :  { %v5703_v34 = vmul.f32 %v5701_v5, %v5701_v5 }
 0xa90   :  { %5706 = vadd.xlane.f32.xlu1 %v5703_v34  ;;  %v10554_v34 = vld [vmem:[#allocation13 + $0x160] sm:$0xff]  }
 0xb1a   :  { %v5705_v40 = vpop.xlane.xlu0 %5704 }
 0xb1b   :  { %v5708_v8 = vmul.f32 0.0078125, %v5705_v40 }
 0xb1d   :  { %v5710_v47 = vadd.f32 1e-06, %v5708_v8  ;;  %v5707_v10 = vpop.xlane.xlu1 %5706 }
 0xb1e   :  { %v5709_v17 = vmul.f32 0.0078125, %v5707_v10 }
 0xb1f   :  { %11010 = vrsqrt.f32 %v5710_v47 }
 0xb20   :  { %v5711_v37 = vadd.f32 1e-06, %v5709_v17 }
 0xb22   :  { %11012 = vrsqrt.f32 %v5711_v37 }
 0xb29   :  { %v11011_v22 = vpop.eup %11010 }
 0xb2a   :  { %v5714_v12 = vmul.f32 %v11011_v22, %v5700_v9  ;;  %v10549_v9 = vld [vmem:[#allocation13 + $0x190] sm:$0xff]  }
 0xb2c   :  { %v5720_v14 = vmul.f32 %v9646_v33, %v5714_v12  ;;  %v11013_v60 = vpop.eup %11012 }
 0xb2d   :  { %v5715_v1 = vmul.f32 %v11013_v60, %v5701_v5  ;;  %v10553_v5 = vld [vmem:[#allocation13 + $0x198] sm:$0xff]  }
 0xb2e   :  { %v5726_v20 = vadd.f32 %v9647_v3, %v5720_v14 }
 0xb2f   :  { %v5721_v53 = vmul.f32 %v9646_v33, %v5715_v1 }
 0xb31   :  { %v5727_v31 = vadd.f32 %v9647_v3, %v5721_v53 }
 0xb33   :  { %v5761_v27 = vpack.c.bf16 %v5727_v31, %v5726_v20 }
 0xb35   :  { %5978 = vmatmul.mubr.bf16.vlgmr.msra.gmra.mrb[24].mxu1 %v5761_v27  ;;  %6021 = vmatmul.mubr.bf16.vlgmr.msra.gmra.mrb[16].mxu0 %v5761_v27 }
 0xb36   :  { %10080 = vmatpush3.bf16.msra.mxu1 %v10540_v25  ;;  %10102 = vmatpush3.bf16.msra.mxu0 %v10541_v52 }
 0xb37   :  { %10081 = vmatprep.subr.bf16.mxu1 %v10542_v48  ;;  %10103 = vmatprep.subr.bf16.mxu0 %v10543_v43 }
 0xb3a   :  { %10082 = vmatpush3.bf16.msra.mxu1 %v10544_v39  ;;  %10104 = vmatpush3.bf16.msra.mxu0 %v10545_v36 }
 0xb3b   :  { %10083 = vmatprep.subr.bf16.mxu1 %v10546_v11  ;;  %10105 = vmatprep.subr.bf16.mxu0 %v10547_v21 }
 0xb3e   :  { %10084 = vmatpush3.bf16.msra.mxu1 %v10548_v57  ;;  %10106 = vmatpush3.bf16.msra.mxu0 %v10549_v9 }
 0xb3f   :  { %10085 = vmatprep.subr.bf16.mxu1 %v10550_v0  ;;  %10107 = vmatprep.subr.bf16.mxu0 %v10551_v63 }
 0xb42   :  { %10086 = vmatpush3.bf16.msra.mxu1 %v10552_v56  ;;  %10108 = vmatpush3.bf16.msra.mxu0 %v10553_v5 }
 0xb43   :  { %10087 = vmatprep.subr.bf16.mxu1 %v10554_v34  ;;  %10109 = vmatprep.subr.bf16.mxu0 %v10555_v58 }
 0xb46   :  { %10088 = vmatpush3.bf16.msra.mxu1 %v10556_v6  ;;  %10110 = vmatpush3.bf16.msra.mxu0 %v10557_v59 }
 0xb47   :  { %10089 = vmatprep.subr.bf16.mxu1 %v10558_v26  ;;  %10111 = vmatprep.subr.bf16.mxu0 %v10559_v19 }
 0xb4a   :  { %10090 = vmatpush3.bf16.msra.mxu1 %v10560_v24  ;;  %10112 = vmatpush3.bf16.msra.mxu0 %v10561_v4 }
 0xb4b   :  { %10091 = vmatprep.subr.bf16.mxu1 %v10562_v42  ;;  %10113 = vmatprep.subr.bf16.mxu0 %v10563_v41 }
 0xb4e   :  { %10092 = vmatpush3.bf16.msra.mxu1 %v10564_v23  ;;  %10114 = vmatpush3.bf16.msra.mxu0 %v10565_v32 }
 0xb4f   :  { %10093 = vmatprep.subr.bf16.mxu1 %v10566_v55  ;;  %10115 = vmatprep.subr.bf16.mxu0 %v10567_v51 }
 0xb52   :  { %10094 = vmatpush3.bf16.msra.mxu1 %v10568_v46  ;;  %10116 = vmatpush3.bf16.msra.mxu0 %v10569_v30 }
 0xc08   :  { %v5979_v40 = vpop.f32.mrb[24].mxu1  ;;  %v6022_v8 = vpop.f32.mrb[16].mxu0 }
 0xc09   :  { %v13354_v47 = vadd.f32 %v5979_v40, %v5768_v61  ;;  %v13356_v10 = vadd.f32 %v6022_v8, %v5776_v15  ;;  %v5981_v17 = vpop.f32.mrb[25].mxu1  ;;  %v6024_v37 = vpop.f32.mrb[17].mxu0 }
 0xc0a   :  { %v13358_v22 = vadd.f32 %v5981_v17, %v5772_v16  ;;  %v13360_v33 = vadd.f32 %v6024_v37, %v5780_v28  ;;  %v5983_v12 = vpop.f32.mrb[26].mxu1  ;;  %v6026_v14 = vpop.f32.mrb[18].mxu0 }
 0xc0b   :  { %v6031_v60 = vmul.f32 %v13354_v47, %v13354_v47  ;;  %v6033_v3 = vmul.f32 %v13356_v10, %v13356_v10  ;;  %v13366_v1 = vadd.f32 %v5983_v12, %v5768_v61  ;;  %v13368_v53 = vadd.f32 %v6026_v14, %v5776_v15  ;;  %v5985_v20 = vpop.f32.mrb[27].mxu1  ;;  %v6028_v31 = vpop.f32.mrb[19].mxu0 }
 0xc0c   :  { %v6032_v27 = vmul.f32 %v13358_v22, %v13358_v22  ;;  %v6034_v50 = vmul.f32 %v13360_v33, %v13360_v33  ;;  %v13374_v54 = vadd.f32 %v5985_v20, %v5772_v16  ;;  %v13376_v25 = vadd.f32 %v6028_v31, %v5780_v28 }
 0xc0d   :  { %v6039_v52 = vmul.f32 %v6031_v60, %v13354_v47  ;;  %v6041_v48 = vmul.f32 %v6033_v3, %v13356_v10  ;;  %v6035_v43 = vmul.f32 %v13366_v1, %v13366_v1  ;;  %v6037_v39 = vmul.f32 %v13368_v53, %v13368_v53 }
 0xc0e   :  { %v6040_v36 = vmul.f32 %v6032_v27, %v13358_v22  ;;  %v6042_v11 = vmul.f32 %v6034_v50, %v13360_v33  ;;  %v6036_v21 = vmul.f32 %v13374_v54, %v13374_v54  ;;  %v6038_v57 = vmul.f32 %v13376_v25, %v13376_v25 }
 0xc0f   :  { %v6047_v9 = vmul.f32 0.044715, %v6039_v52  ;;  %v6049_v0 = vmul.f32 0.044715, %v6041_v48  ;;  %v6043_v63 = vmul.f32 %v6035_v43, %v13366_v1  ;;  %v6045_v56 = vmul.f32 %v6037_v39, %v13368_v53 }
 0xc10   :  { %v6048_v5 = vmul.f32 0.044715, %v6040_v36  ;;  %v6050_v34 = vmul.f32 0.044715, %v6042_v11  ;;  %v6044_v58 = vmul.f32 %v6036_v21, %v13374_v54  ;;  %v6046_v6 = vmul.f32 %v6038_v57, %v13376_v25 }
 0xc11   :  { %v6055_v59 = vadd.f32 %v6047_v9, %v13354_v47  ;;  %v6057_v26 = vadd.f32 %v6049_v0, %v13356_v10  ;;  %v6051_v19 = vmul.f32 0.044715, %v6043_v63  ;;  %v6053_v24 = vmul.f32 0.044715, %v6045_v56 }
 0xc12   :  { %v6056_v4 = vadd.f32 %v6048_v5, %v13358_v22  ;;  %v6058_v42 = vadd.f32 %v6050_v34, %v13360_v33  ;;  %v6052_v41 = vmul.f32 0.044715, %v6044_v58  ;;  %v6054_v23 = vmul.f32 0.044715, %v6046_v6 }
 0xc13   :  { %v6063_v32 = vmul.f32 0.7978846, %v6055_v59  ;;  %v6065_v55 = vmul.f32 0.7978846, %v6057_v26  ;;  %v6059_v51 = vadd.f32 %v6051_v19, %v13366_v1  ;;  %v6061_v46 = vadd.f32 %v6053_v24, %v13368_v53 }
 0xc14   :  { %v6064_v30 = vmul.f32 0.7978846, %v6056_v4  ;;  %v6066_v44 = vmul.f32 0.7978846, %v6058_v42  ;;  %v6060_v61 = vadd.f32 %v6052_v41, %v13374_v54  ;;  %v6062_v15 = vadd.f32 %v6054_v23, %v13376_v25 }
 0xc15   :  { %11014 = vtanh.f32 %v6063_v32  ;;  %v6067_v16 = vmul.f32 0.7978846, %v6059_v51  ;;  %v6069_v28 = vmul.f32 0.7978846, %v6061_v46 }
 0xc16   :  { %11016 = vtanh.f32 %v6065_v55  ;;  %v6068_v40 = vmul.f32 0.7978846, %v6060_v61  ;;  %v6070_v8 = vmul.f32 0.7978846, %v6062_v15 }
 0xc17   :  { %11018 = vtanh.f32 %v6064_v30 }
 0xc18   :  { %11020 = vtanh.f32 %v6066_v44 }
 0xc19   :  { %11022 = vtanh.f32 %v6067_v16  ;;  %v9713_v16 = vld [vmem:[#allocation18 + $0x13] ss:$0 sm:$0xff] }
 0xc1a   :  { %11024 = vtanh.f32 %v6069_v28 }
 0xc1b   :  { %11026 = vtanh.f32 %v6068_v40 }
 0xc1c   :  { %11028 = vtanh.f32 %v6070_v8 }
 0xc1f   :  { %v11015_v17 = vpop.eup %11014 }
 0xc20   :  { %v11017_v37 = vpop.eup %11016  ;;  %v6079_v12 = vadd.f32 1.0, %v11015_v17 }
 0xc21   :  { %v11019_v14 = vpop.eup %11018  ;;  %v6081_v60 = vadd.f32 1.0, %v11017_v37 }
 0xc22   :  { %v11021_v3 = vpop.eup %11020  ;;  %v6080_v20 = vadd.f32 1.0, %v11019_v14  ;;  %v6087_v52 = vmul.f32 0.5, %v6079_v12 }
 0xc23   :  { %v11023_v31 = vpop.eup %11022  ;;  %v6082_v27 = vadd.f32 1.0, %v11021_v3  ;;  %v6089_v39 = vmul.f32 0.5, %v6081_v60  ;;  %v10570_v60 = vld [vmem:[#allocation15] ss:$24 sps:$4 sm:$0xff]   ;;  %v10572_v3 = vld [vmem:[#allocation15 + $0x4] ss:$24 sps:$4 sm:$0xff]  }
 0xc24   :  { %v11025_v50 = vpop.eup %11024  ;;  %v6083_v48 = vadd.f32 1.0, %v11023_v31  ;;  %v6088_v9 = vmul.f32 0.5, %v6080_v20  ;;  %v6095_v5 = vmul.f32 %v6087_v52, %v13354_v47  ;;  %v10573_v20 = vld [vmem:[#allocation15 + $0x8] ss:$24 sps:$4 sm:$0xff]   ;;  %v10575_v31 = vld [vmem:[#allocation15 + $0xc] ss:$24 sps:$4 sm:$0xff]   ;;  %6817 = vmatprep.subr.bf16.mxu1 %v10572_v3 }
 0xc25   :  { %v11027_v43 = vpop.eup %11026  ;;  %v6085_v36 = vadd.f32 1.0, %v11025_v50  ;;  %v6090_v56 = vmul.f32 0.5, %v6082_v27  ;;  %v6097_v6 = vmul.f32 %v6089_v39, %v13356_v10  ;;  %v10578_v27 = vld [vmem:[#allocation15 + $0x34] ss:$24 sps:$4 sm:$0xff]   ;;  %6860 = vmatprep.subr.bf16.mxu0 %v10575_v31  ;;  %v10576_v52 = vld [vmem:[#allocation15 + $0x30] ss:$24 sps:$4 sm:$0xff]  }
 0xc26   :  { %v11029_v11 = vpop.eup %11028  ;;  %v6091_v21 = vmul.f32 0.5, %v6083_v48  ;;  %v6084_v57 = vadd.f32 1.0, %v11027_v43  ;;  %v6096_v19 = vmul.f32 %v6088_v9, %v13358_v22  ;;  %v10581_v50 = vld [vmem:[#allocation15 + $0x3c] ss:$24 sps:$4 sm:$0xff]   ;;  %v10579_v48 = vld [vmem:[#allocation15 + $0x38] ss:$24 sps:$4 sm:$0xff]  }
 0xc27   :  { %v6093_v0 = vmul.f32 0.5, %v6085_v36  ;;  %v6086_v63 = vadd.f32 1.0, %v11029_v11  ;;  %v6098_v42 = vmul.f32 %v6090_v56, %v13360_v33  ;;  %v10584_v9 = vld [vmem:[#allocation15 + $0x64] ss:$24 sps:$4 sm:$0xff]   ;;  %v10585_v56 = vld [vmem:[#allocation15 + $0x68] ss:$24 sps:$4 sm:$0xff]  }
 0xc28   :  { %v6099_v34 = vmul.f32 %v6091_v21, %v13366_v1  ;;  %v6092_v58 = vmul.f32 0.5, %v6084_v57  ;;  %v9680_v1 = vld [vmem:[#allocation18 + $0x12] ss:$0 sm:$0xff]  ;;  %v9715_v31 = vld [vmem:[#allocation18 + $0x4] ss:$0 sm:$0xff] }
 0xc29   :  { %v6101_v59 = vmul.f32 %v6093_v0, %v13368_v53  ;;  %v6094_v26 = vmul.f32 0.5, %v6086_v63  ;;  %v10582_v0 = vld [vmem:[#allocation15 + $0x60] ss:$24 sps:$4 sm:$0xff]   ;;  %v10587_v63 = vld [vmem:[#allocation15 + $0x6c] ss:$24 sps:$4 sm:$0xff]  }
 0xc2a   :  { %v6100_v24 = vmul.f32 %v6092_v58, %v13374_v54  ;;  %v6168_v4 = vpack.c.bf16 %v6099_v34, %v6095_v5  ;;  %v10590_v5 = vld [vmem:[#allocation15 + $0x94] ss:$24 sps:$4 sm:$0xff]   ;;  %v10588_v34 = vld [vmem:[#allocation15 + $0x90] ss:$24 sps:$4 sm:$0xff]  }
 0xc2b   :  { %v6102_v41 = vmul.f32 %v6094_v26, %v13376_v25  ;;  %v6170_v23 = vpack.c.bf16 %v6101_v59, %v6097_v6  ;;  %v10593_v58 = vld [vmem:[#allocation15 + $0x9c] ss:$24 sps:$4 sm:$0xff]   ;;  %v10591_v6 = vld [vmem:[#allocation15 + $0x98] ss:$24 sps:$4 sm:$0xff]  }
 0xc2c   :  { %v6169_v32 = vpack.c.bf16 %v6100_v24, %v6096_v19  ;;  %v10596_v59 = vld [vmem:[#allocation15 + $0xc4] ss:$24 sps:$4 sm:$0xff]   ;;  %v10594_v26 = vld [vmem:[#allocation15 + $0xc0] ss:$24 sps:$4 sm:$0xff]  }
 0xc2d   :  { %v6171_v47 = vpack.c.bf16 %v6102_v41, %v6098_v42  ;;  %v10599_v19 = vld [vmem:[#allocation15 + $0xcc] ss:$24 sps:$4 sm:$0xff]   ;;  %v10597_v24 = vld [vmem:[#allocation15 + $0xc8] ss:$24 sps:$4 sm:$0xff]   ;;  %v10605_v41 = vld [vmem:[#allocation15 + $0xfc] ss:$24 sps:$4 sm:$0xff]  }
 0xc2e   :  { %6401 = vmatprep.mubr.bf16.mxu1 %v6169_v32  ;;  %v10600_v42 = vld [vmem:[#allocation15 + $0xf0] ss:$24 sps:$4 sm:$0xff]   ;;  %v10608_v32 = vld [vmem:[#allocation15 + $0x124] ss:$24 sps:$4 sm:$0xff]  }
 0xc2f   :  { %6442 = vmatprep.mubr.bf16.mxu0 %v6171_v47  ;;  %6402 = vmatmul.mubr.bf16.vlgmr.msra.gmra.mrb[28].mxu1 %v6168_v4  ;;  %v10602_v4 = vld [vmem:[#allocation15 + $0xf4] ss:$24 sps:$4 sm:$0xff]   ;;  %v10606_v47 = vld [vmem:[#allocation15 + $0x120] ss:$24 sps:$4 sm:$0xff]  }
 0xc30   :  { %6443 = vmatmul.mubr.bf16.vlgmr.msra.gmra.mrb[20].mxu0 %v6170_v23  ;;  %6849 = vmatprep.mubr.bf16.mxu1 %v11408_v35  ;;  %v10603_v23 = vld [vmem:[#allocation15 + $0xf8] ss:$24 sps:$4 sm:$0xff]  }
 0xc31   :  { %6892 = vmatprep.mubr.bf16.mxu0 %v11408_v35  ;;  %6818 = vmatpush1.bf16.msra.mxu1 %v10570_v60 }
 0xc32   :  { %6861 = vmatpush1.bf16.msra.mxu0 %v10573_v20  ;;  %6819 = vmatprep.subr.bf16.mxu1 %v10578_v27 }
 0xc33   :  { %6862 = vmatprep.subr.bf16.mxu0 %v10581_v50 }
 0xc35   :  { %6820 = vmatpush1.bf16.msra.mxu1 %v10576_v52 }
 0xc36   :  { %6863 = vmatpush1.bf16.msra.mxu0 %v10579_v48  ;;  %6821 = vmatprep.subr.bf16.mxu1 %v10584_v9  ;;  %v10618_v48 = vld [vmem:[#allocation15 + $0x10] ss:$24 sps:$4 sm:$0xff]  }
 0xc37   :  { %6864 = vmatprep.subr.bf16.mxu0 %v10587_v63  ;;  %v10624_v9 = vld [vmem:[#allocation15 + $0x70] ss:$24 sps:$4 sm:$0xff]  }
 0xc38   :  { %v10654_v63 = vld [vmem:[#allocation16 + $0x50] ss:$20 sps:$4 sm:$0xff]  }
 0xc39   :  { %6822 = vmatpush1.bf16.msra.mxu1 %v10582_v0  ;;  %v10629_v0 = vld [vmem:[#allocation15 + $0xa4] ss:$24 sps:$4 sm:$0xff]  }
 0xc3a   :  { %6865 = vmatpush1.bf16.msra.mxu0 %v10585_v56  ;;  %6823 = vmatprep.subr.bf16.mxu1 %v10590_v5  ;;  %v10662_v56 = vld [vmem:[#allocation16 + $0x7c] ss:$20 sps:$4 sm:$0xff]   ;;  %v10627_v5 = vld [vmem:[#allocation15 + $0xa0] ss:$24 sps:$4 sm:$0xff]  }
 0xc3b   :  { %6866 = vmatprep.subr.bf16.mxu0 %v10593_v58  ;;  %v10668_v58 = vld [vmem:[#allocation16 + $0xa4] ss:$20 sps:$4 sm:$0xff]  }
 0xc3d   :  { %6824 = vmatpush1.bf16.msra.mxu1 %v10588_v34  ;;  %v10632_v34 = vld [vmem:[#allocation15 + $0xd4] ss:$24 sps:$4 sm:$0xff]  }
 0xc3e   :  { %6867 = vmatpush1.bf16.msra.mxu0 %v10591_v6  ;;  %6825 = vmatprep.subr.bf16.mxu1 %v10596_v59  ;;  %v10630_v6 = vld [vmem:[#allocation15 + $0xd0] ss:$24 sps:$4 sm:$0xff]   ;;  %v10635_v59 = vld [vmem:[#allocation15 + $0x104] ss:$24 sps:$4 sm:$0xff]  }
 0xc3f   :  { %6868 = vmatprep.subr.bf16.mxu0 %v10599_v19  ;;  %v10674_v19 = vld [vmem:[#allocation16 + $0xcc] ss:$20 sps:$4 sm:$0xff]  }
 0xc41   :  { %6826 = vmatpush1.bf16.msra.mxu1 %v10594_v26  ;;  %v10666_v26 = vld [vmem:[#allocation16 + $0xa0] ss:$20 sps:$4 sm:$0xff]  }
 0xc42   :  { %6869 = vmatpush1.bf16.msra.mxu0 %v10597_v24  ;;  %6827 = vmatprep.subr.bf16.mxu1 %v10602_v4  ;;  %v10633_v24 = vld [vmem:[#allocation15 + $0x100] ss:$24 sps:$4 sm:$0xff]   ;;  %v10638_v4 = vld [vmem:[#allocation15 + $0x134] ss:$24 sps:$4 sm:$0xff]  }
 0xc43   :  { %6870 = vmatprep.subr.bf16.mxu0 %v10605_v41  ;;  %v10680_v41 = vld [vmem:[#allocation16 + $0xf4] ss:$20 sps:$4 sm:$0xff]  }
 0xc45   :  { %6828 = vmatpush1.bf16.msra.mxu1 %v10600_v42  ;;  %v10672_v42 = vld [vmem:[#allocation16 + $0xc8] ss:$20 sps:$4 sm:$0xff]  }
 0xc46   :  { %6871 = vmatpush1.bf16.msra.mxu0 %v10603_v23  ;;  %6829 = vmatprep.subr.bf16.mxu1 %v10608_v32  ;;  %v10636_v23 = vld [vmem:[#allocation15 + $0x130] ss:$24 sps:$4 sm:$0xff]   ;;  %v10641_v32 = vld [vmem:[#allocation15 + $0x164] ss:$24 sps:$4 sm:$0xff]  }
 0xc49   :  { %6830 = vmatpush1.bf16.msra.mxu1 %v10606_v47  ;;  %v10678_v47 = vld [vmem:[#allocation16 + $0xf0] ss:$20 sps:$4 sm:$0xff]  }
 0xd02   :  { %v10095_v10 = vpop.f32.mrb[28].mxu1 }
 0xd03   :  { %v10117_v22 = vpop.f32.mrb[20].mxu0  ;;  %v10096_v53 = vpop.f32.mrb[29].mxu1 }
 0xd04   :  { %v10097_v54 = vadd.f32 %v10096_v53, %v10095_v10  ;;  %v10118_v55 = vpop.f32.mrb[21].mxu0  ;;  %v10098_v33 = vpop.f32.mrb[30].mxu1  ;;  %v10609_v10 = vld [vmem:[#allocation15 + $0x128] ss:$24 sps:$4 sm:$0xff]  }
 0xd05   :  { %v10119_v51 = vadd.f32 %v10118_v55, %v10117_v22  ;;  %v10120_v25 = vpop.f32.mrb[22].mxu0  ;;  %v10099_v46 = vpop.f32.mrb[31].mxu1  ;;  %v10611_v22 = vld [vmem:[#allocation15 + $0x12c] ss:$24 sps:$4 sm:$0xff]   ;;  %v10612_v53 = vld [vmem:[#allocation15 + $0x150] ss:$24 sps:$4 sm:$0xff]  }
 0xd06   :  { %v6404_v30 = vadd.f32 %v10097_v54, %v9680_v1  ;;  %v10100_v44 = vadd.f32 %v10099_v46, %v10098_v33  ;;  %v10121_v61 = vpop.f32.mrb[23].mxu0  ;;  %6872 = vmatprep.subr.bf16.mxu0 %v10611_v22  ;;  %v10617_v54 = vld [vmem:[#allocation15 + $0x15c] ss:$24 sps:$4 sm:$0xff]   ;;  %v10615_v55 = vld [vmem:[#allocation15 + $0x158] ss:$24 sps:$4 sm:$0xff]  }
 0xd07   :  { %v10122_v15 = vadd.f32 %v10121_v61, %v10120_v25  ;;  %6873 = vmatpush1.bf16.msra.mxu0 %v10609_v10  ;;  %v10620_v33 = vld [vmem:[#allocation15 + $0x14] ss:$24 sps:$4 sm:$0xff]   ;;  %v6959_v25 = vstv %s6958_s18 }
 0xd08   :  { %v6445_v28 = vadd.f32 %v10119_v51, %v6404_v30  ;;  %v6407_v40 = vadd.f32 %v10100_v44, %v9680_v1  ;;  %v10614_v1 = vld [vmem:[#allocation15 + $0x154] ss:$24 sps:$4 sm:$0xff]   ;;  %6874 = vmatprep.subr.bf16.mxu0 %v10617_v54  ;;  %v7026_v51 = vstv %s9765_s10  ;;  %vm6960_vm12 = vcmp.lt.s32.totalorder %v13777_v7, %v6959_v25 }
 0xd09   :  { %6831 = vmatprep.subr.bf16.mxu1 %v10614_v1  ;;  %vm7027_vm11 = vcmp.lt.s32.totalorder %v13777_v7, %v7026_v51  ;;  %v13428_v30 = vsel %vm6960_vm12, 1.0, %v11409_v38  ;;  %v10686_v1 = vld [vmem:[#allocation16 + $0x11c] ss:$20 sps:$4 sm:$0xff]   ;;  %v10647_v25 = vld [vmem:[#allocation16 + $0xc] ss:$20 sps:$4 sm:$0xff]  }
 0xd0a   :  { %v6448_v8 = vadd.f32 %v10122_v15, %v6407_v40  ;;  %v6456_v17 = vmul.f32 %v9713_v16, %v6445_v28  ;;  %6832 = vmatpush1.bf16.msra.mxu1 %v10612_v53  ;;  %v13425_v46 = vsel %vm7027_vm11, 1.0, %v11409_v38  ;;  %v6964_v61 = vsel %vm6963_vm10, %v13428_v30, 0.0  ;;  %v10644_v15 = vld [vmem:[#allocation16 + $0x4] ss:$20 sps:$4 sm:$0xff]  }
 0xd0b   :  { %6875 = vmatpush1.bf16.msra.mxu0 %v10615_v55  ;;  %6903 = vmatprep.subr.bf16.mxu1 %v10620_v33  ;;  %v7030_v44 = vsel %vm6963_vm10, %v13425_v46, 0.0  ;;  %v10639_v55 = vld [vmem:[#allocation15 + $0x160] ss:$24 sps:$4 sm:$0xff]  }
 0xd0c   :  { %v6458_v37 = vadd.f32 %v6456_v17, %v13295_v13  ;;  %v6457_v12 = vmul.f32 %v9713_v16, %v6448_v8  ;;  %8667 = vmatprep.subr.bf16.mxu0 %v10644_v15 }
 0xd0e   :  { %6462 = vadd.xlane.f32.xlu0 %v6458_v37  ;;  %v6459_v14 = vadd.f32 %v6457_v12, %v13298_v29 }
 0xd10   :  { %6464 = vadd.xlane.f32.xlu1 %v6459_v14 }
 0xd9b   :  { %v6463_v13 = vpop.xlane.xlu0 %6462 }
 0xd9c   :  { %v6466_v43 = vmul.f32 0.0078125, %v6463_v13 }
 0xd9d   :  { %v6465_v29 = vpop.xlane.xlu1 %6464 }
 0xd9e   :  { %v13414_v39 = vsub.f32 %v6458_v37, %v6466_v43  ;;  %v6467_v36 = vmul.f32 0.0078125, %v6465_v29  ;;  %v10623_v43 = vld [vmem:[#allocation15 + $0x44] ss:$24 sps:$4 sm:$0xff]   ;;  %v10642_v29 = vld [vmem:[#allocation16] ss:$20 sps:$4 sm:$0xff]  }
 0xda0   :  { %v13416_v11 = vsub.f32 %v6459_v14, %v6467_v36  ;;  %v6470_v21 = vmul.f32 %v13414_v39, %v13414_v39  ;;  %v9714_v14 = vld [vmem:[#allocation18 + $0x3] ss:$0 sm:$0xff] }
 0xda1   :  { %v10650_v36 = vld [vmem:[#allocation16 + $0x2c] ss:$20 sps:$4 sm:$0xff]  }
 0xda2   :  { %6472 = vadd.xlane.f32.xlu0 %v6470_v21  ;;  %v6471_v57 = vmul.f32 %v13416_v11, %v13416_v11  ;;  %v10648_v21 = vld [vmem:[#allocation16 + $0x28] ss:$20 sps:$4 sm:$0xff]  }
 0xda4   :  { %6474 = vadd.xlane.f32.xlu1 %v6471_v57  ;;  %v10656_v57 = vld [vmem:[#allocation16 + $0x54] ss:$20 sps:$4 sm:$0xff]  }
 0xda6   :  { %6965 = vadd.xlane.f32.xlu0 %v6964_v61  ;;  %v10692_v61 = vld [vmem:[#allocation16 + $0x144] ss:$20 sps:$4 sm:$0xff]  }
 0xda8   :  { %7031 = vadd.xlane.f32.xlu1 %v7030_v44  ;;  %v10684_v44 = vld [vmem:[#allocation16 + $0x118] ss:$20 sps:$4 sm:$0xff]  }
 0xe2f   :  { %v6473_v16 = vpop.xlane.xlu0 %6472 }
 0xe30   :  { %v6476_v28 = vmul.f32 0.0078125, %v6473_v16 }
 0xe31   :  { %v6475_v40 = vpop.xlane.xlu1 %6474 }
 0xe32   :  { %v6478_v8 = vadd.f32 1e-06, %v6476_v28  ;;  %v6477_v17 = vmul.f32 0.0078125, %v6475_v40  ;;  %v10645_v28 = vld [vmem:[#allocation16 + $0x8] ss:$20 sps:$4 sm:$0xff]  }
 0xe33   :  { %v6966_v22 = vpop.xlane.xlu0 %6965 }
 0xe34   :  { %11030 = vrsqrt.f32 %v6478_v8  ;;  %v6479_v37 = vadd.f32 1e-06, %v6477_v17  ;;  %v6967_v54 = vrot.slane %v6966_v22, 4  ;;  %v10653_v17 = vld [vmem:[#allocation16 + $0x34] ss:$20 sps:$4 sm:$0xff]  }
 0xe35   :  { %v7032_v10 = vpop.xlane.xlu1 %7031 }
 0xe36   :  { %11032 = vrsqrt.f32 %v6479_v37  ;;  %v7033_v53 = vrot.slane %v7032_v10, 4  ;;  %v6968_v51 = vadd.f32 %v6967_v54, %v6966_v22  ;;  %v10690_v37 = vld [vmem:[#allocation16 + $0x140] ss:$20 sps:$4 sm:$0xff]   ;;  %v10729_v54 = vld [vmem:[#allocation16 + $0x238] ss:$20 sps:$4 sm:$0xff]  }
 0xe37   :  { %v10728_v22 = vld [vmem:[#allocation16 + $0x234] ss:$20 sps:$4 sm:$0xff]  }
 0xe38   :  { %v7034_v33 = vadd.f32 %v7033_v53, %v7032_v10  ;;  %v6969_v16 = vrot.slane %v6968_v51, 2  ;;  %v10723_v10 = vld [vmem:[#allocation16 + $0x210] ss:$20 sps:$4 sm:$0xff]  }
 0xe39   :  { %v10726_v53 = vld [vmem:[#allocation16 + $0x230] ss:$20 sps:$4 sm:$0xff]  }
 0xe3a   :  { %v7035_v15 = vrot.slane %v7034_v33, 2  ;;  %v6970_v8 = vadd.f32 %v6969_v16, %v6968_v51  ;;  %v10735_v51 = vld [vmem:[#allocation16 + $0x260] ss:$20 sps:$4 sm:$0xff]  }
 0xe3c   :  { %v7036_v40 = vadd.f32 %v7035_v15, %v7034_v33  ;;  %v10732_v33 = vld [vmem:[#allocation16 + $0x258] ss:$20 sps:$4 sm:$0xff]  }
 0xe3d   :  { %v13440_v15 = vld [vmem:[#allocation19] ss:$4 sm:$0x3f] }
 0xe3e   :  { %v11031_v12 = vpop.eup %11030  ;;  %v6550_v16 = vrot.slane %v13440_v15, %v13277_v45 }
 0xe3f   :  { %v6482_v38 = vmul.f32 %v11031_v12, %v13414_v39  ;;  %v10621_v39 = vld [vmem:[#allocation15 + $0x40] ss:$24 sps:$4 sm:$0xff]  }
 0xe40   :  { %v11033_v60 = vpop.eup %11032  ;;  %v10698_v12 = vld [vmem:[#allocation16 + $0x16c] ss:$20 sps:$4 sm:$0xff]  }
 0xe41   :  { %v6483_v3 = vmul.f32 %v11033_v60, %v13416_v11  ;;  %v6488_v20 = vmul.f32 %v9714_v14, %v6482_v38  ;;  %v10626_v11 = vld [vmem:[#allocation15 + $0x74] ss:$24 sps:$4 sm:$0xff]   ;;  %v7037_v38 = vrot.slane %v7036_v40, 1  ;;  %v10651_v60 = vld [vmem:[#allocation16 + $0x30] ss:$20 sps:$4 sm:$0xff]  }
 0xe43   :  { %v6489_v27 = vmul.f32 %v9714_v14, %v6483_v3  ;;  %v6494_v50 = vadd.f32 %v9715_v31, %v6488_v20  ;;  %v6971_v14 = vrot.slane %v6970_v8, 1  ;;  %v7038_v20 = vadd.f32 %v7037_v38, %v7036_v40 }
 0xe45   :  { %v6495_v52 = vadd.f32 %v9715_v31, %v6489_v27  ;;  %v6972_v3 = vadd.f32 %v6971_v14, %v6970_v8  ;;  %v10659_v31 = vld [vmem:[#allocation16 + $0x5c] ss:$20 sps:$4 sm:$0xff]   ;;  %v6554_v8 = vrot.slane %v13440_v15, %v13280_v18 }
 0xe46   :  { %v10696_v27 = vld [vmem:[#allocation16 + $0x168] ss:$20 sps:$4 sm:$0xff]  }
 0xe47   :  { %v13434_v13 = vpack.c.bf16 %v6495_v52, %v6494_v50  ;;  %10245 = vpush %v6972_v3  ;;  %v10657_v50 = vld [vmem:[#allocation16 + $0x58] ss:$20 sps:$4 sm:$0xff]  }
 0xe48   :  { %10247 = vpush %v7038_v20  ;;  %v10665_v52 = vld [vmem:[#allocation16 + $0x84] ss:$20 sps:$4 sm:$0xff]  }
 0xe49   :  { %6850 = vmatmul.mubr.bf16.vlgmr.msra.gmra.mrb[32].mxu1 %v13434_v13  ;;  %6893 = vmatmul.mubr.bf16.vlgmr.msra.gmra.mrb[24].mxu0 %v13434_v13 }
 0xe4a   :  { %6904 = vmatpush1.bf16.msra.mxu1 %v10618_v48  ;;  %6935 = vmatprep.mubr.bf16.mxu1 %v11408_v35  ;;  %v10660_v35 = vld [vmem:[#allocation16 + $0x78] ss:$20 sps:$4 sm:$0xff]   ;;  %v10663_v48 = vld [vmem:[#allocation16 + $0x80] ss:$20 sps:$4 sm:$0xff]  }
 0xe4b   :  { %6905 = vmatprep.subr.bf16.mxu1 %v10623_v43  ;;  %8668 = vmatpush1.bf16.msra.mxu0 %v10642_v29  ;;  %v10669_v43 = vld [vmem:[#allocation16 + $0xa8] ss:$20 sps:$4 sm:$0xff]  }
 0xe4c   :  { %8669 = vmatprep.subr.bf16.mxu0 %v10650_v36  ;;  %v10677_v29 = vld [vmem:[#allocation16 + $0xd4] ss:$20 sps:$4 sm:$0xff]   ;;  %v10675_v36 = vld [vmem:[#allocation16 + $0xd0] ss:$20 sps:$4 sm:$0xff]  }
 0xe4e   :  { %6906 = vmatpush1.bf16.msra.mxu1 %v10621_v39  ;;  %v10683_v39 = vld [vmem:[#allocation16 + $0xfc] ss:$20 sps:$4 sm:$0xff]  }
 0xe4f   :  { %6907 = vmatprep.subr.bf16.mxu1 %v10626_v11  ;;  %8670 = vmatpush1.bf16.msra.mxu0 %v10648_v21  ;;  %v10681_v11 = vld [vmem:[#allocation16 + $0xf8] ss:$20 sps:$4 sm:$0xff]  }
 0xe50   :  { %8671 = vmatprep.subr.bf16.mxu0 %v10656_v57  ;;  %v10689_v21 = vld [vmem:[#allocation16 + $0x124] ss:$20 sps:$4 sm:$0xff]   ;;  %v10687_v57 = vld [vmem:[#allocation16 + $0x120] ss:$20 sps:$4 sm:$0xff]  }
 0xe52   :  { %6908 = vmatpush1.bf16.msra.mxu1 %v10624_v9  ;;  %v10695_v9 = vld [vmem:[#allocation16 + $0x14c] ss:$20 sps:$4 sm:$0xff]  }
 0xe53   :  { %6909 = vmatprep.subr.bf16.mxu1 %v10629_v0  ;;  %8672 = vmatpush1.bf16.msra.mxu0 %v10654_v63  ;;  %v10693_v0 = vld [vmem:[#allocation16 + $0x148] ss:$20 sps:$4 sm:$0xff]  }
 0xe54   :  { %8673 = vmatprep.subr.bf16.mxu0 %v10662_v56  ;;  %v10701_v63 = vld [vmem:[#allocation16 + $0x174] ss:$20 sps:$4 sm:$0xff]   ;;  %v10699_v56 = vld [vmem:[#allocation16 + $0x170] ss:$20 sps:$4 sm:$0xff]  }
 0xe56   :  { %6910 = vmatpush1.bf16.msra.mxu1 %v10627_v5  ;;  %v10704_v5 = vld [vmem:[#allocation16 + $0x194] ss:$20 sps:$4 sm:$0xff]  }
 0xe57   :  { %6911 = vmatprep.subr.bf16.mxu1 %v10632_v34  ;;  %8674 = vmatpush1.bf16.msra.mxu0 %v10660_v35  ;;  %v10707_v34 = vld [vmem:[#allocation16 + $0x19c] ss:$20 sps:$4 sm:$0xff]  }
 0xe58   :  { %8675 = vmatprep.subr.bf16.mxu0 %v10668_v58  ;;  %v10702_v35 = vld [vmem:[#allocation16 + $0x190] ss:$20 sps:$4 sm:$0xff]   ;;  %v10705_v58 = vld [vmem:[#allocation16 + $0x198] ss:$20 sps:$4 sm:$0xff]  }
 0xe5a   :  { %6912 = vmatpush1.bf16.msra.mxu1 %v10630_v6  ;;  %v10710_v6 = vld [vmem:[#allocation16 + $0x1bc] ss:$20 sps:$4 sm:$0xff]  }
 0xe5b   :  { %6913 = vmatprep.subr.bf16.mxu1 %v10635_v59  ;;  %8676 = vmatpush1.bf16.msra.mxu0 %v10666_v26  ;;  %v10713_v59 = vld [vmem:[#allocation16 + $0x1c4] ss:$20 sps:$4 sm:$0xff]  }
 0xe5c   :  { %8677 = vmatprep.subr.bf16.mxu0 %v10674_v19  ;;  %v10708_v26 = vld [vmem:[#allocation16 + $0x1b8] ss:$20 sps:$4 sm:$0xff]   ;;  %v10711_v19 = vld [vmem:[#allocation16 + $0x1c0] ss:$20 sps:$4 sm:$0xff]  }
 0xe5e   :  { %6914 = vmatpush1.bf16.msra.mxu1 %v10633_v24  ;;  %v10716_v24 = vld [vmem:[#allocation16 + $0x1e4] ss:$20 sps:$4 sm:$0xff]  }
 0xe5f   :  { %6915 = vmatprep.subr.bf16.mxu1 %v10638_v4  ;;  %8678 = vmatpush1.bf16.msra.mxu0 %v10672_v42  ;;  %v10719_v4 = vld [vmem:[#allocation16 + $0x1ec] ss:$20 sps:$4 sm:$0xff]  }
 0xe60   :  { %8679 = vmatprep.subr.bf16.mxu0 %v10680_v41  ;;  %v10714_v42 = vld [vmem:[#allocation16 + $0x1e0] ss:$20 sps:$4 sm:$0xff]   ;;  %v10717_v41 = vld [vmem:[#allocation16 + $0x1e8] ss:$20 sps:$4 sm:$0xff]  }
 0xe62   :  { %6916 = vmatpush1.bf16.msra.mxu1 %v10636_v23  ;;  %v10722_v23 = vld [vmem:[#allocation16 + $0x20c] ss:$20 sps:$4 sm:$0xff]  }
 0xe63   :  { %6917 = vmatprep.subr.bf16.mxu1 %v10641_v32  ;;  %8680 = vmatpush1.bf16.msra.mxu0 %v10678_v47  ;;  %v10725_v32 = vld [vmem:[#allocation16 + $0x214] ss:$20 sps:$4 sm:$0xff]  }
 0xe64   :  { %8681 = vmatprep.subr.bf16.mxu0 %v10686_v1  ;;  %v10720_v47 = vld [vmem:[#allocation16 + $0x208] ss:$20 sps:$4 sm:$0xff]  }
 0xe65   :  { %v10731_v1 = vld [vmem:[#allocation16 + $0x23c] ss:$20 sps:$4 sm:$0xff]  }
 0xe66   :  { %6918 = vmatpush1.bf16.msra.mxu1 %v10639_v55  ;;  %v10734_v55 = vld [vmem:[#allocation16 + $0x25c] ss:$20 sps:$4 sm:$0xff]  }
 0xe67   :  { %8790 = vmatprep.subr.bf16.mxu1 %v10647_v25  ;;  %8682 = vmatpush1.bf16.msra.mxu0 %v10684_v44  ;;  %v10737_v25 = vld [vmem:[#allocation16 + $0x264] ss:$20 sps:$4 sm:$0xff]  }
 0xe68   :  { %8683 = vmatprep.subr.bf16.mxu0 %v10692_v61  ;;  %v10740_v44 = vld [vmem:[#allocation16 + $0x284] ss:$20 sps:$4 sm:$0xff]   ;;  %v10743_v61 = vld [vmem:[#allocation16 + $0x28c] ss:$20 sps:$4 sm:$0xff]  }
 0xe69   :  { %6936 = vmatmul.mubr.bf16.vlgmr.msra.gmra.mrb[36].mxu1 %v13434_v13  ;;  %v10671_v13 = vld [vmem:[#allocation16 + $0xac] ss:$20 sps:$4 sm:$0xff]  }
 0xe6a   :  { %8791 = vmatpush1.bf16.msra.mxu1 %v10645_v28  ;;  %v6558_v28 = vrot.slane %v13440_v15, %v13285_v49 }
 0xe6b   :  { %8792 = vmatprep.subr.bf16.mxu1 %v10653_v17  ;;  %8684 = vmatpush1.bf16.msra.mxu0 %v10690_v37  ;;  %v6562_v17 = vrot.slane %v13440_v15, %v13288_v62 }
 0xe6c   :  { %8685 = vmatprep.subr.bf16.mxu0 %v10698_v12 }
 0xe6e   :  { %8793 = vmatpush1.bf16.msra.mxu1 %v10651_v60 }
 0xe6f   :  { %8794 = vmatprep.subr.bf16.mxu1 %v10659_v31  ;;  %8686 = vmatpush1.bf16.msra.mxu0 %v10696_v27 }
 0xe70   :  { %8687 = vmatprep.subr.bf16.mxu0 %v10704_v5 }
 0xe72   :  { %8795 = vmatpush1.bf16.msra.mxu1 %v10657_v50 }
 0xe73   :  { %8796 = vmatprep.subr.bf16.mxu1 %v10665_v52  ;;  %8688 = vmatpush1.bf16.msra.mxu0 %v10702_v35 }
 0xe74   :  { %8689 = vmatprep.subr.bf16.mxu0 %v10710_v6 }
 0xe76   :  { %8797 = vmatpush1.bf16.msra.mxu1 %v10663_v48 }
 0xe77   :  { %8798 = vmatprep.subr.bf16.mxu1 %v10671_v13  ;;  %8690 = vmatpush1.bf16.msra.mxu0 %v10708_v26 }
 0xe78   :  { %8691 = vmatprep.subr.bf16.mxu0 %v10716_v24  ;;  %s10246_s15 = spop %10245 }
 0xe79   :  { %s10248_s27 = spop %10247  ;;  %s6974_s28 = smax.f32 %s11410_s0, %s10246_s15 }
 0xe7a   :  { %8799 = vmatpush1.bf16.msra.mxu1 %v10669_v43  ;;  %s7040_s29 = smax.f32 %s11410_s0, %s10248_s27  ;;  %v7017_v40 = vstv %s6974_s28 }
 0xe7b   :  { %8800 = vmatprep.subr.bf16.mxu1 %v10677_v29  ;;  %8692 = vmatpush1.bf16.msra.mxu0 %v10714_v42  ;;  %v7083_v37 = vstv %s7040_s29  ;;  %11034 = vrcp.f32 %v7017_v40 }
 0xe7c   :  { %8693 = vmatprep.subr.bf16.mxu0 %v10722_v23  ;;  %11036 = vrcp.f32 %v7083_v37 }
 0xe7e   :  { %8801 = vmatpush1.bf16.msra.mxu1 %v10675_v36 }
 0xe7f   :  { %8802 = vmatprep.subr.bf16.mxu1 %v10683_v39  ;;  %8694 = vmatpush1.bf16.msra.mxu0 %v10720_v47 }
 0xe80   :  { %8695 = vmatprep.subr.bf16.mxu0 %v10728_v22 }
 0xe82   :  { %8803 = vmatpush1.bf16.msra.mxu1 %v10681_v11 }
 0xe83   :  { %8804 = vmatprep.subr.bf16.mxu1 %v10689_v21  ;;  %8696 = vmatpush1.bf16.msra.mxu0 %v10726_v53 }
 0xe84   :  { %8697 = vmatprep.subr.bf16.mxu0 %v10734_v55 }
 0xe86   :  { %8805 = vmatpush1.bf16.msra.mxu1 %v10687_v57 }
 0xe87   :  { %8806 = vmatprep.subr.bf16.mxu1 %v10695_v9  ;;  %8698 = vmatpush1.bf16.msra.mxu0 %v10732_v33  ;;  %v13458_v33 = vpop.eup %11034 }
 0xe88   :  { %8708 = vmatprep.subr.bf16.mxu0 %v10740_v44 }
 0xe8a   :  { %8807 = vmatpush1.bf16.msra.mxu1 %v10693_v0 }
 0xe8b   :  { %8808 = vmatprep.subr.bf16.mxu1 %v10701_v63 }
 0xe8e   :  { %8809 = vmatpush1.bf16.msra.mxu1 %v10699_v56 }
 0xe8f   :  { %8810 = vmatprep.subr.bf16.mxu1 %v10707_v34 }
 0xe92   :  { %8811 = vmatpush1.bf16.msra.mxu1 %v10705_v58 }
 0xe93   :  { %8812 = vmatprep.subr.bf16.mxu1 %v10713_v59 }
 0xe96   :  { %8813 = vmatpush1.bf16.msra.mxu1 %v10711_v19 }
 0xe97   :  { %8814 = vmatprep.subr.bf16.mxu1 %v10719_v4 }
 0xe9a   :  { %8815 = vmatpush1.bf16.msra.mxu1 %v10717_v41 }
 0xe9b   :  { %8816 = vmatprep.subr.bf16.mxu1 %v10725_v32 }
 0xe9e   :  { %8817 = vmatpush1.bf16.msra.mxu1 %v10723_v10 }
 0xe9f   :  { %8818 = vmatprep.subr.bf16.mxu1 %v10731_v1 }
 0xea2   :  { %8819 = vmatpush1.bf16.msra.mxu1 %v10729_v54 }
 0xea3   :  { %8820 = vmatprep.subr.bf16.mxu1 %v10737_v25 }
 0xea6   :  { %8821 = vmatpush1.bf16.msra.mxu1 %v10735_v51 }
 0xea7   :  { %8831 = vmatprep.subr.bf16.mxu1 %v10743_v61 }
 0xf1c   :  { %v6851_v12 = vpop.f32.mrb[32].mxu1  ;;  %v6894_v14 = vpop.f32.mrb[24].mxu0 }
 0xf1d   :  { %v6852_v38 = vadd.f32 %v6851_v12, %v6550_v16  ;;  %v6895_v60 = vadd.f32 %v6894_v14, %v6558_v28  ;;  %v6853_v3 = vpop.f32.mrb[33].mxu1  ;;  %v6896_v20 = vpop.f32.mrb[25].mxu0 }
 0xf1e   :  { %v6854_v31 = vadd.f32 %v6853_v3, %v6554_v8  ;;  %v6897_v27 = vadd.f32 %v6896_v20, %v6562_v17  ;;  %v6855_v50 = vpop.f32.mrb[34].mxu1  ;;  %v6898_v52 = vpop.f32.mrb[26].mxu0 }
 0xf1f   :  { %6946 = vst [vmem:[#allocation21] sm:$0xff] %v6852_v38  ;;  %v6975_v48 = vmul.f32 %v13428_v30, %v6852_v38  ;;  %6948 = vst [vmem:[#allocation21 + $0x10] sm:$0xff] %v6895_v60  ;;  %v6977_v13 = vmul.f32 %v13428_v30, %v6895_v60  ;;  %v6856_v43 = vadd.f32 %v6855_v50, %v6550_v16  ;;  %v6857_v36 = vpop.f32.mrb[35].mxu1  ;;  %v6900_v39 = vpop.f32.mrb[27].mxu0 }
 0xf20   :  { %v6899_v29 = vadd.f32 %v6898_v52, %v6558_v28  ;;  %6947 = vst [vmem:[#allocation21 + $0x8] sm:$0xff] %v6854_v31  ;;  %v6976_v11 = vmul.f32 %v13428_v30, %v6854_v31  ;;  %6949 = vst [vmem:[#allocation21 + $0x18] sm:$0xff] %v6897_v27  ;;  %v6978_v21 = vmul.f32 %v13428_v30, %v6897_v27  ;;  %v13460_v16 = vpop.eup %11036 }
 0xf21   :  { %v6858_v57 = vadd.f32 %v6857_v36, %v6554_v8  ;;  %v6901_v9 = vadd.f32 %v6900_v39, %v6562_v17  ;;  %v6981_v0 = vrot.slane %v6975_v48, 4  ;;  %v6993_v63 = vrot.slane %v6977_v13, 4  ;;  %6952 = vst [vmem:[#allocation21 + $0x30] sm:$0xff] %v6856_v43 }
 0xf22   :  { %v7041_v56 = vmul.f32 %v13425_v46, %v6856_v43  ;;  %6954 = vst [vmem:[#allocation21 + $0x40] sm:$0xff] %v6899_v29  ;;  %v7043_v5 = vmul.f32 %v13425_v46, %v6899_v29  ;;  %v6987_v34 = vrot.slane %v6976_v11, 4  ;;  %v6999_v35 = vrot.slane %v6978_v21, 4 }
 0xf23   :  { %6953 = vst [vmem:[#allocation21 + $0x38] sm:$0xff] %v6858_v57  ;;  %v7042_v58 = vmul.f32 %v13425_v46, %v6858_v57  ;;  %6955 = vst [vmem:[#allocation21 + $0x48] sm:$0xff] %v6901_v9  ;;  %v7044_v6 = vmul.f32 %v13425_v46, %v6901_v9  ;;  %v6982_v59 = vadd.f32 %v6981_v0, %v6975_v48 }
 0xf24   :  { %v6994_v26 = vadd.f32 %v6993_v63, %v6977_v13  ;;  %v7047_v19 = vrot.slane %v7041_v56, 4  ;;  %v7059_v24 = vrot.slane %v7043_v5, 4  ;;  %v6988_v4 = vadd.f32 %v6987_v34, %v6976_v11 }
 0xf25   :  { %v7000_v42 = vadd.f32 %v6999_v35, %v6978_v21  ;;  %v7053_v41 = vrot.slane %v7042_v58, 4  ;;  %v7065_v23 = vrot.slane %v7044_v6, 4  ;;  %v6983_v32 = vrot.slane %v6982_v59, 2 }
 0xf26   :  { %v6995_v47 = vrot.slane %v6994_v26, 2  ;;  %v7048_v10 = vadd.f32 %v7047_v19, %v7041_v56  ;;  %v7060_v22 = vadd.f32 %v7059_v24, %v7043_v5  ;;  %v6989_v1 = vrot.slane %v6988_v4, 2 }
 0xf27   :  { %v7001_v53 = vrot.slane %v7000_v42, 2  ;;  %v7054_v54 = vadd.f32 %v7053_v41, %v7042_v58  ;;  %v7066_v55 = vadd.f32 %v7065_v23, %v7044_v6  ;;  %v6984_v51 = vadd.f32 %v6983_v32, %v6982_v59  ;;  %v10746_v23 = vld [vmem:[#allocation16 + $0x2ac] ss:$20 sps:$4 sm:$0xff]   ;;  %v10749_v32 = vld [vmem:[#allocation16 + $0x2b4] ss:$20 sps:$4 sm:$0xff]  }
 0xf28   :  { %v6996_v25 = vadd.f32 %v6995_v47, %v6994_v26  ;;  %v7049_v44 = vrot.slane %v7048_v10, 2  ;;  %v7061_v61 = vrot.slane %v7060_v22, 2  ;;  %v6990_v28 = vadd.f32 %v6989_v1, %v6988_v4  ;;  %v10738_v4 = vld [vmem:[#allocation16 + $0x280] ss:$20 sps:$4 sm:$0xff]   ;;  %v10744_v1 = vld [vmem:[#allocation16 + $0x2a8] ss:$20 sps:$4 sm:$0xff]  }
 0xf29   :  { %v7002_v40 = vadd.f32 %v7001_v53, %v7000_v42  ;;  %v7055_v8 = vrot.slane %v7054_v54, 2  ;;  %v7067_v17 = vrot.slane %v7066_v55, 2  ;;  %v6985_v37 = vrot.slane %v6984_v51, 1  ;;  %v10741_v42 = vld [vmem:[#allocation16 + $0x288] ss:$20 sps:$4 sm:$0xff]  }
 0xf2a   :  { %v6997_v12 = vrot.slane %v6996_v25, 1  ;;  %v7050_v14 = vadd.f32 %v7049_v44, %v7048_v10  ;;  %v7062_v38 = vadd.f32 %v7061_v61, %v7060_v22  ;;  %v6991_v60 = vrot.slane %v6990_v28, 1  ;;  %v10747_v53 = vld [vmem:[#allocation16 + $0x2b0] ss:$20 sps:$4 sm:$0xff]   ;;  %v10753_v61 = vld [vmem:[#allocation16 + $0x2d8] ss:$20 sps:$4 sm:$0xff]  }
 0xf2b   :  { %v7003_v3 = vrot.slane %v7002_v40, 1  ;;  %v7056_v20 = vadd.f32 %v7055_v8, %v7054_v54  ;;  %v7068_v31 = vadd.f32 %v7067_v17, %v7066_v55  ;;  %v6986_v27 = vadd.f32 %v6985_v37, %v6984_v51  ;;  %v10752_v54 = vld [vmem:[#allocation16 + $0x2d4] ss:$20 sps:$4 sm:$0xff]   ;;  %v10755_v55 = vld [vmem:[#allocation16 + $0x2dc] ss:$20 sps:$4 sm:$0xff]  }
 0xf2c   :  { %v6998_v50 = vadd.f32 %v6997_v12, %v6996_v25  ;;  %v7051_v52 = vrot.slane %v7050_v14, 1  ;;  %v7063_v48 = vrot.slane %v7062_v38, 1  ;;  %v6992_v13 = vadd.f32 %v6991_v60, %v6990_v28  ;;  %v10750_v44 = vld [vmem:[#allocation16 + $0x2d0] ss:$20 sps:$4 sm:$0xff]  }
 0xf2d   :  { %v7004_v43 = vadd.f32 %v7003_v3, %v7002_v40  ;;  %v7057_v29 = vrot.slane %v7056_v20, 1  ;;  %v7069_v36 = vrot.slane %v7068_v31, 1  ;;  %v7019_v56 = vmul.f32 %v13458_v33, %v6986_v27  ;;  %v10758_v40 = vld [vmem:[#allocation16 + $0x2fc] ss:$20 sps:$4 sm:$0xff]   ;;  %v10761_v8 = vld [vmem:[#allocation16 + $0x304] ss:$20 sps:$4 sm:$0xff]  }
 0xf2e   :  { %v7052_v39 = vadd.f32 %v7051_v52, %v7050_v14  ;;  %v7064_v11 = vadd.f32 %v7063_v48, %v7062_v38  ;;  %v7021_v21 = vmul.f32 %v13458_v33, %v6998_v50  ;;  %v7020_v5 = vmul.f32 %v13458_v33, %v6992_v13  ;;  %v10764_v50 = vld [vmem:[#allocation16 + $0x324] ss:$20 sps:$4 sm:$0xff]   ;;  %v10767_v52 = vld [vmem:[#allocation16 + $0x32c] ss:$20 sps:$4 sm:$0xff]  }
 0xf2f   :  { %v7058_v57 = vadd.f32 %v7057_v29, %v7056_v20  ;;  %v7070_v9 = vadd.f32 %v7069_v36, %v7068_v31  ;;  %v7022_v35 = vmul.f32 %v13458_v33, %v7004_v43  ;;  %v6565_v47 = vsub.s32 4, %v13777_v7  ;;  %v10759_v20 = vld [vmem:[#allocation16 + $0x300] ss:$20 sps:$4 sm:$0xff]  }
 0xf30   :  { %v7085_v0 = vmul.f32 %v13460_v16, %v7052_v39  ;;  %v7087_v63 = vmul.f32 %v13460_v16, %v7064_v11  ;;  %v6569_v22 = vsub.s32 5, %v13777_v7  ;;  %v10762_v11 = vld [vmem:[#allocation16 + $0x320] ss:$20 sps:$4 sm:$0xff]  }
 0xf31   :  { %v7086_v34 = vmul.f32 %v13460_v16, %v7058_v57  ;;  %v7088_v58 = vmul.f32 %v13460_v16, %v7070_v9  ;;  %v6566_v51 = vrot.slane %v13440_v15, %v6565_v47  ;;  %v10770_v9 = vld [vmem:[#allocation16 + $0x34c] ss:$20 sps:$4 sm:$0xff]  }
 0xf32   :  { %v7091_v6 = vsel %vm1361_vm1, %v7019_v56, %v7085_v0  ;;  %v13472_v59 = vsel %vm1361_vm1, %v7021_v21, %v7087_v63  ;;  %v6570_v25 = vrot.slane %v13440_v15, %v6569_v22  ;;  %v10756_v15 = vld [vmem:[#allocation16 + $0x2f8] ss:$20 sps:$4 sm:$0xff]   ;;  %v10765_v21 = vld [vmem:[#allocation16 + $0x328] ss:$20 sps:$4 sm:$0xff]  }
 0xf33   :  { %v7092_v26 = vsel %vm1361_vm1, %v7020_v5, %v7086_v34  ;;  %v7094_v19 = vsel %vm1361_vm1, %v7022_v35, %v7088_v58  ;;  %v13478_v41 = vpack.c.bf16 %v7091_v6, %v7091_v6  ;;  %v10773_v0 = vld [vmem:[#allocation16 + $0x354] ss:$20 sps:$4 sm:$0xff]   ;;  %v10771_v6 = vld [vmem:[#allocation16 + $0x350] ss:$20 sps:$4 sm:$0xff]  }
 0xf34   :  { %v13476_v24 = vpack.c.bf16 %v7092_v26, %v7092_v26  ;;  %v13485_v10 = vpack.c.bf16 %v7094_v19, %v7094_v19 }
 0xf36   :  { %8699 = vmatprep.mubr.bf16.mxu0 %v13476_v24  ;;  %8822 = vmatprep.mubr.bf16.mxu1 %v13476_v24 }
 0xf37   :  { %8700 = vmatmul.mubr.bf16.vlgmr.msra.gmra.mrb[28].mxu0 %v13478_v41  ;;  %8823 = vmatmul.mubr.bf16.vlgmr.msra.gmra.mrb[40].mxu1 %v13478_v41 }
 0xf38   :  { %8709 = vmatpush1.bf16.msra.mxu0 %v10738_v4  ;;  %8832 = vmatpush1.bf16.msra.mxu1 %v10741_v42  ;;  %v10776_v4 = vld [vmem:[#allocation16 + $0x374] ss:$20 sps:$4 sm:$0xff]   ;;  %v10779_v42 = vld [vmem:[#allocation16 + $0x37c] ss:$20 sps:$4 sm:$0xff]  }
 0xf39   :  { %8740 = vmatprep.mubr.bf16.mxu0 %v13485_v10  ;;  %8863 = vmatprep.mubr.bf16.mxu1 %v13485_v10 }
 0xf3a   :  { %8710 = vmatprep.subr.bf16.mxu0 %v10746_v23  ;;  %8833 = vmatprep.subr.bf16.mxu1 %v10749_v32 }
 0xf3c   :  { %8711 = vmatpush1.bf16.msra.mxu0 %v10744_v1  ;;  %8834 = vmatpush1.bf16.msra.mxu1 %v10747_v53  ;;  %v6937_v28 = vpop.f32.mrb[36].mxu1 }
 0xf3d   :  { %8712 = vmatprep.subr.bf16.mxu0 %v10752_v54  ;;  %8835 = vmatprep.subr.bf16.mxu1 %v10755_v55  ;;  %v6938_v17 = vadd.f32 %v6937_v28, %v6566_v51  ;;  %v6939_v37 = vpop.f32.mrb[37].mxu1  ;;  %v10774_v55 = vld [vmem:[#allocation16 + $0x370] ss:$20 sps:$4 sm:$0xff]  }
 0xf3e   :  { %v6940_v12 = vadd.f32 %v6939_v37, %v6570_v25  ;;  %v6941_v14 = vpop.f32.mrb[38].mxu1  ;;  %v10785_v28 = vld [vmem:[#allocation16 + $0x3a4] ss:$20 sps:$4 sm:$0xff]  }
 0xf3f   :  { %6950 = vst [vmem:[#allocation21 + $0x20] sm:$0xff] %v6938_v17  ;;  %v6979_v38 = vmul.f32 %v13428_v30, %v6938_v17  ;;  %v6942_v60 = vadd.f32 %v6941_v14, %v6566_v51  ;;  %v6943_v3 = vpop.f32.mrb[39].mxu1  ;;  %v10777_v51 = vld [vmem:[#allocation16 + $0x378] ss:$20 sps:$4 sm:$0xff]  }
 0xf40   :  { %8713 = vmatpush1.bf16.msra.mxu0 %v10750_v44  ;;  %8836 = vmatpush1.bf16.msra.mxu1 %v10753_v61  ;;  %6951 = vst [vmem:[#allocation21 + $0x28] sm:$0xff] %v6940_v12  ;;  %v6980_v31 = vmul.f32 %v13428_v30, %v6940_v12  ;;  %v6944_v27 = vadd.f32 %v6943_v3, %v6570_v25  ;;  %v10782_v61 = vld [vmem:[#allocation16 + $0x39c] ss:$20 sps:$4 sm:$0xff]   ;;  %v10780_v14 = vld [vmem:[#allocation16 + $0x398] ss:$20 sps:$4 sm:$0xff]  }
 0xf41   :  { %8714 = vmatprep.subr.bf16.mxu0 %v10758_v40  ;;  %8837 = vmatprep.subr.bf16.mxu1 %v10761_v8  ;;  %v7005_v48 = vrot.slane %v6979_v38, 4  ;;  %6956 = vst [vmem:[#allocation21 + $0x50] sm:$0xff] %v6942_v60  ;;  %v7045_v13 = vmul.f32 %v13425_v46, %v6942_v60  ;;  %v10788_v60 = vld [vmem:[#allocation16 + $0x3c4] ss:$20 sps:$4 sm:$0xff]   ;;  %v10791_v3 = vld [vmem:[#allocation16 + $0x3cc] ss:$20 sps:$4 sm:$0xff]  }
 0xf42   :  { %v7011_v43 = vrot.slane %v6980_v31, 4  ;;  %6957 = vst [vmem:[#allocation21 + $0x58] sm:$0xff] %v6944_v27  ;;  %v7046_v29 = vmul.f32 %v13425_v46, %v6944_v27  ;;  %v10768_v46 = vld [vmem:[#allocation16 + $0x348] ss:$20 sps:$4 sm:$0xff]  }
 0xf43   :  { %v7006_v36 = vadd.f32 %v7005_v48, %v6979_v38  ;;  %v7071_v39 = vrot.slane %v7045_v13, 4  ;;  %v10783_v38 = vld [vmem:[#allocation16 + $0x3a0] ss:$20 sps:$4 sm:$0xff]   ;;  %v10789_v27 = vld [vmem:[#allocation16 + $0x3c8] ss:$20 sps:$4 sm:$0xff]  }
 0xf44   :  { %8715 = vmatpush1.bf16.msra.mxu0 %v10756_v15  ;;  %8838 = vmatpush1.bf16.msra.mxu1 %v10759_v20  ;;  %v7012_v30 = vadd.f32 %v7011_v43, %v6980_v31  ;;  %v7077_v57 = vrot.slane %v7046_v29, 4  ;;  %v10792_v48 = vld [vmem:[#allocation16 + $0x3e8] ss:$20 sps:$4 sm:$0xff]  }
 0xf45   :  { %8716 = vmatprep.subr.bf16.mxu0 %v10764_v50  ;;  %8839 = vmatprep.subr.bf16.mxu1 %v10767_v52  ;;  %v7007_v63 = vrot.slane %v7006_v36, 2  ;;  %v7072_v56 = vadd.f32 %v7071_v39, %v7045_v13  ;;  %v10794_v50 = vld [vmem:[#allocation16 + $0x3ec] ss:$20 sps:$4 sm:$0xff]   ;;  %v10797_v52 = vld [vmem:[#allocation16 + $0x3f4] ss:$20 sps:$4 sm:$0xff]  }
 0xf46   :  { %v7013_v5 = vrot.slane %v7012_v30, 2  ;;  %v7078_v34 = vadd.f32 %v7077_v57, %v7046_v29  ;;  %v10795_v13 = vld [vmem:[#allocation16 + $0x3f0] ss:$20 sps:$4 sm:$0xff]  }
 0xf47   :  { %v7008_v35 = vadd.f32 %v7007_v63, %v7006_v36  ;;  %v7073_v58 = vrot.slane %v7072_v56, 2  ;;  %v10803_v43 = vld [vmem:[#allocation16 + $0x41c] ss:$20 sps:$4 sm:$0xff]   ;;  %v10801_v36 = vld [vmem:[#allocation16 + $0x418] ss:$20 sps:$4 sm:$0xff]  }
 0xf48   :  { %8717 = vmatpush1.bf16.msra.mxu0 %v10762_v11  ;;  %8840 = vmatpush1.bf16.msra.mxu1 %v10765_v21  ;;  %v7014_v26 = vadd.f32 %v7013_v5, %v7012_v30  ;;  %v7079_v19 = vrot.slane %v7078_v34, 2  ;;  %v10798_v29 = vld [vmem:[#allocation16 + $0x410] ss:$20 sps:$4 sm:$0xff]   ;;  %v10804_v21 = vld [vmem:[#allocation16 + $0x438] ss:$20 sps:$4 sm:$0xff]  }
 0xf49   :  { %8718 = vmatprep.subr.bf16.mxu0 %v10770_v9  ;;  %8841 = vmatprep.subr.bf16.mxu1 %v10773_v0  ;;  %v7009_v23 = vrot.slane %v7008_v35, 1  ;;  %v7074_v32 = vadd.f32 %v7073_v58, %v7072_v56  ;;  %v10806_v39 = vld [vmem:[#allocation16 + $0x43c] ss:$20 sps:$4 sm:$0xff]   ;;  %v10809_v11 = vld [vmem:[#allocation16 + $0x444] ss:$20 sps:$4 sm:$0xff]  }
 0xf4a   :  { %v7015_v22 = vrot.slane %v7014_v26, 1  ;;  %v7080_v1 = vadd.f32 %v7079_v19, %v7078_v34  ;;  %v10807_v30 = vld [vmem:[#allocation16 + $0x440] ss:$20 sps:$4 sm:$0xff]   ;;  %v10812_v57 = vld [vmem:[#allocation16 + $0x464] ss:$20 sps:$4 sm:$0xff]  }
 0xf4b   :  { %v7010_v53 = vadd.f32 %v7009_v23, %v7008_v35  ;;  %v7075_v54 = vrot.slane %v7074_v32, 1  ;;  %v10815_v9 = vld [vmem:[#allocation16 + $0x46c] ss:$20 sps:$4 sm:$0xff]   ;;  %v10813_v63 = vld [vmem:[#allocation16 + $0x468] ss:$20 sps:$4 sm:$0xff]  }
 0xf4c   :  { %8719 = vmatpush1.bf16.msra.mxu0 %v10768_v46  ;;  %8842 = vmatpush1.bf16.msra.mxu1 %v10771_v6  ;;  %v7016_v25 = vadd.f32 %v7015_v22, %v7014_v26  ;;  %v7081_v44 = vrot.slane %v7080_v1, 1  ;;  %v10810_v0 = vld [vmem:[#allocation16 + $0x460] ss:$20 sps:$4 sm:$0xff]   ;;  %v10816_v34 = vld [vmem:[#allocation16 + $0x488] ss:$20 sps:$4 sm:$0xff]  }
 0xf4d   :  { %8720 = vmatprep.subr.bf16.mxu0 %v10776_v4  ;;  %8843 = vmatprep.subr.bf16.mxu1 %v10779_v42  ;;  %v7023_v40 = vmul.f32 %v13458_v33, %v7010_v53  ;;  %v7076_v8 = vadd.f32 %v7075_v54, %v7074_v32  ;;  %v10818_v56 = vld [vmem:[#allocation16 + $0x48c] ss:$20 sps:$4 sm:$0xff]   ;;  %v10821_v5 = vld [vmem:[#allocation16 + $0x494] ss:$20 sps:$4 sm:$0xff]   ;;  %v10819_v35 = vld [vmem:[#allocation16 + $0x490] ss:$20 sps:$4 sm:$0xff]   ;;  %v13510_v53 = vpack.c.bf16 %v13472_v59, %v13472_v59 }
 0xf4e   :  { %v7082_v17 = vadd.f32 %v7081_v44, %v7080_v1  ;;  %v7024_v37 = vmul.f32 %v13458_v33, %v7016_v25  ;;  %v10786_v33 = vld [vmem:[#allocation16 + $0x3c0] ss:$20 sps:$4 sm:$0xff]   ;;  %v10827_v46 = vld [vmem:[#allocation16 + $0x4bc] ss:$20 sps:$4 sm:$0xff]   ;;  %v10825_v26 = vld [vmem:[#allocation16 + $0x4b8] ss:$20 sps:$4 sm:$0xff]  }
 0xf4f   :  { %v7089_v12 = vmul.f32 %v13460_v16, %v7076_v8  ;;  %v10824_v58 = vld [vmem:[#allocation16 + $0x4b4] ss:$20 sps:$4 sm:$0xff]   ;;  %v10822_v6 = vld [vmem:[#allocation16 + $0x4b0] ss:$20 sps:$4 sm:$0xff]   ;;  %v10828_v42 = vld [vmem:[#allocation16 + $0x4d8] ss:$20 sps:$4 sm:$0xff]  }
 0xf50   :  { %8721 = vmatpush1.bf16.msra.mxu0 %v10774_v55  ;;  %8844 = vmatpush1.bf16.msra.mxu1 %v10777_v51  ;;  %v7090_v15 = vmul.f32 %v13460_v16, %v7082_v17  ;;  %v10800_v16 = vld [vmem:[#allocation16 + $0x414] ss:$20 sps:$4 sm:$0xff]   ;;  %v10830_v19 = vld [vmem:[#allocation16 + $0x4dc] ss:$20 sps:$4 sm:$0xff]   ;;  %v10833_v4 = vld [vmem:[#allocation16 + $0x4e4] ss:$20 sps:$4 sm:$0xff]  }
 0xf51   :  { %8722 = vmatprep.subr.bf16.mxu0 %v10782_v61  ;;  %8845 = vmatprep.subr.bf16.mxu1 %v10785_v28  ;;  %v13503_v20 = vsel %vm1361_vm1, %v7023_v40, %v7089_v12  ;;  %v10831_v23 = vld [vmem:[#allocation16 + $0x4e0] ss:$20 sps:$4 sm:$0xff]   ;;  %v10836_v32 = vld [vmem:[#allocation16 + $0x504] ss:$20 sps:$4 sm:$0xff]   ;;  %v10837_v54 = vld [vmem:[#allocation16 + $0x508] ss:$20 sps:$4 sm:$0xff]  }
 0xf52   :  { %v13506_v31 = vsel %vm1361_vm1, %v7024_v37, %v7090_v15  ;;  %v10839_v22 = vld [vmem:[#allocation16 + $0x50c] ss:$20 sps:$4 sm:$0xff]   ;;  %v10845_v25 = vld [vmem:[#allocation16 + $0x534] ss:$20 sps:$4 sm:$0xff]   ;;  %v10843_v59 = vld [vmem:[#allocation16 + $0x530] ss:$20 sps:$4 sm:$0xff]  }
 0xf53   :  { %v10834_v1 = vld [vmem:[#allocation16 + $0x500] ss:$20 sps:$4 sm:$0xff]   ;;  %v13514_v55 = vpack.c.bf16 %v13506_v31, %v13506_v31  ;;  %v10840_v44 = vld [vmem:[#allocation16 + $0x528] ss:$20 sps:$4 sm:$0xff]   ;;  %v10846_v40 = vld [vmem:[#allocation16 + $0x550] ss:$20 sps:$4 sm:$0xff]  }
 0xf54   :  { %8723 = vmatpush1.bf16.msra.mxu0 %v10780_v14  ;;  %8846 = vmatpush1.bf16.msra.mxu1 %v10783_v38  ;;  %v10842_v51 = vld [vmem:[#allocation16 + $0x52c] ss:$20 sps:$4 sm:$0xff]   ;;  %v10848_v61 = vld [vmem:[#allocation16 + $0x554] ss:$20 sps:$4 sm:$0xff]   ;;  %v10851_v28 = vld [vmem:[#allocation16 + $0x55c] ss:$20 sps:$4 sm:$0xff]  }
 0xf55   :  { %8724 = vmatprep.subr.bf16.mxu0 %v10788_v60  ;;  %8847 = vmatprep.subr.bf16.mxu1 %v10791_v3  ;;  %v10849_v8 = vld [vmem:[#allocation16 + $0x558] ss:$20 sps:$4 sm:$0xff]   ;;  %v10854_v17 = vld [vmem:[#allocation16 + $0x57c] ss:$20 sps:$4 sm:$0xff]   ;;  %v10855_v14 = vld [vmem:[#allocation16 + $0x580] ss:$20 sps:$4 sm:$0xff]  }
 0xf56   :  { %v10857_v37 = vld [vmem:[#allocation16 + $0x584] ss:$20 sps:$4 sm:$0xff]   ;;  %v10863_v60 = vld [vmem:[#allocation16 + $0x5ac] ss:$20 sps:$4 sm:$0xff]   ;;  %v10861_v15 = vld [vmem:[#allocation16 + $0x5a8] ss:$20 sps:$4 sm:$0xff]  }
 0xf57   :  { %v10852_v12 = vld [vmem:[#allocation16 + $0x578] ss:$20 sps:$4 sm:$0xff]   ;;  %v10858_v3 = vld [vmem:[#allocation16 + $0x5a0] ss:$20 sps:$4 sm:$0xff]  }
 0xf58   :  { %8725 = vmatpush1.bf16.msra.mxu0 %v10786_v33  ;;  %8848 = vmatpush1.bf16.msra.mxu1 %v10789_v27  ;;  %v10860_v38 = vld [vmem:[#allocation16 + $0x5a4] ss:$20 sps:$4 sm:$0xff]   ;;  %v10866_v31 = vld [vmem:[#allocation16 + $0x5cc] ss:$20 sps:$4 sm:$0xff]   ;;  %v10869_v33 = vld [vmem:[#allocation16 + $0x5d4] ss:$20 sps:$4 sm:$0xff]  }
 0xf59   :  { %8726 = vmatprep.subr.bf16.mxu0 %v10794_v50  ;;  %8849 = vmatprep.subr.bf16.mxu1 %v10797_v52  ;;  %v10864_v27 = vld [vmem:[#allocation16 + $0x5c8] ss:$20 sps:$4 sm:$0xff]   ;;  %v10867_v50 = vld [vmem:[#allocation16 + $0x5d0] ss:$20 sps:$4 sm:$0xff]  }
 0xf5a   :  { %v10872_v52 = vld [vmem:[#allocation16 + $0x5f4] ss:$20 sps:$4 sm:$0xff]  }
 0xf5c   :  { %8727 = vmatpush1.bf16.msra.mxu0 %v10792_v48  ;;  %8850 = vmatpush1.bf16.msra.mxu1 %v10795_v13  ;;  %v10875_v48 = vld [vmem:[#allocation16 + $0x5fc] ss:$20 sps:$4 sm:$0xff]  }
 0xf5d   :  { %8728 = vmatprep.subr.bf16.mxu0 %v10800_v16  ;;  %8851 = vmatprep.subr.bf16.mxu1 %v10803_v43  ;;  %v10870_v13 = vld [vmem:[#allocation16 + $0x5f0] ss:$20 sps:$4 sm:$0xff]   ;;  %v10873_v16 = vld [vmem:[#allocation16 + $0x5f8] ss:$20 sps:$4 sm:$0xff]  }
 0xf5e   :  { %v10878_v43 = vld [vmem:[#allocation16 + $0x61c] ss:$20 sps:$4 sm:$0xff]  }
 0xf60   :  { %8729 = vmatpush1.bf16.msra.mxu0 %v10798_v29  ;;  %8852 = vmatpush1.bf16.msra.mxu1 %v10801_v36  ;;  %v10881_v29 = vld [vmem:[#allocation16 + $0x624] ss:$20 sps:$4 sm:$0xff]  }
 0xf61   :  { %8730 = vmatprep.subr.bf16.mxu0 %v10806_v39  ;;  %8853 = vmatprep.subr.bf16.mxu1 %v10809_v11  ;;  %v10876_v36 = vld [vmem:[#allocation16 + $0x618] ss:$20 sps:$4 sm:$0xff]   ;;  %v10879_v39 = vld [vmem:[#allocation16 + $0x620] ss:$20 sps:$4 sm:$0xff]  }
 0xf62   :  { %v10884_v11 = vld [vmem:[#allocation16 + $0x644] ss:$20 sps:$4 sm:$0xff]  }
 0xf64   :  { %8731 = vmatpush1.bf16.msra.mxu0 %v10804_v21  ;;  %8854 = vmatpush1.bf16.msra.mxu1 %v10807_v30  ;;  %v10887_v21 = vld [vmem:[#allocation16 + $0x64c] ss:$20 sps:$4 sm:$0xff]  }
 0xf65   :  { %8732 = vmatprep.subr.bf16.mxu0 %v10812_v57  ;;  %8855 = vmatprep.subr.bf16.mxu1 %v10815_v9  ;;  %v10882_v30 = vld [vmem:[#allocation16 + $0x640] ss:$20 sps:$4 sm:$0xff]   ;;  %v10885_v57 = vld [vmem:[#allocation16 + $0x648] ss:$20 sps:$4 sm:$0xff]  }
 0xf66   :  { %v10890_v9 = vld [vmem:[#allocation16 + $0x66c] ss:$20 sps:$4 sm:$0xff]  }
 0xf68   :  { %8733 = vmatpush1.bf16.msra.mxu0 %v10810_v0  ;;  %8856 = vmatpush1.bf16.msra.mxu1 %v10813_v63  ;;  %v10893_v0 = vld [vmem:[#allocation16 + $0x674] ss:$20 sps:$4 sm:$0xff]  }
 0xf69   :  { %8734 = vmatprep.subr.bf16.mxu0 %v10818_v56  ;;  %8857 = vmatprep.subr.bf16.mxu1 %v10821_v5  ;;  %v10888_v63 = vld [vmem:[#allocation16 + $0x668] ss:$20 sps:$4 sm:$0xff]   ;;  %v10891_v56 = vld [vmem:[#allocation16 + $0x670] ss:$20 sps:$4 sm:$0xff]  }
 0xf6a   :  { %v10896_v5 = vld [vmem:[#allocation16 + $0x694] ss:$20 sps:$4 sm:$0xff]  }
 0xf6c   :  { %8735 = vmatpush1.bf16.msra.mxu0 %v10816_v34  ;;  %8858 = vmatpush1.bf16.msra.mxu1 %v10819_v35  ;;  %v10899_v34 = vld [vmem:[#allocation16 + $0x69c] ss:$20 sps:$4 sm:$0xff]  }
 0xf6d   :  { %8736 = vmatprep.subr.bf16.mxu0 %v10824_v58  ;;  %8859 = vmatprep.subr.bf16.mxu1 %v10827_v46  ;;  %v10894_v35 = vld [vmem:[#allocation16 + $0x690] ss:$20 sps:$4 sm:$0xff]   ;;  %v10897_v58 = vld [vmem:[#allocation16 + $0x698] ss:$20 sps:$4 sm:$0xff]  }
 0xf6e   :  { %v10902_v46 = vld [vmem:[#allocation16 + $0x6bc] ss:$20 sps:$4 sm:$0xff]  }
 0xf70   :  { %8737 = vmatpush1.bf16.msra.mxu0 %v10822_v6  ;;  %8860 = vmatpush1.bf16.msra.mxu1 %v10825_v26  ;;  %v10905_v6 = vld [vmem:[#allocation16 + $0x6c4] ss:$20 sps:$4 sm:$0xff]  }
 0xf71   :  { %8738 = vmatprep.subr.bf16.mxu0 %v10830_v19  ;;  %8861 = vmatprep.subr.bf16.mxu1 %v10833_v4  ;;  %v10900_v26 = vld [vmem:[#allocation16 + $0x6b8] ss:$20 sps:$4 sm:$0xff]   ;;  %v10903_v19 = vld [vmem:[#allocation16 + $0x6c0] ss:$20 sps:$4 sm:$0xff]  }
 0xf72   :  { %v10908_v4 = vld [vmem:[#allocation16 + $0x6e4] ss:$20 sps:$4 sm:$0xff]  }
 0xf74   :  { %8739 = vmatpush1.bf16.msra.mxu0 %v10828_v42  ;;  %8862 = vmatpush1.bf16.msra.mxu1 %v10831_v23  ;;  %v10911_v42 = vld [vmem:[#allocation16 + $0x6ec] ss:$20 sps:$4 sm:$0xff]  }
 0xf75   :  { %8749 = vmatprep.subr.bf16.mxu0 %v10836_v32  ;;  %8872 = vmatprep.subr.bf16.mxu1 %v10839_v22  ;;  %v10906_v23 = vld [vmem:[#allocation16 + $0x6e0] ss:$20 sps:$4 sm:$0xff]   ;;  %v10909_v32 = vld [vmem:[#allocation16 + $0x6e8] ss:$20 sps:$4 sm:$0xff]  }
 0xf76   :  { %v10914_v22 = vld [vmem:[#allocation16 + $0x70c] ss:$20 sps:$4 sm:$0xff]  }
 0xf77   :  { %8741 = vmatmul.mubr.bf16.vlgmr.msra.gmra.mrb[28].mxu0 %v13510_v53  ;;  %8864 = vmatmul.mubr.bf16.vlgmr.msra.gmra.mrb[40].mxu1 %v13510_v53 }
 0xf78   :  { %8750 = vmatpush1.bf16.msra.mxu0 %v10834_v1  ;;  %8781 = vmatprep.mubr.bf16.mxu0 %v13514_v55  ;;  %v10917_v1 = vld [vmem:[#allocation16 + $0x714] ss:$20 sps:$4 sm:$0xff]  }
 0xf79   :  { %8873 = vmatpush1.bf16.msra.mxu1 %v10837_v54  ;;  %8904 = vmatprep.mubr.bf16.mxu1 %v13514_v55  ;;  %v10912_v54 = vld [vmem:[#allocation16 + $0x708] ss:$20 sps:$4 sm:$0xff]  }
 0xf7a   :  { %8751 = vmatprep.subr.bf16.mxu0 %v10842_v51  ;;  %8874 = vmatprep.subr.bf16.mxu1 %v10845_v25  ;;  %v10915_v51 = vld [vmem:[#allocation16 + $0x710] ss:$20 sps:$4 sm:$0xff]   ;;  %v10920_v25 = vld [vmem:[#allocation16 + $0x734] ss:$20 sps:$4 sm:$0xff]  }
 0xf7c   :  { %8752 = vmatpush1.bf16.msra.mxu0 %v10840_v44  ;;  %v10923_v44 = vld [vmem:[#allocation16 + $0x73c] ss:$20 sps:$4 sm:$0xff]  }
 0xf7d   :  { %8875 = vmatpush1.bf16.msra.mxu1 %v10843_v59  ;;  %8753 = vmatprep.subr.bf16.mxu0 %v10848_v61  ;;  %v10918_v59 = vld [vmem:[#allocation16 + $0x730] ss:$20 sps:$4 sm:$0xff]   ;;  %v10921_v61 = vld [vmem:[#allocation16 + $0x738] ss:$20 sps:$4 sm:$0xff]  }
 0xf7e   :  { %8876 = vmatprep.subr.bf16.mxu1 %v10851_v28  ;;  %v10926_v28 = vld [vmem:[#allocation16 + $0x75c] ss:$20 sps:$4 sm:$0xff]  }
 0xf80   :  { %8754 = vmatpush1.bf16.msra.mxu0 %v10846_v40  ;;  %v10929_v40 = vld [vmem:[#allocation16 + $0x764] ss:$20 sps:$4 sm:$0xff]  }
 0xf81   :  { %8877 = vmatpush1.bf16.msra.mxu1 %v10849_v8  ;;  %8755 = vmatprep.subr.bf16.mxu0 %v10854_v17  ;;  %v10924_v8 = vld [vmem:[#allocation16 + $0x758] ss:$20 sps:$4 sm:$0xff]   ;;  %v10927_v17 = vld [vmem:[#allocation16 + $0x760] ss:$20 sps:$4 sm:$0xff]  }
 0xf82   :  { %8878 = vmatprep.subr.bf16.mxu1 %v10857_v37  ;;  %v10930_v37 = vld [vmem:[#allocation16 + $0x150] ss:$20 sps:$4 sm:$0xff]  }
 0xf84   :  { %8756 = vmatpush1.bf16.msra.mxu0 %v10852_v12  ;;  %v10931_v12 = vld [vmem:[#allocation16 + $0x3d0] ss:$20 sps:$4 sm:$0xff]  }
 0xf85   :  { %8879 = vmatpush1.bf16.msra.mxu1 %v10855_v14  ;;  %8757 = vmatprep.subr.bf16.mxu0 %v10860_v38  ;;  %v10932_v14 = vld [vmem:[#allocation16 + $0x10] ss:$20 sps:$4 sm:$0xff]   ;;  %v13522_v38 = vpack.c.bf16 %v13503_v20, %v13503_v20  ;;  %v10939_v20 = vld [vmem:[#allocation16 + $0x420] ss:$20 sps:$4 sm:$0xff]  }
 0xf86   :  { %8880 = vmatprep.subr.bf16.mxu1 %v10863_v60  ;;  %v10933_v60 = vld [vmem:[#allocation16 + $0x290] ss:$20 sps:$4 sm:$0xff]  }
 0xf88   :  { %8758 = vmatpush1.bf16.msra.mxu0 %v10858_v3  ;;  %v10934_v3 = vld [vmem:[#allocation16 + $0x178] ss:$20 sps:$4 sm:$0xff]  }
 0xf89   :  { %8881 = vmatpush1.bf16.msra.mxu1 %v10861_v15  ;;  %8759 = vmatprep.subr.bf16.mxu0 %v10866_v31  ;;  %v10935_v15 = vld [vmem:[#allocation16 + $0x3f8] ss:$20 sps:$4 sm:$0xff]  }
 0xf8a   :  { %8882 = vmatprep.subr.bf16.mxu1 %v10869_v33  ;;  %v10936_v31 = vld [vmem:[#allocation16 + $0x38] ss:$20 sps:$4 sm:$0xff]  }
 0xf8b   :  { %v10937_v33 = vld [vmem:[#allocation16 + $0x2b8] ss:$20 sps:$4 sm:$0xff]  }
 0xf8c   :  { %8760 = vmatpush1.bf16.msra.mxu0 %v10864_v27  ;;  %v10938_v27 = vld [vmem:[#allocation16 + $0x1a0] ss:$20 sps:$4 sm:$0xff]  }
 0xf8d   :  { %8883 = vmatpush1.bf16.msra.mxu1 %v10867_v50  ;;  %8761 = vmatprep.subr.bf16.mxu0 %v10872_v52  ;;  %v10940_v50 = vld [vmem:[#allocation16 + $0x60] ss:$20 sps:$4 sm:$0xff]  }
 0xf8e   :  { %8884 = vmatprep.subr.bf16.mxu1 %v10875_v48  ;;  %v10941_v52 = vld [vmem:[#allocation16 + $0x2e0] ss:$20 sps:$4 sm:$0xff]   ;;  %v10942_v48 = vld [vmem:[#allocation16 + $0x1c8] ss:$20 sps:$4 sm:$0xff]  }
 0xf90   :  { %8762 = vmatpush1.bf16.msra.mxu0 %v10870_v13  ;;  %v10943_v13 = vld [vmem:[#allocation16 + $0x448] ss:$20 sps:$4 sm:$0xff]  }
 0xf91   :  { %8885 = vmatpush1.bf16.msra.mxu1 %v10873_v16  ;;  %8763 = vmatprep.subr.bf16.mxu0 %v10878_v43  ;;  %v10944_v16 = vld [vmem:[#allocation16 + $0x88] ss:$20 sps:$4 sm:$0xff]   ;;  %v10946_v43 = vld [vmem:[#allocation16 + $0x1f0] ss:$20 sps:$4 sm:$0xff]  }
 0xf92   :  { %8886 = vmatprep.subr.bf16.mxu1 %v10881_v29  ;;  %v10947_v29 = vld [vmem:[#allocation16 + $0x470] ss:$20 sps:$4 sm:$0xff]  }
 0xf94   :  { %8764 = vmatpush1.bf16.msra.mxu0 %v10876_v36  ;;  %v10949_v36 = vld [vmem:[#allocation16 + $0x330] ss:$20 sps:$4 sm:$0xff]  }
 0xf95   :  { %8887 = vmatpush1.bf16.msra.mxu1 %v10879_v39  ;;  %8765 = vmatprep.subr.bf16.mxu0 %v10884_v11  ;;  %v10950_v39 = vld [vmem:[#allocation16 + $0x218] ss:$20 sps:$4 sm:$0xff]  }
 0xf96   :  { %8888 = vmatprep.subr.bf16.mxu1 %v10887_v21  ;;  %v10951_v11 = vld [vmem:[#allocation16 + $0x498] ss:$20 sps:$4 sm:$0xff]  }
 0xf97   :  { %v10952_v21 = vld [vmem:[#allocation16 + $0xd8] ss:$20 sps:$4 sm:$0xff]  }
 0xf98   :  { %8766 = vmatpush1.bf16.msra.mxu0 %v10882_v30  ;;  %v10953_v30 = vld [vmem:[#allocation16 + $0x358] ss:$20 sps:$4 sm:$0xff]  }
 0xf99   :  { %8889 = vmatpush1.bf16.msra.mxu1 %v10885_v57  ;;  %8767 = vmatprep.subr.bf16.mxu0 %v10890_v9  ;;  %v10954_v57 = vld [vmem:[#allocation16 + $0x240] ss:$20 sps:$4 sm:$0xff]  }
 0xf9a   :  { %8890 = vmatprep.subr.bf16.mxu1 %v10893_v0  ;;  %v10955_v9 = vld [vmem:[#allocation16 + $0x4c0] ss:$20 sps:$4 sm:$0xff]  }
 0xf9b   :  { %v10956_v0 = vld [vmem:[#allocation16 + $0x100] ss:$20 sps:$4 sm:$0xff]  }
 0xf9c   :  { %8768 = vmatpush1.bf16.msra.mxu0 %v10888_v63  ;;  %v10957_v63 = vld [vmem:[#allocation16 + $0x380] ss:$20 sps:$4 sm:$0xff]  }
 0xf9d   :  { %8891 = vmatpush1.bf16.msra.mxu1 %v10891_v56  ;;  %8769 = vmatprep.subr.bf16.mxu0 %v10896_v5  ;;  %v10958_v56 = vld [vmem:[#allocation16 + $0x268] ss:$20 sps:$4 sm:$0xff]  }
 0xf9e   :  { %8892 = vmatprep.subr.bf16.mxu1 %v10899_v34  ;;  %v10959_v5 = vld [vmem:[#allocation16 + $0x4e8] ss:$20 sps:$4 sm:$0xff]  }
 0xf9f   :  { %v10960_v34 = vld [vmem:[#allocation16 + $0x128] ss:$20 sps:$4 sm:$0xff]  }
 0xfa0   :  { %8770 = vmatpush1.bf16.msra.mxu0 %v10894_v35  ;;  %v10961_v35 = vld [vmem:[#allocation16 + $0x3a8] ss:$20 sps:$4 sm:$0xff]  }
 0xfa1   :  { %8893 = vmatpush1.bf16.msra.mxu1 %v10897_v58  ;;  %8771 = vmatprep.subr.bf16.mxu0 %v10902_v46  ;;  %v10962_v58 = vld [vmem:[#allocation16 + $0x650] ss:$20 sps:$4 sm:$0xff]  }
 0xfa2   :  { %8894 = vmatprep.subr.bf16.mxu1 %v10905_v6  ;;  %v10963_v46 = vld [vmem:[#allocation16 + $0x510] ss:$20 sps:$4 sm:$0xff]   ;;  %v10964_v6 = vld [vmem:[#allocation16 + $0x678] ss:$20 sps:$4 sm:$0xff]  }
 0xfa4   :  { %8772 = vmatpush1.bf16.msra.mxu0 %v10900_v26  ;;  %v10965_v26 = vld [vmem:[#allocation16 + $0x538] ss:$20 sps:$4 sm:$0xff]  }
 0xfa5   :  { %8895 = vmatpush1.bf16.msra.mxu1 %v10903_v19  ;;  %8773 = vmatprep.subr.bf16.mxu0 %v10908_v4  ;;  %v10966_v19 = vld [vmem:[#allocation16 + $0x6a0] ss:$20 sps:$4 sm:$0xff]  }
 0xfa6   :  { %8896 = vmatprep.subr.bf16.mxu1 %v10911_v42  ;;  %v10967_v4 = vld [vmem:[#allocation16 + $0x560] ss:$20 sps:$4 sm:$0xff]   ;;  %v10968_v42 = vld [vmem:[#allocation16 + $0x6c8] ss:$20 sps:$4 sm:$0xff]  }
 0xfa8   :  { %8774 = vmatpush1.bf16.msra.mxu0 %v10906_v23  ;;  %v10969_v23 = vld [vmem:[#allocation16 + $0x588] ss:$20 sps:$4 sm:$0xff]  }
 0xfa9   :  { %8897 = vmatpush1.bf16.msra.mxu1 %v10909_v32  ;;  %8775 = vmatprep.subr.bf16.mxu0 %v10914_v22  ;;  %v10970_v32 = vld [vmem:[#allocation16 + $0x6f0] ss:$20 sps:$4 sm:$0xff]  }
 0xfaa   :  { %8898 = vmatprep.subr.bf16.mxu1 %v10917_v1  ;;  %v10971_v22 = vld [vmem:[#allocation16 + $0x5b0] ss:$20 sps:$4 sm:$0xff]   ;;  %v10974_v1 = vld [vmem:[#allocation16 + $0x740] ss:$20 sps:$4 sm:$0xff]  }
 0xfac   :  { %8776 = vmatpush1.bf16.msra.mxu0 %v10912_v54  ;;  %v10976_v54 = vld [vmem:[#allocation16 + $0x768] ss:$20 sps:$4 sm:$0xff]  }
 0xfad   :  { %8899 = vmatpush1.bf16.msra.mxu1 %v10915_v51  ;;  %8777 = vmatprep.subr.bf16.mxu0 %v10920_v25  ;;  %v10977_v51 = vld [vmem:[#allocation16 + $0x628] ss:$20 sps:$4 sm:$0xff]  }
 0xfae   :  { %8900 = vmatprep.subr.bf16.mxu1 %v10923_v44 }
 0xfb0   :  { %8778 = vmatpush1.bf16.msra.mxu0 %v10918_v59 }
 0xfb1   :  { %8901 = vmatpush1.bf16.msra.mxu1 %v10921_v61  ;;  %8779 = vmatprep.subr.bf16.mxu0 %v10926_v28 }
 0xfb2   :  { %8902 = vmatprep.subr.bf16.mxu1 %v10929_v40 }
 0xfb4   :  { %8780 = vmatpush1.bf16.msra.mxu0 %v10924_v8 }
 0xfb5   :  { %8903 = vmatpush1.bf16.msra.mxu1 %v10927_v17  ;;  %10123 = vmatprep.subr.bf16.mxu0 %v10930_v37 }
 0xfb6   :  { %10145 = vmatprep.subr.bf16.mxu1 %v10931_v12 }
 0xfb7   :  { %8782 = vmatmul.mubr.bf16.vlgmr.msra.gmra.mrb[28].mxu0 %v13522_v38 }
 0xfb8   :  { %8905 = vmatmul.mubr.bf16.vlgmr.msra.gmra.mrb[40].mxu1 %v13522_v38  ;;  %10124 = vmatpush3.bf16.msra.mxu0 %v10932_v14 }
 0xfb9   :  { %8945 = vmatprep.mubr.bf16.mxu0 %v13476_v24  ;;  %10146 = vmatpush3.bf16.msra.mxu1 %v10933_v60  ;;  %v10945_v24 = vld [vmem:[#allocation16 + $0x308] ss:$20 sps:$4 sm:$0xff]  }
 0xfba   :  { %8985 = vmatprep.mubr.bf16.mxu1 %v13485_v10  ;;  %10125 = vmatprep.subr.bf16.mxu0 %v10934_v3  ;;  %v10948_v10 = vld [vmem:[#allocation16 + $0xb0] ss:$20 sps:$4 sm:$0xff]  }
 0xfbb   :  { %10147 = vmatprep.subr.bf16.mxu1 %v10935_v15 }
 0xfbc   :  { %10126 = vmatpush3.bf16.msra.mxu0 %v10936_v31 }
 0xfbd   :  { %10148 = vmatpush3.bf16.msra.mxu1 %v10937_v33  ;;  %10127 = vmatprep.subr.bf16.mxu0 %v10938_v27 }
 0xfbe   :  { %10149 = vmatprep.subr.bf16.mxu1 %v10939_v20 }
 0xfc0   :  { %10128 = vmatpush3.bf16.msra.mxu0 %v10940_v50 }
 0xfc1   :  { %10150 = vmatpush3.bf16.msra.mxu1 %v10941_v52  ;;  %10129 = vmatprep.subr.bf16.mxu0 %v10942_v48 }
 0xfc2   :  { %10151 = vmatprep.subr.bf16.mxu1 %v10943_v13 }
 0xfc4   :  { %10130 = vmatpush3.bf16.msra.mxu0 %v10944_v16 }
 0xfc5   :  { %10152 = vmatpush3.bf16.msra.mxu1 %v10945_v24  ;;  %10131 = vmatprep.subr.bf16.mxu0 %v10946_v43 }
 0xfc6   :  { %10153 = vmatprep.subr.bf16.mxu1 %v10947_v29 }
 0xfc8   :  { %10132 = vmatpush3.bf16.msra.mxu0 %v10948_v10 }
 0xfc9   :  { %10154 = vmatpush3.bf16.msra.mxu1 %v10949_v36  ;;  %10133 = vmatprep.subr.bf16.mxu0 %v10950_v39 }
 0xfca   :  { %10155 = vmatprep.subr.bf16.mxu1 %v10951_v11 }
 0xfcc   :  { %10134 = vmatpush3.bf16.msra.mxu0 %v10952_v21 }
 0xfcd   :  { %10156 = vmatpush3.bf16.msra.mxu1 %v10953_v30  ;;  %10135 = vmatprep.subr.bf16.mxu0 %v10954_v57 }
 0xfce   :  { %10157 = vmatprep.subr.bf16.mxu1 %v10955_v9 }
 0xfd0   :  { %10136 = vmatpush3.bf16.msra.mxu0 %v10956_v0 }
 0xfd1   :  { %10158 = vmatpush3.bf16.msra.mxu1 %v10957_v63  ;;  %10137 = vmatprep.subr.bf16.mxu0 %v10958_v56 }
 0xfd2   :  { %10159 = vmatprep.subr.bf16.mxu1 %v10959_v5 }
 0xfd4   :  { %10138 = vmatpush3.bf16.msra.mxu0 %v10960_v34 }
 0xfd5   :  { %10160 = vmatpush3.bf16.msra.mxu1 %v10961_v35  ;;  %10167 = vmatprep.subr.bf16.mxu0 %v10962_v58 }
 0xfd7   :  { %8946 = vmatmul.mubr.bf16.vlgmr.msra.gmra.mrb[32].mxu0 %v13478_v41  ;;  %v10972_v41 = vld [vmem:[#allocation16 + $0x718] ss:$20 sps:$4 sm:$0xff]  }
 0xfd8   :  { %8986 = vmatmul.mubr.bf16.vlgmr.msra.gmra.mrb[44].mxu1 %v13510_v53  ;;  %10168 = vmatpush3.bf16.msra.mxu0 %v10963_v46  ;;  %v10973_v53 = vld [vmem:[#allocation16 + $0x5d8] ss:$20 sps:$4 sm:$0xff]  }
 0xfd9   :  { %9025 = vmatprep.mubr.bf16.mxu0 %v13514_v55  ;;  %10169 = vmatprep.subr.bf16.mxu0 %v10964_v6  ;;  %v10975_v55 = vld [vmem:[#allocation16 + $0x600] ss:$20 sps:$4 sm:$0xff]  }
 0xfdc   :  { %10170 = vmatpush3.bf16.msra.mxu0 %v10965_v26 }
 0xfdd   :  { %10171 = vmatprep.subr.bf16.mxu0 %v10966_v19 }
 0xfe0   :  { %10172 = vmatpush3.bf16.msra.mxu0 %v10967_v4 }
 0xfe1   :  { %10173 = vmatprep.subr.bf16.mxu0 %v10968_v42 }
 0xfe4   :  { %10174 = vmatpush3.bf16.msra.mxu0 %v10969_v23 }
 0xfe5   :  { %10175 = vmatprep.subr.bf16.mxu0 %v10970_v32 }
 0xfe8   :  { %10176 = vmatpush3.bf16.msra.mxu0 %v10971_v22 }
 0xfe9   :  { %10177 = vmatprep.subr.bf16.mxu0 %v10972_v41 }
 0xfec   :  { %10178 = vmatpush3.bf16.msra.mxu0 %v10973_v53 }
 0xfed   :  { %10179 = vmatprep.subr.bf16.mxu0 %v10974_v1 }
 0xff0   :  { %10180 = vmatpush3.bf16.msra.mxu0 %v10975_v55 }
 0xff1   :  { %10181 = vmatprep.subr.bf16.mxu0 %v10976_v54 }
 0xff4   :  { %10182 = vmatpush3.bf16.msra.mxu0 %v10977_v51 }
 0xff7   :  { %9026 = vmatmul.mubr.bf16.vlgmr.msra.gmra.mrb[36].mxu0 %v13522_v38 }
 0xff8   :  { %11331 = shalt.err (!%p11328_p5)
}
 0xff9   :  { %s11332_s6 = scalar_lea.hbm %s13575_s11, 1536 }
 0xffa   :  { %p11333_p6 = scmp.ne.s32.totalorder %s13575_s11, %s11332_s6  ;;  %p11336_p7 = scmp.lt.u32.totalorder %s11332_s6, %s13575_s11 }
 0xffc   :  { %p11338_p8 = pnand %p11336_p7, %p11333_p6 }
 0xffe   :  { %11341 = shalt.err (!%p11338_p8)
}
 0xfff   :  { %s11412_s19 = smov 768   ;;  %s11413_s20 = smov 48   ;;  %v7392_v25 = vld [vmem:[#allocation19 + $0x1] ss:$4 sm:$0x1f] }
0x1000   :  { %9107 = dma.vmem_to_hbm [thread:$0]  %s9102_s14, 1536, %s13575_s11, [#allocation4], %s11412_s19, %s11412_s19, %s11413_s20   ;;  %v7397_v44 = vrot.slane %v7392_v25, %v13277_v45  ;;  %v7405_v59 = vrot.slane %v7392_v25, %v13285_v49  ;;  %v7401_v61 = vrot.slane %v7392_v25, %v13280_v18  ;;  %v7409_v28 = vrot.slane %v7392_v25, %v13288_v62 }
0x1001   :  { %v7413_v21 = vrot.slane %v7392_v25, %v6565_v47  ;;  %s11414_s11 = smov [#allocation22]  }
0x1002   :  { %s9114_s24 = sshll.u32 %s11414_s11, 4  ;;  %s9115_s24 = int_to_ptr.vmem [resolvable:$true] %s9114_s24 }
0x1003   :  { %s11342_s4 = scalar_lea.vmem %s9115_s24, 160  ;;  %p11347_p10 = scmp.lt.s32.totalorder %s9115_s24, %s9115_s24 }
0x1004   :  { %p11343_p9 = scmp.ne.s32.totalorder %s9115_s24, %s11342_s4  ;;  %p11348_p11 = scmp.lt.s32.totalorder %s11342_s4, %s11342_s4 }
0x1006   :  { %p11349_p12 = por %p11348_p11, %p11347_p10 }
0x1008   :  { %p11350_p13 = pnand %p11349_p12, %p11343_p9 }
0x108a   :  { %v8783_v40 = vpop.f32.mrb[28].mxu0 }
0x108b   :  { %v10189_v8 = vadd.f32 %v8783_v40, %v7397_v44  ;;  %v8906_v17 = vpop.f32.mrb[40].mxu1  ;;  %v8785_v37 = vpop.f32.mrb[29].mxu0 }
0x108c   :  { %v10191_v12 = vadd.f32 %v8906_v17, %v7405_v59  ;;  %v10190_v14 = vadd.f32 %v8785_v37, %v7401_v61  ;;  %v8908_v38 = vpop.f32.mrb[41].mxu1  ;;  %v8787_v60 = vpop.f32.mrb[30].mxu0 }
0x108d   :  { %v10007_v3 = vmul.f32 -1.442695, %v10189_v8  ;;  %v10192_v15 = vadd.f32 %v8908_v38, %v7409_v28  ;;  %v8910_v31 = vpop.f32.mrb[42].mxu1  ;;  %v8788_v33 = vpop.f32.mrb[31].mxu0 }
0x108e   :  { %v10009_v27 = vmul.f32 -1.442695, %v10191_v12  ;;  %v10008_v45 = vmul.f32 -1.442695, %v10190_v14  ;;  %v8911_v20 = vpop.f32.mrb[43].mxu1 }
0x108f   :  { %11038 = vpow2.f32 %v10007_v3  ;;  %v10010_v49 = vmul.f32 -1.442695, %v10192_v15 }
0x1090   :  { %11040 = vpow2.f32 %v10009_v27 }
0x1091   :  { %11042 = vpow2.f32 %v10008_v45 }
0x1092   :  { %11044 = vpow2.f32 %v10010_v49 }
0x1099   :  { %v11039_v18 = vpop.eup %11038 }
0x109a   :  { %v11041_v62 = vpop.eup %11040  ;;  %v9048_v50 = vadd.f32 1.0, %v11039_v18 }
0x109b   :  { %v11043_v52 = vpop.eup %11042  ;;  %v9050_v48 = vadd.f32 1.0, %v11041_v62 }
0x109c   :  { %v11045_v13 = vpop.eup %11044  ;;  %11046 = vrcp.f32 %v9048_v50  ;;  %v9049_v16 = vadd.f32 1.0, %v11043_v52 }
0x109d   :  { %11048 = vrcp.f32 %v9050_v48  ;;  %v9051_v24 = vadd.f32 1.0, %v11045_v13 }
0x109e   :  { %11050 = vrcp.f32 %v9049_v16 }
0x109f   :  { %11052 = vrcp.f32 %v9051_v24 }
0x10a6   :  { %v11047_v43 = vpop.eup %11046 }
0x10a7   :  { %v11049_v29 = vpop.eup %11048 }
0x10a8   :  { %v11051_v10 = vpop.eup %11050 }
0x10a9   :  { %v11053_v36 = vpop.eup %11052  ;;  %v9068_v39 = vcombine.low %v11047_v43, %v11051_v10 }
0x10aa   :  { %v10139_v11 = vpop.f32.mrb[32].mxu0  ;;  %v9069_v30 = vcombine.low %v11049_v29, %v11053_v36 }
0x10ab   :  { %v10161_v57 = vpop.f32.mrb[44].mxu1  ;;  %v10140_v9 = vpop.f32.mrb[33].mxu0  ;;  %v9076_v0 = vrot.slane %v9068_v39, %v13686_v2 }
0x10ac   :  { %v10141_v63 = vadd.f32 %v10140_v9, %v10139_v11  ;;  %v10162_v56 = vpop.f32.mrb[45].mxu1  ;;  %v10142_v5 = vpop.f32.mrb[34].mxu0  ;;  %v9083_v34 = vrot.slane %v9069_v30, %v13686_v2 }
0x10ad   :  { %v10163_v35 = vadd.f32 %v10162_v56, %v10161_v57  ;;  %v10164_v58 = vpop.f32.mrb[46].mxu1  ;;  %v10143_v46 = vpop.f32.mrb[35].mxu0 }
0x10ae   :  { %v8948_v6 = vadd.f32 %v10141_v63, %v7413_v21  ;;  %v10165_v26 = vpop.f32.mrb[47].mxu1  ;;  %v9084_v19 = vcombine.low %v9076_v0, %v9083_v34 }
0x10b0   :  { %v8988_v4 = vadd.f32 %v10163_v35, %v8948_v6  ;;  %9094 = vst [vmem:[#allocation22] sm:$0xff] %v9084_v19 }
0x10ca   :  { %v10183_v7 = vpop.f32.mrb[36].mxu0 }
0x10cb   :  { %v10184_v47 = vpop.f32.mrb[37].mxu0 }
0x10cc   :  { %v10185_v42 = vadd.f32 %v10184_v47, %v10183_v7  ;;  %v10186_v23 = vpop.f32.mrb[38].mxu0 }
0x10cd   :  { %v10187_v32 = vpop.f32.mrb[39].mxu0 }
0x10ce   :  { %v9028_v22 = vadd.f32 %v10185_v42, %v8988_v4 }
0x10d0   :  { %v10011_v41 = vmul.f32 -1.442695, %v9028_v22 }
0x10d2   :  { %11054 = vpow2.f32 %v10011_v41 }
0x10dc   :  { %v11055_v53 = vpop.eup %11054 }
0x10dd   :  { %v9052_v1 = vadd.f32 1.0, %v11055_v53 }
0x10df   :  { %11056 = vrcp.f32 %v9052_v1 }
0x10e9   :  { %v11057_v2 = vpop.eup %11056 }
0x10ea   :  { %10012 = vst.sshfl [vmem:[#allocation22 + $0x8] sm:$0x3 pattern:$0x76325410] %v11057_v2 }
0x10eb   :  { %11353 = shalt.err (!%p11350_p13)
}
0x10ec   :  { %s11354_s8 = scalar_lea.hbm %s13576_s12, 160 }
0x10ed   :  { %p11355_p0 = scmp.ne.s32.totalorder %s13576_s12, %s11354_s8  ;;  %p11358_p1 = scmp.lt.u32.totalorder %s11354_s8, %s13576_s12 }
0x10ef   :  { %p11360_p2 = pnand %p11358_p1, %p11355_p0 }
0x10f1   :  { %11363 = shalt.err (!%p11360_p2)
}
0x10f2   :  { %9117 = dma.vmem_to_hbm [thread:$0]  %s9115_s24, 160, %s13576_s12, [#allocation23]  }
0x10f3   :  { %11378 = dma.done.wait [#allocation4], 1536  }
0x10f4   :  { %11379 = vsyncadd [#allocation4], 4294965760 }
0x10f5   :  { %11380 = dma.done.wait [#allocation23], 160  }
0x10f6   :  { %11381 = vsyncadd [#allocation23], 4294967136 }
0x10f7   :  { %9124 = vsyncpa [#allocation3], 1 }
0x10f8   :  { %9125 = vsyncpa [#allocation8], 1 }
0x10f9   :  { %9126 = vsyncpa [#allocation11], 1 }
0x10fa   :  { %9127 = vsyncpa [#allocation14], 1 }
0x10fb   :  { %9128 = vsyncpa [#allocation17], 1 }
0x10fc   :  { %9129 = vsyncpa [#allocation20], 1 }
0x10fd   :  { %9130 = vsyncpa [#allocation4], 1 }
0x10fe   :  { %9131 = vsyncpa [#allocation23], 1 }
0x10ff   :  { %9132 = vsyncpa [#allocation5], 1 }

</bundles_post_ra>
